<compile_context>
chip_gen: v7x
topology: tpu7x:2x2x1
jax: 0.10.0
libtpu: 0.0.40
codegen_flags: <defaults>
</compile_context>

<pallas_src>
import functools

import jax
import jax.numpy as jnp
import numpy as np
from jax.experimental import pallas as pl
from jax.experimental.pallas import tpu as pltpu


def _group_norm_silu(x2d, gamma, beta, m, mt, eps):
    """Fused GroupNorm + SiLU on a (HW, C) f32 tile.

    One pass over x computes sum and sum-of-squares; mean/rstd/gamma/beta are
    folded into a per-channel scale `a` and offset `b`, so normalization is a
    single `y = x*a + b` pass followed by SiLU (sigmoid on the EUP).  `m` is
    the (C, G) one-hot group membership (None when channels_per_group == 1 ->
    per-channel stats, membership matmuls skipped).
    """
    hw, c = x2d.shape
    s1 = jnp.sum(x2d, axis=0, keepdims=True)                    # (1, C)
    s2 = jnp.sum(x2d * x2d, axis=0, keepdims=True)              # (1, C)
    if m is None:
        inv = 1.0 / float(hw)
        mean = s1 * inv
        var = s2 * inv - mean * mean
        rstd = jax.lax.rsqrt(jnp.maximum(var, 0.0) + eps)
    else:
        g = m.shape[1]
        inv = 1.0 / float(hw * (c // g))
        mean_g = jnp.dot(s1, m, preferred_element_type=jnp.float32) * inv
        ex2_g = jnp.dot(s2, m, preferred_element_type=jnp.float32) * inv
        var_g = ex2_g - mean_g * mean_g
        rstd_g = jax.lax.rsqrt(jnp.maximum(var_g, 0.0) + eps)
        mean = jnp.dot(mean_g, mt, preferred_element_type=jnp.float32)   # (1, C)
        rstd = jnp.dot(rstd_g, mt, preferred_element_type=jnp.float32)   # (1, C)
    a = rstd * gamma
    b = beta - mean * a
    y = x2d * a + b
    return y * jax.nn.sigmoid(y)                                # SiLU


def _conv3x3_im2col(h2d, pad_ref, col_ref, w_ref, bias, H, W):
    """3x3 / stride 1 / pad 1 conv as ONE im2col bf16 MXU matmul (f32 accum).

    h2d:     (H*W, C) f32 activations.
    pad_ref: shared VMEM bf16 scratch (H+2, W+2, Cmax) — zero-padded image;
             border already zeroed once per grid step by the caller.
    col_ref: shared VMEM bf16 scratch (H*W, 9*Cmax) — im2col patch matrix.
    w_ref:   bf16 weights (9*C, Cout), rows ordered (ky, kx, cin).
    bias:    (1, Cout) f32.
    Returns (H*W, Cout) f32.
    """
    c = h2d.shape[-1]
    # Interior <- activations (single f32->bf16 cast for the MXU operands).
    pad_ref[1:H + 1, 1:W + 1, :c] = h2d.astype(jnp.bfloat16).reshape(H, W, c)

    # im2col: the 9 shifted taps become the K dimension of one big matmul
    # (K = 9*C) instead of 9 separate K=C matmuls with 9 MXU fill/drains.
    for dy in range(3):
        for dx in range(3):
            k = dy * 3 + dx
            col_ref[:, k * c:(k + 1) * c] = (
                pad_ref[dy:dy + H, dx:dx + W, :c].reshape(H * W, c))

    return jnp.dot(col_ref[:, :9 * c], w_ref[...],
                   preferred_element_type=jnp.float32) + bias


def _resblock_kernel(x_ref, *refs, H, W, Cin, Cout, num_groups, eps,
                     has_shortcut):
    it = iter(refs)
    g1, b1 = next(it), next(it)
    m1 = mt1 = None
    if Cin // num_groups > 1:
        m1, mt1 = next(it), next(it)
    w1, c1b = next(it), next(it)
    g2, b2 = next(it), next(it)
    m2 = mt2 = None
    if Cout // num_groups > 1:
        m2, mt2 = next(it), next(it)
    w2, c2b = next(it), next(it)
    ws = bs = None
    if has_shortcut:
        ws, bs = next(it), next(it)
    o_ref = next(it)
    pad_ref, col_ref = next(it), next(it)

    cmax = max(Cin, Cout)
    # Zero only the 1-pixel border of the shared padded-image scratch, once
    # per grid step at full Cmax width (both convs' reads stay inside it).
    # Re-done every step so each TensorCore's private scratch is initialized
    # when the "parallel" grid is megacore-split; cost is a few masked stores.
    zero_row = jnp.zeros((1, W + 2, cmax), jnp.bfloat16)
    zero_col = jnp.zeros((H + 2, 1, cmax), jnp.bfloat16)
    pad_ref[0:1, :, :] = zero_row
    pad_ref[H + 1:H + 2, :, :] = zero_row
    pad_ref[:, 0:1, :] = zero_col
    pad_ref[:, W + 1:W + 2, :] = zero_col

    x2d = x_ref[0].astype(jnp.float32)                       # (HW, Cin)

    # norm1 + SiLU (f32 stats, folded scale/offset)
    h = _group_norm_silu(x2d, g1[...], b1[...],
                         None if m1 is None else m1[...],
                         None if mt1 is None else mt1[...], eps)
    # conv1: 3x3, pad 1 -> one im2col bf16 matmul, f32 accumulate
    h = _conv3x3_im2col(h, pad_ref, col_ref, w1, c1b[...], H, W)   # (HW, Cout)
    # norm2 + SiLU.  Dropout(p=0.0) is the identity in this forward.
    h = _group_norm_silu(h, g2[...], b2[...],
                         None if m2 is None else m2[...],
                         None if mt2 is None else mt2[...], eps)
    # conv2: 3x3, pad 1 (reuses the same pad/col scratch)
    h = _conv3x3_im2col(h, pad_ref, col_ref, w2, c2b[...], H, W)   # (HW, Cout)

    # shortcut: 1x1 conv (bf16 MXU matmul) when channels change, else identity
    if has_shortcut:
        sc = jnp.dot(x2d.astype(jnp.bfloat16), ws[...],
                     preferred_element_type=jnp.float32) + bs[...]
    else:
        sc = x2d

    o_ref[0] = (h + sc).astype(o_ref.dtype)


def residual_block(x_nchw, params, *, num_groups=32, eps=1e-6):
    N, Cin, H, W = x_nchw.shape
    Cout = params["conv1_w"].shape[0]
    has_shortcut = "shortcut_w" in params
    if not has_shortcut:
        assert Cin == Cout, "identity shortcut requires in_channels == out_channels"
    assert Cin % num_groups == 0 and Cout % num_groups == 0
    cmax = max(Cin, Cout)

    # NCHW -> NHWC, then flatten spatial so the kernel's HBM-facing blocks are
    # full contiguous per-image slabs (single contiguous DMA each).
    x = jnp.transpose(x_nchw, (0, 2, 3, 1)).astype(jnp.float32)
    x = x.reshape(N, H * W, Cin)

    def membership(C):
        cg = C // num_groups
        cid = np.arange(C) // cg
        return jnp.asarray(
            (cid[:, None] == np.arange(num_groups)[None, :]).astype(np.float32))

    inputs = [x]
    in_specs = [pl.BlockSpec((1, H * W, Cin), lambda n: (n, 0, 0))]

    def add(a):
        inputs.append(a)
        in_specs.append(pl.BlockSpec(a.shape, lambda n, _r=a.ndim: (0,) * _r))

    # --- norm1 ---
    add(params["norm1_g"].reshape(1, Cin).astype(jnp.float32))
    add(params["norm1_b"].reshape(1, Cin).astype(jnp.float32))
    if Cin // num_groups > 1:
        m1 = membership(Cin)
        add(m1)
        add(m1.T)
    # --- conv1: OIHW -> (ky, kx, cin, cout) -> (9*Cin, Cout), bf16 ---
    add(jnp.transpose(params["conv1_w"], (2, 3, 1, 0))
        .reshape(9 * Cin, Cout).astype(jnp.bfloat16))
    add(params["conv1_b"].reshape(1, Cout).astype(jnp.float32))
    # --- norm2 ---
    add(params["norm2_g"].reshape(1, Cout).astype(jnp.float32))
    add(params["norm2_b"].reshape(1, Cout).astype(jnp.float32))
    if Cout // num_groups > 1:
        m2 = membership(Cout)
        add(m2)
        add(m2.T)
    # --- conv2 ---
    add(jnp.transpose(params["conv2_w"], (2, 3, 1, 0))
        .reshape(9 * Cout, Cout).astype(jnp.bfloat16))
    add(params["conv2_b"].reshape(1, Cout).astype(jnp.float32))
    # --- shortcut (1x1) ---
    if has_shortcut:
        add(params["shortcut_w"][:, :, 0, 0].T.astype(jnp.bfloat16))   # (Cin, Cout)
        add(params["shortcut_b"].reshape(1, Cout).astype(jnp.float32))

    kernel = functools.partial(_resblock_kernel, H=H, W=W, Cin=Cin, Cout=Cout,
                               num_groups=num_groups, eps=eps,
                               has_shortcut=has_shortcut)

    out = pl.pallas_call(
        kernel,
        out_shape=jax.ShapeDtypeStruct((N, H * W, Cout), jnp.float32),
        grid=(N,),
        in_specs=in_specs,
        out_specs=pl.BlockSpec((1, H * W, Cout), lambda n: (n, 0, 0)),
        scratch_shapes=[
            # One padded image + one im2col matrix, shared by conv1 & conv2
            # (sized for max(Cin, Cout); each conv uses a channel-sliced view).
            pltpu.VMEM((H + 2, W + 2, cmax), jnp.bfloat16),
            pltpu.VMEM((H * W, 9 * cmax), jnp.bfloat16),
        ],
        compiler_params=pltpu.CompilerParams(
            dimension_semantics=("parallel",)),
    )(*inputs)

    # back to PyTorch-style NCHW
    return jnp.transpose(out.reshape(N, H, W, Cout), (0, 3, 1, 2))


def init_params(key, cin, cout):
    ks = jax.random.split(key, 10)
    p = {
        "norm1_g": 1.0 + 0.1 * jax.random.normal(ks[0], (cin,), jnp.float32),
        "norm1_b": 0.1 * jax.random.normal(ks[1], (cin,), jnp.float32),
        "conv1_w": 0.05 * jax.random.normal(ks[2], (cout, cin, 3, 3), jnp.float32),
        "conv1_b": 0.05 * jax.random.normal(ks[3], (cout,), jnp.float32),
        "norm2_g": 1.0 + 0.1 * jax.random.normal(ks[4], (cout,), jnp.float32),
        "norm2_b": 0.1 * jax.random.normal(ks[5], (cout,), jnp.float32),
        "conv2_w": 0.05 * jax.random.normal(ks[6], (cout, cout, 3, 3), jnp.float32),
        "conv2_b": 0.05 * jax.random.normal(ks[7], (cout,), jnp.float32),
    }
    if cin != cout:
        p["shortcut_w"] = 0.1 * jax.random.normal(ks[8], (cout, cin, 1, 1), jnp.float32)
        p["shortcut_b"] = 0.05 * jax.random.normal(ks[9], (cout,), jnp.float32)
    return p


def _reference(x, p, *, num_groups=32, eps=1e-6, mxu_bf16=False):
    """Pure-JAX replica of the PyTorch forward (NCHW).

    With mxu_bf16=True the conv operands are rounded to bf16 (f32 accumulate),
    matching the kernel's mixed-precision policy.
    """
    def gn(h, g, b):
        N, C, H, W = h.shape
        hg = h.reshape(N, num_groups, C // num_groups, H, W)
        mean = hg.mean(axis=(2, 3, 4), keepdims=True)
        var = ((hg - mean) ** 2).mean(axis=(2, 3, 4), keepdims=True)
        hn = ((hg - mean) * jax.lax.rsqrt(var + eps)).reshape(N, C, H, W)
        return hn * g[None, :, None, None] + b[None, :, None, None]

    def conv(h, w, b, pad):
        if mxu_bf16:
            h = h.astype(jnp.bfloat16)
            w = w.astype(jnp.bfloat16)
        y = jax.lax.conv_general_dilated(
            h, w, window_strides=(1, 1), padding=[(pad, pad), (pad, pad)],
            dimension_numbers=("NCHW", "OIHW", "NCHW"),
            preferred_element_type=jnp.float32)
        return y + b[None, :, None, None]

    h = jax.nn.silu(gn(x, p["norm1_g"], p["norm1_b"]))
    h = conv(h, p["conv1_w"], p["conv1_b"], 1)
    h = jax.nn.silu(gn(h, p["norm2_g"], p["norm2_b"]))
    # dropout(p=0.0) -> identity
    h = conv(h, p["conv2_w"], p["conv2_b"], 1)
    sc = conv(x, p["shortcut_w"], p["shortcut_b"], 0) if "shortcut_w" in p else x
    return h + sc


if __name__ == "__main__":
    # GroupNorm(32) requires channels % 32 == 0 -> smallest sensible shapes.
    N, Cin, Cout, H, W = 2, 32, 64, 16, 16
    key = jax.random.PRNGKey(0)
    kx, kp = jax.random.split(key)
    x = jax.random.normal(kx, (N, Cin, H, W), jnp.float32)
    params = init_params(kp, Cin, Cout)

    out = jax.block_until_ready(residual_block(x, params))
    assert out.shape == (N, Cout, H, W) and out.dtype == jnp.float32

    # Tight check against a reference with the same precision policy as the
    # kernel (bf16 MXU operands, f32 GroupNorm stats + accumulation).
    ref_mixed = _reference(x, params, mxu_bf16=True)
    np.testing.assert_allclose(np.asarray(out), np.asarray(ref_mixed),
                               rtol=3e-3, atol=3e-3)

    # Looser check against the pure-f32 PyTorch-equivalent forward; the gap is
    # bf16 operand rounding in the convolutions (accumulation stays f32).
    ref_f32 = _reference(x, params, mxu_bf16=False)
    np.testing.assert_allclose(np.asarray(out), np.asarray(ref_f32),
                               rtol=5e-2, atol=5e-2)

    print("KERNEL_OK")
</pallas_src>

<mosaic_0001>
module attributes {stable_mosaic.version = 11 : i64} {
  func.func @_resblock_kernel(%arg0: i32, %arg1: memref<1x256x32xf32, #tpu.memory_space<vmem>>, %arg2: memref<1x32xf32, #tpu.memory_space<vmem>>, %arg3: memref<1x32xf32, #tpu.memory_space<vmem>>, %arg4: memref<288x64xbf16, #tpu.memory_space<vmem>>, %arg5: memref<1x64xf32, #tpu.memory_space<vmem>>, %arg6: memref<1x64xf32, #tpu.memory_space<vmem>>, %arg7: memref<1x64xf32, #tpu.memory_space<vmem>>, %arg8: memref<64x32xf32, #tpu.memory_space<vmem>>, %arg9: memref<32x64xf32, #tpu.memory_space<vmem>>, %arg10: memref<576x64xbf16, #tpu.memory_space<vmem>>, %arg11: memref<1x64xf32, #tpu.memory_space<vmem>>, %arg12: memref<32x64xbf16, #tpu.memory_space<vmem>>, %arg13: memref<1x64xf32, #tpu.memory_space<vmem>>, %arg14: memref<1x256x64xf32, #tpu.memory_space<vmem>>, %arg15: memref<18x18x64xbf16, #tpu.memory_space<vmem>>, %arg16: memref<256x576xbf16, #tpu.memory_space<vmem>>) attributes {dimension_semantics = [#tpu.dimension_semantics<parallel>], iteration_bounds = array<i64: 2>, scalar_prefetch = 0 : i64, scratch_operands = 2 : i64, tpu.core_type = #tpu.core_type<tc>, window_params = [{transform_indices = @transform_0, window_bounds = array<i64: 1, 256, 32>}, {pipeline_mode = #tpu.pipeline_mode<synchronous>, transform_indices = @transform_1, window_bounds = array<i64: 1, 32>}, {pipeline_mode = #tpu.pipeline_mode<synchronous>, transform_indices = @transform_2, window_bounds = array<i64: 1, 32>}, {pipeline_mode = #tpu.pipeline_mode<synchronous>, transform_indices = @transform_3, window_bounds = array<i64: 288, 64>}, {pipeline_mode = #tpu.pipeline_mode<synchronous>, transform_indices = @transform_4, window_bounds = array<i64: 1, 64>}, {pipeline_mode = #tpu.pipeline_mode<synchronous>, transform_indices = @transform_5, window_bounds = array<i64: 1, 64>}, {pipeline_mode = #tpu.pipeline_mode<synchronous>, transform_indices = @transform_6, window_bounds = array<i64: 1, 64>}, {pipeline_mode = #tpu.pipeline_mode<synchronous>, transform_indices = @transform_7, window_bounds = array<i64: 64, 32>}, {pipeline_mode = #tpu.pipeline_mode<synchronous>, transform_indices = @transform_8, window_bounds = array<i64: 32, 64>}, {pipeline_mode = #tpu.pipeline_mode<synchronous>, transform_indices = @transform_9, window_bounds = array<i64: 576, 64>}, {pipeline_mode = #tpu.pipeline_mode<synchronous>, transform_indices = @transform_10, window_bounds = array<i64: 1, 64>}, {pipeline_mode = #tpu.pipeline_mode<synchronous>, transform_indices = @transform_11, window_bounds = array<i64: 32, 64>}, {pipeline_mode = #tpu.pipeline_mode<synchronous>, transform_indices = @transform_12, window_bounds = array<i64: 1, 64>}, {transform_indices = @transform_13, window_bounds = array<i64: 1, 256, 64>}]} {
    %cst = arith.constant 0.000000e+00 : bf16
    %0 = vector.broadcast %cst : bf16 to vector<1x18x64xbf16>
    %cst_0 = arith.constant 0.000000e+00 : bf16
    %1 = vector.broadcast %cst_0 : bf16 to vector<18x1x64xbf16>
    %c0 = arith.constant 0 : index
    %c0_1 = arith.constant 0 : index
    %c0_2 = arith.constant 0 : index
    %2 = vector.load %arg15[%c0, %c0_1, %c0_2] : memref<18x18x64xbf16, #tpu.memory_space<vmem>>, vector<1x18x64xbf16>
    tpu.vector_store %arg15[%c0, %c0_1, %c0_2], %0 {strides = array<i32>} : memref<18x18x64xbf16, #tpu.memory_space<vmem>>, vector<1x18x64xbf16>,
    %c17 = arith.constant 17 : index
    %c0_3 = arith.constant 0 : index
    %c0_4 = arith.constant 0 : index
    %3 = vector.load %arg15[%c17, %c0_3, %c0_4] : memref<18x18x64xbf16, #tpu.memory_space<vmem>>, vector<1x18x64xbf16>
    tpu.vector_store %arg15[%c17, %c0_3, %c0_4], %0 {strides = array<i32>} : memref<18x18x64xbf16, #tpu.memory_space<vmem>>, vector<1x18x64xbf16>,
    %c0_5 = arith.constant 0 : index
    %c0_6 = arith.constant 0 : index
    %c0_7 = arith.constant 0 : index
    %4 = vector.load %arg15[%c0_5, %c0_6, %c0_7] : memref<18x18x64xbf16, #tpu.memory_space<vmem>>, vector<18x1x64xbf16>
    tpu.vector_store %arg15[%c0_5, %c0_6, %c0_7], %1 {strides = array<i32>} : memref<18x18x64xbf16, #tpu.memory_space<vmem>>, vector<18x1x64xbf16>,
    %c0_8 = arith.constant 0 : index
    %c17_9 = arith.constant 17 : index
    %c0_10 = arith.constant 0 : index
    %5 = vector.load %arg15[%c0_8, %c17_9, %c0_10] : memref<18x18x64xbf16, #tpu.memory_space<vmem>>, vector<18x1x64xbf16>
    tpu.vector_store %arg15[%c0_8, %c17_9, %c0_10], %1 {strides = array<i32>} : memref<18x18x64xbf16, #tpu.memory_space<vmem>>, vector<18x1x64xbf16>,
    %c0_11 = arith.constant 0 : index
    %c0_12 = arith.constant 0 : index
    %c0_13 = arith.constant 0 : index
    %6 = vector.load %arg1[%c0_11, %c0_12, %c0_13] : memref<1x256x32xf32, #tpu.memory_space<vmem>>, vector<1x256x32xf32>
    %7 = vector.shape_cast %6 : vector<1x256x32xf32> to vector<256x32xf32>
    %c0_14 = arith.constant 0 : index
    %c0_15 = arith.constant 0 : index
    %8 = vector.load %arg2[%c0_14, %c0_15] : memref<1x32xf32, #tpu.memory_space<vmem>>, vector<1x32xf32>
    %c0_16 = arith.constant 0 : index
    %c0_17 = arith.constant 0 : index
    %9 = vector.load %arg3[%c0_16, %c0_17] : memref<1x32xf32, #tpu.memory_space<vmem>>, vector<1x32xf32>
    %cst_18 = arith.constant dense<0.000000e+00> : vector<32xf32>
    %10 = vector.multi_reduction <add>, %7, %cst_18 [0] : vector<256x32xf32> to vector<32xf32>
    %11 = vector.shape_cast %10 : vector<32xf32> to vector<1x32xf32>
    %12 = arith.mulf %7, %7 : vector<256x32xf32>
    %cst_19 = arith.constant dense<0.000000e+00> : vector<32xf32>
    %13 = vector.multi_reduction <add>, %12, %cst_19 [0] : vector<256x32xf32> to vector<32xf32>
    %14 = vector.shape_cast %13 : vector<32xf32> to vector<1x32xf32>
    %cst_20 = arith.constant 3.906250e-03 : f32
    %15 = vector.broadcast %cst_20 : f32 to vector<1x32xf32>
    %16 = arith.mulf %11, %15 : vector<1x32xf32>
    %cst_21 = arith.constant 3.906250e-03 : f32
    %17 = vector.broadcast %cst_21 : f32 to vector<1x32xf32>
    %18 = arith.mulf %14, %17 : vector<1x32xf32>
    %19 = arith.mulf %16, %16 : vector<1x32xf32>
    %20 = arith.subf %18, %19 : vector<1x32xf32>
    %cst_22 = arith.constant 0.000000e+00 : f32
    %21 = vector.broadcast %cst_22 : f32 to vector<1x32xf32>
    %22 = arith.maximumf %20, %21 : vector<1x32xf32>
    %cst_23 = arith.constant 9.99999997E-7 : f32
    %23 = vector.broadcast %cst_23 : f32 to vector<1x32xf32>
    %24 = arith.addf %22, %23 : vector<1x32xf32>
    %25 = math.rsqrt %24 : vector<1x32xf32>
    %26 = arith.mulf %25, %8 : vector<1x32xf32>
    %27 = arith.mulf %16, %26 : vector<1x32xf32>
    %28 = arith.subf %9, %27 : vector<1x32xf32>
    %29 = vector.broadcast %26 : vector<1x32xf32> to vector<256x32xf32>
    %30 = arith.mulf %7, %29 : vector<256x32xf32>
    %31 = vector.broadcast %28 : vector<1x32xf32> to vector<256x32xf32>
    %32 = arith.addf %30, %31 : vector<256x32xf32>
    %33 = arith.negf %32 : vector<256x32xf32>
    %34 = math.exp %33 : vector<256x32xf32>
    %cst_24 = arith.constant 1.000000e+00 : f32
    %35 = vector.broadcast %cst_24 : f32 to vector<256x32xf32>
    %36 = arith.addf %35, %34 : vector<256x32xf32>
    %37 = arith.divf %35, %36 : vector<256x32xf32>
    %38 = arith.mulf %32, %37 : vector<256x32xf32>
    %c0_25 = arith.constant 0 : index
    %c0_26 = arith.constant 0 : index
    %39 = vector.load %arg5[%c0_25, %c0_26] : memref<1x64xf32, #tpu.memory_space<vmem>>, vector<1x64xf32>
    %40 = arith.truncf %38 : vector<256x32xf32> to vector<256x32xbf16>
    %41 = vector.shape_cast %40 : vector<256x32xbf16> to vector<16x16x32xbf16>
    %c1 = arith.constant 1 : index
    %c1_27 = arith.constant 1 : index
    %c0_28 = arith.constant 0 : index
    %42 = vector.load %arg15[%c1, %c1_27, %c0_28] : memref<18x18x64xbf16, #tpu.memory_space<vmem>>, vector<16x16x32xbf16>
    tpu.vector_store %arg15[%c1, %c1_27, %c0_28], %41 {strides = array<i32>} : memref<18x18x64xbf16, #tpu.memory_space<vmem>>, vector<16x16x32xbf16>,
    %c0_29 = arith.constant 0 : index
    %c0_30 = arith.constant 0 : index
    %c0_31 = arith.constant 0 : index
    %43 = vector.load %arg15[%c0_29, %c0_30, %c0_31] : memref<18x18x64xbf16, #tpu.memory_space<vmem>>, vector<16x16x32xbf16>
    %44 = vector.shape_cast %43 : vector<16x16x32xbf16> to vector<256x32xbf16>
    %c0_32 = arith.constant 0 : index
    %c0_33 = arith.constant 0 : index
    %45 = vector.load %arg16[%c0_32, %c0_33] : memref<256x576xbf16, #tpu.memory_space<vmem>>, vector<256x32xbf16>
    tpu.vector_store %arg16[%c0_32, %c0_33], %44 {strides = array<i32>} : memref<256x576xbf16, #tpu.memory_space<vmem>>, vector<256x32xbf16>,
    %c0_34 = arith.constant 0 : index
    %c1_35 = arith.constant 1 : index
    %c0_36 = arith.constant 0 : index
    %46 = vector.load %arg15[%c0_34, %c1_35, %c0_36] : memref<18x18x64xbf16, #tpu.memory_space<vmem>>, vector<16x16x32xbf16>
    %47 = vector.shape_cast %46 : vector<16x16x32xbf16> to vector<256x32xbf16>
    %c0_37 = arith.constant 0 : index
    %c32 = arith.constant 32 : index
    %48 = vector.load %arg16[%c0_37, %c32] : memref<256x576xbf16, #tpu.memory_space<vmem>>, vector<256x32xbf16>
    tpu.vector_store %arg16[%c0_37, %c32], %47 {strides = array<i32>} : memref<256x576xbf16, #tpu.memory_space<vmem>>, vector<256x32xbf16>,
    %c0_38 = arith.constant 0 : index
    %c2 = arith.constant 2 : index
    %c0_39 = arith.constant 0 : index
    %49 = vector.load %arg15[%c0_38, %c2, %c0_39] : memref<18x18x64xbf16, #tpu.memory_space<vmem>>, vector<16x16x32xbf16>
    %50 = vector.shape_cast %49 : vector<16x16x32xbf16> to vector<256x32xbf16>
    %c0_40 = arith.constant 0 : index
    %c64 = arith.constant 64 : index
    %51 = vector.load %arg16[%c0_40, %c64] : memref<256x576xbf16, #tpu.memory_space<vmem>>, vector<256x32xbf16>
    tpu.vector_store %arg16[%c0_40, %c64], %50 {strides = array<i32>} : memref<256x576xbf16, #tpu.memory_space<vmem>>, vector<256x32xbf16>,
    %c1_41 = arith.constant 1 : index
    %c0_42 = arith.constant 0 : index
    %c0_43 = arith.constant 0 : index
    %52 = vector.load %arg15[%c1_41, %c0_42, %c0_43] : memref<18x18x64xbf16, #tpu.memory_space<vmem>>, vector<16x16x32xbf16>
    %53 = vector.shape_cast %52 : vector<16x16x32xbf16> to vector<256x32xbf16>
    %c0_44 = arith.constant 0 : index
    %c96 = arith.constant 96 : index
    %54 = vector.load %arg16[%c0_44, %c96] : memref<256x576xbf16, #tpu.memory_space<vmem>>, vector<256x32xbf16>
    tpu.vector_store %arg16[%c0_44, %c96], %53 {strides = array<i32>} : memref<256x576xbf16, #tpu.memory_space<vmem>>, vector<256x32xbf16>,
    %c1_45 = arith.constant 1 : index
    %c1_46 = arith.constant 1 : index
    %c0_47 = arith.constant 0 : index
    %55 = vector.load %arg15[%c1_45, %c1_46, %c0_47] : memref<18x18x64xbf16, #tpu.memory_space<vmem>>, vector<16x16x32xbf16>
    %56 = vector.shape_cast %55 : vector<16x16x32xbf16> to vector<256x32xbf16>
    %c0_48 = arith.constant 0 : index
    %c128 = arith.constant 128 : index
    %57 = vector.load %arg16[%c0_48, %c128] : memref<256x576xbf16, #tpu.memory_space<vmem>>, vector<256x32xbf16>
    tpu.vector_store %arg16[%c0_48, %c128], %56 {strides = array<i32>} : memref<256x576xbf16, #tpu.memory_space<vmem>>, vector<256x32xbf16>,
    %c1_49 = arith.constant 1 : index
    %c2_50 = arith.constant 2 : index
    %c0_51 = arith.constant 0 : index
    %58 = vector.load %arg15[%c1_49, %c2_50, %c0_51] : memref<18x18x64xbf16, #tpu.memory_space<vmem>>, vector<16x16x32xbf16>
    %59 = vector.shape_cast %58 : vector<16x16x32xbf16> to vector<256x32xbf16>
    %c0_52 = arith.constant 0 : index
    %c160 = arith.constant 160 : index
    %60 = vector.load %arg16[%c0_52, %c160] : memref<256x576xbf16, #tpu.memory_space<vmem>>, vector<256x32xbf16>
    tpu.vector_store %arg16[%c0_52, %c160], %59 {strides = array<i32>} : memref<256x576xbf16, #tpu.memory_space<vmem>>, vector<256x32xbf16>,
    %c2_53 = arith.constant 2 : index
    %c0_54 = arith.constant 0 : index
    %c0_55 = arith.constant 0 : index
    %61 = vector.load %arg15[%c2_53, %c0_54, %c0_55] : memref<18x18x64xbf16, #tpu.memory_space<vmem>>, vector<16x16x32xbf16>
    %62 = vector.shape_cast %61 : vector<16x16x32xbf16> to vector<256x32xbf16>
    %c0_56 = arith.constant 0 : index
    %c192 = arith.constant 192 : index
    %63 = vector.load %arg16[%c0_56, %c192] : memref<256x576xbf16, #tpu.memory_space<vmem>>, vector<256x32xbf16>
    tpu.vector_store %arg16[%c0_56, %c192], %62 {strides = array<i32>} : memref<256x576xbf16, #tpu.memory_space<vmem>>, vector<256x32xbf16>,
    %c2_57 = arith.constant 2 : index
    %c1_58 = arith.constant 1 : index
    %c0_59 = arith.constant 0 : index
    %64 = vector.load %arg15[%c2_57, %c1_58, %c0_59] : memref<18x18x64xbf16, #tpu.memory_space<vmem>>, vector<16x16x32xbf16>
    %65 = vector.shape_cast %64 : vector<16x16x32xbf16> to vector<256x32xbf16>
    %c0_60 = arith.constant 0 : index
    %c224 = arith.constant 224 : index
    %66 = vector.load %arg16[%c0_60, %c224] : memref<256x576xbf16, #tpu.memory_space<vmem>>, vector<256x32xbf16>
    tpu.vector_store %arg16[%c0_60, %c224], %65 {strides = array<i32>} : memref<256x576xbf16, #tpu.memory_space<vmem>>, vector<256x32xbf16>,
    %c2_61 = arith.constant 2 : index
    %c2_62 = arith.constant 2 : index
    %c0_63 = arith.constant 0 : index
    %67 = vector.load %arg15[%c2_61, %c2_62, %c0_63] : memref<18x18x64xbf16, #tpu.memory_space<vmem>>, vector<16x16x32xbf16>
    %68 = vector.shape_cast %67 : vector<16x16x32xbf16> to vector<256x32xbf16>
    %c0_64 = arith.constant 0 : index
    %c256 = arith.constant 256 : index
    %69 = vector.load %arg16[%c0_64, %c256] : memref<256x576xbf16, #tpu.memory_space<vmem>>, vector<256x32xbf16>
    tpu.vector_store %arg16[%c0_64, %c256], %68 {strides = array<i32>} : memref<256x576xbf16, #tpu.memory_space<vmem>>, vector<256x32xbf16>,
    %c0_65 = arith.constant 0 : index
    %c0_66 = arith.constant 0 : index
    %70 = vector.load %arg16[%c0_65, %c0_66] : memref<256x576xbf16, #tpu.memory_space<vmem>>, vector<256x288xbf16>
    %c0_67 = arith.constant 0 : index
    %c0_68 = arith.constant 0 : index
    %71 = vector.load %arg4[%c0_67, %c0_68] : memref<288x64xbf16, #tpu.memory_space<vmem>>, vector<288x64xbf16>
    %cst_69 = arith.constant dense<0.000000e+00> : vector<256x64xf32>
    %72 = tpu.matmul %70, %71, %cst_69 {dimension_numbers = #tpu.dot_dimension_numbers<[1], [0], [0], [1], [0, 0, 1, 1], [], []>} : vector<256x288xbf16>, vector<288x64xbf16>, vector<256x64xf32> -> vector<256x64xf32>
    %73 = vector.broadcast %39 : vector<1x64xf32> to vector<256x64xf32>
    %74 = arith.addf %72, %73 : vector<256x64xf32>
    %c0_70 = arith.constant 0 : index
    %c0_71 = arith.constant 0 : index
    %75 = vector.load %arg6[%c0_70, %c0_71] : memref<1x64xf32, #tpu.memory_space<vmem>>, vector<1x64xf32>
    %c0_72 = arith.constant 0 : index
    %c0_73 = arith.constant 0 : index
    %76 = vector.load %arg7[%c0_72, %c0_73] : memref<1x64xf32, #tpu.memory_space<vmem>>, vector<1x64xf32>
    %c0_74 = arith.constant 0 : index
    %c0_75 = arith.constant 0 : index
    %77 = vector.load %arg8[%c0_74, %c0_75] : memref<64x32xf32, #tpu.memory_space<vmem>>, vector<64x32xf32>
    %c0_76 = arith.constant 0 : index
    %c0_77 = arith.constant 0 : index
    %78 = vector.load %arg9[%c0_76, %c0_77] : memref<32x64xf32, #tpu.memory_space<vmem>>, vector<32x64xf32>
    %cst_78 = arith.constant dense<0.000000e+00> : vector<64xf32>
    %79 = vector.multi_reduction <add>, %74, %cst_78 [0] : vector<256x64xf32> to vector<64xf32>
    %80 = vector.shape_cast %79 : vector<64xf32> to vector<1x64xf32>
    %81 = arith.mulf %74, %74 : vector<256x64xf32>
    %cst_79 = arith.constant dense<0.000000e+00> : vector<64xf32>
    %82 = vector.multi_reduction <add>, %81, %cst_79 [0] : vector<256x64xf32> to vector<64xf32>
    %83 = vector.shape_cast %82 : vector<64xf32> to vector<1x64xf32>
    %cst_80 = arith.constant dense<0.000000e+00> : vector<1x32xf32>
    %84 = tpu.matmul %80, %77, %cst_80 {dimension_numbers = #tpu.dot_dimension_numbers<[1], [0], [0], [1], [0, 0, 1, 1], [], []>} : vector<1x64xf32>, vector<64x32xf32>, vector<1x32xf32> -> vector<1x32xf32>
    %cst_81 = arith.constant 0.001953125 : f32
    %85 = vector.broadcast %cst_81 : f32 to vector<1x32xf32>
    %86 = arith.mulf %84, %85 : vector<1x32xf32>
    %cst_82 = arith.constant dense<0.000000e+00> : vector<1x32xf32>
    %87 = tpu.matmul %83, %77, %cst_82 {dimension_numbers = #tpu.dot_dimension_numbers<[1], [0], [0], [1], [0, 0, 1, 1], [], []>} : vector<1x64xf32>, vector<64x32xf32>, vector<1x32xf32> -> vector<1x32xf32>
    %cst_83 = arith.constant 0.001953125 : f32
    %88 = vector.broadcast %cst_83 : f32 to vector<1x32xf32>
    %89 = arith.mulf %87, %88 : vector<1x32xf32>
    %90 = arith.mulf %86, %86 : vector<1x32xf32>
    %91 = arith.subf %89, %90 : vector<1x32xf32>
    %cst_84 = arith.constant 0.000000e+00 : f32
    %92 = vector.broadcast %cst_84 : f32 to vector<1x32xf32>
    %93 = arith.maximumf %91, %92 : vector<1x32xf32>
    %cst_85 = arith.constant 9.99999997E-7 : f32
    %94 = vector.broadcast %cst_85 : f32 to vector<1x32xf32>
    %95 = arith.addf %93, %94 : vector<1x32xf32>
    %96 = math.rsqrt %95 : vector<1x32xf32>
    %cst_86 = arith.constant dense<0.000000e+00> : vector<1x64xf32>
    %97 = tpu.matmul %86, %78, %cst_86 {dimension_numbers = #tpu.dot_dimension_numbers<[1], [0], [0], [1], [0, 0, 1, 1], [], []>} : vector<1x32xf32>, vector<32x64xf32>, vector<1x64xf32> -> vector<1x64xf32>
    %cst_87 = arith.constant dense<0.000000e+00> : vector<1x64xf32>
    %98 = tpu.matmul %96, %78, %cst_87 {dimension_numbers = #tpu.dot_dimension_numbers<[1], [0], [0], [1], [0, 0, 1, 1], [], []>} : vector<1x32xf32>, vector<32x64xf32>, vector<1x64xf32> -> vector<1x64xf32>
    %99 = arith.mulf %98, %75 : vector<1x64xf32>
    %100 = arith.mulf %97, %99 : vector<1x64xf32>
    %101 = arith.subf %76, %100 : vector<1x64xf32>
    %102 = vector.broadcast %99 : vector<1x64xf32> to vector<256x64xf32>
    %103 = arith.mulf %74, %102 : vector<256x64xf32>
    %104 = vector.broadcast %101 : vector<1x64xf32> to vector<256x64xf32>
    %105 = arith.addf %103, %104 : vector<256x64xf32>
    %106 = arith.negf %105 : vector<256x64xf32>
    %107 = math.exp %106 : vector<256x64xf32>
    %cst_88 = arith.constant 1.000000e+00 : f32
    %108 = vector.broadcast %cst_88 : f32 to vector<256x64xf32>
    %109 = arith.addf %108, %107 : vector<256x64xf32>
    %110 = arith.divf %108, %109 : vector<256x64xf32>
    %111 = arith.mulf %105, %110 : vector<256x64xf32>
    %c0_89 = arith.constant 0 : index
    %c0_90 = arith.constant 0 : index
    %112 = vector.load %arg11[%c0_89, %c0_90] : memref<1x64xf32, #tpu.memory_space<vmem>>, vector<1x64xf32>
    %113 = arith.truncf %111 : vector<256x64xf32> to vector<256x64xbf16>
    %114 = vector.shape_cast %113 : vector<256x64xbf16> to vector<16x16x64xbf16>
    %c1_91 = arith.constant 1 : index
    %c1_92 = arith.constant 1 : index
    %c0_93 = arith.constant 0 : index
    %115 = vector.load %arg15[%c1_91, %c1_92, %c0_93] : memref<18x18x64xbf16, #tpu.memory_space<vmem>>, vector<16x16x64xbf16>
    tpu.vector_store %arg15[%c1_91, %c1_92, %c0_93], %114 {strides = array<i32>} : memref<18x18x64xbf16, #tpu.memory_space<vmem>>, vector<16x16x64xbf16>,
    %c0_94 = arith.constant 0 : index
    %c0_95 = arith.constant 0 : index
    %c0_96 = arith.constant 0 : index
    %116 = vector.load %arg15[%c0_94, %c0_95, %c0_96] : memref<18x18x64xbf16, #tpu.memory_space<vmem>>, vector<16x16x64xbf16>
    %117 = vector.shape_cast %116 : vector<16x16x64xbf16> to vector<256x64xbf16>
    %c0_97 = arith.constant 0 : index
    %c0_98 = arith.constant 0 : index
    %118 = vector.load %arg16[%c0_97, %c0_98] : memref<256x576xbf16, #tpu.memory_space<vmem>>, vector<256x64xbf16>
    tpu.vector_store %arg16[%c0_97, %c0_98], %117 {strides = array<i32>} : memref<256x576xbf16, #tpu.memory_space<vmem>>, vector<256x64xbf16>,
    %c0_99 = arith.constant 0 : index
    %c1_100 = arith.constant 1 : index
    %c0_101 = arith.constant 0 : index
    %119 = vector.load %arg15[%c0_99, %c1_100, %c0_101] : memref<18x18x64xbf16, #tpu.memory_space<vmem>>, vector<16x16x64xbf16>
    %120 = vector.shape_cast %119 : vector<16x16x64xbf16> to vector<256x64xbf16>
    %c0_102 = arith.constant 0 : index
    %c64_103 = arith.constant 64 : index
    %121 = vector.load %arg16[%c0_102, %c64_103] : memref<256x576xbf16, #tpu.memory_space<vmem>>, vector<256x64xbf16>
    tpu.vector_store %arg16[%c0_102, %c64_103], %120 {strides = array<i32>} : memref<256x576xbf16, #tpu.memory_space<vmem>>, vector<256x64xbf16>,
    %c0_104 = arith.constant 0 : index
    %c2_105 = arith.constant 2 : index
    %c0_106 = arith.constant 0 : index
    %122 = vector.load %arg15[%c0_104, %c2_105, %c0_106] : memref<18x18x64xbf16, #tpu.memory_space<vmem>>, vector<16x16x64xbf16>
    %123 = vector.shape_cast %122 : vector<16x16x64xbf16> to vector<256x64xbf16>
    %c0_107 = arith.constant 0 : index
    %c128_108 = arith.constant 128 : index
    %124 = vector.load %arg16[%c0_107, %c128_108] : memref<256x576xbf16, #tpu.memory_space<vmem>>, vector<256x64xbf16>
    tpu.vector_store %arg16[%c0_107, %c128_108], %123 {strides = array<i32>} : memref<256x576xbf16, #tpu.memory_space<vmem>>, vector<256x64xbf16>,
    %c1_109 = arith.constant 1 : index
    %c0_110 = arith.constant 0 : index
    %c0_111 = arith.constant 0 : index
    %125 = vector.load %arg15[%c1_109, %c0_110, %c0_111] : memref<18x18x64xbf16, #tpu.memory_space<vmem>>, vector<16x16x64xbf16>
    %126 = vector.shape_cast %125 : vector<16x16x64xbf16> to vector<256x64xbf16>
    %c0_112 = arith.constant 0 : index
    %c192_113 = arith.constant 192 : index
    %127 = vector.load %arg16[%c0_112, %c192_113] : memref<256x576xbf16, #tpu.memory_space<vmem>>, vector<256x64xbf16>
    tpu.vector_store %arg16[%c0_112, %c192_113], %126 {strides = array<i32>} : memref<256x576xbf16, #tpu.memory_space<vmem>>, vector<256x64xbf16>,
    %c1_114 = arith.constant 1 : index
    %c1_115 = arith.constant 1 : index
    %c0_116 = arith.constant 0 : index
    %128 = vector.load %arg15[%c1_114, %c1_115, %c0_116] : memref<18x18x64xbf16, #tpu.memory_space<vmem>>, vector<16x16x64xbf16>
    %129 = vector.shape_cast %128 : vector<16x16x64xbf16> to vector<256x64xbf16>
    %c0_117 = arith.constant 0 : index
    %c256_118 = arith.constant 256 : index
    %130 = vector.load %arg16[%c0_117, %c256_118] : memref<256x576xbf16, #tpu.memory_space<vmem>>, vector<256x64xbf16>
    tpu.vector_store %arg16[%c0_117, %c256_118], %129 {strides = array<i32>} : memref<256x576xbf16, #tpu.memory_space<vmem>>, vector<256x64xbf16>,
    %c1_119 = arith.constant 1 : index
    %c2_120 = arith.constant 2 : index
    %c0_121 = arith.constant 0 : index
    %131 = vector.load %arg15[%c1_119, %c2_120, %c0_121] : memref<18x18x64xbf16, #tpu.memory_space<vmem>>, vector<16x16x64xbf16>
    %132 = vector.shape_cast %131 : vector<16x16x64xbf16> to vector<256x64xbf16>
    %c0_122 = arith.constant 0 : index
    %c320 = arith.constant 320 : index
    %133 = vector.load %arg16[%c0_122, %c320] : memref<256x576xbf16, #tpu.memory_space<vmem>>, vector<256x64xbf16>
    tpu.vector_store %arg16[%c0_122, %c320], %132 {strides = array<i32>} : memref<256x576xbf16, #tpu.memory_space<vmem>>, vector<256x64xbf16>,
    %c2_123 = arith.constant 2 : index
    %c0_124 = arith.constant 0 : index
    %c0_125 = arith.constant 0 : index
    %134 = vector.load %arg15[%c2_123, %c0_124, %c0_125] : memref<18x18x64xbf16, #tpu.memory_space<vmem>>, vector<16x16x64xbf16>
    %135 = vector.shape_cast %134 : vector<16x16x64xbf16> to vector<256x64xbf16>
    %c0_126 = arith.constant 0 : index
    %c384 = arith.constant 384 : index
    %136 = vector.load %arg16[%c0_126, %c384] : memref<256x576xbf16, #tpu.memory_space<vmem>>, vector<256x64xbf16>
    tpu.vector_store %arg16[%c0_126, %c384], %135 {strides = array<i32>} : memref<256x576xbf16, #tpu.memory_space<vmem>>, vector<256x64xbf16>,
    %c2_127 = arith.constant 2 : index
    %c1_128 = arith.constant 1 : index
    %c0_129 = arith.constant 0 : index
    %137 = vector.load %arg15[%c2_127, %c1_128, %c0_129] : memref<18x18x64xbf16, #tpu.memory_space<vmem>>, vector<16x16x64xbf16>
    %138 = vector.shape_cast %137 : vector<16x16x64xbf16> to vector<256x64xbf16>
    %c0_130 = arith.constant 0 : index
    %c448 = arith.constant 448 : index
    %139 = vector.load %arg16[%c0_130, %c448] : memref<256x576xbf16, #tpu.memory_space<vmem>>, vector<256x64xbf16>
    tpu.vector_store %arg16[%c0_130, %c448], %138 {strides = array<i32>} : memref<256x576xbf16, #tpu.memory_space<vmem>>, vector<256x64xbf16>,
    %c2_131 = arith.constant 2 : index
    %c2_132 = arith.constant 2 : index
    %c0_133 = arith.constant 0 : index
    %140 = vector.load %arg15[%c2_131, %c2_132, %c0_133] : memref<18x18x64xbf16, #tpu.memory_space<vmem>>, vector<16x16x64xbf16>
    %141 = vector.shape_cast %140 : vector<16x16x64xbf16> to vector<256x64xbf16>
    %c0_134 = arith.constant 0 : index
    %c512 = arith.constant 512 : index
    %142 = vector.load %arg16[%c0_134, %c512] : memref<256x576xbf16, #tpu.memory_space<vmem>>, vector<256x64xbf16>
    tpu.vector_store %arg16[%c0_134, %c512], %141 {strides = array<i32>} : memref<256x576xbf16, #tpu.memory_space<vmem>>, vector<256x64xbf16>,
    %c0_135 = arith.constant 0 : index
    %c0_136 = arith.constant 0 : index
    %143 = vector.load %arg16[%c0_135, %c0_136] : memref<256x576xbf16, #tpu.memory_space<vmem>>, vector<256x576xbf16>
    %c0_137 = arith.constant 0 : index
    %c0_138 = arith.constant 0 : index
    %144 = vector.load %arg10[%c0_137, %c0_138] : memref<576x64xbf16, #tpu.memory_space<vmem>>, vector<576x64xbf16>
    %cst_139 = arith.constant dense<0.000000e+00> : vector<256x64xf32>
    %145 = tpu.matmul %143, %144, %cst_139 {dimension_numbers = #tpu.dot_dimension_numbers<[1], [0], [0], [1], [0, 0, 1, 1], [], []>} : vector<256x576xbf16>, vector<576x64xbf16>, vector<256x64xf32> -> vector<256x64xf32>
    %146 = vector.broadcast %112 : vector<1x64xf32> to vector<256x64xf32>
    %147 = arith.addf %145, %146 : vector<256x64xf32>
    %148 = arith.truncf %7 : vector<256x32xf32> to vector<256x32xbf16>
    %c0_140 = arith.constant 0 : index
    %c0_141 = arith.constant 0 : index
    %149 = vector.load %arg12[%c0_140, %c0_141] : memref<32x64xbf16, #tpu.memory_space<vmem>>, vector<32x64xbf16>
    %cst_142 = arith.constant dense<0.000000e+00> : vector<256x64xf32>
    %150 = tpu.matmul %148, %149, %cst_142 {dimension_numbers = #tpu.dot_dimension_numbers<[1], [0], [0], [1], [0, 0, 1, 1], [], []>} : vector<256x32xbf16>, vector<32x64xbf16>, vector<256x64xf32> -> vector<256x64xf32>
    %c0_143 = arith.constant 0 : index
    %c0_144 = arith.constant 0 : index
    %151 = vector.load %arg13[%c0_143, %c0_144] : memref<1x64xf32, #tpu.memory_space<vmem>>, vector<1x64xf32>
    %152 = vector.broadcast %151 : vector<1x64xf32> to vector<256x64xf32>
    %153 = arith.addf %150, %152 : vector<256x64xf32>
    %154 = arith.addf %147, %153 : vector<256x64xf32>
    %c0_145 = arith.constant 0 : index
    %c0_146 = arith.constant 0 : index
    %c0_147 = arith.constant 0 : index
    %155 = vector.load %arg14[%c0_145, %c0_146, %c0_147] : memref<1x256x64xf32, #tpu.memory_space<vmem>>, vector<1x256x64xf32>
    %156 = vector.shape_cast %155 : vector<1x256x64xf32> to vector<256x64xf32>
    %157 = vector.shape_cast %154 : vector<256x64xf32> to vector<1x256x64xf32>
    tpu.vector_store %arg14[%c0_145, %c0_146, %c0_147], %157 {strides = array<i32>} : memref<1x256x64xf32, #tpu.memory_space<vmem>>, vector<1x256x64xf32>,
    return
  }
  func.func @transform_0(%arg0: i32) -> (i32, i32, i32) {
    %c0_i32 = arith.constant 0 : i32
    %c0_i32_0 = arith.constant 0 : i32
    %c0_i32_1 = arith.constant 0 : i32
    return %arg0, %c0_i32, %c0_i32_0 : i32, i32, i32
  }
  func.func @transform_1(%arg0: i32) -> (i32, i32) {
    %c0_i32 = arith.constant 0 : i32
    %c0_i32_0 = arith.constant 0 : i32
    %c0_i32_1 = arith.constant 0 : i32
    return %c0_i32, %c0_i32_0 : i32, i32
  }
  func.func @transform_2(%arg0: i32) -> (i32, i32) {
    %c0_i32 = arith.constant 0 : i32
    %c0_i32_0 = arith.constant 0 : i32
    %c0_i32_1 = arith.constant 0 : i32
    return %c0_i32, %c0_i32_0 : i32, i32
  }
  func.func @transform_3(%arg0: i32) -> (i32, i32) {
    %c0_i32 = arith.constant 0 : i32
    %c0_i32_0 = arith.constant 0 : i32
    %c0_i32_1 = arith.constant 0 : i32
    return %c0_i32, %c0_i32_0 : i32, i32
  }
  func.func @transform_4(%arg0: i32) -> (i32, i32) {
    %c0_i32 = arith.constant 0 : i32
    %c0_i32_0 = arith.constant 0 : i32
    %c0_i32_1 = arith.constant 0 : i32
    return %c0_i32, %c0_i32_0 : i32, i32
  }
  func.func @transform_5(%arg0: i32) -> (i32, i32) {
    %c0_i32 = arith.constant 0 : i32
    %c0_i32_0 = arith.constant 0 : i32
    %c0_i32_1 = arith.constant 0 : i32
    return %c0_i32, %c0_i32_0 : i32, i32
  }
  func.func @transform_6(%arg0: i32) -> (i32, i32) {
    %c0_i32 = arith.constant 0 : i32
    %c0_i32_0 = arith.constant 0 : i32
    %c0_i32_1 = arith.constant 0 : i32
    return %c0_i32, %c0_i32_0 : i32, i32
  }
  func.func @transform_7(%arg0: i32) -> (i32, i32) {
    %c0_i32 = arith.constant 0 : i32
    %c0_i32_0 = arith.constant 0 : i32
    %c0_i32_1 = arith.constant 0 : i32
    return %c0_i32, %c0_i32_0 : i32, i32
  }
  func.func @transform_8(%arg0: i32) -> (i32, i32) {
    %c0_i32 = arith.constant 0 : i32
    %c0_i32_0 = arith.constant 0 : i32
    %c0_i32_1 = arith.constant 0 : i32
    return %c0_i32, %c0_i32_0 : i32, i32
  }
  func.func @transform_9(%arg0: i32) -> (i32, i32) {
    %c0_i32 = arith.constant 0 : i32
    %c0_i32_0 = arith.constant 0 : i32
    %c0_i32_1 = arith.constant 0 : i32
    return %c0_i32, %c0_i32_0 : i32, i32
  }
  func.func @transform_10(%arg0: i32) -> (i32, i32) {
    %c0_i32 = arith.constant 0 : i32
    %c0_i32_0 = arith.constant 0 : i32
    %c0_i32_1 = arith.constant 0 : i32
    return %c0_i32, %c0_i32_0 : i32, i32
  }
  func.func @transform_11(%arg0: i32) -> (i32, i32) {
    %c0_i32 = arith.constant 0 : i32
    %c0_i32_0 = arith.constant 0 : i32
    %c0_i32_1 = arith.constant 0 : i32
    return %c0_i32, %c0_i32_0 : i32, i32
  }
  func.func @transform_12(%arg0: i32) -> (i32, i32) {
    %c0_i32 = arith.constant 0 : i32
    %c0_i32_0 = arith.constant 0 : i32
    %c0_i32_1 = arith.constant 0 : i32
    return %c0_i32, %c0_i32_0 : i32, i32
  }
  func.func @transform_13(%arg0: i32) -> (i32, i32, i32) {
    %c0_i32 = arith.constant 0 : i32
    %c0_i32_0 = arith.constant 0 : i32
    %c0_i32_1 = arith.constant 0 : i32
    return %arg0, %c0_i32, %c0_i32_0 : i32, i32, i32
  }
}

</mosaic_0001>

<bundles_post_ra>
// kernel: tpu_custom_call.1
= control target key start
LH: loop header
LB: loop body
LE: loop exit
PB: predicated region body
PF: predicated region fallthrough
CT: control target
= control target key end

     0   :  { %s12747_s25 = smov 0   ;;  %s17202_s0 = inlined_call_operand.vmem [shape: f32[2,256,32], index: 0, kind: input, shape index: {}]   ;;  %s17203_s1 = inlined_call_operand.vmem [shape: f32[1,32], index: 1, kind: input, shape index: {}]   ;;  %s17204_s2 = inlined_call_operand.vmem [shape: f32[1,32], index: 2, kind: input, shape index: {}]   ;;  %s17205_s3 = inlined_call_operand.vmem [shape: bf16[288,64], index: 3, kind: input, shape index: {}]   ;;  %s17206_s4 = inlined_call_operand.vmem [shape: f32[1,64], index: 4, kind: input, shape index: {}]   ;;  %s17207_s5 = inlined_call_operand.vmem [shape: f32[1,64], index: 5, kind: input, shape index: {}]   ;;  %s17208_s6 = inlined_call_operand.vmem [shape: f32[1,64], index: 6, kind: input, shape index: {}]   ;;  %s17209_s7 = inlined_call_operand.vmem [shape: f32[64,32], index: 7, kind: input, shape index: {}]   ;;  %s17210_s8 = inlined_call_operand.vmem [shape: f32[32,64], index: 8, kind: input, shape index: {}]   ;;  %s17211_s9 = inlined_call_operand.vmem [shape: bf16[576,64], index: 9, kind: input, shape index: {}]   ;;  %s17212_s10 = inlined_call_operand.vmem [shape: f32[1,64], index: 10, kind: input, shape index: {}]   ;;  %s17213_s11 = inlined_call_operand.vmem [shape: bf16[32,64], index: 11, kind: input, shape index: {}]   ;;  %s17214_s12 = inlined_call_operand.vmem [shape: f32[1,64], index: 12, kind: input, shape index: {}]   ;;  %s17215_s13 = inlined_call_operand.vmem [shape: f32[2,256,64], index: 13, kind: output, shape index: {}]  }
   0x1 LB: > { %s10765_s26 = sadd.s32 4294967295, %s12668_s25   ;;  %p10769_p0 = scmp.ge.s32.totalorder %s12668_s25, 1  ;;  %s12668_s25 = sphi %s12747_s25, %s23_s25  }
   0x2   : > { %p387_p1 = scmp.lt.s32.totalorder %s12668_s25, 3 }
   0x4   : > { %p388_p2 = pnand %p10769_p0, %p387_p1 }
   0x6   : > { %391 = sbr.rel (%p388_p2) target bundleno = 2182 (0x886), region = 72 }
   0xd   : > { %vm442_vm0 = vcmask 519168   ;;  %vm445_vm1 = vcmask 516096   ;;  %vm452_vm2 = vsmask.f32 256  ;;  %v12670_v0 = vmov 0   ;;  %p431_p3 = scmp.lt.s32.totalorder %s10765_s26, 1 }
   0xe   : > { %443 = vst.msk [vmem:[#allocation2] sm:$0xf] %vm442_vm0, %v12670_v0  ;;  %444 = vst.msk [vmem:[#allocation2 + $0x4] sm:$0xf] %vm442_vm0, %v12670_v0  ;;  %v17246_v1 = vmov 0  ;;  %v17249_v4 = vmov 0 }
   0xf   : > { %446 = vst.msk [vmem:[#allocation2 + $0x8] sm:$0x1] %vm445_vm1, %v12670_v0  ;;  %450 = vst.msk [vmem:[#allocation2 + $0xd4] sm:$0x1] %vm445_vm1, %v12670_v0  ;;  %vm508_vm4 = vsmask.f32 7938 }
  0x10   : > { %448 = vst.msk [vmem:[#allocation2 + $0xcc] sm:$0xf] %vm442_vm0, %v12670_v0  ;;  %449 = vst.msk [vmem:[#allocation2 + $0xd0] sm:$0xf] %vm442_vm0, %v12670_v0  ;;  %v463_v2 = vld [vmem:[#allocation2 + $0x24] sm:$0x1] }
  0x11   : > { %vm12763_vm3 = vmand %vm445_vm1, %vm452_vm2  ;;  %s17387_s26 = smov (!%p431_p3, %s10765_s26), 1  ;;  %vm598_vm6 = vcmask 261120   ;;  %vm2402_vm7 = vcmask 1042432   ;;  %vm2403_vm8 = vcmask 1046532   ;;  %v17252_v28 = vmov 0  ;;  %s12671_s14 = smov 64  }
  0x12   : > { %v17247_v1 = vsel %vm12763_vm3, 4294967295, %v17246_v1  ;;  %v464_v3 = vsel %vm12763_vm3, 0, %v463_v2  ;;  %vm12773_vm5 = vmand %vm445_vm1, %vm508_vm4  ;;  %s11399_s27 = sshll.u32 %s17387_s26, 8  ;;  %vm1806_vm10 = vsmask.f32 3328  ;;  %v17255_v56 = vmov 0 }
  0x13   : > { %17248 = vst [vmem:[#allocation4_spill] sm:$0xff] %v17247_v1  ;;  %465 = vst [vmem:[#allocation2 + $0x24] sm:$0x1] %v464_v3  ;;  %v17250_v4 = vsel %vm12773_vm5, 4294967295, %v17249_v4  ;;  %s12783_s30 = scalar_lea.vmem %s17202_s0, %s11399_s27  ;;  %vm1807_vm11 = vsmask.f32 7440  ;;  %s17072_s21 = scalar_lea.vmem %s17215_s13, %s11399_s27 }
  0x14   : > { %17251 = vst [vmem:[#allocation5_spill] sm:$0xff] %v17250_v4  ;;  %v12788_v9 = vld [vmem:[%s12783_s30] sm:$0xff]  ;;  %v12793_v12 = vld [vmem:[%s12783_s30 + $0x8] sm:$0xff]  ;;  %v12796_v13 = vld [vmem:[%s12783_s30 + $0x10] sm:$0xff]  ;;  %s12672_s15 = smov 32   ;;  %vm1497_vm13 = vcmask 257024  }
  0x15   : > { %v2307_v7 = vld [vmem:[#allocation2 + $0x4] sm:$0xf]  ;;  %v454_v8 = vld [vmem:[#allocation2] sm:$0x1]  ;;  %v599_v14 = vsel %vm598_vm6, %v12788_v9, 0.0  ;;  %v12801_v18 = vld [vmem:[%s12783_s30 + $0x18] sm:$0xff] }
  0x16   : > { %v510_v5 = vld [vmem:[#allocation2 + $0x8] sm:$0x1]  ;;  %v455_v10 = vsel %vm12763_vm3, 0, %v454_v8  ;;  %v1759_v11 = vld [vmem:[#allocation2 + $0x4] sm:$0xf]  ;;  %v2407_v19 = vrot.slane %v2307_v7, 5  ;;  %vm12813_vm9 = vmor %vm2402_vm7, %vm2403_vm8 }
  0x17   : > { %v511_v6 = vsel %vm12773_vm5, 0, %v510_v5  ;;  %v2306_v15 = vld [vmem:[#allocation2] sm:$0xe]  ;;  %456 = vst [vmem:[#allocation2] sm:$0x1] %v455_v10  ;;  %v1819_v16 = vshll.u32 %v1759_v11, 16  ;;  %vm12840_vm12 = vmor %vm1806_vm10, %vm1807_vm11 }
  0x18   : > { %512 = vst [vmem:[#allocation2 + $0x8] sm:$0x1] %v511_v6  ;;  %v1823_v17 = vshrl.u32 %v1759_v11, 16  ;;  %v600_v20 = vsel %vm598_vm6, %v12793_v12, 0.0  ;;  %v602_v21 = vsel %vm598_vm6, %v12796_v13, 0.0  ;;  %v12808_v24 = vld [vmem:[%s12783_s30 + $0x20] sm:$0xff]  ;;  %vm13303_vm15 = vmand %vm1497_vm13, %vm508_vm4 }
  0x19   : > { %v1821_v22 = vrot.slane %v1819_v16, 5  ;;  %v601_v25 = vadd.f32 %v600_v20, %v599_v14  ;;  %v10870_v26 = vrot.slane %v2306_v15, 9  ;;  %v604_v27 = vsel %vm598_vm6, %v12801_v18, 0.0  ;;  %v12818_v29 = vld [vmem:[%s12783_s30 + $0x28] sm:$0xff]  ;;  %v12823_v36 = vld [vmem:[%s12783_s30 + $0x30] sm:$0xff]  ;;  %v12830_v45 = vld [vmem:[%s12783_s30 + $0x38] sm:$0xff] }
  0x1a   : > { %v1825_v23 = vrot.slane %v1823_v17, 4  ;;  %v17253_v28 = vsel %vm12813_vm9, 4294967295, %v17252_v28  ;;  %v2409_v31 = vrot.slane %v2407_v19, 4  ;;  %v606_v33 = vsel %vm598_vm6, %v12808_v24, 0.0  ;;  %v12837_v54 = vld [vmem:[%s12783_s30 + $0x40] sm:$0xff]  ;;  %v12845_v57 = vld [vmem:[%s12783_s30 + $0x48] sm:$0xff] }
  0x1b   : > { %17254 = vst [vmem:[#allocation6_spill] sm:$0xff] %v17253_v28  ;;  %v603_v30 = vadd.f32 %v602_v21, %v601_v25  ;;  %v2408_v38 = vsel %vm12813_vm9, %v10870_v26, %v2407_v19  ;;  %v608_v42 = vsel %vm598_vm6, %v12818_v29, 0.0  ;;  %v610_v50 = vsel %vm598_vm6, %v12823_v36, 0.0  ;;  %v12851_v60 = vld [vmem:[%s12783_s30 + $0x50] sm:$0xff]  ;;  %v12854_v62 = vld [vmem:[%s12783_s30 + $0x58] sm:$0xff]  ;;  %v12857_v63 = vld [vmem:[%s12783_s30 + $0x60] sm:$0xff] }
  0x1c   : > { %v1826_v32 = vor.u32 %v1825_v23, %v1821_v22  ;;  %v17256_v56 = vsel %vm12840_vm12, 4294967295, %v17255_v56  ;;  %v612_v58 = vsel %vm598_vm6, %v12830_v45, 0.0  ;;  %v614_v0 = vsel %vm598_vm6, %v12837_v54, 0.0  ;;  %v12874_v16 = vld [vmem:[%s12783_s30 + $0x68] sm:$0xff]  ;;  %v12880_v20 = vld [vmem:[%s12783_s30 + $0x70] sm:$0xff]  ;;  %v12887_v25 = vld [vmem:[%s12783_s30 + $0x78] sm:$0xff] }
  0x1d   : > { %v605_v37 = vadd.f32 %v604_v27, %v603_v30  ;;  %17257 = vst [vmem:[#allocation7_spill] sm:$0xff] %v17256_v56  ;;  %v616_v6 = vsel %vm598_vm6, %v12845_v57, 0.0  ;;  %v618_v7 = vsel %vm598_vm6, %v12851_v60, 0.0  ;;  %v620_v11 = vsel %vm598_vm6, %v12854_v62, 0.0  ;;  %v12890_v26 = vld [vmem:[%s12783_s30 + $0x80] sm:$0xff]  ;;  %v12893_v27 = vld [vmem:[%s12783_s30 + $0x88] sm:$0xff] }
  0x1e   : > { %v1758_v40 = vld [vmem:[#allocation2] sm:$0xf]  ;;  %v1827_v48 = vrot.slane %v1826_v32, 4  ;;  %v622_v14 = vsel %vm598_vm6, %v12857_v63, 0.0  ;;  %v668_v19 = vmul.f32 %v12788_v9, %v12788_v9  ;;  %v670_v23 = vmul.f32 %v12796_v13, %v12796_v13  ;;  %s12673_s20 = smov 96  }
  0x1f   : > { %v2308_v34 = vld [vmem:[#allocation2 + $0x8] sm:$0x1]  ;;  %v1810_v43 = vshrl.u32 %v1758_v40, 16  ;;  %v1813_v44 = vshll.u32 %v1758_v40, 16  ;;  %v607_v46 = vadd.f32 %v606_v33, %v605_v37  ;;  %v624_v32 = vsel %vm598_vm6, %v12874_v16, 0.0 }
  0x20   : > { %v1760_v35 = vld [vmem:[#allocation2 + $0x8] sm:$0x1]  ;;  %v2410_v39 = vrot.slane %v2308_v34, 5  ;;  %v700_v33 = vsel %vm598_vm6, %v668_v19, 0.0  ;;  %v12901_v34 = vld [vmem:[%s12783_s30 + $0x90] sm:$0xff]  ;;  %v703_v40 = vsel %vm598_vm6, %v670_v23, 0.0 }
  0x21   : > { %v1829_v41 = vshll.u32 %v1760_v35, 16  ;;  %v1812_v52 = vrot.slane %v1810_v43, 4  ;;  %v1815_v53 = vrot.slane %v1813_v44, 5  ;;  %v609_v55 = vadd.f32 %v608_v42, %v607_v46  ;;  %v12904_v35 = vld [vmem:[%s12783_s30 + $0x98] sm:$0xff]  ;;  %v12914_v42 = vld [vmem:[%s12783_s30 + $0xa8] sm:$0xff]  ;;  %v12963_v19 = vld [vmem:[%s12783_s30 + $0xe0] sm:$0xff] }
  0x22   : > { %v2411_v47 = vsel %vm12813_vm9, %v2409_v31, %v2410_v39  ;;  %v671_v31 = vmul.f32 %v12801_v18, %v12801_v18  ;;  %v626_v43 = vsel %vm598_vm6, %v12880_v20, 0.0  ;;  %v673_v44 = vmul.f32 %v12818_v29, %v12818_v29 }
  0x23   : > { %v1831_v49 = vrot.slane %v1829_v41, 5  ;;  %v10886_v51 = vcombine.low %v2408_v38, %v2411_v47  ;;  %v1816_v59 = vor.u32 %v1815_v53, %v1812_v52  ;;  %v611_v61 = vadd.f32 %v610_v50, %v609_v55  ;;  %v12911_v41 = vld [vmem:[%s12783_s30 + $0xa0] sm:$0xff] }
  0x24   : > { %v672_v38 = vmul.f32 %v12808_v24, %v12808_v24  ;;  %v674_v46 = vmul.f32 %v12823_v36, %v12823_v36  ;;  %v675_v52 = vmul.f32 %v12830_v45, %v12830_v45  ;;  %v705_v53 = vsel %vm598_vm6, %v671_v31, 0.0  ;;  %v12934_v55 = vld [vmem:[%s12783_s30 + $0xc0] sm:$0xff] }
  0x25   : > { %2565 = vrot.lane.b32.xlu1 %v10886_v51, %s12671_s14  ;;  %v1817_v2 = vrot.slane %v1816_v59, 4  ;;  %v1832_v3 = vsel %vm12840_vm12, %v1827_v48, %v1831_v49  ;;  %v613_v5 = vadd.f32 %v612_v58, %v611_v61  ;;  %v12923_v48 = vld [vmem:[%s12783_s30 + $0xb0] sm:$0xff]  ;;  %v12926_v49 = vld [vmem:[%s12783_s30 + $0xb8] sm:$0xff]  ;;  %v628_v51 = vsel %vm598_vm6, %v12887_v25, 0.0  ;;  %v12937_v58 = vld [vmem:[%s12783_s30 + $0xc8] sm:$0xff] }
  0x26   : > { %v630_v59 = vsel %vm598_vm6, %v12890_v26, 0.0  ;;  %v632_v61 = vsel %vm598_vm6, %v12893_v27, 0.0  ;;  %v646_v23 = vsel %vm598_vm6, %v12934_v55, 0.0  ;;  %v709_v31 = vsel %vm598_vm6, %v673_v44, 0.0 }
  0x27   : > { %v1822_v8 = vsel %vm12840_vm12, %v1817_v2, %v1821_v22  ;;  %v615_v10 = vadd.f32 %v614_v0, %v613_v5  ;;  %v669_v22 = vmul.f32 %v12793_v12, %v12793_v12  ;;  %v634_v0 = vsel %vm598_vm6, %v12901_v34, 0.0 }
  0x28   : > { %v10854_v15 = vcombine.low %v1822_v8, %v1832_v3  ;;  %v12946_v3 = vld [vmem:[%s12783_s30 + $0xd0] sm:$0xff]  ;;  %v707_v8 = vsel %vm598_vm6, %v672_v38, 0.0  ;;  %v460_v38 = vld [vmem:[#allocation2 + $0x18] sm:$0x1]  ;;  %vm1174_vm14 = vsmask.f32 4368 }
  0x29   : > { %v617_v17 = vadd.f32 %v616_v6, %v615_v10  ;;  %v701_v39 = vsel %vm598_vm6, %v669_v22, 0.0  ;;  %v636_v6 = vsel %vm598_vm6, %v12904_v35, 0.0  ;;  %v12954_v10 = vld [vmem:[%s12783_s30 + $0xd8] sm:$0xff]  ;;  %vm13311_vm1 = vmor %vm452_vm2, %vm1174_vm14  ;;  %vm1504_vm7 = vcmask 253952  }
  0x2a   : > { %2241 = vrot.lane.b32.xlu0 %v10854_v15, %s12672_s15  ;;  %v702_v47 = vadd.f32 %v701_v39, %v700_v33  ;;  %v644_v15 = vsel %vm598_vm6, %v12926_v49, 0.0  ;;  %v12977_v33 = vsel %vm598_vm6, %v12946_v3, 0.0  ;;  %v12986_v44 = vsel %vm598_vm6, %v12954_v10, 0.0  ;;  %vm13364_vm8 = vmand %vm1504_vm7, %vm452_vm2 }
  0x2b   : > { %v619_v21 = vadd.f32 %v618_v7, %v617_v17  ;;  %v638_v7 = vsel %vm598_vm6, %v12911_v41, 0.0  ;;  %vm2289_vm2 = vcmask 523520   ;;  %vm2613_vm10 = vcmask 785920   ;;  %vm15461_vm14 = vmand %vm442_vm0, %vm508_vm4 }
  0x2c   : > { %v704_v2 = vadd.f32 %v703_v40, %v702_v47  ;;  %v677_v40 = vmul.f32 %v12845_v57, %v12845_v57  ;;  %v711_v47 = vsel %vm598_vm6, %v674_v46, 0.0  ;;  %vm2790_vm11 = vcmask 1048320  }
  0x2d   : > { %v621_v30 = vadd.f32 %v620_v11, %v619_v21  ;;  %v640_v11 = vsel %vm598_vm6, %v12914_v42, 0.0  ;;  %v12966_v21 = vld [vmem:[%s12783_s30 + $0xe8] sm:$0xff] }
  0x2e   : > { %v706_v17 = vadd.f32 %v705_v53, %v704_v2 }
  0x2f   : > { %v623_v37 = vadd.f32 %v622_v14, %v621_v30  ;;  %v642_v14 = vsel %vm598_vm6, %v12923_v48, 0.0  ;;  %v676_v30 = vmul.f32 %v12837_v54, %v12837_v54 }
  0x31   : > { %v625_v50 = vadd.f32 %v624_v32, %v623_v37  ;;  %v648_v32 = vsel %vm598_vm6, %v12937_v58, 0.0  ;;  %v708_v37 = vadd.f32 %v707_v8, %v706_v17  ;;  %v715_v46 = vsel %vm598_vm6, %v676_v30, 0.0  ;;  %v457_v17 = vld [vmem:[#allocation2 + $0xc] sm:$0x1] }
  0x32   : > { %v461_v8 = vsel %vm12763_vm3, 0, %v460_v38  ;;  %v13010_v38 = vld [vmem:[%s12783_s30 + $0xf8] sm:$0xff] }
  0x33   : > { %v627_v5 = vadd.f32 %v626_v43, %v625_v50  ;;  %v678_v43 = vmul.f32 %v12851_v60, %v12851_v60  ;;  %v12990_v50 = vsel %vm598_vm6, %v12963_v19, 0.0  ;;  %v710_v53 = vadd.f32 %v709_v31, %v708_v37  ;;  %462 = vst [vmem:[#allocation2 + $0x18] sm:$0x1] %v461_v8 }
  0x34   : > { %v458_v31 = vsel %vm12763_vm3, 0, %v457_v17  ;;  %v682_v17 = vmul.f32 %v12880_v20, %v12880_v20 }
  0x35   : > { %v629_v22 = vadd.f32 %v628_v51, %v627_v5  ;;  %v12994_v51 = vsel %vm598_vm6, %v12966_v21, 0.0  ;;  %v713_v5 = vsel %vm598_vm6, %v675_v52, 0.0  ;;  %459 = vst [vmem:[#allocation2 + $0xc] sm:$0x1] %v458_v31  ;;  %v13007_v52 = vld [vmem:[%s12783_s30 + $0xf0] sm:$0xff] }
  0x37   : > { %v631_v39 = vadd.f32 %v630_v59, %v629_v22  ;;  %v466_v59 = vld [vmem:[#allocation2 + $0x30] sm:$0x1]  ;;  %v712_v22 = vadd.f32 %v711_v47, %v710_v53  ;;  %v679_v53 = vmul.f32 %v12854_v62, %v12854_v62 }
  0x38   : > { %v467_v56 = vsel %vm12763_vm3, 0, %v466_v59  ;;  %v680_v59 = vmul.f32 %v12857_v63, %v12857_v63 }
  0x39   : > { %v633_v2 = vadd.f32 %v632_v61, %v631_v39  ;;  %v717_v61 = vsel %vm598_vm6, %v677_v40, 0.0  ;;  %v719_v39 = vsel %vm598_vm6, %v678_v43, 0.0  ;;  %468 = vst [vmem:[#allocation2 + $0x30] sm:$0x1] %v467_v56  ;;  %v714_v30 = vadd.f32 %v713_v5, %v712_v22 }
  0x3a   : > { %v681_v40 = vmul.f32 %v12874_v16, %v12874_v16  ;;  %v721_v5 = vsel %vm598_vm6, %v679_v53, 0.0  ;;  %v684_v53 = vmul.f32 %v12890_v26, %v12890_v26 }
  0x3b   : > { %v635_v37 = vadd.f32 %v634_v0, %v633_v2  ;;  %v716_v8 = vadd.f32 %v715_v46, %v714_v30  ;;  %v658_v2 = vsel %vm598_vm6, %v13007_v52, 0.0  ;;  %v723_v46 = vsel %vm598_vm6, %v680_v59, 0.0 }
  0x3d   : > { %v637_v47 = vadd.f32 %v636_v6, %v635_v37  ;;  %v718_v43 = vadd.f32 %v717_v61, %v716_v8  ;;  %v660_v6 = vsel %vm598_vm6, %v13010_v38, 0.0  ;;  %v683_v37 = vmul.f32 %v12887_v25, %v12887_v25  ;;  %v472_v8 = vld [vmem:[#allocation2 + $0x48] sm:$0x1] }
  0x3f   : > { %v639_v0 = vadd.f32 %v638_v7, %v637_v47  ;;  %v720_v22 = vadd.f32 %v719_v39, %v718_v43  ;;  %v469_v7 = vld [vmem:[#allocation2 + $0x3c] sm:$0x1]  ;;  %v685_v39 = vmul.f32 %v12893_v27, %v12893_v27  ;;  %v729_v43 = vsel %vm598_vm6, %v683_v37, 0.0 }
  0x40   : > { %v470_v61 = vsel %vm12763_vm3, 0, %v469_v7 }
  0x41   : > { %v641_v56 = vadd.f32 %v640_v11, %v639_v0  ;;  %v725_v11 = vsel %vm598_vm6, %v681_v40, 0.0  ;;  %v722_v30 = vadd.f32 %v721_v5, %v720_v22  ;;  %471 = vst [vmem:[#allocation2 + $0x3c] sm:$0x1] %v470_v61  ;;  %v727_v0 = vsel %vm598_vm6, %v682_v17, 0.0 }
  0x42   : > { %v473_v40 = vsel %vm12763_vm3, 0, %v472_v8  ;;  %v687_v22 = vmul.f32 %v12904_v35, %v12904_v35  ;;  %v731_v17 = vsel %vm598_vm6, %v684_v53, 0.0 }
  0x43   : > { %v643_v31 = vadd.f32 %v642_v14, %v641_v56  ;;  %v724_v59 = vadd.f32 %v723_v46, %v722_v30  ;;  %474 = vst [vmem:[#allocation2 + $0x48] sm:$0x1] %v473_v40  ;;  %v475_v46 = vld [vmem:[#allocation2 + $0x54] sm:$0x1] }
  0x44   : > { %v476_v37 = vsel %vm12763_vm3, 0, %v475_v46 }
  0x45   : > { %v645_v47 = vadd.f32 %v644_v15, %v643_v31  ;;  %v726_v56 = vadd.f32 %v725_v11, %v724_v59  ;;  %v686_v15 = vmul.f32 %v12901_v34, %v12901_v34  ;;  %v733_v31 = vsel %vm598_vm6, %v685_v39, 0.0  ;;  %477 = vst [vmem:[#allocation2 + $0x54] sm:$0x1] %v476_v37  ;;  %v478_v37 = vld [vmem:[#allocation2 + $0x60] sm:$0x1] }
  0x46   : > { %v689_v11 = vmul.f32 %v12914_v42, %v12914_v42  ;;  %v737_v39 = vsel %vm598_vm6, %v687_v22, 0.0 }
  0x47   : > { %v647_v14 = vadd.f32 %v646_v23, %v645_v47  ;;  %v728_v7 = vadd.f32 %v727_v0, %v726_v56  ;;  %v735_v53 = vsel %vm598_vm6, %v686_v15, 0.0  ;;  %v692_v15 = vmul.f32 %v12934_v55, %v12934_v55 }
  0x48   : > { %v479_v55 = vsel %vm12763_vm3, 0, %v478_v37  ;;  %v522_v37 = vld [vmem:[#allocation2 + $0x38] sm:$0x1] }
  0x49   : > { %v649_v5 = vadd.f32 %v648_v32, %v647_v14  ;;  %v688_v32 = vmul.f32 %v12911_v41, %v12911_v41  ;;  %v730_v61 = vadd.f32 %v729_v43, %v728_v7  ;;  %v741_v14 = vsel %vm598_vm6, %v689_v11, 0.0  ;;  %480 = vst [vmem:[#allocation2 + $0x60] sm:$0x1] %v479_v55 }
  0x4a   : > { %v690_v43 = vmul.f32 %v12923_v48, %v12923_v48  ;;  %v523_v55 = vsel %vm12773_vm5, 0, %v522_v37 }
  0x4b   : > { %v651_v23 = vadd.f32 %v12977_v33, %v649_v5  ;;  %v732_v47 = vadd.f32 %v731_v17, %v730_v61  ;;  %v739_v8 = vsel %vm598_vm6, %v688_v32, 0.0  ;;  %524 = vst [vmem:[#allocation2 + $0x38] sm:$0x1] %v523_v55 }
  0x4c   : > { %v743_v22 = vsel %vm598_vm6, %v690_v43, 0.0 }
  0x4d   : > { %v653_v30 = vadd.f32 %v12986_v44, %v651_v23  ;;  %v734_v59 = vadd.f32 %v733_v31, %v732_v47  ;;  %v747_v31 = vsel %vm598_vm6, %v692_v15, 0.0 }
  0x4f   : > { %v655_v33 = vadd.f32 %v12990_v50, %v653_v30  ;;  %v736_v40 = vadd.f32 %v735_v53, %v734_v59  ;;  %v691_v50 = vmul.f32 %v12926_v49, %v12926_v49  ;;  %v696_v30 = vmul.f32 %v12963_v19, %v12963_v19  ;;  %v513_v19 = vld [vmem:[#allocation2 + $0x14] sm:$0x1] }
  0x50   : > { %v697_v53 = vmul.f32 %v12966_v21, %v12966_v21  ;;  %v699_v21 = vmul.f32 %v13010_v38, %v13010_v38 }
  0x51   : > { %v657_v0 = vadd.f32 %v12994_v51, %v655_v33  ;;  %v738_v44 = vadd.f32 %v737_v39, %v736_v40  ;;  %v693_v51 = vmul.f32 %v12937_v58, %v12937_v58  ;;  %v745_v23 = vsel %vm598_vm6, %v691_v50, 0.0 }
  0x53   : > { %v659_v56 = vadd.f32 %v658_v2, %v657_v0  ;;  %v740_v5 = vadd.f32 %v739_v8, %v738_v44  ;;  %v694_v2 = vmul.f32 %v12946_v3, %v12946_v3  ;;  %v749_v61 = vsel %vm598_vm6, %v693_v51, 0.0  ;;  %v481_v8 = vld [vmem:[#allocation2 + $0x6c] sm:$0x1] }
  0x54   : > { %v482_v0 = vsel %vm12763_vm3, 0, %v481_v8  ;;  %v757_v44 = vsel %vm598_vm6, %v697_v53, 0.0 }
  0x55   : > { %v661_v7 = vadd.f32 %v660_v6, %v659_v56  ;;  %v742_v46 = vadd.f32 %v741_v14, %v740_v5  ;;  %v695_v6 = vmul.f32 %v12954_v10, %v12954_v10  ;;  %v751_v3 = vsel %vm598_vm6, %v694_v2, 0.0  ;;  %483 = vst [vmem:[#allocation2 + $0x6c] sm:$0x1] %v482_v0  ;;  %v516_v5 = vld [vmem:[#allocation2 + $0x20] sm:$0x1] }
  0x56   : > { %v698_v10 = vmul.f32 %v13007_v52, %v13007_v52  ;;  %v755_v14 = vsel %vm598_vm6, %v696_v30, 0.0  ;;  %v514_v56 = vsel %vm12773_vm5, 0, %v513_v19 }
  0x57   : > { %v744_v17 = vadd.f32 %v743_v22, %v742_v46  ;;  %v662_v32 = vrot.slane %v661_v7, 4  ;;  %v753_v39 = vsel %vm598_vm6, %v695_v6, 0.0  ;;  %515 = vst [vmem:[#allocation2 + $0x14] sm:$0x1] %v514_v56  ;;  %v761_v46 = vsel %vm598_vm6, %v699_v21, 0.0 }
  0x58   : > { %v759_v52 = vsel %vm598_vm6, %v698_v10, 0.0  ;;  %v531_v10 = vld [vmem:[#allocation2 + $0x5c] sm:$0x1]  ;;  %v779_v21 = vlaneseq }
  0x59   : > { %v746_v11 = vadd.f32 %v745_v23, %v744_v17  ;;  %v663_v47 = vadd.f32 %v662_v32, %v661_v7  ;;  %v517_v7 = vsel %vm12773_vm5, 0, %v516_v5  ;;  %v519_v23 = vld [vmem:[#allocation2 + $0x2c] sm:$0x1]  ;;  %v532_v0 = vsel %vm12773_vm5, 0, %v531_v10  ;;  %v596_v5 = vld [vmem:[%s17203_s1] sm:$0x1] }
  0x5a   : > { %518 = vst [vmem:[#allocation2 + $0x20] sm:$0x1] %v517_v7  ;;  %v520_v38 = vsel %vm12773_vm5, 0, %v519_v23  ;;  %533 = vst [vmem:[#allocation2 + $0x5c] sm:$0x1] %v532_v0 }
  0x5b   : > { %v748_v58 = vadd.f32 %v747_v31, %v746_v11  ;;  %v664_v40 = vrot.slane %v663_v47, 2  ;;  %521 = vst [vmem:[#allocation2 + $0x2c] sm:$0x1] %v520_v38 }
  0x5d   : > { %v750_v33 = vadd.f32 %v749_v61, %v748_v58  ;;  %v665_v15 = vadd.f32 %v664_v40, %v663_v47  ;;  %v525_v61 = vld [vmem:[#allocation2 + $0x44] sm:$0x1]  ;;  %v534_v40 = vld [vmem:[#allocation2 + $0x68] sm:$0x1] }
  0x5e   : > { %v535_v56 = vsel %vm12773_vm5, 0, %v534_v40 }
  0x5f   : > { %v752_v59 = vadd.f32 %v751_v3, %v750_v33  ;;  %v666_v17 = vrot.slane %v665_v15, 1  ;;  %v526_v3 = vsel %vm12773_vm5, 0, %v525_v61  ;;  %v528_v33 = vld [vmem:[#allocation2 + $0x50] sm:$0x1]  ;;  %536 = vst [vmem:[#allocation2 + $0x68] sm:$0x1] %v535_v56 }
  0x60   : > { %527 = vst [vmem:[#allocation2 + $0x44] sm:$0x1] %v526_v3 }
  0x61   : > { %v754_v43 = vadd.f32 %v753_v39, %v752_v59  ;;  %v667_v32 = vadd.f32 %v666_v17, %v665_v15  ;;  %v529_v59 = vsel %vm12773_vm5, 0, %v528_v33  ;;  %v484_v17 = vld [vmem:[#allocation2 + $0x78] sm:$0x1] }
  0x62   : > { %530 = vst [vmem:[#allocation2 + $0x50] sm:$0x1] %v529_v59 }
  0x63   : > { %v756_v50 = vadd.f32 %v755_v14, %v754_v43  ;;  %v769_v30 = vmul.f32 0.00390625, %v667_v32 }
  0x65   : > { %v758_v22 = vadd.f32 %v757_v44, %v756_v50  ;;  %v771_v39 = vmul.f32 %v769_v30, %v769_v30  ;;  %v537_v44 = vld [vmem:[#allocation2 + $0x74] sm:$0x1] }
  0x66   : > { %v538_v50 = vsel %vm12773_vm5, 0, %v537_v44 }
  0x67   : > { %v760_v51 = vadd.f32 %v759_v52, %v758_v22  ;;  %539 = vst [vmem:[#allocation2 + $0x74] sm:$0x1] %v538_v50  ;;  %v780_v52 = vshrl.u32 %v779_v21, 7  ;;  %v540_v50 = vld [vmem:[#allocation2 + $0x80] sm:$0x1] }
  0x69   : > { %v762_v2 = vadd.f32 %v761_v46, %v760_v51  ;;  %v13114_v15 = vsub.s32 0, %v780_v52  ;;  %v597_v46 = vld [vmem:[%s17204_s2] sm:$0x1] }
  0x6b   : > { %v763_v31 = vrot.slane %v762_v2, 4  ;;  %17258 = vst [vmem:[#allocation8_spill] sm:$0xff] %v13114_v15 }
  0x6d   : > { %v764_v11 = vadd.f32 %v763_v31, %v762_v2  ;;  %v485_v2 = vsel %vm12763_vm3, 0, %v484_v17 }
  0x6e   : > { %486 = vst [vmem:[#allocation2 + $0x78] sm:$0x1] %v485_v2 }
  0x6f   : > { %v765_v6 = vrot.slane %v764_v11, 2 }
  0x71   : > { %v766_v58 = vadd.f32 %v765_v6, %v764_v11 }
  0x73   : > { %v767_v47 = vrot.slane %v766_v58, 1 }
  0x75   : > { %v768_v53 = vadd.f32 %v767_v47, %v766_v58 }
  0x77   : > { %v770_v8 = vmul.f32 0.00390625, %v768_v53 }
  0x79   : > { %v772_v14 = vsub.f32 %v770_v8, %v771_v39 }
  0x7b   : > { %v773_v19 = vmax.f32 %v772_v14, 0.0 }
  0x7d   : > { %v774_v43 = vadd.f32 1e-06, %v773_v19 }
  0x7f   : > { %12360 = vrsqrt.f32 %v774_v43 }
  0x89   : > { %v12361_v22 = vpop.eup %12360 }
  0x8a   : > { %v776_v7 = vmul.f32 %v12361_v22, %v596_v5  ;;  %v487_v5 = vld [vmem:[#allocation2 + $0x84] sm:$0x1] }
  0x8b   : > { %v488_v2 = vsel %vm12763_vm3, 0, %v487_v5 }
  0x8c   : > { %v777_v51 = vmul.f32 %v776_v7, %v769_v30  ;;  %v13120_v23 = vrot.slane %v776_v7, %v13114_v15  ;;  %489 = vst [vmem:[#allocation2 + $0x84] sm:$0x1] %v488_v2 }
  0x8e   : > { %17259 = vst [vmem:[#allocation9_spill] sm:$0xff] %v13120_v23  ;;  %v778_v38 = vsub.f32 %v597_v46, %v777_v51  ;;  %v787_v31 = vmul.f32 %v13120_v23, %v12808_v24  ;;  %v788_v37 = vmul.f32 %v13120_v23, %v12818_v29  ;;  %v785_v32 = vmul.f32 %v13120_v23, %v12796_v13 }
  0x8f   : > { %v786_v11 = vmul.f32 %v13120_v23, %v12801_v18  ;;  %v789_v55 = vmul.f32 %v13120_v23, %v12823_v36  ;;  %v790_v6 = vmul.f32 %v13120_v23, %v12830_v45  ;;  %v783_v24 = vmul.f32 %v13120_v23, %v12788_v9 }
  0x90   : > { %v13137_v61 = vrot.slane %v778_v38, %v13114_v15  ;;  %v784_v29 = vmul.f32 %v13120_v23, %v12793_v12  ;;  %v791_v13 = vmul.f32 %v13120_v23, %v12837_v54  ;;  %v792_v54 = vmul.f32 %v13120_v23, %v12845_v57 }
  0x91   : > { %v793_v30 = vmul.f32 %v13120_v23, %v12851_v60  ;;  %v794_v57 = vmul.f32 %v13120_v23, %v12854_v62  ;;  %v795_v10 = vmul.f32 %v13120_v23, %v12857_v63  ;;  %v796_v44 = vmul.f32 %v13120_v23, %v12874_v16 }
  0x92   : > { %17260 = vst [vmem:[#allocation10_spill] sm:$0xff] %v13137_v61  ;;  %v13146_v18 = vadd.f32 %v13137_v61, %v787_v31  ;;  %v13149_v36 = vadd.f32 %v13137_v61, %v788_v37  ;;  %v13152_v45 = vadd.f32 %v13137_v61, %v785_v32  ;;  %v13155_v58 = vadd.f32 %v13137_v61, %v786_v11 }
  0x93   : > { %v13158_v9 = vadd.f32 %v13137_v61, %v789_v55  ;;  %v13161_v12 = vadd.f32 %v13137_v61, %v790_v6  ;;  %v13171_v53 = vadd.f32 %v13137_v61, %v783_v24  ;;  %v13175_v59 = vadd.f32 %v13137_v61, %v784_v29 }
  0x94   : > { %v10778_v3 = vmul.f32 -1.442695, %v13146_v18  ;;  %v10779_v47 = vmul.f32 -1.442695, %v13149_v36  ;;  %v10776_v33 = vmul.f32 -1.442695, %v13152_v45  ;;  %v13181_v8 = vadd.f32 %v13137_v61, %v791_v13 }
  0x95   : > { %v10777_v39 = vmul.f32 -1.442695, %v13155_v58  ;;  %v10780_v60 = vmul.f32 -1.442695, %v13158_v9  ;;  %v10781_v14 = vmul.f32 -1.442695, %v13161_v12  ;;  %v13187_v0 = vadd.f32 %v13137_v61, %v792_v54 }
  0x96   : > { %12362 = vpow2.f32 %v10778_v3  ;;  %v10774_v19 = vmul.f32 -1.442695, %v13171_v53  ;;  %v13191_v62 = vadd.f32 %v13137_v61, %v793_v30  ;;  %v10775_v40 = vmul.f32 -1.442695, %v13175_v59 }
  0x97   : > { %12364 = vpow2.f32 %v10779_v47  ;;  %v13195_v43 = vadd.f32 %v13137_v61, %v794_v57  ;;  %v10782_v63 = vmul.f32 -1.442695, %v13181_v8  ;;  %v13199_v56 = vadd.f32 %v13137_v61, %v795_v10 }
  0x98   : > { %12366 = vpow2.f32 %v10776_v33  ;;  %v10783_v21 = vmul.f32 -1.442695, %v13187_v0  ;;  %v10784_v52 = vmul.f32 -1.442695, %v13191_v62  ;;  %v797_v7 = vmul.f32 %v13120_v23, %v12880_v20 }
  0x99   : > { %12368 = vpow2.f32 %v10777_v39  ;;  %v10785_v22 = vmul.f32 -1.442695, %v13195_v43  ;;  %v10786_v46 = vmul.f32 -1.442695, %v13199_v56  ;;  %v798_v51 = vmul.f32 %v13120_v23, %v12887_v25 }
  0x9a   : > { %12370 = vpow2.f32 %v10780_v60  ;;  %v541_v16 = vsel %vm12773_vm5, 0, %v540_v50  ;;  %v13214_v17 = vadd.f32 %v13137_v61, %v796_v44  ;;  %v13219_v37 = vadd.f32 %v13137_v61, %v797_v7 }
  0x9b   : > { %12372 = vpow2.f32 %v10781_v14  ;;  %542 = vst [vmem:[#allocation2 + $0x80] sm:$0x1] %v541_v16  ;;  %v13222_v11 = vadd.f32 %v13137_v61, %v798_v51  ;;  %v799_v54 = vmul.f32 %v13120_v23, %v12890_v26  ;;  %v800_v30 = vmul.f32 %v13120_v23, %v12893_v27  ;;  %v543_v14 = vld [vmem:[#allocation2 + $0x8c] sm:$0x1] }
  0x9c   : > { %12374 = vpow2.f32 %v10774_v19  ;;  %v10787_v24 = vmul.f32 -1.442695, %v13214_v17  ;;  %v13230_v33 = vmul.f32 -1.442695, %v13219_v37  ;;  %v801_v39 = vmul.f32 %v13120_v23, %v12901_v34 }
  0x9d   : > { %12376 = vpow2.f32 %v10775_v40  ;;  %v13235_v10 = vmul.f32 -1.442695, %v13222_v11  ;;  %v802_v26 = vmul.f32 %v13120_v23, %v12904_v35  ;;  %v803_v40 = vmul.f32 %v13120_v23, %v12911_v41 }
  0x9e   : > { %12378 = vpow2.f32 %v10782_v63  ;;  %v544_v63 = vsel %vm12773_vm5, 0, %v543_v14  ;;  %v13244_v44 = vadd.f32 %v13137_v61, %v799_v54  ;;  %v804_v50 = vmul.f32 %v13120_v23, %v12914_v42 }
  0x9f   : > { %12380 = vpow2.f32 %v10783_v21  ;;  %545 = vst [vmem:[#allocation2 + $0x8c] sm:$0x1] %v544_v63  ;;  %v13249_v5 = vadd.f32 %v13137_v61, %v800_v30  ;;  %v805_v41 = vmul.f32 %v13120_v23, %v12923_v48  ;;  %v13257_v51 = vadd.f32 %v13137_v61, %v802_v26 }
  0xa0   : > { %v12363_v38 = vpop.eup %12362  ;;  %12382 = vpow2.f32 %v10784_v52  ;;  %v13260_v2 = vadd.f32 %v13137_v61, %v803_v40  ;;  %v806_v48 = vmul.f32 %v13120_v23, %v12926_v49 }
  0xa1   : > { %v12365_v20 = vpop.eup %12364  ;;  %v953_v31 = vadd.f32 1.0, %v12363_v38  ;;  %12384 = vpow2.f32 %v10785_v22  ;;  %v13281_v30 = vmul.f32 -1.442695, %v13257_v51 }
  0xa2   : > { %v12367_v25 = vpop.eup %12366  ;;  %v954_v32 = vadd.f32 1.0, %v12365_v20  ;;  %12386 = vpow2.f32 %v10786_v46  ;;  %v13254_v46 = vadd.f32 %v13137_v61, %v801_v39  ;;  %v13285_v39 = vmul.f32 -1.442695, %v13260_v2 }
  0xa3   : > { %v12369_v55 = vpop.eup %12368  ;;  %12388 = vrcp.f32 %v953_v31  ;;  %v951_v6 = vadd.f32 1.0, %v12367_v25  ;;  %v13265_v31 = vmul.f32 -1.442695, %v13244_v44  ;;  %v13268_v25 = vadd.f32 %v13137_v61, %v804_v50 }
  0xa4   : > { %v12371_v29 = vpop.eup %12370  ;;  %12390 = vrcp.f32 %v954_v32  ;;  %v952_v13 = vadd.f32 1.0, %v12369_v55  ;;  %v13278_v54 = vmul.f32 -1.442695, %v13254_v46 }
  0xa5   : > { %v12373_v3 = vpop.eup %12372  ;;  %12392 = vrcp.f32 %v951_v6  ;;  %v955_v47 = vadd.f32 1.0, %v12371_v29  ;;  %v13271_v6 = vmul.f32 -1.442695, %v13249_v5  ;;  %v13274_v29 = vadd.f32 %v13137_v61, %v805_v41 }
  0xa6   : > { %v12375_v57 = vpop.eup %12374  ;;  %12394 = vrcp.f32 %v952_v13  ;;  %v956_v60 = vadd.f32 1.0, %v12373_v3  ;;  %v13292_v14 = vmul.f32 -1.442695, %v13268_v25 }
  0xa7   : > { %v12377_v27 = vpop.eup %12376  ;;  %12396 = vrcp.f32 %v955_v47  ;;  %v949_v19 = vadd.f32 1.0, %v12375_v57  ;;  %17261 = vst [vmem:[#allocation11_spill] sm:$0xff] %v13274_v29  ;;  %v13288_v57 = vadd.f32 %v13137_v61, %v806_v48 }
  0xa8   : > { %v12379_v34 = vpop.eup %12378  ;;  %12398 = vrcp.f32 %v956_v60  ;;  %v950_v21 = vadd.f32 1.0, %v12377_v27 }
  0xa9   : > { %v12381_v35 = vpop.eup %12380  ;;  %12400 = vrcp.f32 %v949_v19  ;;  %v957_v52 = vadd.f32 1.0, %v12379_v34  ;;  %17262 = vst [vmem:[#allocation12_spill] sm:$0xff] %v13288_v57 }
  0xaa   : > { %v12383_v22 = vpop.eup %12382  ;;  %12402 = vrcp.f32 %v950_v21  ;;  %v958_v7 = vadd.f32 1.0, %v12381_v35 }
  0xab   : > { %v12385_v42 = vpop.eup %12384  ;;  %12404 = vrcp.f32 %v957_v52  ;;  %v959_v16 = vadd.f32 1.0, %v12383_v22 }
  0xac   : > { %v12387_v38 = vpop.eup %12386  ;;  %12406 = vrcp.f32 %v958_v7  ;;  %v960_v20 = vadd.f32 1.0, %v12385_v42 }
  0xad   : > { %v12389_v32 = vpop.eup %12388  ;;  %12408 = vrcp.f32 %v959_v16  ;;  %v961_v55 = vadd.f32 1.0, %v12387_v38 }
  0xae   : > { %v12391_v13 = vpop.eup %12390  ;;  %v1049_v49 = vmul.f32 %v12389_v32, %v13146_v18  ;;  %12410 = vrcp.f32 %v960_v20 }
  0xaf   : > { %v12393_v3 = vpop.eup %12392  ;;  %v1050_v47 = vmul.f32 %v12391_v13, %v13149_v36  ;;  %12412 = vpow2.f32 %v10787_v24  ;;  %v13297_v36 = vmul.f32 -1.442695, %v13274_v29 }
  0xb0   : > { %v12395_v60 = vpop.eup %12394  ;;  %v11405_v26 = vpack.c.bf16 %v1049_v49, %v1049_v49  ;;  %v1047_v18 = vmul.f32 %v12393_v3, %v13152_v45  ;;  %12414 = vrcp.f32 %v961_v55 }
  0xb1   : > { %v12397_v27 = vpop.eup %12396  ;;  %v11406_v19 = vpack.c.bf16 %v1050_v47, %v1050_v47  ;;  %v1048_v40 = vmul.f32 %v12395_v60, %v13155_v58  ;;  %12416 = vpow2.f32 %v13230_v33 }
  0xb2   : > { %v12399_v24 = vpop.eup %12398  ;;  %v1211_v63 = vshrl.u32 %v11405_v26, 16  ;;  %v1214_v34 = vshll.u32 %v11405_v26, 16  ;;  %v11403_v21 = vpack.c.bf16 %v1047_v18, %v1047_v18  ;;  %v1051_v50 = vmul.f32 %v12397_v27, %v13158_v9  ;;  %v1516_v9 = vld [vmem:[#allocation2 + $0x24] sm:$0xf] }
  0xb3   : > { %v12401_v45 = vpop.eup %12400  ;;  %v1219_v35 = vshrl.u32 %v11406_v19, 16  ;;  %v1222_v52 = vshll.u32 %v11406_v19, 16  ;;  %v11404_v41 = vpack.c.bf16 %v1048_v40, %v1048_v40  ;;  %v1052_v22 = vmul.f32 %v12399_v24, %v13161_v12  ;;  %v1509_v24 = vld [vmem:[#allocation2 + $0x18] sm:$0xf]  ;;  %v1523_v19 = vld [vmem:[#allocation2 + $0x30] sm:$0xf] }
  0xb4   : > { %v12403_v7 = vpop.eup %12402  ;;  %v1213_v42 = vrot.slane %v1211_v63, 7  ;;  %v1194_v58 = vshrl.u32 %v11403_v21, 16  ;;  %v1197_v16 = vshll.u32 %v11403_v21, 16  ;;  %v11407_v33 = vpack.c.bf16 %v1051_v50, %v1051_v50 }
  0xb5   : > { %v12405_v48 = vpop.eup %12404  ;;  %v13307_v20 = vrot.slane %v1219_v35, 7  ;;  %v1202_v32 = vshrl.u32 %v11404_v41, 16  ;;  %v1205_v55 = vshll.u32 %v11404_v41, 16  ;;  %v11408_v13 = vpack.c.bf16 %v1052_v22, %v1052_v22 }
  0xb6   : > { %v12407_v49 = vpop.eup %12406  ;;  %v1216_v3 = vor.u32 %v1214_v34, %v1213_v42  ;;  %v1217_v47 = vrot.slane %v1213_v42, 4  ;;  %v1196_v60 = vrot.slane %v1194_v58, 7  ;;  %v1228_v26 = vshrl.u32 %v11407_v33, 16 }
  0xb7   : > { %v12409_v18 = vpop.eup %12408  ;;  %v1224_v27 = vor.u32 %v1222_v52, %v13307_v20  ;;  %v13317_v40 = vrot.slane %v1202_v32, 7  ;;  %v1231_v63 = vshll.u32 %v11407_v33, 16  ;;  %v1236_v32 = vshrl.u32 %v11408_v13, 16 }
  0xb8   : > { %v12411_v21 = vpop.eup %12410  ;;  %v1517_v50 = vsel %vm13303_vm15, %v1216_v3, %v1516_v9  ;;  %v1199_v35 = vor.u32 %v1197_v16, %v1196_v60  ;;  %v1200_v41 = vrot.slane %v1196_v60, 4  ;;  %v1230_v22 = vrot.slane %v1228_v26, 7 }
  0xb9   : > { %v13321_v34 = vpop.eup %12412  ;;  %v1225_v42 = vsel %vm13311_vm1, %v1217_v47, %v1224_v27  ;;  %1518 = vst [vmem:[#allocation2 + $0x24] sm:$0xf] %v1517_v50  ;;  %v1207_v52 = vor.u32 %v1205_v55, %v13317_v40  ;;  %v1209_v58 = vrot.slane %v13317_v40, 4  ;;  %v1239_v60 = vshll.u32 %v11408_v13, 16 }
  0xba   : > { %v12415_v33 = vpop.eup %12414  ;;  %1519 = vst.msk [vmem:[#allocation2 + $0x28] sm:$0xf] %vm1497_vm13, %v1225_v42  ;;  %v1510_v16 = vsel %vm13303_vm15, %v1199_v35, %v1509_v24  ;;  %v1233_v9 = vor.u32 %v1231_v63, %v1230_v22  ;;  %v1234_v3 = vrot.slane %v1230_v22, 4  ;;  %v13334_v55 = vrot.slane %v1236_v32, 7 }
  0xbb   : > { %v13330_v26 = vpop.eup %12416  ;;  %v1208_v47 = vsel %vm13311_vm1, %v1200_v41, %v1207_v52  ;;  %1511 = vst [vmem:[#allocation2 + $0x18] sm:$0xf] %v1510_v16  ;;  %v1045_v27 = vmul.f32 %v12401_v45, %v13171_v53  ;;  %v1046_v50 = vmul.f32 %v12403_v7, %v13175_v59  ;;  %v1053_v13 = vmul.f32 %v12405_v48, %v13181_v8 }
  0xbc   : > { %1512 = vst.msk [vmem:[#allocation2 + $0x1c] sm:$0xf] %vm1497_vm13, %v1208_v47  ;;  %v1524_v24 = vsel %vm13303_vm15, %v1233_v9, %v1523_v19  ;;  %v1054_v63 = vmul.f32 %v12407_v49, %v13187_v0  ;;  %v1055_v35 = vmul.f32 %v12409_v18, %v13191_v62  ;;  %v1241_v41 = vor.u32 %v1239_v60, %v13334_v55  ;;  %v1499_v49 = vld [vmem:[#allocation2 + $0xc] sm:$0xf] }
  0xbd   : > { %v1243_v22 = vrot.slane %v13334_v55, 4  ;;  %1525 = vst [vmem:[#allocation2 + $0x30] sm:$0xf] %v1524_v24  ;;  %v11401_v42 = vpack.c.bf16 %v1045_v27, %v1045_v27  ;;  %v11402_v53 = vpack.c.bf16 %v1046_v50, %v1046_v50  ;;  %v11409_v45 = vpack.c.bf16 %v1053_v13, %v1053_v13  ;;  %v1530_v50 = vld [vmem:[#allocation2 + $0x3c] sm:$0xf] }
  0xbe   : > { %v11410_v59 = vpack.c.bf16 %v1054_v63, %v1054_v63  ;;  %v1056_v7 = vmul.f32 %v12411_v21, %v13195_v43  ;;  %v11411_v52 = vpack.c.bf16 %v1055_v35, %v1055_v35  ;;  %v1242_v19 = vsel %vm13311_vm1, %v1234_v3, %v1241_v41 }
  0xbf   : > { %v1177_v8 = vshrl.u32 %v11401_v42, 16  ;;  %v1180_v48 = vshll.u32 %v11401_v42, 16  ;;  %v1185_v0 = vshrl.u32 %v11402_v53, 16  ;;  %1526 = vst.msk [vmem:[#allocation2 + $0x34] sm:$0xf] %vm1497_vm13, %v1242_v19  ;;  %v1188_v62 = vshll.u32 %v11402_v53, 16 }
  0xc0   : > { %v1245_v18 = vshrl.u32 %v11409_v45, 16  ;;  %v1248_v32 = vshll.u32 %v11409_v45, 16  ;;  %v1253_v16 = vshrl.u32 %v11410_v59, 16  ;;  %v1256_v27 = vshll.u32 %v11410_v59, 16  ;;  %v1506_v53 = vld [vmem:[#allocation2 + $0x14] sm:$0x1] }
  0xc1   : > { %v12208_v9 = vld [vmem:[#allocation2 + $0x24] sm:$0xff]   ;;  %v1179_v60 = vrot.slane %v1177_v8, 7  ;;  %v1187_v47 = vrot.slane %v1185_v0, 7  ;;  %v11412_v43 = vpack.c.bf16 %v1056_v7, %v1056_v7  ;;  %v1057_v3 = vmul.f32 %v12415_v33, %v13199_v56 }
  0xc2   : > { %v1247_v21 = vrot.slane %v1245_v18, 7  ;;  %v13350_v24 = vrot.slane %v1253_v16, 7  ;;  %12418 = vpow2.f32 %v13235_v10  ;;  %3754 = vrot.lane.b32.xlu0 %v12208_v9, %s12671_s14  ;;  %v1262_v33 = vshrl.u32 %v11411_v52, 16  ;;  %v1513_v16 = vld [vmem:[#allocation2 + $0x20] sm:$0x1] }
  0xc3   : > { %v12209_v13 = vld [vmem:[#allocation2 + $0x18] sm:$0xff]   ;;  %v1182_v63 = vor.u32 %v1180_v48, %v1179_v60  ;;  %v1183_v35 = vrot.slane %v1179_v60, 4  ;;  %v1190_v41 = vor.u32 %v1188_v62, %v1187_v47  ;;  %v1192_v42 = vrot.slane %v1187_v47, 4 }
  0xc4   : > { %v1250_v45 = vor.u32 %v1248_v32, %v1247_v21  ;;  %v1251_v19 = vrot.slane %v1247_v21, 4  ;;  %v1258_v59 = vor.u32 %v1256_v27, %v13350_v24  ;;  %v1260_v7 = vrot.slane %v13350_v24, 4  ;;  %3752 = vrot.lane.b32.xlu1 %v12209_v13, %s12671_s14 }
  0xc5   : > { %v1191_v56 = vsel %vm13311_vm1, %v1183_v35, %v1190_v41  ;;  %v1500_v10 = vsel %vm13303_vm15, %v1182_v63, %v1499_v49  ;;  %v1265_v8 = vshll.u32 %v11411_v52, 16  ;;  %v1270_v18 = vshrl.u32 %v11412_v43, 16  ;;  %v1537_v49 = vld [vmem:[#allocation2 + $0x48] sm:$0xf] }
  0xc6   : > { %1501 = vst [vmem:[#allocation2 + $0xc] sm:$0xf] %v1500_v10  ;;  %1503 = vst.msk [vmem:[#allocation2 + $0x10] sm:$0xf] %vm1497_vm13, %v1191_v56  ;;  %v1259_v0 = vsel %vm13311_vm1, %v1251_v19, %v1258_v59  ;;  %v1531_v62 = vsel %vm13303_vm15, %v1250_v45, %v1530_v50  ;;  %v1273_v32 = vshll.u32 %v11412_v43, 16  ;;  %v12210_v52 = vld [vmem:[#allocation2 + $0x30] sm:$0xff]   ;;  %v11413_v47 = vpack.c.bf16 %v1057_v3, %v1057_v3 }
  0xc7   : > { %1532 = vst [vmem:[#allocation2 + $0x3c] sm:$0xf] %v1531_v62  ;;  %1533 = vst.msk [vmem:[#allocation2 + $0x40] sm:$0xf] %vm1497_vm13, %v1259_v0  ;;  %v1264_v9 = vrot.slane %v1262_v33, 7  ;;  %v962_v60 = vadd.f32 1.0, %v13321_v34  ;;  %12420 = vpow2.f32 %v13265_v31  ;;  %v1507_v50 = vsel %vm13364_vm8, %v1192_v42, %v1506_v53  ;;  %3756 = vrot.lane.b32.xlu0 %v12210_v52, %s12671_s14 }
  0xc8   : > { %v1272_v27 = vrot.slane %v1270_v18, 7  ;;  %v963_v21 = vadd.f32 1.0, %v13330_v26  ;;  %12422 = vpow2.f32 %v13271_v6  ;;  %v1520_v43 = vld [vmem:[#allocation2 + $0x2c] sm:$0x1]  ;;  %v1279_v35 = vshrl.u32 %v11413_v47, 16 }
  0xc9   : > { %v1267_v13 = vor.u32 %v1265_v8, %v1264_v9  ;;  %v1268_v63 = vrot.slane %v1264_v9, 4  ;;  %12424 = vrcp.f32 %v962_v60  ;;  %1508 = vst [vmem:[#allocation2 + $0x14] sm:$0x1] %v1507_v50  ;;  %v13381_v34 = vld [vmem:[#allocation2 + $0x18] sm:$0xe]  ;;  %v1282_v45 = vshll.u32 %v11413_v47, 16 }
  0xca   : > { %v1527_v3 = vld [vmem:[#allocation2 + $0x38] sm:$0x1]  ;;  %v1275_v31 = vor.u32 %v1273_v32, %v1272_v27  ;;  %v1277_v41 = vrot.slane %v1272_v27, 4  ;;  %v1544_v26 = vld [vmem:[#allocation2 + $0x54] sm:$0xf]  ;;  %12426 = vrcp.f32 %v963_v21  ;;  %v13387_v53 = vrot.slane %v1279_v35, 7 }
  0xcb   : > { %v13383_v6 = vld [vmem:[#allocation2 + $0x1c] sm:$0xf]  ;;  %v1534_v19 = vld [vmem:[#allocation2 + $0x44] sm:$0x1]  ;;  %v1538_v42 = vsel %vm13303_vm15, %v1267_v13, %v1537_v49  ;;  %v1514_v59 = vsel %vm13364_vm8, %v1209_v58, %v1513_v16  ;;  %v1541_v56 = vld [vmem:[#allocation2 + $0x50] sm:$0x1] }
  0xcc   : > { %v13394_v10 = vmul.f32 -1.442695, %v13288_v57  ;;  %v12419_v33 = vpop.eup %12418  ;;  %v1276_v8 = vsel %vm13311_vm1, %v1268_v63, %v1275_v31  ;;  %1539 = vst [vmem:[#allocation2 + $0x48] sm:$0xf] %v1538_v42  ;;  %1515 = vst [vmem:[#allocation2 + $0x20] sm:$0x1] %v1514_v59  ;;  %v1284_v16 = vor.u32 %v1282_v45, %v13387_v53  ;;  %v1535_v9 = vsel %vm13364_vm8, %v1260_v7, %v1534_v19 }
  0xcd   : > { %v10935_v0 = vrot.slane %v13381_v34, 9  ;;  %v17269_v62 = vrot.slane %v13307_v20, 4  ;;  %v13403_v18 = vld [vmem:[#allocation2 + $0x24] sm:$0xe]  ;;  %v13405_v58 = vld [vmem:[#allocation2 + $0x28] sm:$0xf]  ;;  %v1528_v20 = vsel %vm13364_vm8, %v1243_v22, %v1527_v3  ;;  %v1542_v27 = vsel %vm13364_vm8, %v1277_v41, %v1541_v56 }
  0xce   : > { %v12211_v32 = vld [vmem:[#allocation2 + $0xc] sm:$0xff]   ;;  %v12213_v49 = vld [vmem:[#allocation2 + $0x18] sm:$0xff]   ;;  %1540 = vst.msk [vmem:[#allocation2 + $0x4c] sm:$0xf] %vm1497_vm13, %v1276_v8  ;;  %v3424_v52 = vrot.slane %v13383_v6, 5  ;;  %v964_v47 = vadd.f32 1.0, %v12419_v33  ;;  %v1545_v22 = vsel %vm13303_vm15, %v1284_v16, %v1544_v26 }
  0xcf   : > { %v1521_v40 = vsel %vm13364_vm8, %v17269_v62, %v1520_v43  ;;  %v12212_v60 = vld [vmem:[#allocation2 + $0x3c] sm:$0xff]   ;;  %1529 = vst [vmem:[#allocation2 + $0x38] sm:$0x1] %v1528_v20  ;;  %1536 = vst [vmem:[#allocation2 + $0x44] sm:$0x1] %v1535_v9  ;;  %2742 = vrot.lane.b32.xlu1 %v12211_v32, %s12673_s20  ;;  %v1285_v55 = vrot.slane %v13387_v53, 4 }
  0xd0   : > { %1522 = vst [vmem:[#allocation2 + $0x2c] sm:$0x1] %v1521_v40  ;;  %v10936_v24 = vrot.slane %v13403_v18, 9  ;;  %1543 = vst [vmem:[#allocation2 + $0x50] sm:$0x1] %v1542_v27  ;;  %v12620_v21 = vld [vmem:[%s12783_s30 + $0xc0] sm:$0xff]  ;;  %3758 = vrot.lane.b32.xlu0 %v12212_v60, %s12671_s14  ;;  %12428 = vrcp.f32 %v964_v47  ;;  %v13441_v20 = vsel %vm12813_vm9, %v10935_v0, %v3424_v52 }
  0xd1   : > { %v807_v7 = vmul.f32 %v12620_v21, %v13120_v23  ;;  %1546 = vst [vmem:[#allocation2 + $0x54] sm:$0xf] %v1545_v22  ;;  %v3319_v50 = vld [vmem:[#allocation2 + $0xc] sm:$0xe]  ;;  %v3320_v43 = vld [vmem:[#allocation2 + $0x10] sm:$0xf]  ;;  %v12421_v63 = vpop.eup %12420  ;;  %12430 = vpow2.f32 %v13278_v54 }
  0xd2   : > { %v3321_v13 = vld [vmem:[#allocation2 + $0x14] sm:$0x1]  ;;  %v12215_v35 = vld [vmem:[#allocation2 + $0x24] sm:$0xff]   ;;  %v10934_v34 = vrot.slane %v3319_v50, 9  ;;  %v3417_v3 = vrot.slane %v3320_v43, 5  ;;  %v3426_v31 = vrot.slane %v3424_v52, 4  ;;  %v12423_v26 = vpop.eup %12422 }
  0xd3   : > { %v3431_v41 = vrot.slane %v13405_v58, 5  ;;  %v2309_v45 = vld [vmem:[#allocation2 + $0xc] sm:$0xe]  ;;  %v965_v6 = vadd.f32 1.0, %v12421_v63  ;;  %v3420_v19 = vrot.slane %v3321_v13, 5  ;;  %v12425_v8 = vpop.eup %12424  ;;  %2744 = vrot.lane.b32.xlu1 %v12213_v49, %s12673_s20  ;;  %v966_v62 = vadd.f32 1.0, %v12423_v26 }
  0xd4   : > { %v2310_v42 = vld [vmem:[#allocation2 + $0x10] sm:$0xf]  ;;  %v2311_v59 = vld [vmem:[#allocation2 + $0x14] sm:$0x1]  ;;  %v12621_v56 = vld [vmem:[%s12783_s30 + $0xc8] sm:$0xff]  ;;  %v3419_v40 = vrot.slane %v3417_v3, 4  ;;  %v13436_v18 = vadd.f32 %v13137_v61, %v807_v7  ;;  %v12427_v58 = vpop.eup %12426  ;;  %v1058_v16 = vmul.f32 %v12425_v8, %v13214_v17  ;;  %v13447_v17 = vsel %vm12813_vm9, %v10934_v34, %v3417_v3 }
  0xd5   : > { %v13431_v33 = vmul.f32 %v12621_v56, %v13120_v23  ;;  %v12214_v32 = vld [vmem:[#allocation2 + $0x48] sm:$0xff]   ;;  %12432 = vrcp.f32 %v965_v6  ;;  %v10871_v9 = vrot.slane %v2309_v45, 9  ;;  %v1059_v60 = vmul.f32 %v12427_v58, %v13219_v37  ;;  %v3324_v49 = vld [vmem:[#allocation2 + $0x20] sm:$0x1]  ;;  %v12217_v21 = vld [vmem:[#allocation2 + $0x30] sm:$0xff]  }
  0xd6   : > { %17271 = vst [vmem:[#allocation14_spill] sm:$0xff] %v13436_v18  ;;  %12434 = vrcp.f32 %v966_v62  ;;  %v3433_v27 = vrot.slane %v3431_v41, 4  ;;  %v2414_v54 = vrot.slane %v2310_v42, 5  ;;  %3760 = vrot.lane.b32.xlu0 %v12214_v32, %s12671_s14  ;;  %v11414_v22 = vpack.c.bf16 %v1058_v16, %v1058_v16  ;;  %v3329_v0 = vld [vmem:[#allocation2 + $0x34] sm:$0xf]  ;;  %v12219_v62 = vld [vmem:[#allocation2 + $0x3c] sm:$0xff]  }
  0xd7   : > { %17270 = vst [vmem:[#allocation13_spill] sm:$0xff] %v13431_v33  ;;  %v3327_v47 = vld [vmem:[#allocation2 + $0x2c] sm:$0x1]  ;;  %v3427_v7 = vrot.slane %v3324_v49, 5  ;;  %2746 = vrot.lane.b32.xlu1 %v12215_v35, %s12673_s20  ;;  %v11415_v52 = vpack.c.bf16 %v1059_v60, %v1059_v60  ;;  %v13452_v37 = vsel %vm12813_vm9, %v3419_v40, %v3420_v19  ;;  %v2417_v13 = vrot.slane %v2311_v59, 5 }
  0xd8   : > { %v3434_v50 = vrot.slane %v3327_v47, 5  ;;  %v2416_v43 = vrot.slane %v2414_v54, 4  ;;  %v1287_v63 = vshrl.u32 %v11414_v22, 16  ;;  %v1290_v45 = vshll.u32 %v11414_v22, 16  ;;  %v3328_v19 = vld [vmem:[#allocation2 + $0x30] sm:$0xe] }
  0xd9   : > { %v13456_v26 = vsel %vm12813_vm9, %v10936_v24, %v3431_v41  ;;  %12436 = vpow2.f32 %v13281_v30  ;;  %v1296_v34 = vshrl.u32 %v11415_v52, 16  ;;  %v1299_v3 = vshll.u32 %v11415_v52, 16  ;;  %v3330_v41 = vld [vmem:[#allocation2 + $0x38] sm:$0x1]  ;;  %v12230_v30 = vld [vmem:[#allocation2] sm:$0xff]   ;;  %v12221_v52 = vld [vmem:[#allocation2 + $0x48] sm:$0xff]  }
  0xda   : > { %v13461_v35 = vsel %vm12813_vm9, %v3426_v31, %v3427_v7  ;;  %v13465_v6 = vsel %vm12813_vm9, %v3433_v27, %v3434_v50  ;;  %v12429_v42 = vpop.eup %12428  ;;  %v13467_v59 = vrot.slane %v1287_v63, 7  ;;  %v3438_v56 = vrot.slane %v3329_v0, 5  ;;  %v13484_v32 = vld [vmem:[#allocation2 + $0x1c] sm:$0xf]  ;;  %v1551_v16 = vld [vmem:[#allocation2 + $0x60] sm:$0xf] }
  0xdb   : > { %12438 = vpow2.f32 %v13285_v39  ;;  %2748 = vrot.lane.b32.xlu1 %v12217_v21, %s12673_s20  ;;  %v1060_v31 = vmul.f32 %v12429_v42, %v13222_v11  ;;  %v13474_v8 = vrot.slane %v1296_v34, 7  ;;  %v13478_v40 = vsel %vm12813_vm9, %v10871_v9, %v2414_v54  ;;  %1742 = vst.msk [vmem:[#allocation3] sm:$0xff] %vm598_vm6, %v12230_v30  ;;  %v13492_v9 = vpop.eup %12430  ;;  %v13495_v21 = vld [vmem:[#allocation2 + $0x18] sm:$0xe]  ;;  %v13505_v63 = vld [vmem:[#allocation2 + $0x40] sm:$0xf] }
  0xdc   : > { %v13482_v58 = vsel %vm12813_vm9, %v2416_v43, %v2417_v13  ;;  %v1292_v39 = vor.u32 %v1290_v45, %v13467_v59  ;;  %v10937_v49 = vrot.slane %v3328_v19, 9  ;;  %v3440_v54 = vrot.slane %v3438_v56, 4  ;;  %v2314_v19 = vld [vmem:[#allocation2 + $0x20] sm:$0x1]  ;;  %v3331_v42 = vld [vmem:[#allocation2 + $0x3c] sm:$0xe] }
  0xdd   : > { %v11416_v47 = vpack.c.bf16 %v1060_v31, %v1060_v31  ;;  %v1301_v27 = vor.u32 %v1299_v3, %v13474_v8  ;;  %v3441_v22 = vrot.slane %v3330_v41, 5  ;;  %v1294_v0 = vrot.slane %v13467_v59, 4  ;;  %v1558_v11 = vld [vmem:[#allocation2 + $0x6c] sm:$0xf]  ;;  %v2318_v43 = vld [vmem:[#allocation2 + $0x30] sm:$0xe] }
  0xde   : > { %v1293_v50 = vsel %vm13311_vm1, %v1285_v55, %v1292_v39  ;;  %v2421_v13 = vrot.slane %v13484_v32, 5  ;;  %v1302_v59 = vrot.slane %v13474_v8, 4  ;;  %v13516_v30 = vsel %vm12813_vm9, %v10937_v49, %v3438_v56  ;;  %v1548_v8 = vld [vmem:[#allocation2 + $0x5c] sm:$0x1]  ;;  %v2317_v24 = vld [vmem:[#allocation2 + $0x2c] sm:$0x1] }
  0xdf   : > { %v12433_v7 = vpop.eup %12432  ;;  %1547 = vst.msk [vmem:[#allocation2 + $0x58] sm:$0xf] %vm1497_vm13, %v1293_v50  ;;  %v1304_v34 = vshrl.u32 %v11416_v47, 16  ;;  %v1307_v3 = vshll.u32 %v11416_v47, 16  ;;  %v1552_v53 = vsel %vm13303_vm15, %v1301_v27, %v1551_v16  ;;  %2750 = vrot.lane.b32.xlu1 %v12219_v62, %s12673_s20  ;;  %v10872_v31 = vrot.slane %v13495_v21, 9 }
  0xe0   : > { %v12435_v45 = vpop.eup %12434  ;;  %v1061_v55 = vmul.f32 %v12433_v7, %v13244_v44  ;;  %1553 = vst [vmem:[#allocation2 + $0x60] sm:$0xf] %v1552_v53  ;;  %v13521_v62 = vsel %vm12813_vm9, %v3440_v54, %v3441_v22  ;;  %v3333_v44 = vld [vmem:[#allocation2 + $0x44] sm:$0x1]  ;;  %v3445_v16 = vrot.slane %v13505_v63, 5  ;;  %v2423_v7 = vrot.slane %v2421_v13, 4 }
  0xe1   : > { %v1062_v41 = vmul.f32 %v12435_v45, %v13249_v5  ;;  %v1306_v32 = vrot.slane %v1304_v34, 7  ;;  %v13524_v47 = vld [vmem:[#allocation2 + $0x24] sm:$0xe]  ;;  %v2424_v56 = vrot.slane %v2314_v19, 5  ;;  %v10938_v49 = vrot.slane %v3331_v42, 9 }
  0xe2   : > { %v11417_v39 = vpack.c.bf16 %v1061_v55, %v1061_v55  ;;  %v13528_v50 = vld [vmem:[#allocation2 + $0x28] sm:$0xf]  ;;  %v3448_v60 = vrot.slane %v3333_v44, 5  ;;  %v13534_v19 = vld [vmem:[#allocation2 + $0x4c] sm:$0xf]  ;;  %v1549_v57 = vsel %vm13364_vm8, %v1294_v0, %v1548_v8  ;;  %v13548_v23 = vsel %vm12813_vm9, %v10872_v31, %v2421_v13 }
  0xe3   : > { %v13526_v27 = vpop.eup %12436  ;;  %v11418_v5 = vpack.c.bf16 %v1062_v41, %v1062_v41  ;;  %v1309_v21 = vor.u32 %v1307_v3, %v1306_v32  ;;  %v1311_v45 = vrot.slane %v1306_v32, 4  ;;  %2752 = vrot.lane.b32.xlu1 %v12221_v52, %s12673_s20  ;;  %v1555_v54 = vld [vmem:[#allocation2 + $0x68] sm:$0x1]  ;;  %v10873_v41 = vrot.slane %v13524_v47, 9  ;;  %v3334_v52 = vld [vmem:[#allocation2 + $0x48] sm:$0xe] }
  0xe4   : > { %v1313_v34 = vshrl.u32 %v11417_v39, 16  ;;  %v1316_v53 = vshll.u32 %v11417_v39, 16  ;;  %v3447_v32 = vrot.slane %v3445_v16, 4  ;;  %v2428_v39 = vrot.slane %v13528_v50, 5  ;;  %v2319_v15 = vld [vmem:[#allocation2 + $0x34] sm:$0xf] }
  0xe5   : > { %v13531_v22 = vpop.eup %12438  ;;  %v1321_v63 = vshrl.u32 %v11418_v5, 16  ;;  %v1324_v55 = vshll.u32 %v11418_v5, 16  ;;  %v1310_v3 = vsel %vm13311_vm1, %v1302_v59, %v1309_v21  ;;  %v3336_v47 = vld [vmem:[#allocation2 + $0x50] sm:$0x1]  ;;  %v1556_v59 = vsel %vm13364_vm8, %v1311_v45, %v1555_v54  ;;  %1550 = vst [vmem:[#allocation2 + $0x5c] sm:$0x1] %v1549_v57 }
  0xe6   : > { %v1315_v42 = vrot.slane %v1313_v34, 7  ;;  %v12216_v18 = vld [vmem:[#allocation2 + $0x54] sm:$0xff]   ;;  %1554 = vst.msk [vmem:[#allocation2 + $0x64] sm:$0xf] %vm1497_vm13, %v1310_v3  ;;  %1557 = vst [vmem:[#allocation2 + $0x68] sm:$0x1] %v1556_v59  ;;  %v13557_v8 = vsel %vm12813_vm9, %v10938_v49, %v3445_v16  ;;  %v13561_v45 = vsel %vm12813_vm9, %v3447_v32, %v3448_v60  ;;  %12440 = vpow2.f32 %v13292_v14 }
  0xe7   : > { %v1323_v5 = vrot.slane %v1321_v63, 7  ;;  %v12222_v50 = vld [vmem:[#allocation2 + $0x54] sm:$0xff]   ;;  %v13552_v63 = vsel %vm12813_vm9, %v2423_v7, %v2424_v56  ;;  %3762 = vrot.lane.b32.xlu0 %v12216_v18, %s12671_s14  ;;  %v2430_v57 = vrot.slane %v2428_v39, 4  ;;  %v2431_v18 = vrot.slane %v2317_v24, 5  ;;  %v2321_v54 = vld [vmem:[#allocation2 + $0x3c] sm:$0xe] }
  0xe8   : > { %v1318_v21 = vor.u32 %v1316_v53, %v1315_v42  ;;  %v1319_v34 = vrot.slane %v1315_v42, 4  ;;  %v2320_v13 = vld [vmem:[#allocation2 + $0x38] sm:$0x1]  ;;  %v3337_v31 = vld [vmem:[#allocation2 + $0x54] sm:$0xe]  ;;  %2754 = vrot.lane.b32.xlu1 %v12222_v50, %s12673_s20  ;;  %v3452_v56 = vrot.slane %v13534_v19, 5  ;;  %v13574_v19 = vsel %vm12813_vm9, %v10873_v41, %v2428_v39 }
  0xe9   : > { %v1326_v3 = vor.u32 %v1324_v55, %v1323_v5  ;;  %v1328_v0 = vrot.slane %v1323_v5, 4  ;;  %v1562_v53 = vld [vmem:[#allocation2 + $0x74] sm:$0x1]  ;;  %v10939_v49 = vrot.slane %v3334_v52, 9  ;;  %v10874_v60 = vrot.slane %v2318_v43, 9 }
  0xea   : > { %v1559_v7 = vsel %vm13303_vm15, %v1318_v21, %v1558_v11  ;;  %v2435_v55 = vrot.slane %v2319_v15, 5  ;;  %v3338_v42 = vld [vmem:[#allocation2 + $0x58] sm:$0xf]  ;;  %v3454_v32 = vrot.slane %v3452_v56, 4  ;;  %v3455_v5 = vrot.slane %v3336_v47, 5 }
  0xeb   : > { %v1327_v16 = vsel %vm13311_vm1, %v1319_v34, %v1326_v3  ;;  %1560 = vst [vmem:[#allocation2 + $0x6c] sm:$0xf] %v1559_v7  ;;  %v2438_v59 = vrot.slane %v2320_v13, 5  ;;  %v2322_v24 = vld [vmem:[#allocation2 + $0x40] sm:$0xf]  ;;  %v10940_v34 = vrot.slane %v3337_v31, 9  ;;  %v13581_v3 = vsel %vm12813_vm9, %v2430_v57, %v2431_v18 }
  0xec   : > { %1561 = vst.msk [vmem:[#allocation2 + $0x70] sm:$0xf] %vm1497_vm13, %v1327_v16  ;;  %v2437_v21 = vrot.slane %v2435_v55, 4  ;;  %v2323_v50 = vld [vmem:[#allocation2 + $0x44] sm:$0x1]  ;;  %v3459_v47 = vrot.slane %v3338_v42, 5  ;;  %v1563_v41 = vsel %vm13364_vm8, %v1328_v0, %v1562_v53  ;;  %v13587_v31 = vsel %vm12813_vm9, %v10939_v49, %v3452_v56 }
  0xed   : > { %v3340_v52 = vld [vmem:[#allocation2 + $0x60] sm:$0xe]  ;;  %v2324_v13 = vld [vmem:[#allocation2 + $0x48] sm:$0xe]  ;;  %v2325_v7 = vld [vmem:[#allocation2 + $0x4c] sm:$0xf]  ;;  %v13591_v14 = vsel %vm12813_vm9, %v10874_v60, %v2435_v55  ;;  %v13596_v18 = vsel %vm12813_vm9, %v3454_v32, %v3455_v5  ;;  %v10889_v5 = vcombine.low %v13574_v19, %v13581_v3 }
  0xee   : > { %v12218_v15 = vld [vmem:[#allocation2 + $0x60] sm:$0xff]   ;;  %v2326_v16 = vld [vmem:[#allocation2 + $0x50] sm:$0x1]  ;;  %v3339_v43 = vld [vmem:[#allocation2 + $0x5c] sm:$0x1]  ;;  %v10875_v44 = vrot.slane %v2321_v54, 9  ;;  %v13600_v0 = vsel %vm12813_vm9, %v2437_v21, %v2438_v59  ;;  %v13605_v54 = vsel %vm12813_vm9, %v10940_v34, %v3459_v47 }
  0xef   : > { %v12223_v39 = vld [vmem:[#allocation2 + $0x60] sm:$0xff]   ;;  %v2442_v57 = vrot.slane %v2322_v24, 5  ;;  %1564 = vst [vmem:[#allocation2 + $0x74] sm:$0x1] %v1563_v41  ;;  %3764 = vrot.lane.b32.xlu0 %v12218_v15, %s12671_s14  ;;  %v3461_v53 = vrot.slane %v3459_v47, 4  ;;  %v3462_v56 = vrot.slane %v3339_v43, 5 }
  0xf0   : > { %v3341_v49 = vld [vmem:[#allocation2 + $0x64] sm:$0xf]  ;;  %v3342_v42 = vld [vmem:[#allocation2 + $0x68] sm:$0x1]  ;;  %2756 = vrot.lane.b32.xlu1 %v12223_v39, %s12673_s20  ;;  %v2445_v55 = vrot.slane %v2323_v50, 5  ;;  %v10941_v24 = vrot.slane %v3340_v52, 9  ;;  %v13636_v33 = vpop.eup %12440 }
  0xf1   : > { %v2444_v60 = vrot.slane %v2442_v57, 4  ;;  %v2327_v15 = vld [vmem:[#allocation2 + $0x54] sm:$0xe]  ;;  %v3816_v32 = vld [vmem:[#allocation2 + $0x18] sm:$0xf]  ;;  %v13611_v59 = vsel %vm12813_vm9, %v3461_v53, %v3462_v56  ;;  %v3466_v21 = vrot.slane %v3341_v49, 5  ;;  %v13621_v3 = vsel %vm12813_vm9, %v10875_v44, %v2442_v57 }
  0xf2   : > { %v3469_v43 = vrot.slane %v3342_v42, 5  ;;  %v2328_v41 = vld [vmem:[#allocation2 + $0x58] sm:$0xf]  ;;  %v10876_v47 = vrot.slane %v2324_v13, 9  ;;  %v2449_v11 = vrot.slane %v2325_v7, 5  ;;  %v2452_v50 = vrot.slane %v2326_v16, 5 }
  0xf3   : > { %v12220_v39 = vld [vmem:[#allocation2 + $0x6c] sm:$0xff]   ;;  %v3468_v53 = vrot.slane %v3466_v21, 4  ;;  %v3817_v42 = vld [vmem:[#allocation2 + $0x1c] sm:$0xf]  ;;  %v17272_v13 = vcombine.low %v13478_v40, %v13482_v58  ;;  %v13630_v7 = vsel %vm12813_vm9, %v2444_v60, %v2445_v55  ;;  %v13634_v16 = vsel %vm12813_vm9, %v10941_v24, %v3466_v21  ;;  %v3818_v34 = vld [vmem:[#allocation2 + $0x20] sm:$0x1] }
  0xf4   : > { %v3343_v56 = vld [vmem:[#allocation2 + $0x6c] sm:$0xe]  ;;  %v3344_v49 = vld [vmem:[#allocation2 + $0x70] sm:$0xf]  ;;  %3766 = vrot.lane.b32.xlu0 %v12220_v39, %s12671_s14  ;;  %v2451_v44 = vrot.slane %v2449_v11, 4  ;;  %v10877_v39 = vrot.slane %v2327_v15, 9  ;;  %v13644_v58 = vsel %vm12813_vm9, %v10876_v47, %v2449_v11  ;;  %v10891_v15 = vcombine.low %v13621_v3, %v13630_v7 }
  0xf5   : > { %2567 = vrot.lane.b32.xlu1 %v17272_v13, %s12671_s14  ;;  %v3473_v57 = vrot.slane %v3344_v49, 5  ;;  %v2329_v19 = vld [vmem:[#allocation2 + $0x5c] sm:$0x1]  ;;  %v10942_v29 = vrot.slane %v3343_v56, 9  ;;  %v2456_v4 = vrot.slane %v2328_v41, 5  ;;  %v3865_v61 = vshrl.u32 %v3816_v32, 16 }
  0xf6   : > { %v3345_v52 = vld [vmem:[#allocation2 + $0x74] sm:$0x1]  ;;  %v13640_v40 = vsel %vm12813_vm9, %v3468_v53, %v3469_v43  ;;  %v13648_v60 = vsel %vm12813_vm9, %v2451_v44, %v2452_v50  ;;  %v2330_v24 = vld [vmem:[#allocation2 + $0x60] sm:$0xe]  ;;  %v2459_v56 = vrot.slane %v2329_v19, 5  ;;  %v17273_v43 = vcombine.low %v13447_v17, %v13452_v37 }
  0xf7   : > { %v3475_v55 = vrot.slane %v3473_v57, 4  ;;  %v3476_v21 = vrot.slane %v3345_v52, 5  ;;  %v2458_v41 = vrot.slane %v2456_v4, 4  ;;  %v17274_v11 = vcombine.low %v13548_v23, %v13552_v63  ;;  %v2331_v13 = vld [vmem:[#allocation2 + $0x64] sm:$0xf] }
  0xf8   : > { %3575 = vrot.lane.b32.xlu0 %v17273_v43, %s12672_s15  ;;  %v3867_v47 = vrot.slane %v3865_v61, 4  ;;  %v3868_v50 = vshll.u32 %v3816_v32, 16  ;;  %v3874_v53 = vshll.u32 %v3817_v42, 16  ;;  %v3878_v49 = vshrl.u32 %v3817_v42, 16  ;;  %v1761_v44 = vld [vmem:[#allocation2 + $0xc] sm:$0xf] }
  0xf9   : > { %2569 = vrot.lane.b32.xlu1 %v17274_v11, %s12671_s14  ;;  %v10892_v19 = vcombine.low %v13644_v58, %v13648_v60  ;;  %v13666_v17 = vsel %vm12813_vm9, %v10942_v29, %v3473_v57  ;;  %v3884_v37 = vshll.u32 %v3818_v34, 16  ;;  %v13670_v23 = vsel %vm12813_vm9, %v3475_v55, %v3476_v21  ;;  %v2332_v42 = vld [vmem:[#allocation2 + $0x68] sm:$0x1]  ;;  %v1762_v11 = vld [vmem:[#allocation2 + $0x10] sm:$0xf] }
  0xfa   : > { %v13674_v61 = vsel %vm12813_vm9, %v10877_v39, %v2456_v4  ;;  %v3870_v63 = vrot.slane %v3868_v50, 5  ;;  %v13676_v32 = vrot.slane %v3874_v53, 5  ;;  %v13680_v43 = vsel %vm12813_vm9, %v2458_v41, %v2459_v56  ;;  %v1763_v53 = vld [vmem:[#allocation2 + $0x14] sm:$0x1] }
  0xfb   : > { %v3880_v29 = vrot.slane %v3878_v49, 4  ;;  %v10878_v57 = vrot.slane %v2330_v24, 9  ;;  %v2463_v34 = vrot.slane %v2331_v13, 5  ;;  %v17275_v55 = vcombine.low %v13441_v20, %v13461_v35  ;;  %v3819_v35 = vld [vmem:[#allocation2 + $0x24] sm:$0xf] }
  0xfc   : > { %v3871_v4 = vor.u32 %v3870_v63, %v3867_v47  ;;  %v967_v39 = vadd.f32 1.0, %v13492_v9  ;;  %v968_v21 = vadd.f32 1.0, %v13526_v27  ;;  %v1834_v50 = vshrl.u32 %v1761_v44, 16  ;;  %v3820_v9 = vld [vmem:[#allocation2 + $0x28] sm:$0xf] }
  0xfd   : > { %3577 = vrot.lane.b32.xlu0 %v17275_v55, %s12672_s15  ;;  %2571 = vrot.lane.b32.xlu1 %v10889_v5, %s12671_s14  ;;  %v3881_v41 = vor.u32 %v3880_v29, %v13676_v32  ;;  %v13690_v56 = vrot.slane %v3884_v37, 5  ;;  %v2466_v24 = vrot.slane %v2332_v42, 5  ;;  %v1837_v49 = vshll.u32 %v1761_v44, 16 }
  0xfe   : > { %v2465_v13 = vrot.slane %v2463_v34, 4  ;;  %12442 = vrcp.f32 %v967_v39  ;;  %v1836_v52 = vrot.slane %v1834_v50, 4  ;;  %v1843_v20 = vshll.u32 %v1762_v11, 16 }
  0xff   : > { %v3872_v55 = vrot.slane %v3871_v4, 4  ;;  %v3882_v5 = vrot.slane %v3881_v41, 4  ;;  %12444 = vrcp.f32 %v968_v21  ;;  %v1839_v47 = vrot.slane %v1837_v49, 5  ;;  %v1764_v41 = vld [vmem:[#allocation2 + $0x18] sm:$0xf] }
 0x100   : > { %v17276_v27 = vcombine.low %v13456_v26, %v13465_v6  ;;  %v17277_v37 = vcombine.low %v13591_v14, %v13600_v0  ;;  %v10958_v44 = vcombine.low %v13666_v17, %v13670_v23  ;;  %v10893_v63 = vcombine.low %v13674_v61, %v13680_v43  ;;  %v3827_v23 = vld [vmem:[#allocation2 + $0x44] sm:$0x1]  ;;  %v6476_v49 = vld [vmem:[#allocation2 + $0x6c] sm:$0xf] }
 0x101   : > { %v1845_v42 = vrot.slane %v1843_v20, 5  ;;  %v1847_v29 = vshrl.u32 %v1762_v11, 16  ;;  %v13706_v4 = vsel %vm12813_vm9, %v10878_v57, %v2463_v34  ;;  %v1840_v39 = vor.u32 %v1839_v47, %v1836_v52  ;;  %v3821_v57 = vld [vmem:[#allocation2 + $0x2c] sm:$0x1]  ;;  %v1765_v11 = vld [vmem:[#allocation2 + $0x1c] sm:$0xf] }
 0x102   : > { %3579 = vrot.lane.b32.xlu0 %v17276_v27, %s12672_s15  ;;  %2573 = vrot.lane.b32.xlu1 %v17277_v37, %s12671_s14  ;;  %v1853_v26 = vshll.u32 %v1763_v53, 16  ;;  %v3889_v6 = vshrl.u32 %v3819_v35, 16  ;;  %v13710_v21 = vsel %vm12813_vm9, %v2465_v13, %v2466_v24  ;;  %v3892_v0 = vshll.u32 %v3819_v35, 16 }
 0x103   : > { %v1849_v14 = vrot.slane %v1847_v29, 4  ;;  %v3898_v50 = vshll.u32 %v3820_v9, 16  ;;  %v3877_v61 = vsel %vm12840_vm12, %v3872_v55, %v13676_v32  ;;  %v3887_v43 = vsel %vm12840_vm12, %v3882_v5, %v13690_v56  ;;  %v1766_v55 = vld [vmem:[#allocation2 + $0x20] sm:$0x1] }
 0x104   : > { %v3891_v52 = vrot.slane %v3889_v6, 4  ;;  %v3902_v34 = vshrl.u32 %v3820_v9, 16  ;;  %v17279_v24 = vcombine.low %v13516_v30, %v13521_v62  ;;  %v1841_v53 = vrot.slane %v1840_v39, 4 }
 0x105   : > { %v1850_v32 = vor.u32 %v1849_v14, %v1845_v42  ;;  %v1855_v13 = vrot.slane %v1853_v26, 5  ;;  %v3894_v20 = vrot.slane %v3892_v0, 5  ;;  %v13726_v35 = vrot.slane %v3898_v50, 5  ;;  %v3822_v14 = vld [vmem:[#allocation2 + $0x30] sm:$0xf] }
 0x106   : > { %3581 = vrot.lane.b32.xlu0 %v17279_v24, %s12672_s15  ;;  %2575 = vrot.lane.b32.xlu1 %v10891_v15, %s12671_s14  ;;  %v3904_v56 = vrot.slane %v3902_v34, 4  ;;  %v1858_v5 = vshrl.u32 %v1764_v41, 16  ;;  %v1861_v47 = vshll.u32 %v1764_v41, 16  ;;  %v3908_v37 = vshll.u32 %v3821_v57, 16 }
 0x107   : > { %v1851_v9 = vrot.slane %v1850_v32, 4  ;;  %v3895_v27 = vor.u32 %v3894_v20, %v3891_v52  ;;  %v1867_v30 = vshll.u32 %v1765_v11, 16  ;;  %v10894_v62 = vcombine.low %v13706_v4, %v13710_v21 }
 0x108   : > { %v1860_v29 = vrot.slane %v1858_v5, 4  ;;  %v1863_v3 = vrot.slane %v1861_v47, 5  ;;  %v1871_v7 = vshrl.u32 %v1765_v11, 16  ;;  %v12443_v15 = vpop.eup %12442  ;;  %v17280_v39 = vcombine.low %v13557_v8, %v13561_v45  ;;  %v1565_v47 = vld [vmem:[#allocation2 + $0x78] sm:$0xf] }
 0x109   : > { %v1846_v26 = vsel %vm12840_vm12, %v1841_v53, %v1845_v42  ;;  %v1856_v4 = vsel %vm12840_vm12, %v1851_v9, %v1855_v13  ;;  %v1869_v6 = vrot.slane %v1867_v30, 5  ;;  %v1877_v21 = vshll.u32 %v1766_v55, 16  ;;  %v12445_v0 = vpop.eup %12444 }
 0x10a   : > { %3583 = vrot.lane.b32.xlu0 %v17280_v39, %s12672_s15  ;;  %2577 = vrot.lane.b32.xlu1 %v10892_v19, %s12671_s14  ;;  %v13742_v50 = vcombine.low %v3877_v61, %v3887_v43  ;;  %v1063_v8 = vmul.f32 %v12443_v15, %v13254_v46  ;;  %v3905_v45 = vor.u32 %v3904_v56, %v13726_v35  ;;  %v13747_v60 = vrot.slane %v3895_v27, 4 }
 0x10b   : > { %v1864_v41 = vor.u32 %v1863_v3, %v1860_v29  ;;  %v1064_v58 = vmul.f32 %v12445_v0, %v13257_v51  ;;  %v13749_v19 = vrot.slane %v3908_v37, 5  ;;  %v1873_v42 = vrot.slane %v1871_v7, 4  ;;  %v3823_v51 = vld [vmem:[#allocation2 + $0x34] sm:$0xf] }
 0x10c   : > { %v11419_v57 = vpack.c.bf16 %v1063_v8, %v1063_v8  ;;  %v10855_v52 = vcombine.low %v1846_v26, %v1856_v4  ;;  %v1879_v34 = vrot.slane %v1877_v21, 5  ;;  %v3913_v11 = vshrl.u32 %v3822_v14, 16  ;;  %v2333_v26 = vld [vmem:[#allocation2 + $0x6c] sm:$0xe]  ;;  %v2334_v4 = vld [vmem:[#allocation2 + $0x70] sm:$0xf] }
 0x10d   : > { %v17281_v61 = vcombine.low %v13587_v31, %v13596_v18  ;;  %v11420_v46 = vpack.c.bf16 %v1064_v58, %v1064_v58  ;;  %v1865_v43 = vrot.slane %v1864_v41, 4  ;;  %v1874_v24 = vor.u32 %v1873_v42, %v1869_v6  ;;  %v3824_v18 = vld [vmem:[#allocation2 + $0x38] sm:$0x1]  ;;  %v2335_v41 = vld [vmem:[#allocation2 + $0x74] sm:$0x1] }
 0x10e   : > { %2579 = vrot.lane.b32.xlu1 %v10893_v63, %s12671_s14  ;;  %v3916_v53 = vshll.u32 %v3822_v14, 16  ;;  %v1330_v32 = vshrl.u32 %v11419_v57, 16  ;;  %v1333_v13 = vshll.u32 %v11419_v57, 16  ;;  %v13756_v20 = vrot.slane %v3905_v45, 4 }
 0x10f   : > { %3585 = vrot.lane.b32.xlu0 %v17281_v61, %s12672_s15  ;;  %v3915_v56 = vrot.slane %v3913_v11, 4  ;;  %v1338_v55 = vshrl.u32 %v11420_v46, 16  ;;  %v1341_v5 = vshll.u32 %v11420_v46, 16  ;;  %v1875_v9 = vrot.slane %v1874_v24, 4  ;;  %v1767_v11 = vld [vmem:[#allocation2 + $0x24] sm:$0xf] }
 0x110   : > { %v3918_v27 = vrot.slane %v3916_v53, 5  ;;  %v1332_v37 = vrot.slane %v1330_v32, 7  ;;  %v3901_v31 = vsel %vm12840_vm12, %v13747_v60, %v13726_v35  ;;  %v3922_v63 = vshll.u32 %v3823_v51, 16  ;;  %v1768_v61 = vld [vmem:[#allocation2 + $0x28] sm:$0xf] }
 0x111   : > { %v3926_v30 = vshrl.u32 %v3823_v51, 16  ;;  %v17282_v29 = vcombine.low %v13605_v54, %v13611_v59  ;;  %v1340_v3 = vrot.slane %v1338_v55, 7  ;;  %v1870_v7 = vsel %vm12840_vm12, %v1865_v43, %v1869_v6  ;;  %v1569_v59 = vld [vmem:[#allocation2 + $0x80] sm:$0x1]  ;;  %v12225_v43 = vld [vmem:[#allocation2 + $0x6c] sm:$0xff]  }
 0x112   : > { %2581 = vrot.lane.b32.xlu1 %v10894_v62, %s12671_s14  ;;  %v1880_v15 = vsel %vm12840_vm12, %v1875_v9, %v1879_v34  ;;  %v3919_v39 = vor.u32 %v3918_v27, %v3915_v56  ;;  %v1335_v21 = vor.u32 %v1333_v13, %v1332_v37  ;;  %v1336_v14 = vrot.slane %v1332_v37, 4 }
 0x113   : > { %3587 = vrot.lane.b32.xlu0 %v17282_v29, %s12672_s15  ;;  %v3911_v54 = vsel %vm12840_vm12, %v13756_v20, %v13749_v19  ;;  %v13775_v0 = vrot.slane %v3922_v63, 5  ;;  %v1343_v62 = vor.u32 %v1341_v5, %v1340_v3  ;;  %v1345_v8 = vrot.slane %v1340_v3, 4  ;;  %v1769_v20 = vld [vmem:[#allocation2 + $0x2c] sm:$0x1]  ;;  %v3825_v5 = vld [vmem:[#allocation2 + $0x3c] sm:$0xf] }
 0x114   : > { %v3928_v45 = vrot.slane %v3926_v30, 4  ;;  %v3932_v6 = vshll.u32 %v3824_v18, 16  ;;  %v1566_v58 = vsel %vm13303_vm15, %v1335_v21, %v1565_v47  ;;  %v10856_v42 = vcombine.low %v1870_v7, %v1880_v15 }
 0x115   : > { %v10879_v57 = vrot.slane %v2333_v26, 9  ;;  %v2470_v34 = vrot.slane %v2334_v4, 5  ;;  %v17283_v19 = vcombine.low %v13634_v16, %v13640_v40  ;;  %v1344_v46 = vsel %vm13311_vm1, %v1336_v14, %v1343_v62  ;;  %1567 = vst [vmem:[#allocation2 + $0x78] sm:$0xf] %v1566_v58 }
 0x116   : > { %2243 = vrot.lane.b32.xlu1 %v10855_v52, %s12672_s15  ;;  %v1570_v24 = vsel %vm13364_vm8, %v1345_v8, %v1569_v59  ;;  %v3920_v51 = vrot.slane %v3919_v39, 4  ;;  %v969_v53 = vadd.f32 1.0, %v13531_v22  ;;  %1568 = vst.msk [vmem:[#allocation2 + $0x7c] sm:$0xf] %vm1497_vm13, %v1344_v46  ;;  %v3929_v32 = vor.u32 %v3928_v45, %v13775_v0  ;;  %v3826_v22 = vld [vmem:[#allocation2 + $0x40] sm:$0xf] }
 0x117   : > { %3589 = vrot.lane.b32.xlu0 %v17283_v19, %s12672_s15  ;;  %1571 = vst [vmem:[#allocation2 + $0x80] sm:$0x1] %v1570_v24  ;;  %v2472_v16 = vrot.slane %v2470_v34, 4  ;;  %v2473_v40 = vrot.slane %v2335_v41, 5  ;;  %v970_v13 = vadd.f32 1.0, %v13636_v33  ;;  %v1882_v56 = vshrl.u32 %v1767_v11, 16 }
 0x118   : > { %12446 = vrcp.f32 %v969_v53  ;;  %v1885_v52 = vshll.u32 %v1767_v11, 16  ;;  %v1891_v55 = vshll.u32 %v1768_v61, 16  ;;  %v3930_v47 = vrot.slane %v3929_v32, 4  ;;  %v1770_v41 = vld [vmem:[#allocation2 + $0x30] sm:$0xf] }
 0x119   : > { %v3934_v9 = vrot.slane %v3932_v6, 5  ;;  %12448 = vrcp.f32 %v970_v13  ;;  %v1895_v27 = vshrl.u32 %v1768_v61, 16  ;;  %v2471_v33 = vsel %vm12813_vm9, %v10879_v57, %v2470_v34  ;;  %v1771_v32 = vld [vmem:[#allocation2 + $0x34] sm:$0xf] }
 0x11a   : > { %2758 = vrot.lane.b32.xlu1 %v12225_v43, %s12673_s20  ;;  %v1884_v37 = vrot.slane %v1882_v56, 4  ;;  %v1887_v18 = vrot.slane %v1885_v52, 5  ;;  %v1893_v63 = vrot.slane %v1891_v55, 5  ;;  %v2474_v30 = vsel %vm12813_vm9, %v2472_v16, %v2473_v40 }
 0x11b   : > { %3591 = vrot.lane.b32.xlu0 %v10958_v44, %s12672_s15  ;;  %v1897_v29 = vrot.slane %v1895_v27, 4  ;;  %v1901_v3 = vshll.u32 %v1769_v20, 16  ;;  %v3937_v7 = vshrl.u32 %v3825_v5, 16  ;;  %v3925_v15 = vsel %vm12840_vm12, %v3920_v51, %v13775_v0 }
 0x11c   : > { %v1888_v17 = vor.u32 %v1887_v18, %v1884_v37  ;;  %v3940_v44 = vshll.u32 %v3825_v5, 16  ;;  %v3946_v39 = vshll.u32 %v3826_v22, 16  ;;  %v3346_v26 = vld [vmem:[#allocation2 + $0x78] sm:$0xe]  ;;  %v3935_v4 = vsel %vm12840_vm12, %v3930_v47, %v3934_v9 }
 0x11d   : > { %v1898_v21 = vor.u32 %v1897_v29, %v1893_v63  ;;  %v1903_v14 = vrot.slane %v1901_v3, 5  ;;  %v3939_v59 = vrot.slane %v3937_v7, 4  ;;  %v12224_v62 = vld [vmem:[#allocation2 + $0x78] sm:$0xff]   ;;  %v10983_v0 = vcombine.low %v3901_v31, %v3911_v54 }
 0x11e   : > { %v3347_v8 = vld [vmem:[#allocation2 + $0x7c] sm:$0xf]  ;;  %v10943_v45 = vrot.slane %v3346_v26, 9  ;;  %2245 = vrot.lane.b32.xlu1 %v10856_v42, %s12672_s15  ;;  %v10895_v6 = vcombine.low %v2471_v33, %v2474_v30  ;;  %12450 = vpow2.f32 %v13297_v36  ;;  %v3348_v58 = vld [vmem:[#allocation2 + $0x80] sm:$0x1]  ;;  %v1889_v34 = vrot.slane %v1888_v17, 4 }
 0x11f   : > { %4296 = vrot.lane.b32.xlu0 %v13742_v50, %s12673_s20  ;;  %v3480_v57 = vrot.slane %v3347_v8, 5  ;;  %v1899_v11 = vrot.slane %v1898_v21, 4  ;;  %v3942_v50 = vrot.slane %v3940_v44, 5  ;;  %v3483_v61 = vrot.slane %v3348_v58, 5  ;;  %v12227_v18 = vld [vmem:[#allocation2 + $0x78] sm:$0xff]  }
 0x120   : > { %v13815_v19 = vcombine.low %v3925_v15, %v3935_v4  ;;  %v13817_v46 = vrot.slane %v3946_v39, 5  ;;  %v3950_v35 = vshrl.u32 %v3826_v22, 16  ;;  %v1894_v31 = vsel %vm12840_vm12, %v1889_v34, %v1893_v63  ;;  %v1572_v44 = vld [vmem:[#allocation2 + $0x84] sm:$0xf] }
 0x121   : > { %v3482_v60 = vrot.slane %v3480_v57, 4  ;;  %v1904_v54 = vsel %vm12840_vm12, %v1899_v11, %v1903_v14  ;;  %v3956_v42 = vshll.u32 %v3827_v23, 16  ;;  %v3481_v43 = vsel %vm12813_vm9, %v10943_v45, %v3480_v57  ;;  %v1576_v14 = vld [vmem:[#allocation2 + $0x8c] sm:$0x1] }
 0x122   : > { %v12447_v36 = vpop.eup %12446  ;;  %2583 = vrot.lane.b32.xlu1 %v10895_v6, %s12671_s14  ;;  %v10857_v24 = vcombine.low %v1894_v31, %v1904_v54  ;;  %v3943_v51 = vor.u32 %v3942_v50, %v3939_v59  ;;  %v3952_v53 = vrot.slane %v3950_v35, 4  ;;  %v1906_v20 = vshrl.u32 %v1770_v41, 16  ;;  %v3830_v6 = vld [vmem:[#allocation2 + $0x50] sm:$0x1]  ;;  %v2337_v35 = vld [vmem:[#allocation2 + $0x7c] sm:$0xf] }
 0x123   : > { %3768 = vrot.lane.b32.xlu0 %v12224_v62, %s12671_s14  ;;  %v12449_v16 = vpop.eup %12448  ;;  %v3484_v40 = vsel %vm12813_vm9, %v3482_v60, %v3483_v61  ;;  %v1065_v13 = vmul.f32 %v12447_v36, %v13260_v2  ;;  %v1909_v56 = vshll.u32 %v1770_v41, 16  ;;  %12452 = vpow2.f32 %v13394_v10  ;;  %v3828_v10 = vld [vmem:[#allocation2 + $0x48] sm:$0xf]  ;;  %v2336_v61 = vld [vmem:[#allocation2 + $0x78] sm:$0xe] }
 0x124   : > { %v1066_v52 = vmul.f32 %v12449_v16, %v13268_v25  ;;  %v13831_v55 = vrot.slane %v3943_v51, 4  ;;  %v3953_v5 = vor.u32 %v3952_v53, %v13817_v46  ;;  %v1908_v9 = vrot.slane %v1906_v20, 4  ;;  %v1772_v25 = vld [vmem:[#allocation2 + $0x38] sm:$0x1]  ;;  %v2338_v60 = vld [vmem:[#allocation2 + $0x80] sm:$0x1] }
 0x125   : > { %v11421_v47 = vpack.c.bf16 %v1065_v13, %v1065_v13  ;;  %v1911_v27 = vrot.slane %v1909_v56, 5  ;;  %v1915_v22 = vshll.u32 %v1771_v32, 16  ;;  %v10959_v33 = vcombine.low %v3481_v43, %v3484_v40  ;;  %v490_v43 = vld [vmem:[#allocation2 + $0x90] sm:$0x1] }
 0x126   : > { %v11422_v37 = vpack.c.bf16 %v1066_v52, %v1066_v52  ;;  %2247 = vrot.lane.b32.xlu1 %v10857_v24, %s12672_s15  ;;  %v13837_v2 = vrot.slane %v3956_v42, 5  ;;  %v1919_v63 = vshrl.u32 %v1771_v32, 16  ;;  %v3949_v39 = vsel %vm12840_vm12, %v13831_v55, %v13817_v46  ;;  %v1773_v52 = vld [vmem:[#allocation2 + $0x3c] sm:$0xf]  ;;  %v13895_v55 = vpop.permute.xlu1 %2565 }
 0x127   : > { %4298 = vrot.lane.b32.xlu0 %v10983_v0, %s12673_s20  ;;  %v1347_v30 = vshrl.u32 %v11421_v47, 16  ;;  %v1350_v29 = vshll.u32 %v11421_v47, 16  ;;  %v1912_v3 = vor.u32 %v1911_v27, %v1908_v9  ;;  %v1917_v7 = vrot.slane %v1915_v22, 5  ;;  %v3829_v0 = vld [vmem:[#allocation2 + $0x4c] sm:$0xf] }
 0x128   : > { %v12451_v15 = vpop.eup %12450  ;;  %v1355_v17 = vshrl.u32 %v11422_v37, 16  ;;  %v1358_v23 = vshll.u32 %v11422_v37, 16  ;;  %v1921_v26 = vrot.slane %v1919_v63, 4  ;;  %v13843_v21 = vrot.slane %v3953_v5, 4  ;;  %v1774_v27 = vld [vmem:[#allocation2 + $0x40] sm:$0xf] }
 0x129   : > { %v1349_v4 = vrot.slane %v1347_v30, 7  ;;  %v1913_v59 = vrot.slane %v1912_v3, 4  ;;  %v1925_v62 = vshll.u32 %v1772_v25, 16  ;;  %v3961_v41 = vshrl.u32 %v3828_v10, 16  ;;  %v3833_v46 = vld [vmem:[#allocation2 + $0x5c] sm:$0x1] }
 0x12a   : > { %v1357_v8 = vrot.slane %v1355_v17, 7  ;;  %2760 = vrot.lane.b32.xlu1 %v12227_v18, %s12673_s20  ;;  %v1922_v45 = vor.u32 %v1921_v26, %v1917_v7  ;;  %v3964_v58 = vshll.u32 %v3828_v10, 16  ;;  %v3970_v53 = vshll.u32 %v3829_v0, 16 }
 0x12b   : > { %3593 = vrot.lane.b32.xlu0 %v10959_v33, %s12672_s15  ;;  %v1352_v57 = vor.u32 %v1350_v29, %v1349_v4  ;;  %v1353_v34 = vrot.slane %v1349_v4, 4  ;;  %v1918_v11 = vsel %vm12840_vm12, %v1913_v59, %v1917_v7  ;;  %v1927_v50 = vrot.slane %v1925_v62, 5  ;;  %v3831_v62 = vld [vmem:[#allocation2 + $0x54] sm:$0xf] }
 0x12c   : > { %v1360_v31 = vor.u32 %v1358_v23, %v1357_v8  ;;  %v1362_v54 = vrot.slane %v1357_v8, 4  ;;  %v1923_v42 = vrot.slane %v1922_v45, 4  ;;  %v3963_v36 = vrot.slane %v3961_v41, 4  ;;  %v3832_v41 = vld [vmem:[#allocation2 + $0x58] sm:$0xf] }
 0x12d   : > { %v1573_v24 = vsel %vm13303_vm15, %v1352_v57, %v1572_v44  ;;  %v3966_v51 = vrot.slane %v3964_v58, 5  ;;  %v3974_v32 = vshrl.u32 %v3829_v0, 16  ;;  %v12453_v16 = vpop.eup %12452  ;;  %v3980_v56 = vshll.u32 %v3830_v6, 16  ;;  %v17284_v58 = vld [vmem:[#allocation13_spill] sm:$0xff]  ;;  %v17285_v57 = vld [vmem:[#allocation10_spill] sm:$0xff] }
 0x12e   : > { %v1361_v40 = vsel %vm13311_vm1, %v1353_v34, %v1360_v31  ;;  %1574 = vst [vmem:[#allocation2 + $0x84] sm:$0xf] %v1573_v24  ;;  %v1577_v13 = vsel %vm13364_vm8, %v1362_v54, %v1576_v14  ;;  %v1928_v20 = vsel %vm12840_vm12, %v1923_v42, %v1927_v50  ;;  %v13860_v9 = vrot.slane %v3970_v53, 5 }
 0x12f   : > { %4300 = vrot.lane.b32.xlu0 %v13815_v19, %s12673_s20  ;;  %1575 = vst.msk [vmem:[#allocation2 + $0x88] sm:$0xf] %vm1497_vm13, %v1361_v40  ;;  %1578 = vst [vmem:[#allocation2 + $0x8c] sm:$0x1] %v1577_v13  ;;  %v10858_v5 = vcombine.low %v1918_v11, %v1928_v20  ;;  %v3967_v47 = vor.u32 %v3966_v51, %v3963_v36  ;;  %v3976_v19 = vrot.slane %v3974_v32, 4  ;;  %v13862_v22 = vrot.slane %v3980_v56, 5 }
 0x130   : > { %v10880_v33 = vrot.slane %v2336_v61, 9  ;;  %v2477_v37 = vrot.slane %v2337_v35, 5  ;;  %v2480_v18 = vrot.slane %v2338_v60, 5  ;;  %v491_v30 = vsel %vm12763_vm3, 0, %v490_v43  ;;  %v546_v13 = vld [vmem:[#allocation2 + $0x98] sm:$0x1] }
 0x131   : > { %2249 = vrot.lane.b32.xlu1 %v10858_v5, %s12672_s15  ;;  %v13865_v25 = vrot.slane %v3967_v47, 4  ;;  %v3977_v63 = vor.u32 %v3976_v19, %v13860_v9  ;;  %v971_v29 = vadd.f32 1.0, %v12451_v15  ;;  %492 = vst [vmem:[#allocation2 + $0x90] sm:$0x1] %v491_v30  ;;  %v972_v10 = vadd.f32 1.0, %v12453_v16 }
 0x132   : > { %v2478_v3 = vsel %vm12813_vm9, %v10880_v33, %v2477_v37  ;;  %v2479_v7 = vrot.slane %v2477_v37, 4  ;;  %v1930_v17 = vshrl.u32 %v1773_v52, 16  ;;  %v3959_v23 = vsel %vm12840_vm12, %v13843_v21, %v13837_v2  ;;  %v1775_v15 = vld [vmem:[#allocation2 + $0x44] sm:$0x1]  ;;  %v1776_v47 = vld [vmem:[#allocation2 + $0x48] sm:$0xf] }
 0x133   : > { %v3978_v44 = vrot.slane %v3977_v63, 4  ;;  %12454 = vrcp.f32 %v971_v29  ;;  %v1933_v26 = vshll.u32 %v1773_v52, 16  ;;  %v1939_v59 = vshll.u32 %v1774_v27, 16 }
 0x134   : > { %v2481_v4 = vsel %vm12813_vm9, %v2479_v7, %v2480_v18  ;;  %12456 = vrcp.f32 %v972_v10  ;;  %v1932_v14 = vrot.slane %v1930_v17, 4  ;;  %v1943_v6 = vshrl.u32 %v1774_v27, 16  ;;  %v1777_v10 = vld [vmem:[#allocation2 + $0x4c] sm:$0xf] }
 0x135   : > { %v3349_v0 = vld [vmem:[#allocation2 + $0x84] sm:$0xe]  ;;  %v10896_v8 = vcombine.low %v2478_v3, %v2481_v4  ;;  %v1935_v45 = vrot.slane %v1933_v26, 5  ;;  %v13880_v34 = vadd.f32 %v17285_v57, %v17284_v58  ;;  %v10985_v21 = vcombine.low %v3949_v39, %v3959_v23  ;;  %v17287_v4 = vld [vmem:[#allocation11_spill] sm:$0xff] }
 0x136   : > { %v12226_v2 = vld [vmem:[#allocation2 + $0x84] sm:$0xff]   ;;  %v10944_v50 = vrot.slane %v3349_v0, 9  ;;  %v3973_v61 = vsel %vm12840_vm12, %v13865_v25, %v13860_v9  ;;  %v3983_v35 = vsel %vm12840_vm12, %v3978_v44, %v13862_v22  ;;  %v3351_v60 = vld [vmem:[#allocation2 + $0x8c] sm:$0x1]  ;;  %v1941_v42 = vrot.slane %v1939_v59, 5  ;;  %v13911_v23 = vpop.permute.xlu1 %3752 }
 0x137   : > { %v3350_v11 = vld [vmem:[#allocation2 + $0x88] sm:$0xf]  ;;  %2585 = vrot.lane.b32.xlu1 %v10896_v8, %s12671_s14  ;;  %v1936_v54 = vor.u32 %v1935_v45, %v1932_v14  ;;  %v1945_v36 = vrot.slane %v1943_v6, 4  ;;  %3770 = vrot.lane.b32.xlu0 %v12226_v2, %s12671_s14  ;;  %v3490_v39 = vrot.slane %v3351_v60, 5  ;;  %v1949_v43 = vshll.u32 %v1775_v15, 16  ;;  %v17288_v0 = vld [vmem:[#allocation9_spill] sm:$0xff] }
 0x138   : > { %v3487_v31 = vrot.slane %v3350_v11, 5  ;;  %v3985_v24 = vshrl.u32 %v3831_v62, 16  ;;  %v3988_v51 = vshll.u32 %v3831_v62, 16  ;;  %v3994_v5 = vshll.u32 %v3832_v41, 16  ;;  %v1778_v59 = vld [vmem:[#allocation2 + $0x50] sm:$0x1] }
 0x139   : > { %v1937_v16 = vrot.slane %v1936_v54, 4  ;;  %v1946_v40 = vor.u32 %v1945_v36, %v1941_v42  ;;  %v1951_v20 = vrot.slane %v1949_v43, 5  ;;  %v3998_v22 = vshrl.u32 %v3832_v41, 16  ;;  %v12622_v62 = vld [vmem:[%s12783_s30 + $0xd0] sm:$0xff]  ;;  %v17289_v45 = vld [vmem:[#allocation12_spill] sm:$0xff] }
 0x13a   : > { %v3488_v53 = vsel %vm12813_vm9, %v10944_v50, %v3487_v31  ;;  %v3489_v32 = vrot.slane %v3487_v31, 4  ;;  %v3987_v56 = vrot.slane %v3985_v24, 4  ;;  %v3990_v52 = vrot.slane %v3988_v51, 5 }
 0x13b   : > { %v1942_v19 = vsel %vm12840_vm12, %v1937_v16, %v1941_v42  ;;  %v1947_v27 = vrot.slane %v1946_v40, 4  ;;  %4302 = vrot.lane.b32.xlu0 %v10985_v21, %s12673_s20  ;;  %v13905_v18 = vrot.slane %v3994_v5, 5  ;;  %v4004_v25 = vshll.u32 %v3833_v46, 16  ;;  %v2242_v21 = vpop.permute.xlu0 %2241  ;;  %v3834_v46 = vld [vmem:[#allocation2 + $0x60] sm:$0xf] }
 0x13c   : > { %v3491_v9 = vsel %vm12813_vm9, %v3489_v32, %v3490_v39  ;;  %v3991_v37 = vor.u32 %v3990_v52, %v3987_v56  ;;  %v4000_v29 = vrot.slane %v3998_v22, 4  ;;  %v547_v7 = vsel %vm12773_vm5, 0, %v546_v13  ;;  %v12238_v32 = vld [vmem:[%s17205_s3] sm:$0xff]   ;;  %2290 = vst.msk [vmem:[#allocation3] sm:$0xff] %vm2289_vm2, %v2242_v21 }
 0x13d   : > { %v10960_v33 = vcombine.low %v3488_v53, %v3491_v9  ;;  %v12455_v63 = vpop.eup %12454  ;;  %v1952_v30 = vsel %vm12840_vm12, %v1947_v27, %v1951_v20  ;;  %v1954_v17 = vshrl.u32 %v1776_v47, 16  ;;  %v10986_v26 = vcombine.low %v3973_v61, %v3983_v35  ;;  %548 = vst [vmem:[#allocation2 + $0x98] sm:$0x1] %v547_v7  ;;  %v12229_v61 = vld [vmem:[#allocation2 + $0x84] sm:$0xff]   ;;  %2614 = vst.msk [vmem:[#allocation3] sm:$0xff] %vm2613_vm10, %v13895_v55  ;;  %v12243_v55 = vld [vmem:[%s17205_s3 + $0x58] sm:$0xff]  }
 0x13e   : > { %v12457_v44 = vpop.eup %12456  ;;  %v1067_v15 = vmul.f32 %v12455_v63, %v17287_v4  ;;  %v10859_v14 = vcombine.low %v1942_v19, %v1952_v30  ;;  %v13916_v8 = vmul.f32 %v12622_v62, %v17288_v0  ;;  %v13919_v41 = vrot.slane %v3991_v37, 4  ;;  %v12237_v53 = vld [vmem:[%s17205_s3 + $0x40] sm:$0xff]  }
 0x13f   : > { %v1068_v6 = vmul.f32 %v12457_v44, %v17289_v45  ;;  %v1956_v58 = vrot.slane %v1954_v17, 4  ;;  %v1957_v2 = vshll.u32 %v1776_v47, 16  ;;  %3595 = vrot.lane.b32.xlu0 %v10960_v33, %s12672_s15  ;;  %v4001_v50 = vor.u32 %v4000_v29, %v13905_v18  ;;  %v3835_v56 = vld [vmem:[#allocation2 + $0x64] sm:$0xf]  ;;  %v1579_v47 = vld [vmem:[#allocation2 + $0x90] sm:$0xf]  ;;  %v13942_v30 = vpop.permute.xlu0 %3754  ;;  %11465 = vmatprep.subr.bf16.mxu0 %v12237_v53 }
 0x140   : > { %v11423_v11 = vpack.c.bf16 %v1067_v15, %v1067_v15  ;;  %2251 = vrot.lane.b32.xlu1 %v10859_v14, %s12672_s15  ;;  %v1963_v35 = vshll.u32 %v1777_v10, 16  ;;  %v1967_v60 = vshrl.u32 %v1777_v10, 16  ;;  %v13924_v54 = vrot.slane %v4004_v25, 5  ;;  %v3836_v25 = vld [vmem:[#allocation2 + $0x68] sm:$0x1]  ;;  %11466 = vmatpush3.bf16.msra.mxu0 %v12238_v32  ;;  %v12242_v53 = vld [vmem:[%s17205_s3 + $0x10] sm:$0xff]  }
 0x141   : > { %v11424_v31 = vpack.c.bf16 %v1068_v6, %v1068_v6  ;;  %v1959_v42 = vrot.slane %v1957_v2, 5  ;;  %v1973_v36 = vshll.u32 %v1778_v59, 16  ;;  %v3997_v13 = vsel %vm12840_vm12, %v13919_v41, %v13905_v18  ;;  %v13936_v52 = vpop.permute.xlu1 %2742  ;;  %v12239_v44 = vld [vmem:[%s17205_s3 + $0x48] sm:$0xff]   ;;  %v2339_v62 = vld [vmem:[#allocation2 + $0x84] sm:$0xe] }
 0x142   : > { %v1364_v39 = vshrl.u32 %v11423_v11, 16  ;;  %v1367_v43 = vshll.u32 %v11423_v11, 16  ;;  %v1965_v24 = vrot.slane %v1963_v35, 5  ;;  %v1969_v51 = vrot.slane %v1967_v60, 4  ;;  %v493_v45 = vld [vmem:[#allocation2 + $0x9c] sm:$0x1]  ;;  %11467 = vmatprep.subr.bf16.mxu0 %v12239_v44 }
 0x143   : > { %v1372_v16 = vshrl.u32 %v11424_v31, 16  ;;  %v1375_v40 = vshll.u32 %v11424_v31, 16  ;;  %v1960_v20 = vor.u32 %v1959_v42, %v1956_v58  ;;  %4304 = vrot.lane.b32.xlu0 %v10986_v26, %s12673_s20  ;;  %v13939_v9 = vrot.slane %v4001_v50, 4  ;;  %v12240_v26 = vld [vmem:[%s17205_s3 + $0x8] sm:$0xff]   ;;  %2791 = vst.msk [vmem:[#allocation3] sm:$0xff] %vm2790_vm11, %v13936_v52 }
 0x144   : > { %v1366_v5 = vrot.slane %v1364_v39, 7  ;;  %2762 = vrot.lane.b32.xlu1 %v12229_v61, %s12673_s20  ;;  %v1970_v19 = vor.u32 %v1969_v51, %v1965_v24  ;;  %v1975_v27 = vrot.slane %v1973_v36, 5  ;;  %v1583_v33 = vld [vmem:[#allocation2 + $0x98] sm:$0x1]  ;;  %v4009_v63 = vshrl.u32 %v3834_v46, 16  ;;  %11468 = vmatpush3.bf16.msra.mxu0 %v12240_v26  ;;  %v12241_v51 = vld [vmem:[%s17205_s3 + $0x50] sm:$0xff]  }
 0x145   : > { %v1374_v22 = vrot.slane %v1372_v16, 7  ;;  %v1961_v37 = vrot.slane %v1960_v20, 4  ;;  %v4012_v17 = vshll.u32 %v3834_v46, 16  ;;  %v13953_v6 = vpop.permute.xlu1 %2744  ;;  %v4018_v11 = vshll.u32 %v3835_v56, 16  ;;  %v2340_v50 = vld [vmem:[#allocation2 + $0x88] sm:$0xf]  ;;  %11469 = vmatprep.subr.bf16.mxu0 %v12241_v51 }
 0x146   : > { %v1369_v29 = vor.u32 %v1367_v43, %v1366_v5  ;;  %v1370_v7 = vrot.slane %v1366_v5, 4  ;;  %v1971_v10 = vrot.slane %v1970_v19, 4  ;;  %v4011_v59 = vrot.slane %v4009_v63, 4  ;;  %v2341_v61 = vld [vmem:[#allocation2 + $0x8c] sm:$0x1]  ;;  %v13975_v5 = vpop.permute.xlu0 %3756 }
 0x147   : > { %v1377_v4 = vor.u32 %v1375_v40, %v1374_v22  ;;  %v1379_v15 = vrot.slane %v1374_v22, 4  ;;  %v1966_v14 = vsel %vm12840_vm12, %v1961_v37, %v1965_v24  ;;  %v4014_v21 = vrot.slane %v4012_v17, 5  ;;  %v1779_v36 = vld [vmem:[#allocation2 + $0x54] sm:$0xf]  ;;  %v17290_v22 = vld [vmem:[#allocation14_spill] sm:$0xff] }
 0x148   : > { %v1580_v58 = vsel %vm13303_vm15, %v1369_v29, %v1579_v47  ;;  %v1976_v2 = vsel %vm12840_vm12, %v1971_v10, %v1975_v27  ;;  %v4022_v42 = vshrl.u32 %v3835_v56, 16  ;;  %v13964_v39 = vrot.slane %v4018_v11, 5  ;;  %v1780_v56 = vld [vmem:[#allocation2 + $0x58] sm:$0xf]  ;;  %v1781_v17 = vld [vmem:[#allocation2 + $0x5c] sm:$0x1]  ;;  %11470 = vmatpush3.bf16.msra.mxu0 %v12242_v53 }
 0x149   : > { %v1378_v35 = vsel %vm13311_vm1, %v1370_v7, %v1377_v4  ;;  %1581 = vst [vmem:[#allocation2 + $0x90] sm:$0xf] %v1580_v58  ;;  %v1584_v60 = vsel %vm13364_vm8, %v1379_v15, %v1583_v33  ;;  %v10860_v31 = vcombine.low %v1966_v14, %v1976_v2  ;;  %v4015_v46 = vor.u32 %v4014_v21, %v4011_v59  ;;  %v13977_v47 = vpop.permute.xlu1 %2746  ;;  %v3838_v2 = vld [vmem:[#allocation2 + $0x70] sm:$0xf]  ;;  %v12623_v21 = vld [vmem:[%s12783_s30 + $0xd8] sm:$0xff] }
 0x14a   : > { %1582 = vst.msk [vmem:[#allocation2 + $0x94] sm:$0xf] %vm1497_vm13, %v1378_v35  ;;  %1585 = vst [vmem:[#allocation2 + $0x98] sm:$0x1] %v1584_v60  ;;  %v4028_v43 = vshll.u32 %v3836_v25, 16  ;;  %v10881_v24 = vrot.slane %v2339_v62, 9  ;;  %v4007_v10 = vsel %vm12840_vm12, %v13939_v9, %v13924_v54  ;;  %v14002_v11 = vmul.f32 %v12623_v21, %v17288_v0  ;;  %11471 = vmatprep.subr.bf16.mxu0 %v12243_v55 }
 0x14b   : > { %2253 = vrot.lane.b32.xlu1 %v10860_v31, %s12672_s15  ;;  %v4024_v32 = vrot.slane %v4022_v42, 4  ;;  %v2484_v16 = vrot.slane %v2340_v50, 5  ;;  %v2487_v40 = vrot.slane %v2341_v61, 5  ;;  %v494_v20 = vsel %vm12763_vm3, 0, %v493_v45  ;;  %v3837_v9 = vld [vmem:[#allocation2 + $0x6c] sm:$0xf]  ;;  %v14013_v42 = vpop.permute.xlu0 %3758 }
 0x14c   : > { %v13979_v19 = vrot.slane %v4015_v46, 4  ;;  %v13981_v27 = vrot.slane %v4028_v43, 5  ;;  %495 = vst [vmem:[#allocation2 + $0x9c] sm:$0x1] %v494_v20  ;;  %v10798_v33 = vmul.f32 -1.442695, %v17290_v22  ;;  %v10987_v61 = vcombine.low %v3997_v13, %v4007_v10 }
 0x14d   : > { %v10799_v37 = vmul.f32 -1.442695, %v13880_v34  ;;  %v4025_v25 = vor.u32 %v4024_v32, %v13964_v39  ;;  %v2485_v63 = vsel %vm12813_vm9, %v10881_v24, %v2484_v16  ;;  %v2486_v29 = vrot.slane %v2484_v16, 4  ;;  %v13996_v59 = vpop.permute.xlu1 %2748  ;;  %v3839_v53 = vld [vmem:[#allocation2 + $0x74] sm:$0x1] }
 0x14e   : > { %v1978_v7 = vshrl.u32 %v1779_v36, 16  ;;  %12458 = vpow2.f32 %v10798_v33  ;;  %v1981_v44 = vshll.u32 %v1779_v36, 16  ;;  %v1987_v26 = vshll.u32 %v1780_v56, 16  ;;  %v12624_v36 = vld [vmem:[%s12783_s30 + $0xe0] sm:$0xff] }
 0x14f   : > { %v13992_v4 = vrot.slane %v4025_v25, 4  ;;  %v2488_v15 = vsel %vm12813_vm9, %v2486_v29, %v2487_v40  ;;  %12460 = vpow2.f32 %v10799_v37  ;;  %v4021_v31 = vsel %vm12840_vm12, %v13979_v19, %v13964_v39  ;;  %v549_v25 = vld [vmem:[#allocation2 + $0xa4] sm:$0x1] }
 0x150   : > { %v1980_v14 = vrot.slane %v1978_v7, 4  ;;  %v3352_v62 = vld [vmem:[#allocation2 + $0x90] sm:$0xe]  ;;  %v10897_v45 = vcombine.low %v2485_v63, %v2488_v15  ;;  %v1983_v58 = vrot.slane %v1981_v44, 5  ;;  %v13998_v54 = vrot.slane %v1987_v26, 5  ;;  %v14045_v15 = vpop.permute.xlu0 %3760 }
 0x151   : > { %v12228_v50 = vld [vmem:[#allocation2 + $0x90] sm:$0xff]   ;;  %v10945_v60 = vrot.slane %v3352_v62, 9  ;;  %v14017_v46 = vmul.f32 %v12624_v36, %v17288_v0  ;;  %v3354_v43 = vld [vmem:[#allocation2 + $0x98] sm:$0x1]  ;;  %v4031_v18 = vsel %vm12840_vm12, %v13992_v4, %v13981_v27  ;;  %v1991_v13 = vshrl.u32 %v1780_v56, 16  ;;  %v14025_v32 = vpop.permute.xlu1 %2750  ;;  %17291 = vst [vmem:[#allocation13_spill] sm:$0xff] %v14045_v15 }
 0x152   : > { %v3353_v35 = vld [vmem:[#allocation2 + $0x94] sm:$0xf]  ;;  %2587 = vrot.lane.b32.xlu1 %v10897_v45, %s12671_s14  ;;  %v1984_v41 = vor.u32 %v1983_v58, %v1980_v14  ;;  %3772 = vrot.lane.b32.xlu0 %v12228_v50, %s12671_s14  ;;  %v3497_v39 = vrot.slane %v3354_v43, 5  ;;  %v1997_v51 = vshll.u32 %v1781_v17, 16  ;;  %v4033_v56 = vshrl.u32 %v3837_v9, 16  ;;  %v12244_v14 = vld [vmem:[%s17205_s3 + $0x18] sm:$0xff]  }
 0x153   : > { %v3494_v24 = vrot.slane %v3353_v35, 5  ;;  %v1993_v19 = vrot.slane %v1991_v13, 4  ;;  %v4036_v33 = vshll.u32 %v3837_v9, 16  ;;  %v4042_v37 = vshll.u32 %v3838_v2, 16  ;;  %v1782_v17 = vld [vmem:[#allocation2 + $0x60] sm:$0xf]  ;;  %11472 = vmatpush3.bf16.msra.mxu0 %v12244_v14 }
 0x154   : > { %v1985_v20 = vrot.slane %v1984_v41, 4  ;;  %v1999_v27 = vrot.slane %v1997_v51, 5  ;;  %v4046_v10 = vshrl.u32 %v3838_v2, 16  ;;  %v4035_v44 = vrot.slane %v4033_v56, 4  ;;  %v1783_v35 = vld [vmem:[#allocation2 + $0x64] sm:$0xf] }
 0x155   : > { %v3495_v16 = vsel %vm12813_vm9, %v10945_v60, %v3494_v24  ;;  %v3496_v40 = vrot.slane %v3494_v24, 4  ;;  %v1994_v7 = vor.u32 %v1993_v19, %v13998_v54  ;;  %v4038_v26 = vrot.slane %v4036_v33, 5  ;;  %v14052_v2 = vpop.permute.xlu1 %2752  ;;  %v3840_v51 = vld [vmem:[#allocation2 + $0x78] sm:$0xf]  ;;  %v3841_v19 = vld [vmem:[#allocation2 + $0x7c] sm:$0xf] }
 0x156   : > { %v1990_v29 = vsel %vm12840_vm12, %v1985_v20, %v13998_v54  ;;  %4306 = vrot.lane.b32.xlu0 %v10987_v61, %s12673_s20  ;;  %v14043_v4 = vrot.slane %v4042_v37, 5  ;;  %v4048_v58 = vrot.slane %v4046_v10, 4  ;;  %v4052_v54 = vshll.u32 %v3839_v53, 16  ;;  %17292 = vst [vmem:[#allocation10_spill] sm:$0xff] %v14052_v2  ;;  %v2343_v33 = vld [vmem:[#allocation2 + $0x94] sm:$0xf] }
 0x157   : > { %v3498_v63 = vsel %vm12813_vm9, %v3496_v40, %v3497_v39  ;;  %v1995_v45 = vrot.slane %v1994_v7, 4  ;;  %v550_v9 = vsel %vm12773_vm5, 0, %v549_v25  ;;  %v4039_v61 = vor.u32 %v4038_v26, %v4035_v44  ;;  %v1784_v39 = vld [vmem:[#allocation2 + $0x68] sm:$0x1]  ;;  %v12232_v40 = vld [vmem:[#allocation2 + $0x90] sm:$0xff]  }
 0x158   : > { %v10961_v52 = vcombine.low %v3495_v16, %v3498_v63  ;;  %v12459_v62 = vpop.eup %12458  ;;  %551 = vst [vmem:[#allocation2 + $0xa4] sm:$0x1] %v550_v9  ;;  %v2002_v60 = vshrl.u32 %v1782_v17, 16  ;;  %v2005_v36 = vshll.u32 %v1782_v17, 16  ;;  %v10988_v43 = vcombine.low %v4021_v31, %v4031_v18  ;;  %v2342_v18 = vld [vmem:[#allocation2 + $0x90] sm:$0xe] }
 0x159   : > { %v12461_v21 = vpop.eup %12460  ;;  %v973_v50 = vadd.f32 1.0, %v12459_v62  ;;  %v2000_v41 = vsel %vm12840_vm12, %v1995_v45, %v1999_v27  ;;  %v4049_v13 = vor.u32 %v4048_v58, %v14043_v4  ;;  %v14058_v16 = vrot.slane %v4039_v61, 4  ;;  %v14067_v7 = vpop.permute.xlu0 %3762  ;;  %v3842_v62 = vld [vmem:[#allocation2 + $0x80] sm:$0x1] }
 0x15a   : > { %v974_v24 = vadd.f32 1.0, %v12461_v21  ;;  %3597 = vrot.lane.b32.xlu0 %v10961_v52, %s12672_s15  ;;  %v10861_v53 = vcombine.low %v1990_v29, %v2000_v41  ;;  %v2004_v20 = vrot.slane %v2002_v60, 4  ;;  %v2007_v56 = vrot.slane %v2005_v36, 5  ;;  %17293 = vst [vmem:[#allocation5_spill] sm:$0xff] %v14067_v7  ;;  %v14073_v44 = vpop.permute.xlu1 %2754 }
 0x15b   : > { %12462 = vrcp.f32 %v973_v50  ;;  %v2011_v31 = vshll.u32 %v1783_v35, 16  ;;  %v14062_v27 = vadd.f32 %v17285_v57, %v13916_v8  ;;  %v14065_v37 = vrot.slane %v4052_v54, 5  ;;  %17294 = vst [vmem:[#allocation11_spill] sm:$0xff] %v14073_v44 }
 0x15c   : > { %12464 = vrcp.f32 %v974_v24  ;;  %2255 = vrot.lane.b32.xlu1 %v10861_v53, %s12672_s15  ;;  %v2015_v25 = vshrl.u32 %v1783_v35, 16  ;;  %v2021_v63 = vshll.u32 %v1784_v39, 16  ;;  %v4057_v29 = vshrl.u32 %v3840_v51, 16  ;;  %v2344_v35 = vld [vmem:[#allocation2 + $0x98] sm:$0x1] }
 0x15d   : > { %v2008_v10 = vor.u32 %v2007_v56, %v2004_v20  ;;  %v2013_v17 = vrot.slane %v2011_v31, 5  ;;  %v4060_v55 = vshll.u32 %v3840_v51, 16  ;;  %v14071_v52 = vadd.f32 %v17285_v57, %v14002_v11  ;;  %v496_v11 = vld [vmem:[#allocation2 + $0xa8] sm:$0x1]  ;;  %v1785_v39 = vld [vmem:[#allocation2 + $0x6c] sm:$0xf] }
 0x15e   : > { %4308 = vrot.lane.b32.xlu0 %v10988_v43, %s12673_s20  ;;  %v14080_v26 = vrot.slane %v4049_v13, 4  ;;  %v2017_v14 = vrot.slane %v2015_v25, 4  ;;  %v4059_v45 = vrot.slane %v4057_v29, 4  ;;  %v4066_v9 = vshll.u32 %v3841_v19, 16 }
 0x15f   : > { %v2009_v58 = vrot.slane %v2008_v10, 4  ;;  %v4062_v54 = vrot.slane %v4060_v55, 5  ;;  %v4070_v21 = vshrl.u32 %v3841_v19, 16  ;;  %v2023_v61 = vrot.slane %v2021_v63, 5 }
 0x160   : > { %2764 = vrot.lane.b32.xlu1 %v12232_v40, %s12673_s20  ;;  %v2018_v50 = vor.u32 %v2017_v14, %v2013_v17  ;;  %v10882_v60 = vrot.slane %v2342_v18, 9  ;;  %v2491_v36 = vrot.slane %v2343_v33, 5  ;;  %v14083_v24 = vrot.slane %v4066_v9, 5  ;;  %v1786_v9 = vld [vmem:[#allocation2 + $0x70] sm:$0xf] }
 0x161   : > { %v4063_v43 = vor.u32 %v4062_v54, %v4059_v45  ;;  %v4072_v41 = vrot.slane %v4070_v21, 4  ;;  %v4076_v13 = vshll.u32 %v3842_v62, 16  ;;  %v2014_v51 = vsel %vm12840_vm12, %v2009_v58, %v2013_v17  ;;  %v14089_v40 = vpop.permute.xlu0 %3764 }
 0x162   : > { %v2019_v53 = vrot.slane %v2018_v50, 4  ;;  %v2492_v20 = vsel %vm12813_vm9, %v10882_v60, %v2491_v36  ;;  %v2493_v19 = vrot.slane %v2491_v36, 4  ;;  %17295 = vst [vmem:[#allocation9_spill] sm:$0xff] %v14089_v40  ;;  %v2494_v18 = vrot.slane %v2344_v35, 5  ;;  %v14096_v25 = vpop.permute.xlu1 %2756 }
 0x163   : > { %v14091_v56 = vrot.slane %v4063_v43, 4  ;;  %v4073_v31 = vor.u32 %v4072_v41, %v14083_v24  ;;  %v497_v33 = vsel %vm12763_vm3, 0, %v496_v11  ;;  %17296 = vst [vmem:[#allocation12_spill] sm:$0xff] %v14096_v25  ;;  %v10800_v10 = vmul.f32 -1.442695, %v14062_v27 }
 0x164   : > { %v2024_v29 = vsel %vm12840_vm12, %v2019_v53, %v2023_v61  ;;  %498 = vst [vmem:[#allocation2 + $0xa8] sm:$0x1] %v497_v33  ;;  %v10801_v17 = vmul.f32 -1.442695, %v14071_v52  ;;  %v2026_v55 = vshrl.u32 %v1785_v39, 16  ;;  %v14107_v54 = vrot.slane %v4076_v13, 5 }
 0x165   : > { %v12463_v63 = vpop.eup %12462  ;;  %v10862_v58 = vcombine.low %v2014_v51, %v2024_v29  ;;  %v2495_v50 = vsel %vm12813_vm9, %v2493_v19, %v2494_v18  ;;  %12466 = vpow2.f32 %v10800_v10  ;;  %v14117_v35 = vrot.slane %v4073_v31, 4  ;;  %v3843_v53 = vld [vmem:[#allocation2 + $0x84] sm:$0xf]  ;;  %v3844_v29 = vld [vmem:[#allocation2 + $0x88] sm:$0xf] }
 0x166   : > { %v12465_v14 = vpop.eup %12464  ;;  %v1069_v62 = vmul.f32 %v12463_v63, %v17290_v22  ;;  %v1787_v22 = vld [vmem:[#allocation2 + $0x74] sm:$0x1]  ;;  %v10898_v60 = vcombine.low %v2492_v20, %v2495_v50  ;;  %12468 = vpow2.f32 %v10801_v17  ;;  %v14119_v36 = vpop.permute.xlu0 %3766  ;;  %v2028_v41 = vrot.slane %v2026_v55, 4  ;;  %v1586_v11 = vld [vmem:[#allocation2 + $0x9c] sm:$0xf] }
 0x167   : > { %v1070_v21 = vmul.f32 %v12465_v14, %v13880_v34  ;;  %2257 = vrot.lane.b32.xlu1 %v10862_v58, %s12672_s15  ;;  %17297 = vst [vmem:[#allocation14_spill] sm:$0xff] %v14119_v36  ;;  %v14121_v34 = vpop.permute.xlu1 %2567  ;;  %v2029_v13 = vshll.u32 %v1785_v39, 16  ;;  %v2035_v51 = vshll.u32 %v1786_v9, 16  ;;  %v2039_v18 = vshrl.u32 %v1786_v9, 16 }
 0x168   : > { %v11425_v61 = vpack.c.bf16 %v1069_v62, %v1069_v62  ;;  %v2045_v63 = vshll.u32 %v1787_v22, 16  ;;  %v4081_v50 = vshrl.u32 %v3843_v53, 16  ;;  %v4084_v9 = vshll.u32 %v3843_v53, 16 }
 0x169   : > { %v11426_v43 = vpack.c.bf16 %v1070_v21, %v1070_v21  ;;  %v2031_v31 = vrot.slane %v2029_v13, 5  ;;  %v2037_v62 = vrot.slane %v2035_v51, 5  ;;  %v2041_v17 = vrot.slane %v2039_v18, 4  ;;  %v3845_v18 = vld [vmem:[#allocation2 + $0x8c] sm:$0x1] }
 0x16a   : > { %v1381_v33 = vshrl.u32 %v11425_v61, 16  ;;  %v1384_v19 = vshll.u32 %v11425_v61, 16  ;;  %v2047_v58 = vrot.slane %v2045_v63, 5  ;;  %v14124_v21 = vpop.permute.xlu0 %3575  ;;  %v4090_v22 = vshll.u32 %v3844_v29, 16 }
 0x16b   : > { %v1389_v10 = vshrl.u32 %v11426_v43, 16  ;;  %v1392_v14 = vshll.u32 %v11426_v43, 16  ;;  %2589 = vrot.lane.b32.xlu1 %v10898_v60, %s12671_s14  ;;  %v14126_v39 = vpop.permute.xlu1 %2569  ;;  %v2032_v61 = vor.u32 %v2031_v31, %v2028_v41  ;;  %v1590_v43 = vld [vmem:[#allocation2 + $0xa4] sm:$0x1]  ;;  %v2042_v13 = vor.u32 %v2041_v17, %v2037_v62  ;;  %v552_v41 = vld [vmem:[#allocation2 + $0xb0] sm:$0x1] }
 0x16c   : > { %v1383_v20 = vrot.slane %v1381_v33, 7  ;;  %v4083_v51 = vrot.slane %v4081_v50, 4  ;;  %v4086_v63 = vrot.slane %v4084_v9, 5  ;;  %v14130_v7 = vrot.slane %v4090_v22, 5  ;;  %v1788_v17 = vld [vmem:[#allocation2 + $0x78] sm:$0xf] }
 0x16d   : > { %v1391_v55 = vrot.slane %v1389_v10, 7  ;;  %v2033_v60 = vrot.slane %v2032_v61, 4  ;;  %v2043_v25 = vrot.slane %v2042_v13, 4  ;;  %v4094_v10 = vshrl.u32 %v3844_v29, 16 }
 0x16e   : > { %v1386_v8 = vor.u32 %v1384_v19, %v1383_v20  ;;  %v1387_v45 = vrot.slane %v1383_v20, 4  ;;  %v4100_v9 = vshll.u32 %v3845_v18, 16  ;;  %v553_v22 = vsel %vm12773_vm5, 0, %v552_v41 }
 0x16f   : > { %v1394_v33 = vor.u32 %v1392_v14, %v1391_v55  ;;  %v1396_v36 = vrot.slane %v1391_v55, 4  ;;  %v14132_v53 = vpop.permute.xlu0 %3577  ;;  %v14134_v19 = vpop.permute.xlu1 %2571  ;;  %v2048_v55 = vsel %vm12840_vm12, %v2043_v25, %v2047_v58  ;;  %v4096_v61 = vrot.slane %v4094_v10, 4  ;;  %554 = vst [vmem:[#allocation2 + $0xb0] sm:$0x1] %v553_v22  ;;  %v2808_v58 = vld [vmem:[#allocation2 + $0x10] sm:$0xf] }
 0x170   : > { %v1587_v40 = vsel %vm13303_vm15, %v1386_v8, %v1586_v11  ;;  %v12467_v31 = vpop.eup %12466  ;;  %v2038_v8 = vsel %vm12840_vm12, %v2033_v60, %v2037_v62  ;;  %v4087_v11 = vor.u32 %v4086_v63, %v4083_v51  ;;  %v2050_v25 = vshrl.u32 %v1788_v17, 16 }
 0x171   : > { %v1395_v14 = vsel %vm13311_vm1, %v1387_v45, %v1394_v33  ;;  %1588 = vst [vmem:[#allocation2 + $0x9c] sm:$0xf] %v1587_v40  ;;  %v1591_v20 = vsel %vm13364_vm8, %v1396_v36, %v1590_v43  ;;  %v12469_v50 = vpop.eup %12468  ;;  %v975_v29 = vadd.f32 1.0, %v12467_v31  ;;  %v1789_v45 = vld [vmem:[#allocation2 + $0x7c] sm:$0xf]  ;;  %v4079_v40 = vsel %vm12840_vm12, %v14117_v35, %v14107_v54 }
 0x172   : > { %1589 = vst.msk [vmem:[#allocation2 + $0xa0] sm:$0xf] %vm1497_vm13, %v1395_v14  ;;  %1592 = vst [vmem:[#allocation2 + $0xa4] sm:$0x1] %v1591_v20  ;;  %v976_v36 = vadd.f32 1.0, %v12469_v50  ;;  %v10863_v62 = vcombine.low %v2038_v8, %v2048_v55  ;;  %v14151_v13 = vrot.slane %v4087_v11, 4  ;;  %v4097_v51 = vor.u32 %v4096_v61, %v14130_v7 }
 0x173   : > { %v1790_v43 = vld [vmem:[#allocation2 + $0x80] sm:$0x1]  ;;  %12470 = vrcp.f32 %v975_v29  ;;  %v14159_v54 = vrot.slane %v4100_v9, 5  ;;  %v2053_v35 = vshll.u32 %v1788_v17, 16  ;;  %v2059_v18 = vshll.u32 %v1789_v45, 16  ;;  %v12625_v61 = vld [vmem:[%s12783_s30 + $0xe8] sm:$0xff] }
 0x174   : > { %v14154_v33 = vpop.permute.xlu0 %3579  ;;  %v14156_v60 = vpop.permute.xlu1 %2573  ;;  %12472 = vrcp.f32 %v976_v36  ;;  %2259 = vrot.lane.b32.xlu1 %v10863_v62, %s12672_s15  ;;  %v14161_v63 = vrot.slane %v4097_v51, 4  ;;  %v2052_v10 = vrot.slane %v2050_v25, 4  ;;  %v2063_v41 = vshrl.u32 %v1789_v45, 16  ;;  %v2809_v29 = vld [vmem:[#allocation2 + $0x14] sm:$0x1] }
 0x175   : > { %v2069_v31 = vshll.u32 %v1790_v43, 16  ;;  %v2055_v14 = vrot.slane %v2053_v35, 5  ;;  %v14163_v20 = vrot.slane %v2059_v18, 5  ;;  %v2865_v8 = vshll.u32 %v2808_v58, 16  ;;  %v2807_v55 = vld [vmem:[#allocation2 + $0xc] sm:$0xf] }
 0x176   : > { %v2869_v11 = vshrl.u32 %v2808_v58, 16  ;;  %v14167_v9 = vmul.f32 %v12625_v61, %v17288_v0  ;;  %v14171_v17 = vadd.f32 %v17285_v57, %v14017_v46  ;;  %v17298_v62 = vsel %vm12840_vm12, %v14080_v26, %v14065_v37  ;;  %v12626_v46 = vld [vmem:[%s12783_s30 + $0xf0] sm:$0xff] }
 0x177   : > { %v17299_v22 = vsel %vm12840_vm12, %v14058_v16, %v14043_v4  ;;  %v2056_v58 = vor.u32 %v2055_v14, %v2052_v10  ;;  %v14189_v18 = vmul.f32 %v12626_v46, %v17288_v0  ;;  %v17300_v37 = vsel %vm12840_vm12, %v14091_v56, %v14083_v24  ;;  %v3846_v24 = vld [vmem:[#allocation2 + $0x90] sm:$0xf] }
 0x178   : > { %v3355_v50 = vld [vmem:[#allocation2 + $0x9c] sm:$0xe]  ;;  %v14173_v36 = vpop.permute.xlu0 %3581  ;;  %v10989_v43 = vcombine.low %v17299_v22, %v17298_v62  ;;  %v14185_v35 = vpop.permute.xlu1 %2575  ;;  %v14196_v26 = vcombine.low %v17300_v37, %v4079_v40  ;;  %v2065_v62 = vrot.slane %v2063_v41, 4  ;;  %v2071_v22 = vrot.slane %v2069_v31, 5 }
 0x179   : > { %v12231_v45 = vld [vmem:[#allocation2 + $0x9c] sm:$0xff]   ;;  %v10946_v25 = vrot.slane %v3355_v50, 9  ;;  %v3357_v61 = vld [vmem:[#allocation2 + $0xa4] sm:$0x1]  ;;  %v2057_v50 = vrot.slane %v2056_v58, 4  ;;  %v2871_v46 = vrot.slane %v2869_v11, 4 }
 0x17a   : > { %v3356_v51 = vld [vmem:[#allocation2 + $0xa0] sm:$0xf]  ;;  %3774 = vrot.lane.b32.xlu0 %v12231_v45, %s12671_s14  ;;  %v3504_v14 = vrot.slane %v3357_v61, 5  ;;  %v2066_v31 = vor.u32 %v2065_v62, %v14163_v20  ;;  %v2875_v58 = vshll.u32 %v2809_v29, 16  ;;  %v2859_v61 = vshll.u32 %v2807_v55, 16 }
 0x17b   : > { %v3501_v44 = vrot.slane %v3356_v51, 5  ;;  %v12234_v10 = vld [vmem:[#allocation2 + $0x9c] sm:$0xff]   ;;  %v14210_v51 = vrot.slane %v2865_v8, 5  ;;  %v2062_v41 = vsel %vm12840_vm12, %v2057_v50, %v14163_v20 }
 0x17c   : > { %2766 = vrot.lane.b32.xlu1 %v12234_v10, %s12673_s20  ;;  %v14212_v37 = vpop.permute.xlu0 %3583  ;;  %v12246_v45 = vld [vmem:[%s17205_s3 + $0x60] sm:$0xff]   ;;  %v4105_v10 = vshrl.u32 %v3846_v24, 16  ;;  %v2067_v50 = vrot.slane %v2066_v31, 4  ;;  %v14226_v20 = vpop.permute.xlu1 %2577 }
 0x17d   : > { %v3502_v56 = vsel %vm12813_vm9, %v10946_v25, %v3501_v44  ;;  %v3503_v40 = vrot.slane %v3501_v44, 4  ;;  %17301 = vst [vmem:[#allocation15_spill] sm:$0xff] %v14212_v37  ;;  %v2856_v25 = vshrl.u32 %v2807_v55, 16  ;;  %v12471_v44 = vpop.eup %12470  ;;  %v2872_v11 = vor.u32 %v2871_v46, %v14210_v51  ;;  %11473 = vmatprep.subr.bf16.mxu0 %v12246_v45  ;;  %17302 = vst [vmem:[#allocation16_spill] sm:$0xff] %v14226_v20  ;;  %v12247_v55 = vld [vmem:[%s17205_s3 + $0x20] sm:$0xff]  }
 0x17e   : > { %v12473_v4 = vpop.eup %12472  ;;  %4310 = vrot.lane.b32.xlu0 %v10989_v43, %s12673_s20  ;;  %v1071_v15 = vmul.f32 %v12471_v44, %v14062_v27  ;;  %v2877_v37 = vrot.slane %v2875_v58, 5  ;;  %v2072_v27 = vsel %vm12840_vm12, %v2067_v50, %v2071_v22  ;;  %v4108_v45 = vshll.u32 %v3846_v24, 16  ;;  %11474 = vmatpush3.bf16.msra.mxu0 %v12247_v55  ;;  %v1593_v20 = vld [vmem:[#allocation2 + $0xa8] sm:$0xf] }
 0x17f   : > { %v3505_v8 = vsel %vm12813_vm9, %v3503_v40, %v3504_v14  ;;  %v1072_v29 = vmul.f32 %v12473_v4, %v14071_v52  ;;  %v2873_v62 = vrot.slane %v2872_v11, 4  ;;  %v2858_v2 = vrot.slane %v2856_v25, 4  ;;  %v3847_v40 = vld [vmem:[#allocation2 + $0x94] sm:$0xf]  ;;  %v3848_v25 = vld [vmem:[#allocation2 + $0x98] sm:$0x1] }
 0x180   : > { %v10962_v16 = vcombine.low %v3502_v56, %v3505_v8  ;;  %v2861_v14 = vrot.slane %v2859_v61, 5  ;;  %v11427_v43 = vpack.c.bf16 %v1071_v15, %v1071_v15  ;;  %v4107_v56 = vrot.slane %v4105_v10, 4  ;;  %v12250_v55 = vld [vmem:[%s17205_s3 + $0x28] sm:$0xff]  }
 0x181   : > { %v14229_v46 = vpop.permute.xlu0 %3585  ;;  %v11428_v31 = vpack.c.bf16 %v1072_v29, %v1072_v29  ;;  %v10864_v58 = vcombine.low %v2062_v41, %v2072_v27  ;;  %v2878_v52 = vsel %vm12840_vm12, %v2873_v62, %v2877_v37  ;;  %v4110_v11 = vrot.slane %v4108_v45, 5  ;;  %v2345_v41 = vld [vmem:[#allocation2 + $0x9c] sm:$0xe]  ;;  %v14244_v62 = vpop.permute.xlu1 %2579  ;;  %v2347_v45 = vld [vmem:[#allocation2 + $0xa4] sm:$0x1] }
 0x182   : > { %17303 = vst [vmem:[#allocation17_spill] sm:$0xff] %v14229_v46  ;;  %v2862_v4 = vor.u32 %v2861_v14, %v2858_v2  ;;  %3599 = vrot.lane.b32.xlu0 %v10962_v16, %s12672_s15  ;;  %v1398_v44 = vshrl.u32 %v11427_v43, 16  ;;  %v1401_v8 = vshll.u32 %v11427_v43, 16  ;;  %v4114_v61 = vshll.u32 %v3847_v40, 16  ;;  %v2810_v16 = vld [vmem:[#allocation2 + $0x18] sm:$0xf] }
 0x183   : > { %v1406_v15 = vshrl.u32 %v11428_v31, 16  ;;  %v1409_v46 = vshll.u32 %v11428_v31, 16  ;;  %2261 = vrot.lane.b32.xlu1 %v10864_v58, %s12672_s15  ;;  %v4118_v24 = vshrl.u32 %v3847_v40, 16  ;;  %v4111_v2 = vor.u32 %v4110_v11, %v4107_v56  ;;  %17305 = vst [vmem:[#allocation19_spill] sm:$0xff] %v14244_v62  ;;  %v12249_v14 = vld [vmem:[%s17205_s3 + $0x68] sm:$0xff]  }
 0x184   : > { %v2863_v22 = vrot.slane %v2862_v4, 4  ;;  %v1400_v37 = vrot.slane %v1398_v44, 7  ;;  %v14242_v50 = vrot.slane %v4114_v61, 5  ;;  %v4124_v29 = vshll.u32 %v3848_v25, 16  ;;  %v2346_v56 = vld [vmem:[#allocation2 + $0xa0] sm:$0xf]  ;;  %11475 = vmatprep.subr.bf16.mxu0 %v12249_v14 }
 0x185   : > { %v14240_v10 = vpop.permute.xlu0 %3587  ;;  %v1408_v40 = vrot.slane %v1406_v15, 7  ;;  %v4120_v27 = vrot.slane %v4118_v24, 4  ;;  %v2811_v31 = vld [vmem:[#allocation2 + $0x1c] sm:$0xf]  ;;  %v14257_v58 = vadd.f32 %v17285_v57, %v14167_v9  ;;  %v1597_v44 = vld [vmem:[#allocation2 + $0xb0] sm:$0x1]  ;;  %11476 = vmatpush3.bf16.msra.mxu0 %v12250_v55 }
 0x186   : > { %17304 = vst [vmem:[#allocation18_spill] sm:$0xff] %v14240_v10  ;;  %v2868_v43 = vsel %vm12840_vm12, %v2863_v22, %v14210_v51  ;;  %4312 = vrot.lane.b32.xlu0 %v14196_v26, %s12673_s20  ;;  %v1403_v4 = vor.u32 %v1401_v8, %v1400_v37  ;;  %v1404_v25 = vrot.slane %v1400_v37, 4  ;;  %v10883_v61 = vrot.slane %v2345_v41, 9  ;;  %v2812_v24 = vld [vmem:[#allocation2 + $0x20] sm:$0x1]  ;;  %v14271_v41 = vpop.permute.xlu1 %2581  ;;  %v12252_v37 = vld [vmem:[%s17205_s3 + $0x30] sm:$0xff]  }
 0x187   : > { %v10918_v11 = vcombine.low %v2868_v43, %v2878_v52  ;;  %v1411_v15 = vor.u32 %v1409_v46, %v1408_v40  ;;  %v1413_v10 = vrot.slane %v1408_v40, 4  ;;  %v14261_v51 = vrot.slane %v4111_v2, 4  ;;  %v12251_v46 = vld [vmem:[%s17205_s3 + $0x70] sm:$0xff]  }
 0x188   : > { %v4121_v22 = vor.u32 %v4120_v27, %v14242_v50  ;;  %v1594_v9 = vsel %vm13303_vm15, %v1403_v4, %v1593_v20  ;;  %v14269_v26 = vrot.slane %v4124_v29, 5  ;;  %v2498_v52 = vrot.slane %v2346_v56, 5  ;;  %v499_v55 = vld [vmem:[#allocation2 + $0xb4] sm:$0x1]  ;;  %11477 = vmatprep.subr.bf16.mxu0 %v12251_v46 }
 0x189   : > { %v14264_v62 = vpop.permute.xlu0 %3589  ;;  %3303 = vst.msk [vmem:[#allocation3 + $0x8] sm:$0xff] %vm598_vm6, %v10918_v11  ;;  %v2501_v8 = vrot.slane %v2347_v45, 5  ;;  %v1412_v2 = vsel %vm13311_vm1, %v1404_v25, %v1411_v15  ;;  %1595 = vst [vmem:[#allocation2 + $0xa8] sm:$0xf] %v1594_v9  ;;  %v1598_v20 = vsel %vm13364_vm8, %v1413_v10, %v1597_v44  ;;  %v2880_v14 = vshrl.u32 %v2810_v16, 16  ;;  %11478 = vmatpush3.bf16.msra.mxu0 %v12252_v37  ;;  %v12254_v9 = vld [vmem:[#allocation2 + $0xc] sm:$0xff]  }
 0x18a   : > { %3623 = vst.msk [vmem:[#allocation3 + $0x8] sm:$0xff] %vm2289_vm2, %v14124_v21  ;;  %v4122_v29 = vrot.slane %v4121_v22, 4  ;;  %1599 = vst [vmem:[#allocation2 + $0xb0] sm:$0x1] %v1598_v20  ;;  %v2499_v40 = vsel %vm12813_vm9, %v10883_v61, %v2498_v52  ;;  %v2500_v43 = vrot.slane %v2498_v52, 4  ;;  %v2883_v27 = vshll.u32 %v2810_v16, 16  ;;  %v2244_v22 = vpop.permute.xlu1 %2243 }
 0x18b   : > { %1596 = vst.msk [vmem:[#allocation2 + $0xac] sm:$0xf] %vm1497_vm13, %v1412_v2  ;;  %v2889_v56 = vshll.u32 %v2811_v31, 16  ;;  %v1791_v45 = vld [vmem:[#allocation2 + $0x84] sm:$0xf]  ;;  %v4117_v21 = vsel %vm12840_vm12, %v14261_v51, %v14242_v50  ;;  %v2882_v10 = vrot.slane %v2880_v14, 4 }
 0x18c   : > { %3800 = vst.msk [vmem:[#allocation3 + $0x8] sm:$0xff] %vm2613_vm10, %v13911_v23  ;;  %v2893_v4 = vshrl.u32 %v2811_v31, 16  ;;  %v2899_v25 = vshll.u32 %v2812_v24, 16  ;;  %v1792_v44 = vld [vmem:[#allocation2 + $0x88] sm:$0xf]  ;;  %v4127_v23 = vsel %vm12840_vm12, %v4122_v29, %v14269_v26  ;;  %v2502_v16 = vsel %vm12813_vm9, %v2500_v43, %v2501_v8  ;;  %v12255_v50 = vld [vmem:[%s17205_s3 + $0x78] sm:$0xff]  }
 0x18d   : > { %v14294_v11 = vpop.permute.xlu0 %3591  ;;  %v2885_v61 = vrot.slane %v2883_v27, 5  ;;  %v2891_v15 = vrot.slane %v2889_v56, 5  ;;  %v12256_v31 = vld [vmem:[%s17205_s3 + $0x38] sm:$0xff]   ;;  %v10899_v51 = vcombine.low %v2499_v40, %v2502_v16  ;;  %v500_v26 = vsel %vm12763_vm3, 0, %v499_v55  ;;  %1743 = vst.msk [vmem:[#allocation3 + $0x28] sm:$0xff] %vm598_vm6, %v12254_v9  ;;  %11479 = vmatprep.subr.bf16.mxu0 %v12255_v50 }
 0x18e   : > { %v2895_v24 = vrot.slane %v2893_v4, 4  ;;  %v2901_v52 = vrot.slane %v2899_v25, 5  ;;  %501 = vst [vmem:[#allocation2 + $0xb4] sm:$0x1] %v500_v26  ;;  %v10802_v8 = vmul.f32 -1.442695, %v14171_v17  ;;  %11480 = vmatpush3.bf16.msra.mxu0 %v12256_v31  ;;  %v14333_v31 = vcombine.low %v4117_v21, %v4127_v23 }
 0x18f   : > { %v2886_v46 = vor.u32 %v2885_v61, %v2882_v10  ;;  %v10803_v37 = vmul.f32 -1.442695, %v14257_v58  ;;  %v2074_v2 = vshrl.u32 %v1791_v45, 16  ;;  %2591 = vrot.lane.b32.xlu1 %v10899_v51, %s12671_s14  ;;  %v1793_v29 = vld [vmem:[#allocation2 + $0x8c] sm:$0x1]  ;;  %v2077_v14 = vshll.u32 %v1791_v45, 16  ;;  %v14321_v45 = vpop.permute.xlu1 %2758 }
 0x190   : > { %v2896_v20 = vor.u32 %v2895_v24, %v2891_v15  ;;  %v2083_v40 = vshll.u32 %v1792_v44, 16  ;;  %v2087_v43 = vshrl.u32 %v1792_v44, 16  ;;  %2291 = vst.msk [vmem:[#allocation3 + $0x28] sm:$0xff] %vm2289_vm2, %v2244_v22  ;;  %v3358_v55 = vld [vmem:[#allocation2 + $0xa8] sm:$0xe]  ;;  %12474 = vpow2.f32 %v10802_v8  ;;  %v12627_v25 = vld [vmem:[%s12783_s30 + $0xf8] sm:$0xff] }
 0x191   : > { %v4297_v27 = vpop.permute.xlu0 %4296  ;;  %v2887_v56 = vrot.slane %v2886_v46, 4  ;;  %v2076_v10 = vrot.slane %v2074_v2, 4  ;;  %v2813_v4 = vld [vmem:[#allocation2 + $0x24] sm:$0xf]  ;;  %v14316_v16 = vmul.f32 %v12627_v25, %v17288_v0  ;;  %2615 = vst.msk [vmem:[#allocation3 + $0x28] sm:$0xff] %vm2613_vm10, %v14121_v34  ;;  %v17306_v61 = vsel %vm12840_vm12, %v14161_v63, %v14159_v54 }
 0x192   : > { %4344 = vst.msk [vmem:[#allocation3 + $0x8] sm:$0xff] %vm2790_vm11, %v4297_v27  ;;  %v12233_v44 = vld [vmem:[#allocation2 + $0xa8] sm:$0xff]   ;;  %v17307_v22 = vsel %vm12840_vm12, %v14151_v13, %v14130_v7  ;;  %v10947_v50 = vrot.slane %v3358_v55, 9  ;;  %12476 = vpow2.f32 %v10803_v37  ;;  %2792 = vst.msk [vmem:[#allocation3 + $0x28] sm:$0xff] %vm2790_vm11, %v13953_v6  ;;  %v3360_v51 = vld [vmem:[#allocation2 + $0xb0] sm:$0x1] }
 0x193   : > { %v10991_v0 = vcombine.low %v17307_v22, %v17306_v61  ;;  %v3359_v9 = vld [vmem:[#allocation2 + $0xac] sm:$0xf]  ;;  %v2814_v34 = vld [vmem:[#allocation2 + $0x28] sm:$0xf]  ;;  %v2892_v54 = vsel %vm12840_vm12, %v2887_v56, %v2891_v15  ;;  %v2897_v63 = vrot.slane %v2896_v20, 4  ;;  %v2079_v26 = vrot.slane %v2077_v14, 5  ;;  %3776 = vrot.lane.b32.xlu0 %v12233_v44, %s12671_s14  ;;  %v2246_v20 = vpop.permute.xlu1 %2245 }
 0x194   : > { %v3508_v24 = vrot.slane %v3359_v9, 5  ;;  %v3511_v7 = vrot.slane %v3360_v51, 5  ;;  %v2085_v13 = vrot.slane %v2083_v40, 5  ;;  %v2089_v46 = vrot.slane %v2087_v43, 4  ;;  %v12258_v15 = vld [vmem:[%s17205_s3 + $0x80] sm:$0xff]  }
 0x195   : > { %v2093_v8 = vshll.u32 %v1793_v29, 16  ;;  %v14340_v21 = vpop.permute.xlu0 %3768  ;;  %v2902_v6 = vsel %vm12840_vm12, %v2897_v63, %v2901_v52  ;;  %v2080_v2 = vor.u32 %v2079_v26, %v2076_v10  ;;  %v2815_v43 = vld [vmem:[#allocation2 + $0x2c] sm:$0x1]  ;;  %v2904_v29 = vshrl.u32 %v2813_v4, 16  ;;  %v3849_v61 = vld [vmem:[#allocation2 + $0x9c] sm:$0xf]  ;;  %11885 = vmatprep.subr.bf16.mxu0 %v12258_v15  ;;  %12093 = vmatprep.subr.bf16.mxu1 %v12258_v15 }
 0x196   : > { %v3509_v23 = vsel %vm12813_vm9, %v10947_v50, %v3508_v24  ;;  %v3510_v37 = vrot.slane %v3508_v24, 4  ;;  %v10919_v14 = vcombine.low %v2892_v54, %v2902_v6  ;;  %v2090_v27 = vor.u32 %v2089_v46, %v2085_v13  ;;  %v12259_v52 = vld [vmem:[#allocation2 + $0x18] sm:$0xff]   ;;  %v3850_v51 = vld [vmem:[#allocation2 + $0xa0] sm:$0xf]  ;;  %12095 = vmatpush3.bf16.msra.mxu1 %v12258_v15  ;;  %v6515_v12 = vld [vmem:[#allocation2 + $0xb0] sm:$0x1] }
 0x197   : > { %v2095_v40 = vrot.slane %v2093_v8, 5  ;;  %v2081_v56 = vrot.slane %v2080_v2, 4  ;;  %v2907_v25 = vshll.u32 %v2813_v4, 16  ;;  %v2913_v44 = vshll.u32 %v2814_v34, 16  ;;  %4314 = vrot.lane.b32.xlu0 %v10991_v0, %s12673_s20  ;;  %1744 = vst.msk [vmem:[#allocation3 + $0x50] sm:$0xff] %vm598_vm6, %v12259_v52  ;;  %v14360_v46 = vpop.permute.xlu1 %2583  ;;  %v12236_v52 = vld [vmem:[#allocation2 + $0xa8] sm:$0xff]  }
 0x198   : > { %v3512_v55 = vsel %vm12813_vm9, %v3510_v37, %v3511_v7  ;;  %3304 = vst.msk [vmem:[#allocation3 + $0x30] sm:$0xff] %vm598_vm6, %v10919_v14  ;;  %v2091_v22 = vrot.slane %v2090_v27, 4  ;;  %v2906_v9 = vrot.slane %v2904_v29, 4  ;;  %v2917_v50 = vshrl.u32 %v2814_v34, 16  ;;  %v4648_v7 = vld [vmem:[#allocation3] sm:$0xff] }
 0x199   : > { %v10963_v10 = vcombine.low %v3509_v23, %v3512_v55  ;;  %v4299_v24 = vpop.permute.xlu0 %4298  ;;  %v4649_v54 = vld [vmem:[#allocation3 + $0x8] sm:$0xff]  ;;  %3624 = vst.msk [vmem:[#allocation3 + $0x30] sm:$0xff] %vm2289_vm2, %v14132_v53  ;;  %v2086_v4 = vsel %vm12840_vm12, %v2081_v56, %v2085_v13  ;;  %v2909_v63 = vrot.slane %v2907_v25, 5  ;;  %v14357_v26 = vrot.slane %v2913_v44, 5  ;;  %2292 = vst.msk [vmem:[#allocation3 + $0x50] sm:$0xff] %vm2289_vm2, %v2246_v20  ;;  %v12261_v25 = vld [vmem:[#allocation2 + $0x30] sm:$0xff]  }
 0x19a   : > { %v2923_v0 = vshll.u32 %v2815_v43, 16  ;;  %4926 = vmatprep.mubr.bf16.mxu0 %v4649_v54  ;;  %3801 = vst.msk [vmem:[#allocation3 + $0x30] sm:$0xff] %vm2613_vm10, %v13942_v30  ;;  %v2096_v34 = vsel %vm12840_vm12, %v2091_v22, %v2095_v40  ;;  %v2919_v53 = vrot.slane %v2917_v50, 4  ;;  %v4129_v8 = vshrl.u32 %v3849_v61, 16  ;;  %v12260_v13 = vld [vmem:[#allocation2 + $0x24] sm:$0xff]   ;;  %v12475_v37 = vpop.eup %12474  ;;  %2616 = vst.msk [vmem:[#allocation3 + $0x50] sm:$0xff] %vm2613_vm10, %v14126_v39 }
 0x19b   : > { %v4132_v23 = vshll.u32 %v3849_v61, 16  ;;  %4927 = vmatmul.mubr.bf16.vlgmr.msra.gmra.mrb[0].mxu0 %v4648_v7  ;;  %v10865_v6 = vcombine.low %v2086_v4, %v2096_v34  ;;  %v2910_v2 = vor.u32 %v2909_v63, %v2906_v9  ;;  %v3851_v27 = vld [vmem:[#allocation2 + $0xa4] sm:$0x1]  ;;  %v4138_v43 = vshll.u32 %v3850_v51, 16  ;;  %4345 = vst.msk [vmem:[#allocation3 + $0x30] sm:$0xff] %vm2790_vm11, %v4299_v24  ;;  %3601 = vrot.lane.b32.xlu0 %v10963_v10, %s12672_s15  ;;  %v2248_v22 = vpop.permute.xlu1 %2247  ;;  %v12262_v7 = vld [vmem:[#allocation2 + $0x3c] sm:$0xff]  }
 0x19c   : > { %v2925_v14 = vrot.slane %v2923_v0, 5  ;;  %11886 = vmatpush3.bf16.msra.mxu0 %v12258_v15  ;;  %v12477_v30 = vpop.eup %12476  ;;  %v977_v40 = vadd.f32 1.0, %v12475_v37  ;;  %v2920_v29 = vor.u32 %v2919_v53, %v14357_v26  ;;  %v4131_v20 = vrot.slane %v4129_v8, 4  ;;  %v2816_v56 = vld [vmem:[#allocation2 + $0x30] sm:$0xf]  ;;  %2793 = vst.msk [vmem:[#allocation3 + $0x50] sm:$0xff] %vm2790_vm11, %v13977_v47 }
 0x19d   : > { %v4134_v55 = vrot.slane %v4132_v23, 5  ;;  %1745 = vst.msk [vmem:[#allocation3 + $0x78] sm:$0xff] %vm598_vm6, %v12260_v13  ;;  %v978_v44 = vadd.f32 1.0, %v12477_v30  ;;  %2263 = vrot.lane.b32.xlu1 %v10865_v6, %s12672_s15  ;;  %v2911_v15 = vrot.slane %v2910_v2, 4  ;;  %v14376_v39 = vrot.slane %v4138_v43, 5  ;;  %v14378_v10 = vpop.permute.xlu0 %3593  ;;  %1746 = vst.msk [vmem:[#allocation3 + $0xa0] sm:$0xff] %vm598_vm6, %v12261_v25 }
 0x19e   : > { %v4142_v61 = vshrl.u32 %v3850_v51, 16  ;;  %12478 = vrcp.f32 %v977_v40  ;;  %v2921_v9 = vrot.slane %v2920_v29, 4  ;;  %v4148_v24 = vshll.u32 %v3851_v27, 16  ;;  %v2817_v54 = vld [vmem:[#allocation2 + $0x34] sm:$0xf]  ;;  %2293 = vst.msk [vmem:[#allocation3 + $0x78] sm:$0xff] %vm2289_vm2, %v2248_v22 }
 0x19f   : > { %v4135_v50 = vor.u32 %v4134_v55, %v4131_v20  ;;  %v555_v47 = vld [vmem:[#allocation2 + $0xbc] sm:$0x1]  ;;  %12480 = vrcp.f32 %v978_v44  ;;  %v2916_v4 = vsel %vm12840_vm12, %v2911_v15, %v14357_v26  ;;  %v2818_v63 = vld [vmem:[#allocation2 + $0x38] sm:$0x1]  ;;  %v2928_v0 = vshrl.u32 %v2816_v56, 16  ;;  %2617 = vst.msk [vmem:[#allocation3 + $0x78] sm:$0xff] %vm2613_vm10, %v14134_v19  ;;  %4316 = vrot.lane.b32.xlu0 %v14333_v31, %s12673_s20  ;;  %v14401_v27 = vpop.permute.xlu1 %2760 }
 0x1a0   : > { %v4144_v51 = vrot.slane %v4142_v61, 4  ;;  %v12263_v34 = vld [vmem:[#allocation2 + $0x48] sm:$0xff]   ;;  %v2926_v53 = vsel %vm12840_vm12, %v2921_v9, %v2925_v14  ;;  %v2931_v23 = vshll.u32 %v2816_v56, 16  ;;  %v1794_v13 = vld [vmem:[#allocation2 + $0x90] sm:$0xf]  ;;  %v14395_v26 = vadd.f32 %v17285_v57, %v14189_v18  ;;  %2794 = vst.msk [vmem:[#allocation3 + $0x78] sm:$0xff] %vm2790_vm11, %v13996_v59 }
 0x1a1   : > { %v14391_v8 = vrot.slane %v4135_v50, 4  ;;  %v12264_v19 = vld [vmem:[#allocation2 + $0x54] sm:$0xff]   ;;  %v10920_v37 = vcombine.low %v2916_v4, %v2926_v53  ;;  %2768 = vrot.lane.b32.xlu1 %v12236_v52, %s12673_s20  ;;  %v2930_v31 = vrot.slane %v2928_v0, 4  ;;  %v2937_v2 = vshll.u32 %v2817_v54, 16  ;;  %1747 = vst.msk [vmem:[#allocation3 + $0xc8] sm:$0xff] %vm598_vm6, %v12262_v7  ;;  %1748 = vst.msk [vmem:[#allocation3 + $0xf0] sm:$0xff] %vm598_vm6, %v12263_v34  ;;  %v4301_v44 = vpop.permute.xlu0 %4300 }
 0x1a2   : > { %v4145_v6 = vor.u32 %v4144_v51, %v14376_v39  ;;  %v1795_v14 = vld [vmem:[#allocation2 + $0x94] sm:$0xf]  ;;  %v14405_v18 = vrot.slane %v4148_v24, 5  ;;  %v2933_v43 = vrot.slane %v2931_v23, 5  ;;  %v2941_v30 = vshrl.u32 %v2817_v54, 16  ;;  %v4652_v29 = vld [vmem:[#allocation3 + $0x30] sm:$0xff] }
 0x1a3   : > { %v2947_v59 = vshll.u32 %v2818_v63, 16  ;;  %v2819_v40 = vld [vmem:[#allocation2 + $0x3c] sm:$0xf]  ;;  %1749 = vst.msk [vmem:[#allocation3 + $0x118] sm:$0xff] %vm598_vm6, %v12264_v19  ;;  %3305 = vst.msk [vmem:[#allocation3 + $0x58] sm:$0xff] %vm598_vm6, %v10920_v37  ;;  %v2939_v55 = vrot.slane %v2937_v2, 5  ;;  %4934 = vmatprep.mubr.bf16.mxu0 %v4652_v29  ;;  %v4141_v52 = vsel %vm12840_vm12, %v14391_v8, %v14376_v39 }
 0x1a4   : > { %v14409_v20 = vrot.slane %v4145_v6, 4  ;;  %v556_v56 = vsel %vm12773_vm5, 0, %v555_v47  ;;  %v2098_v25 = vshrl.u32 %v1794_v13, 16  ;;  %v4651_v15 = vld [vmem:[#allocation3 + $0x28] sm:$0xff]  ;;  %3625 = vst.msk [vmem:[#allocation3 + $0x58] sm:$0xff] %vm2289_vm2, %v14154_v33  ;;  %v2934_v22 = vor.u32 %v2933_v43, %v2930_v31  ;;  %v12266_v54 = vld [vmem:[#allocation2 + $0x6c] sm:$0xff]   ;;  %v2250_v33 = vpop.permute.xlu1 %2249 }
 0x1a5   : > { %v12265_v61 = vld [vmem:[#allocation2 + $0x60] sm:$0xff]   ;;  %v2943_v9 = vrot.slane %v2941_v30, 4  ;;  %557 = vst [vmem:[#allocation2 + $0xbc] sm:$0x1] %v556_v56  ;;  %v1796_v50 = vld [vmem:[#allocation2 + $0x98] sm:$0x1]  ;;  %4935 = vmatmul.mubr.bf16.gmra.mrb[4].mxu0 %v4651_v15 }
 0x1a6   : > { %v2101_v24 = vshll.u32 %v1794_v13, 16  ;;  %3802 = vst.msk [vmem:[#allocation3 + $0x58] sm:$0xff] %vm2613_vm10, %v13975_v5  ;;  %v2949_v47 = vrot.slane %v2947_v59, 5  ;;  %v2100_v4 = vrot.slane %v2098_v25, 4  ;;  %v2107_v51 = vshll.u32 %v1795_v14, 16  ;;  %v12267_v0 = vld [vmem:[%s17205_s3 + $0x88] sm:$0xff]  }
 0x1a7   : > { %v2111_v63 = vshrl.u32 %v1795_v14, 16  ;;  %1750 = vst.msk [vmem:[#allocation3 + $0x140] sm:$0xff] %vm598_vm6, %v12265_v61  ;;  %v4151_v7 = vsel %vm12840_vm12, %v14409_v20, %v14405_v18  ;;  %v2935_v34 = vrot.slane %v2934_v22, 4  ;;  %v2944_v53 = vor.u32 %v2943_v9, %v2939_v55  ;;  %v2820_v5 = vld [vmem:[#allocation2 + $0x40] sm:$0xf]  ;;  %1751 = vst.msk [vmem:[#allocation3 + $0x168] sm:$0xff] %vm598_vm6, %v12266_v54  ;;  %11887 = vmatprep.subr.bf16.mxu0 %v12267_v0 }
 0x1a8   : > { %v2103_v23 = vrot.slane %v2101_v24, 5  ;;  %4346 = vst.msk [vmem:[#allocation3 + $0x58] sm:$0xff] %vm2790_vm11, %v4301_v44  ;;  %v2109_v13 = vrot.slane %v2107_v51, 5  ;;  %v2117_v37 = vshll.u32 %v1796_v50, 16  ;;  %v2952_v6 = vshrl.u32 %v2819_v40, 16  ;;  %v12268_v31 = vld [vmem:[#allocation2 + $0x78] sm:$0xff]   ;;  %12094 = vmatprep.subr.bf16.mxu1 %v12267_v0  ;;  %v12479_v2 = vpop.eup %12478  ;;  %11888 = vmatpush3.bf16.msra.mxu0 %v12267_v0 }
 0x1a9   : > { %2294 = vst.msk [vmem:[#allocation3 + $0xa0] sm:$0xff] %vm2289_vm2, %v2250_v33  ;;  %v2113_v19 = vrot.slane %v2111_v63, 4  ;;  %v2940_v14 = vsel %vm12840_vm12, %v2935_v34, %v2939_v55  ;;  %v2945_v43 = vrot.slane %v2944_v53, 4  ;;  %v2955_v59 = vshll.u32 %v2819_v40, 16  ;;  %12096 = vmatpush3.bf16.msra.mxu1 %v12267_v0  ;;  %v12481_v29 = vpop.eup %12480  ;;  %v14443_v22 = vpop.permute.xlu0 %3770  ;;  %v3852_v33 = vld [vmem:[#allocation2 + $0xa8] sm:$0xf] }
 0x1aa   : > { %2618 = vst.msk [vmem:[#allocation3 + $0xa0] sm:$0xff] %vm2613_vm10, %v14156_v60  ;;  %v2104_v30 = vor.u32 %v2103_v23, %v2100_v4  ;;  %v1073_v56 = vmul.f32 %v12479_v2, %v14171_v17  ;;  %v2119_v60 = vrot.slane %v2117_v37, 5  ;;  %v2954_v44 = vrot.slane %v2952_v6, 4  ;;  %v2821_v4 = vld [vmem:[#allocation2 + $0x44] sm:$0x1]  ;;  %v4654_v2 = vld [vmem:[#allocation3 + $0x50] sm:$0xff] }
 0x1ab   : > { %2795 = vst.msk [vmem:[#allocation3 + $0xa0] sm:$0xff] %vm2790_vm11, %v14025_v32  ;;  %v2114_v25 = vor.u32 %v2113_v19, %v2109_v13  ;;  %v1074_v15 = vmul.f32 %v12481_v29, %v14257_v58  ;;  %v2950_v55 = vsel %vm12840_vm12, %v2945_v43, %v2949_v47  ;;  %v2957_v40 = vrot.slane %v2955_v59, 5  ;;  %v14447_v58 = vpop.permute.xlu1 %2585  ;;  %v3853_v23 = vld [vmem:[#allocation2 + $0xac] sm:$0xf]  ;;  %v1600_v43 = vld [vmem:[#allocation2 + $0xb4] sm:$0xf] }
 0x1ac   : > { %1752 = vst.msk [vmem:[#allocation3 + $0x190] sm:$0xff] %vm598_vm6, %v12268_v31  ;;  %v2105_v61 = vrot.slane %v2104_v30, 4  ;;  %v11429_v32 = vpack.c.bf16 %v1073_v56, %v1073_v56  ;;  %v10921_v9 = vcombine.low %v2940_v14, %v2950_v55  ;;  %v2961_v24 = vshll.u32 %v2820_v5, 16 }
 0x1ad   : > { %v2115_v50 = vrot.slane %v2114_v25, 4  ;;  %v11430_v54 = vpack.c.bf16 %v1074_v15, %v1074_v15  ;;  %v2958_v51 = vor.u32 %v2957_v40, %v2954_v44  ;;  %v2965_v63 = vshrl.u32 %v2820_v5, 16  ;;  %v4303_v31 = vpop.permute.xlu0 %4302  ;;  %v3854_v25 = vld [vmem:[#allocation2 + $0xb0] sm:$0x1] }
 0x1ae   : > { %v2110_v17 = vsel %vm12840_vm12, %v2105_v61, %v2109_v13  ;;  %v1415_v0 = vshrl.u32 %v11429_v32, 16  ;;  %v1418_v47 = vshll.u32 %v11429_v32, 16  ;;  %3306 = vst.msk [vmem:[#allocation3 + $0x80] sm:$0xff] %vm598_vm6, %v10921_v9  ;;  %v2963_v53 = vrot.slane %v2961_v24, 5  ;;  %v1604_v61 = vld [vmem:[#allocation2 + $0xbc] sm:$0x1] }
 0x1af   : > { %v2120_v34 = vsel %vm12840_vm12, %v2115_v50, %v2119_v60  ;;  %v4655_v19 = vld [vmem:[#allocation3 + $0x58] sm:$0xff]  ;;  %v1423_v37 = vshrl.u32 %v11430_v54, 16  ;;  %v1426_v6 = vshll.u32 %v11430_v54, 16  ;;  %3626 = vst.msk [vmem:[#allocation3 + $0x80] sm:$0xff] %vm2289_vm2, %v14173_v36  ;;  %v2959_v5 = vrot.slane %v2958_v51, 4  ;;  %v12269_v32 = vld [vmem:[#allocation2 + $0x84] sm:$0xff]  }
 0x1b0   : > { %v10866_v13 = vcombine.low %v2110_v17, %v2120_v34  ;;  %4942 = vmatprep.mubr.bf16.mxu0 %v4655_v19  ;;  %v1417_v14 = vrot.slane %v1415_v0, 7  ;;  %3803 = vst.msk [vmem:[#allocation3 + $0x80] sm:$0xff] %vm2613_vm10, %v14013_v42  ;;  %v2967_v30 = vrot.slane %v2965_v63, 4  ;;  %v2971_v59 = vshll.u32 %v2821_v4, 16  ;;  %v1797_v17 = vld [vmem:[#allocation2 + $0x9c] sm:$0xf] }
 0x1b1   : > { %v4153_v29 = vshrl.u32 %v3852_v33, 16  ;;  %4943 = vmatmul.mubr.bf16.gmra.mrb[8].mxu0 %v4654_v2  ;;  %v1425_v56 = vrot.slane %v1423_v37, 7  ;;  %v2964_v36 = vsel %vm12840_vm12, %v2959_v5, %v2963_v53  ;;  %v4156_v60 = vshll.u32 %v3852_v33, 16  ;;  %4347 = vst.msk [vmem:[#allocation3 + $0x80] sm:$0xff] %vm2790_vm11, %v4303_v31  ;;  %v14460_v4 = vpop.permute.xlu0 %3595  ;;  %v1798_v34 = vld [vmem:[#allocation2 + $0xa0] sm:$0xf] }
 0x1b2   : > { %2265 = vrot.lane.b32.xlu1 %v10866_v13, %s12672_s15  ;;  %v4162_v44 = vshll.u32 %v3853_v23, 16  ;;  %v1420_v15 = vor.u32 %v1418_v47, %v1417_v14  ;;  %v1421_v55 = vrot.slane %v1417_v14, 4  ;;  %v2968_v40 = vor.u32 %v2967_v30, %v2963_v53  ;;  %v2252_v51 = vpop.permute.xlu1 %2251  ;;  %1753 = vst.msk [vmem:[#allocation3 + $0x1b8] sm:$0xff] %vm598_vm6, %v12269_v32  ;;  %v2822_v13 = vld [vmem:[#allocation2 + $0x48] sm:$0xf] }
 0x1b3   : > { %v2973_v42 = vrot.slane %v2971_v59, 5  ;;  %v1428_v9 = vor.u32 %v1426_v6, %v1425_v56  ;;  %v1430_v50 = vrot.slane %v1425_v56, 4  ;;  %v4155_v24 = vrot.slane %v4153_v29, 4  ;;  %2295 = vst.msk [vmem:[#allocation3 + $0xc8] sm:$0xff] %vm2289_vm2, %v2252_v51  ;;  %v1799_v31 = vld [vmem:[#allocation2 + $0xa4] sm:$0x1] }
 0x1b4   : > { %v4158_v54 = vrot.slane %v4156_v60, 5  ;;  %v1601_v63 = vsel %vm13303_vm15, %v1420_v15, %v1600_v43  ;;  %v2969_v33 = vrot.slane %v2968_v40, 4  ;;  %v14464_v0 = vrot.slane %v4162_v44, 5  ;;  %2619 = vst.msk [vmem:[#allocation3 + $0xc8] sm:$0xff] %vm2613_vm10, %v14185_v35  ;;  %v17308_v43 = vld [vmem:[#allocation10_spill] sm:$0xff] }
 0x1b5   : > { %v4166_v47 = vshrl.u32 %v3853_v23, 16  ;;  %v1429_v53 = vsel %vm13311_vm1, %v1421_v55, %v1428_v9  ;;  %1602 = vst [vmem:[#allocation2 + $0xb4] sm:$0xf] %v1601_v63  ;;  %v1605_v19 = vsel %vm13364_vm8, %v1430_v50, %v1604_v61  ;;  %v4172_v6 = vshll.u32 %v3854_v25, 16  ;;  %2796 = vst.msk [vmem:[#allocation3 + $0xc8] sm:$0xff] %vm2790_vm11, %v17308_v43  ;;  %v4305_v9 = vpop.permute.xlu0 %4304  ;;  %v4657_v50 = vld [vmem:[#allocation3 + $0x78] sm:$0xff] }
 0x1b6   : > { %v4159_v37 = vor.u32 %v4158_v54, %v4155_v24  ;;  %1603 = vst.msk [vmem:[#allocation2 + $0xb8] sm:$0xf] %vm1497_vm13, %v1429_v53  ;;  %1606 = vst [vmem:[#allocation2 + $0xbc] sm:$0x1] %v1605_v19  ;;  %v2974_v23 = vsel %vm12840_vm12, %v2969_v33, %v2973_v42  ;;  %v2122_v2 = vshrl.u32 %v1797_v17, 16  ;;  %v2125_v14 = vshll.u32 %v1797_v17, 16  ;;  %v14480_v61 = vpop.permute.xlu1 %2762 }
 0x1b7   : > { %v4168_v5 = vrot.slane %v4166_v47, 4  ;;  %v10922_v30 = vcombine.low %v2964_v36, %v2974_v23  ;;  %v4174_v29 = vrot.slane %v4172_v6, 5  ;;  %v2131_v56 = vshll.u32 %v1798_v34, 16  ;;  %v2823_v15 = vld [vmem:[#allocation2 + $0x4c] sm:$0xf]  ;;  %v17309_v24 = vld [vmem:[#allocation15_spill] sm:$0xff] }
 0x1b8   : > { %v4160_v59 = vrot.slane %v4159_v37, 4  ;;  %v2124_v35 = vrot.slane %v2122_v2, 4  ;;  %v2127_v60 = vrot.slane %v2125_v14, 5  ;;  %v2135_v44 = vshrl.u32 %v1798_v34, 16  ;;  %v4658_v55 = vld [vmem:[#allocation3 + $0x80] sm:$0xff]  ;;  %v12270_v33 = vld [vmem:[#allocation2 + $0x90] sm:$0xff]  }
 0x1b9   : > { %v4169_v25 = vor.u32 %v4168_v5, %v14464_v0  ;;  %3307 = vst.msk [vmem:[#allocation3 + $0xa8] sm:$0xff] %vm598_vm6, %v10922_v30  ;;  %v2133_v42 = vrot.slane %v2131_v56, 5  ;;  %v2141_v36 = vshll.u32 %v1799_v31, 16  ;;  %v2976_v32 = vshrl.u32 %v2822_v13, 16  ;;  %4950 = vmatprep.mubr.bf16.mxu0 %v4658_v55  ;;  %v17310_v47 = vld [vmem:[#allocation13_spill] sm:$0xff]  ;;  %1754 = vst.msk [vmem:[#allocation3 + $0x1e0] sm:$0xff] %vm598_vm6, %v12270_v33 }
 0x1ba   : > { %v4165_v40 = vsel %vm12840_vm12, %v4160_v59, %v14464_v0  ;;  %3627 = vst.msk [vmem:[#allocation3 + $0xa8] sm:$0xff] %vm2289_vm2, %v17309_v24  ;;  %v2128_v17 = vor.u32 %v2127_v60, %v2124_v35  ;;  %v2137_v51 = vrot.slane %v2135_v44, 4  ;;  %v2979_v63 = vshll.u32 %v2822_v13, 16  ;;  %4951 = vmatmul.mubr.bf16.gmra.mrb[12].mxu0 %v4657_v50  ;;  %v2824_v0 = vld [vmem:[#allocation2 + $0x50] sm:$0x1] }
 0x1bb   : > { %v4170_v54 = vrot.slane %v4169_v25, 4  ;;  %3804 = vst.msk [vmem:[#allocation3 + $0xa8] sm:$0xff] %vm2613_vm10, %v17310_v47  ;;  %v2143_v34 = vrot.slane %v2141_v36, 5  ;;  %v2978_v53 = vrot.slane %v2976_v32, 4  ;;  %v2985_v19 = vshll.u32 %v2823_v15, 16  ;;  %v17311_v36 = vld [vmem:[#allocation16_spill] sm:$0xff] }
 0x1bc   : > { %v2989_v37 = vshrl.u32 %v2823_v15, 16  ;;  %v3361_v6 = vld [vmem:[#allocation2 + $0xb4] sm:$0xe]  ;;  %v2129_v5 = vrot.slane %v2128_v17, 4  ;;  %v2138_v31 = vor.u32 %v2137_v51, %v2133_v42  ;;  %v2981_v2 = vrot.slane %v2979_v63, 5  ;;  %4348 = vst.msk [vmem:[#allocation3 + $0xa8] sm:$0xff] %vm2790_vm11, %v4305_v9 }
 0x1bd   : > { %v4175_v23 = vsel %vm12840_vm12, %v4170_v54, %v4174_v29  ;;  %v12235_v13 = vld [vmem:[#allocation2 + $0xb4] sm:$0xff]   ;;  %v10993_v14 = vcombine.low %v4141_v52, %v4151_v7  ;;  %v10948_v30 = vrot.slane %v3361_v6, 9  ;;  %v14508_v29 = vadd.f32 %v17285_v57, %v14316_v16  ;;  %v3363_v56 = vld [vmem:[#allocation2 + $0xbc] sm:$0x1]  ;;  %v2254_v44 = vpop.permute.xlu1 %2253 }
 0x1be   : > { %v3362_v43 = vld [vmem:[#allocation2 + $0xb8] sm:$0xf]  ;;  %v14504_v59 = vcombine.low %v4165_v40, %v4175_v23  ;;  %v2134_v35 = vsel %vm12840_vm12, %v2129_v5, %v2133_v42  ;;  %v2139_v18 = vrot.slane %v2138_v31, 4  ;;  %v2982_v20 = vor.u32 %v2981_v2, %v2978_v53  ;;  %v3855_v60 = vld [vmem:[#allocation2 + $0xb4] sm:$0xf]  ;;  %3778 = vrot.lane.b32.xlu0 %v12235_v13, %s12671_s14  ;;  %2296 = vst.msk [vmem:[#allocation3 + $0xf0] sm:$0xff] %vm2289_vm2, %v2254_v44 }
 0x1bf   : > { %v3515_v25 = vrot.slane %v3362_v43, 5  ;;  %v3518_v39 = vrot.slane %v3363_v56, 5  ;;  %v2987_v8 = vrot.slane %v2985_v19, 5  ;;  %v2991_v52 = vrot.slane %v2989_v37, 4  ;;  %v3856_v15 = vld [vmem:[#allocation2 + $0xb8] sm:$0xf] }
 0x1c0   : > { %v2995_v7 = vshll.u32 %v2824_v0, 16  ;;  %v2144_v55 = vsel %vm12840_vm12, %v2139_v18, %v2143_v34  ;;  %v2983_v40 = vrot.slane %v2982_v20, 4  ;;  %v1800_v42 = vld [vmem:[#allocation2 + $0xa8] sm:$0xf]  ;;  %2620 = vst.msk [vmem:[#allocation3 + $0xf0] sm:$0xff] %vm2613_vm10, %v17311_v36  ;;  %v4177_v54 = vshrl.u32 %v3855_v60, 16 }
 0x1c1   : > { %v3516_v57 = vsel %vm12813_vm9, %v10948_v30, %v3515_v25  ;;  %v3517_v16 = vrot.slane %v3515_v25, 4  ;;  %v10867_v32 = vcombine.low %v2134_v35, %v2144_v55  ;;  %v2992_v9 = vor.u32 %v2991_v52, %v2987_v8  ;;  %v3857_v24 = vld [vmem:[#allocation2 + $0xbc] sm:$0x1]  ;;  %v17312_v17 = vld [vmem:[#allocation11_spill] sm:$0xff]  ;;  %v1801_v34 = vld [vmem:[#allocation2 + $0xac] sm:$0xf] }
 0x1c2   : > { %v2997_v50 = vrot.slane %v2995_v7, 5  ;;  %2797 = vst.msk [vmem:[#allocation3 + $0xf0] sm:$0xff] %vm2790_vm11, %v17312_v17  ;;  %v2988_v63 = vsel %vm12840_vm12, %v2983_v40, %v2987_v8  ;;  %v4180_v33 = vshll.u32 %v3855_v60, 16  ;;  %v4186_v47 = vshll.u32 %v3856_v15, 16  ;;  %4318 = vrot.lane.b32.xlu0 %v10993_v14, %s12673_s20  ;;  %v2825_v6 = vld [vmem:[#allocation2 + $0x54] sm:$0xf] }
 0x1c3   : > { %v3519_v51 = vsel %vm12813_vm9, %v3517_v16, %v3518_v39  ;;  %2267 = vrot.lane.b32.xlu1 %v10867_v32, %s12672_s15  ;;  %v2993_v53 = vrot.slane %v2992_v9, 4  ;;  %v4179_v19 = vrot.slane %v4177_v54, 4  ;;  %v4190_v37 = vshrl.u32 %v3856_v15, 16  ;;  %v4661_v23 = vld [vmem:[#allocation3 + $0xa8] sm:$0xff]  ;;  %v4660_v43 = vld [vmem:[#allocation3 + $0xa0] sm:$0xff]  ;;  %v12272_v55 = vld [vmem:[#allocation2 + $0xa8] sm:$0xff]  }
 0x1c4   : > { %v10964_v0 = vcombine.low %v3516_v57, %v3519_v51  ;;  %v4182_v5 = vrot.slane %v4180_v33, 5  ;;  %v4188_v31 = vrot.slane %v4186_v47, 5  ;;  %v4196_v2 = vshll.u32 %v3857_v24, 16  ;;  %4958 = vmatprep.mubr.bf16.mxu0 %v4661_v23  ;;  %v1802_v25 = vld [vmem:[#allocation2 + $0xb0] sm:$0x1]  ;;  %v12271_v18 = vld [vmem:[#allocation2 + $0x9c] sm:$0xff]   ;;  %v14530_v52 = vpop.permute.xlu0 %3772 }
 0x1c5   : > { %v2146_v13 = vshrl.u32 %v1800_v42, 16  ;;  %v2998_v30 = vsel %vm12840_vm12, %v2993_v53, %v2997_v50  ;;  %v4192_v56 = vrot.slane %v4190_v37, 4  ;;  %v2149_v14 = vshll.u32 %v1800_v42, 16  ;;  %4959 = vmatmul.mubr.bf16.gmra.mrb[16].mxu0 %v4660_v43  ;;  %v2826_v8 = vld [vmem:[#allocation2 + $0x58] sm:$0xf]  ;;  %1755 = vst.msk [vmem:[#allocation3 + $0x208] sm:$0xff] %vm598_vm6, %v12271_v18  ;;  %v14542_v37 = vpop.permute.xlu1 %2587 }
 0x1c6   : > { %v2155_v35 = vshll.u32 %v1801_v34, 16  ;;  %v10923_v20 = vcombine.low %v2988_v63, %v2998_v30  ;;  %v4183_v60 = vor.u32 %v4182_v5, %v4179_v19  ;;  %v4198_v44 = vrot.slane %v4196_v2, 5  ;;  %3603 = vrot.lane.b32.xlu0 %v10964_v0, %s12672_s15  ;;  %v502_v9 = vld [vmem:[#allocation2 + $0xc0] sm:$0x1]  ;;  %v2827_v51 = vld [vmem:[#allocation2 + $0x5c] sm:$0x1] }
 0x1c7   : > { %v2148_v39 = vrot.slane %v2146_v13, 4  ;;  %v4193_v7 = vor.u32 %v4192_v56, %v4188_v31  ;;  %v2151_v15 = vrot.slane %v2149_v14, 5  ;;  %v2159_v16 = vshrl.u32 %v1801_v34, 16  ;;  %v17313_v50 = vld [vmem:[#allocation17_spill] sm:$0xff]  ;;  %1756 = vst.msk [vmem:[#allocation3 + $0x230] sm:$0xff] %vm598_vm6, %v12272_v55 }
 0x1c8   : > { %v2157_v57 = vrot.slane %v2155_v35, 5  ;;  %3308 = vst.msk [vmem:[#allocation3 + $0xd0] sm:$0xff] %vm598_vm6, %v10923_v20  ;;  %v4184_v40 = vrot.slane %v4183_v60, 4  ;;  %v2165_v42 = vshll.u32 %v1802_v25, 16  ;;  %v3000_v36 = vshrl.u32 %v2825_v6, 16  ;;  %v17314_v33 = vld [vmem:[#allocation5_spill] sm:$0xff]  ;;  %v4307_v19 = vpop.permute.xlu0 %4306 }
 0x1c9   : > { %v3003_v32 = vshll.u32 %v2825_v6, 16  ;;  %3628 = vst.msk [vmem:[#allocation3 + $0xd0] sm:$0xff] %vm2289_vm2, %v17313_v50  ;;  %v4194_v24 = vrot.slane %v4193_v7, 4  ;;  %v2152_v54 = vor.u32 %v2151_v15, %v2148_v39  ;;  %v2161_v17 = vrot.slane %v2159_v16, 4  ;;  %v2348_v56 = vld [vmem:[#allocation2 + $0xa8] sm:$0xe] }
 0x1ca   : > { %v3009_v63 = vshll.u32 %v2826_v8, 16  ;;  %3805 = vst.msk [vmem:[#allocation3 + $0xd0] sm:$0xff] %vm2613_vm10, %v17314_v33  ;;  %v4189_v47 = vsel %vm12840_vm12, %v4184_v40, %v4188_v31  ;;  %v2167_v34 = vrot.slane %v2165_v42, 5  ;;  %v3002_v0 = vrot.slane %v3000_v36, 4  ;;  %4320 = vrot.lane.b32.xlu0 %v14504_v59, %s12673_s20  ;;  %v2349_v25 = vld [vmem:[#allocation2 + $0xac] sm:$0xf] }
 0x1cb   : > { %v3005_v53 = vrot.slane %v3003_v32, 5  ;;  %v4199_v6 = vsel %vm12840_vm12, %v4194_v24, %v4198_v44  ;;  %v2153_v23 = vrot.slane %v2152_v54, 4  ;;  %v2162_v5 = vor.u32 %v2161_v17, %v2157_v57  ;;  %4349 = vst.msk [vmem:[#allocation3 + $0xd0] sm:$0xff] %vm2790_vm11, %v4307_v19  ;;  %v2828_v14 = vld [vmem:[#allocation2 + $0x60] sm:$0xf] }
 0x1cc   : > { %v14548_v2 = vrot.slane %v3009_v63, 5  ;;  %v10995_v13 = vcombine.low %v4189_v47, %v4199_v6  ;;  %v3013_v43 = vshrl.u32 %v2826_v8, 16  ;;  %v3019_v30 = vshll.u32 %v2827_v51, 16  ;;  %v2350_v60 = vld [vmem:[#allocation2 + $0xb0] sm:$0x1]  ;;  %v14566_v33 = vpop.permute.xlu0 %3597 }
 0x1cd   : > { %v3006_v31 = vor.u32 %v3005_v53, %v3002_v0  ;;  %v2158_v35 = vsel %vm12840_vm12, %v2153_v23, %v2157_v57  ;;  %v2163_v59 = vrot.slane %v2162_v5, 4  ;;  %v503_v18 = vsel %vm12763_vm3, 0, %v502_v9  ;;  %v2829_v55 = vld [vmem:[#allocation2 + $0x64] sm:$0xf]  ;;  %v2830_v32 = vld [vmem:[#allocation2 + $0x68] sm:$0x1] }
 0x1ce   : > { %v10804_v20 = vmul.f32 -1.442695, %v14395_v26  ;;  %v3015_v39 = vrot.slane %v3013_v43, 4  ;;  %v3021_v7 = vrot.slane %v3019_v30, 5  ;;  %504 = vst [vmem:[#allocation2 + $0xc0] sm:$0x1] %v503_v18  ;;  %4322 = vrot.lane.b32.xlu0 %v10995_v13, %s12673_s20  ;;  %v2256_v50 = vpop.permute.xlu1 %2255 }
 0x1cf   : > { %v3007_v44 = vrot.slane %v3006_v31, 4  ;;  %v10805_v8 = vmul.f32 -1.442695, %v14508_v29  ;;  %v2168_v15 = vsel %vm12840_vm12, %v2163_v59, %v2167_v34  ;;  %v10884_v57 = vrot.slane %v2348_v56, 9  ;;  %v558_v9 = vld [vmem:[#allocation2 + $0xc8] sm:$0x1] }
 0x1d0   : > { %12482 = vpow2.f32 %v10804_v20  ;;  %v2505_v16 = vrot.slane %v2349_v25, 5  ;;  %v10868_v40 = vcombine.low %v2158_v35, %v2168_v15  ;;  %v3016_v36 = vor.u32 %v3015_v39, %v14548_v2  ;;  %v2831_v63 = vld [vmem:[#allocation2 + $0x6c] sm:$0xf]  ;;  %2297 = vst.msk [vmem:[#allocation3 + $0x118] sm:$0xff] %vm2289_vm2, %v2256_v50  ;;  %v17315_v6 = vld [vmem:[#allocation19_spill] sm:$0xff]  ;;  %v4663_v43 = vld [vmem:[#allocation3 + $0xc8] sm:$0xff]  ;;  %v4309_v50 = vpop.permute.xlu0 %4308 }
 0x1d1   : > { %v3012_v42 = vsel %vm12840_vm12, %v3007_v44, %v14548_v2  ;;  %12484 = vpow2.f32 %v10805_v8  ;;  %v2508_v17 = vrot.slane %v2350_v60, 5  ;;  %v3024_v51 = vshrl.u32 %v2828_v14, 16  ;;  %2621 = vst.msk [vmem:[#allocation3 + $0x118] sm:$0xff] %vm2613_vm10, %v17315_v6  ;;  %v2832_v31 = vld [vmem:[#allocation2 + $0x70] sm:$0xf]  ;;  %v17316_v30 = vld [vmem:[#allocation12_spill] sm:$0xff] }
 0x1d2   : > { %v2506_v24 = vsel %vm12813_vm9, %v10884_v57, %v2505_v16  ;;  %v2507_v54 = vrot.slane %v2505_v16, 4  ;;  %2269 = vrot.lane.b32.xlu1 %v10868_v40, %s12672_s15  ;;  %v3017_v47 = vrot.slane %v3016_v36, 4  ;;  %v3027_v34 = vshll.u32 %v2828_v14, 16  ;;  %v4664_v19 = vld [vmem:[#allocation3 + $0xd0] sm:$0xff]  ;;  %2798 = vst.msk [vmem:[#allocation3 + $0x118] sm:$0xff] %vm2790_vm11, %v17316_v30  ;;  %v14580_v8 = vpop.permute.xlu1 %2764  ;;  %v12248_v57 = vld [vmem:[#allocation2 + $0xb4] sm:$0xff]  }
 0x1d3   : > { %v3033_v0 = vshll.u32 %v2829_v55, 16  ;;  %v3037_v53 = vshrl.u32 %v2829_v55, 16  ;;  %v3026_v5 = vrot.slane %v3024_v51, 4  ;;  %v3043_v2 = vshll.u32 %v2830_v32, 16  ;;  %4966 = vmatprep.mubr.bf16.mxu0 %v4664_v19  ;;  %v2833_v59 = vld [vmem:[#allocation2 + $0x74] sm:$0x1] }
 0x1d4   : > { %v2509_v23 = vsel %vm12813_vm9, %v2507_v54, %v2508_v17  ;;  %v559_v13 = vsel %vm12773_vm5, 0, %v558_v9  ;;  %v3022_v56 = vsel %vm12840_vm12, %v3017_v47, %v3021_v7  ;;  %v3029_v14 = vrot.slane %v3027_v34, 5  ;;  %v1803_v18 = vld [vmem:[#allocation2 + $0xb4] sm:$0xf]  ;;  %4967 = vmatmul.mubr.bf16.gmra.mrb[20].mxu0 %v4663_v43  ;;  %v1804_v47 = vld [vmem:[#allocation2 + $0xb8] sm:$0xf] }
 0x1d5   : > { %v10900_v25 = vcombine.low %v2506_v24, %v2509_v23  ;;  %v3035_v35 = vrot.slane %v3033_v0, 5  ;;  %560 = vst [vmem:[#allocation2 + $0xc8] sm:$0x1] %v559_v13  ;;  %v10924_v20 = vcombine.low %v3012_v42, %v3022_v56  ;;  %v3039_v60 = vrot.slane %v3037_v53, 4  ;;  %v17317_v42 = vld [vmem:[#allocation18_spill] sm:$0xff]  ;;  %v17318_v0 = vld [vmem:[#allocation9_spill] sm:$0xff] }
 0x1d6   : > { %v3045_v44 = vrot.slane %v3043_v2, 5  ;;  %v3048_v39 = vshrl.u32 %v2831_v63, 16  ;;  %v3030_v15 = vor.u32 %v3029_v14, %v3026_v5  ;;  %v3051_v16 = vshll.u32 %v2831_v63, 16  ;;  %v505_v43 = vld [vmem:[#allocation2 + $0xcc] sm:$0x1] }
 0x1d7   : > { %2593 = vrot.lane.b32.xlu1 %v10900_v25, %s12671_s14  ;;  %v3057_v55 = vshll.u32 %v2832_v31, 16  ;;  %v3061_v7 = vshrl.u32 %v2832_v31, 16  ;;  %3309 = vst.msk [vmem:[#allocation3 + $0xf8] sm:$0xff] %vm598_vm6, %v10924_v20  ;;  %v3040_v40 = vor.u32 %v3039_v60, %v3035_v35  ;;  %v3067_v32 = vshll.u32 %v2833_v59, 16  ;;  %v1805_v25 = vld [vmem:[#allocation2 + $0xbc] sm:$0x1] }
 0x1d8   : > { %v3050_v36 = vrot.slane %v3048_v39, 4  ;;  %v2170_v9 = vshrl.u32 %v1803_v18, 16  ;;  %3629 = vst.msk [vmem:[#allocation3 + $0xf8] sm:$0xff] %vm2289_vm2, %v17317_v42  ;;  %v3031_v24 = vrot.slane %v3030_v15, 4  ;;  %v3053_v54 = vrot.slane %v3051_v16, 5 }
 0x1d9   : > { %v3059_v17 = vrot.slane %v3057_v55, 5  ;;  %v3063_v51 = vrot.slane %v3061_v7, 4  ;;  %3806 = vst.msk [vmem:[#allocation3 + $0xf8] sm:$0xff] %vm2613_vm10, %v17318_v0  ;;  %v3041_v63 = vrot.slane %v3040_v40, 4  ;;  %v3069_v53 = vrot.slane %v3067_v32, 5 }
 0x1da   : > { %v12483_v34 = vpop.eup %12482  ;;  %v2172_v19 = vrot.slane %v2170_v9, 4  ;;  %v2173_v6 = vshll.u32 %v1803_v18, 16  ;;  %v3036_v2 = vsel %vm12840_vm12, %v3031_v24, %v3035_v35  ;;  %v3054_v13 = vor.u32 %v3053_v54, %v3050_v36  ;;  %4350 = vst.msk [vmem:[#allocation3 + $0xf8] sm:$0xff] %vm2790_vm11, %v4309_v50  ;;  %v2258_v18 = vpop.permute.xlu1 %2257  ;;  %v2351_v35 = vld [vmem:[#allocation2 + $0xb4] sm:$0xe] }
 0x1db   : > { %v12485_v23 = vpop.eup %12484  ;;  %v979_v5 = vadd.f32 1.0, %v12483_v34  ;;  %2770 = vrot.lane.b32.xlu1 %v12248_v57, %s12673_s20  ;;  %v3064_v31 = vor.u32 %v3063_v51, %v3059_v17  ;;  %v3046_v56 = vsel %vm12840_vm12, %v3041_v63, %v3045_v44  ;;  %v2179_v59 = vshll.u32 %v1804_v47, 16  ;;  %v561_v15 = vld [vmem:[#allocation2 + $0xd4] sm:$0x1]  ;;  %2298 = vst.msk [vmem:[#allocation3 + $0x140] sm:$0xff] %vm2289_vm2, %v2258_v18  ;;  %v17319_v51 = vld [vmem:[#allocation14_spill] sm:$0xff] }
 0x1dc   : > { %v980_v30 = vadd.f32 1.0, %v12485_v23  ;;  %v2175_v14 = vrot.slane %v2173_v6, 5  ;;  %v10925_v20 = vcombine.low %v3036_v2, %v3046_v56  ;;  %v3055_v60 = vrot.slane %v3054_v13, 4  ;;  %v2352_v7 = vld [vmem:[#allocation2 + $0xb8] sm:$0xf]  ;;  %2622 = vst.msk [vmem:[#allocation3 + $0x140] sm:$0xff] %vm2613_vm10, %v14271_v41 }
 0x1dd   : > { %12486 = vrcp.f32 %v979_v5  ;;  %v3065_v39 = vrot.slane %v3064_v31, 4  ;;  %v2181_v16 = vrot.slane %v2179_v59, 5  ;;  %v2183_v55 = vshrl.u32 %v1804_v47, 16  ;;  %v2353_v40 = vld [vmem:[#allocation2 + $0xbc] sm:$0x1]  ;;  %2799 = vst.msk [vmem:[#allocation3 + $0x140] sm:$0xff] %vm2790_vm11, %v14321_v45 }
 0x1de   : > { %12488 = vrcp.f32 %v980_v30  ;;  %v2176_v57 = vor.u32 %v2175_v14, %v2172_v19  ;;  %3310 = vst.msk [vmem:[#allocation3 + $0x120] sm:$0xff] %vm598_vm6, %v10925_v20  ;;  %v3060_v44 = vsel %vm12840_vm12, %v3055_v60, %v3059_v17  ;;  %v2189_v32 = vshll.u32 %v1805_v25, 16  ;;  %v3862_v50 = vld [vmem:[#allocation2 + $0xd0] sm:$0xf]  ;;  %v2834_v17 = vld [vmem:[#allocation2 + $0x78] sm:$0xf]  ;;  %v14615_v31 = vpop.permute.xlu1 %2589 }
 0x1df   : > { %v3070_v36 = vsel %vm12840_vm12, %v3065_v39, %v3069_v53  ;;  %v506_v9 = vsel %vm12763_vm3, 0, %v505_v43  ;;  %3630 = vst.msk [vmem:[#allocation3 + $0x120] sm:$0xff] %vm2289_vm2, %v14264_v62  ;;  %v2185_v24 = vrot.slane %v2183_v55, 4  ;;  %v10885_v54 = vrot.slane %v2351_v35, 9  ;;  %v2835_v63 = vld [vmem:[#allocation2 + $0x7c] sm:$0xf] }
 0x1e0   : > { %v10926_v41 = vcombine.low %v3060_v44, %v3070_v36  ;;  %v2177_v42 = vrot.slane %v2176_v57, 4  ;;  %507 = vst [vmem:[#allocation2 + $0xcc] sm:$0x1] %v506_v9  ;;  %3807 = vst.msk [vmem:[#allocation3 + $0x120] sm:$0xff] %vm2613_vm10, %v17319_v51  ;;  %v2512_v47 = vrot.slane %v2352_v7, 5  ;;  %v2515_v34 = vrot.slane %v2353_v40, 5 }
 0x1e1   : > { %v562_v0 = vsel %vm12773_vm5, 0, %v561_v15  ;;  %v2186_v45 = vor.u32 %v2185_v24, %v2181_v16  ;;  %v2191_v53 = vrot.slane %v2189_v32, 5  ;;  %v4234_v62 = vshll.u32 %v3862_v50, 16  ;;  %v4667_v6 = vld [vmem:[#allocation3 + $0xf8] sm:$0xff]  ;;  %v4666_v13 = vld [vmem:[#allocation3 + $0xf0] sm:$0xff] }
 0x1e2   : > { %3311 = vst.msk [vmem:[#allocation3 + $0x148] sm:$0xff] %vm598_vm6, %v10926_v41  ;;  %563 = vst [vmem:[#allocation2 + $0xd4] sm:$0x1] %v562_v0  ;;  %v4238_v19 = vshrl.u32 %v3862_v50, 16  ;;  %v2514_v23 = vrot.slane %v2512_v47, 4  ;;  %v3072_v5 = vshrl.u32 %v2834_v17, 16  ;;  %4974 = vmatprep.mubr.bf16.mxu0 %v4667_v6  ;;  %v2182_v3 = vsel %vm12840_vm12, %v2177_v42, %v2181_v16 }
 0x1e3   : > { %3631 = vst.msk [vmem:[#allocation3 + $0x148] sm:$0xff] %vm2289_vm2, %v14294_v11  ;;  %v3075_v2 = vshll.u32 %v2834_v17, 16  ;;  %v2187_v43 = vrot.slane %v2186_v45, 4  ;;  %v2513_v30 = vsel %vm12813_vm9, %v10885_v54, %v2512_v47  ;;  %v3081_v56 = vshll.u32 %v2835_v63, 16  ;;  %4975 = vmatmul.mubr.bf16.gmra.mrb[24].mxu0 %v4666_v13  ;;  %v2836_v39 = vld [vmem:[#allocation2 + $0x80] sm:$0x1] }
 0x1e4   : > { %3808 = vst.msk [vmem:[#allocation3 + $0x148] sm:$0xff] %vm2613_vm10, %v14340_v21  ;;  %v2516_v11 = vsel %vm12813_vm9, %v2514_v23, %v2515_v34  ;;  %v3074_v25 = vrot.slane %v3072_v5, 4  ;;  %v3085_v59 = vshrl.u32 %v2835_v63, 16  ;;  %v14627_v20 = vrot.slane %v4234_v62, 5  ;;  %v2837_v51 = vld [vmem:[#allocation2 + $0x84] sm:$0xf] }
 0x1e5   : > { %v3077_v14 = vrot.slane %v3075_v2, 5  ;;  %v2192_v18 = vsel %vm12840_vm12, %v2187_v43, %v2191_v53  ;;  %v4240_v60 = vrot.slane %v4238_v19, 4  ;;  %v3083_v35 = vrot.slane %v3081_v56, 5  ;;  %v2838_v62 = vld [vmem:[#allocation2 + $0x88] sm:$0xf] }
 0x1e6   : > { %v10869_v57 = vcombine.low %v2182_v3, %v2192_v18  ;;  %v3087_v55 = vrot.slane %v3085_v59, 4  ;;  %v10901_v44 = vcombine.low %v2513_v30, %v2516_v11  ;;  %v3091_v42 = vshll.u32 %v2836_v39, 16  ;;  %v2260_v24 = vpop.permute.xlu1 %2259  ;;  %v2839_v43 = vld [vmem:[#allocation2 + $0x8c] sm:$0x1]  ;;  %v2840_v30 = vld [vmem:[#allocation2 + $0x90] sm:$0xf] }
 0x1e7   : > { %v12487_v15 = vpop.eup %12486  ;;  %v3861_v16 = vld [vmem:[#allocation2 + $0xcc] sm:$0xf]  ;;  %v3078_v21 = vor.u32 %v3077_v14, %v3074_v25  ;;  %v4241_v17 = vor.u32 %v4240_v60, %v14627_v20  ;;  %2299 = vst.msk [vmem:[#allocation3 + $0x168] sm:$0xff] %vm2289_vm2, %v2260_v24  ;;  %v3096_v2 = vshrl.u32 %v2837_v51, 16  ;;  %v1607_v11 = vld [vmem:[#allocation2 + $0xc0] sm:$0xf] }
 0x1e8   : > { %v12489_v7 = vpop.eup %12488  ;;  %v1075_v40 = vmul.f32 %v12487_v15, %v14395_v26  ;;  %v4225_v36 = vshrl.u32 %v3861_v16, 16  ;;  %v4228_v32 = vshll.u32 %v3861_v16, 16  ;;  %2271 = vrot.lane.b32.xlu1 %v10869_v57, %s12672_s15  ;;  %v3088_v41 = vor.u32 %v3087_v55, %v3083_v35  ;;  %2623 = vst.msk [vmem:[#allocation3 + $0x168] sm:$0xff] %vm2613_vm10, %v14360_v46  ;;  %v1611_v39 = vld [vmem:[#allocation2 + $0xc8] sm:$0x1] }
 0x1e9   : > { %v1076_v9 = vmul.f32 %v12489_v7, %v14508_v29  ;;  %v3079_v50 = vrot.slane %v3078_v21, 4  ;;  %v3093_v0 = vrot.slane %v3091_v42, 5  ;;  %2800 = vst.msk [vmem:[#allocation3 + $0x168] sm:$0xff] %vm2790_vm11, %v14401_v27  ;;  %v3863_v23 = vld [vmem:[#allocation2 + $0xd4] sm:$0x1]  ;;  %v14643_v3 = vrot.slane %v4241_v17, 4 }
 0x1ea   : > { %v11431_v54 = vpack.c.bf16 %v1075_v40, %v1075_v40  ;;  %v3089_v34 = vrot.slane %v3088_v41, 4  ;;  %v4227_v45 = vrot.slane %v4225_v36, 4  ;;  %v4230_v53 = vrot.slane %v4228_v32, 5  ;;  %v2841_v7 = vld [vmem:[#allocation2 + $0x94] sm:$0xf] }
 0x1eb   : > { %v11432_v47 = vpack.c.bf16 %v1076_v9, %v1076_v9  ;;  %v3084_v26 = vsel %vm12840_vm12, %v3079_v50, %v3083_v35  ;;  %v3098_v25 = vrot.slane %v3096_v2, 4  ;;  %v3099_v14 = vshll.u32 %v2837_v51, 16  ;;  %v2842_v9 = vld [vmem:[#allocation2 + $0x98] sm:$0x1] }
 0x1ec   : > { %v1432_v29 = vshrl.u32 %v11431_v54, 16  ;;  %v1435_v63 = vshll.u32 %v11431_v54, 16  ;;  %2595 = vrot.lane.b32.xlu1 %v10901_v44, %s12671_s14  ;;  %v3094_v5 = vsel %vm12840_vm12, %v3089_v34, %v3093_v0  ;;  %v3105_v27 = vshll.u32 %v2838_v62, 16  ;;  %v14645_v59 = vpop.permute.xlu0 %3774  ;;  %v2843_v54 = vld [vmem:[#allocation2 + $0x9c] sm:$0xf] }
 0x1ed   : > { %v1440_v19 = vshrl.u32 %v11432_v47, 16  ;;  %v1443_v6 = vshll.u32 %v11432_v47, 16  ;;  %v10927_v46 = vcombine.low %v3084_v26, %v3094_v5  ;;  %v4244_v35 = vshll.u32 %v3863_v23, 16 }
 0x1ee   : > { %v1434_v13 = vrot.slane %v1432_v29, 7  ;;  %v3109_v15 = vshrl.u32 %v2838_v62, 16  ;;  %v4231_v21 = vor.u32 %v4230_v53, %v4227_v45  ;;  %v3101_v55 = vrot.slane %v3099_v14, 5  ;;  %v14654_v50 = vpop.permute.xlu1 %2766  ;;  %v14662_v53 = vld [vmem:[#allocation2 + $0xa0] sm:$0xf] }
 0x1ef   : > { %v1442_v56 = vrot.slane %v1440_v19, 7  ;;  %3312 = vst.msk [vmem:[#allocation3 + $0x170] sm:$0xff] %vm598_vm6, %v10927_v46  ;;  %v3107_v44 = vrot.slane %v3105_v27, 5  ;;  %v3115_v32 = vshll.u32 %v2839_v43, 16  ;;  %v3120_v24 = vshrl.u32 %v2840_v30, 16 }
 0x1f0   : > { %v1437_v18 = vor.u32 %v1435_v63, %v1434_v13  ;;  %v1438_v60 = vrot.slane %v1434_v13, 4  ;;  %3632 = vst.msk [vmem:[#allocation3 + $0x170] sm:$0xff] %vm2289_vm2, %v14378_v10  ;;  %v3111_v36 = vrot.slane %v3109_v15, 4  ;;  %v3102_v42 = vor.u32 %v3101_v55, %v3098_v25  ;;  %v4311_v38 = vpop.permute.xlu0 %4310 }
 0x1f1   : > { %v1445_v57 = vor.u32 %v1443_v6, %v1442_v56  ;;  %v1447_v16 = vrot.slane %v1442_v56, 4  ;;  %3809 = vst.msk [vmem:[#allocation3 + $0x170] sm:$0xff] %vm2613_vm10, %v14443_v22  ;;  %v3117_v17 = vrot.slane %v3115_v32, 5  ;;  %v3123_v51 = vshll.u32 %v2840_v30, 16 }
 0x1f2   : > { %v1608_v40 = vsel %vm13303_vm15, %v1437_v18, %v1607_v11  ;;  %v3112_v22 = vor.u32 %v3111_v36, %v3107_v44  ;;  %v3129_v47 = vshll.u32 %v2841_v7, 16  ;;  %4351 = vst.msk [vmem:[#allocation3 + $0x120] sm:$0xff] %vm2790_vm11, %v4311_v38  ;;  %v4246_v26 = vrot.slane %v4244_v35, 5 }
 0x1f3   : > { %v1446_v41 = vsel %vm13311_vm1, %v1438_v60, %v1445_v57  ;;  %1609 = vst [vmem:[#allocation2 + $0xc0] sm:$0xf] %v1608_v40  ;;  %v1612_v10 = vsel %vm13364_vm8, %v1447_v16, %v1611_v39  ;;  %v3103_v34 = vrot.slane %v3102_v42, 4  ;;  %v3133_v0 = vshrl.u32 %v2841_v7, 16 }
 0x1f4   : > { %1610 = vst.msk [vmem:[#allocation2 + $0xc4] sm:$0xf] %vm1497_vm13, %v1446_v41  ;;  %1613 = vst [vmem:[#allocation2 + $0xc8] sm:$0x1] %v1612_v10  ;;  %v3139_v29 = vshll.u32 %v2842_v9, 16  ;;  %v4232_v63 = vrot.slane %v4231_v21, 4  ;;  %v14668_v2 = vpop.permute.xlu0 %3599  ;;  %v4247_v16 = vsel %vm12840_vm12, %v14643_v3, %v4246_v26 }
 0x1f5   : > { %v3113_v48 = vrot.slane %v3112_v22, 4  ;;  %v3122_v45 = vrot.slane %v3120_v24, 4  ;;  %v3144_v62 = vshrl.u32 %v2843_v54, 16  ;;  %v3108_v19 = vsel %vm12840_vm12, %v3103_v34, %v3107_v44  ;;  %v2262_v56 = vpop.permute.xlu1 %2261 }
 0x1f6   : > { %v3125_v6 = vrot.slane %v3123_v51, 5  ;;  %v14666_v23 = vrot.slane %v3129_v47, 5  ;;  %v3147_v5 = vshll.u32 %v2843_v54, 16  ;;  %v3135_v46 = vrot.slane %v3133_v0, 4  ;;  %2300 = vst.msk [vmem:[#allocation3 + $0x190] sm:$0xff] %vm2289_vm2, %v2262_v56 }
 0x1f7   : > { %v3118_v13 = vsel %vm12840_vm12, %v3113_v48, %v3117_v17  ;;  %v14672_v43 = vrot.slane %v3139_v29, 5  ;;  %v3146_v30 = vrot.slane %v3144_v62, 4  ;;  %v3153_v14 = vshll.u32 %v14662_v53, 16  ;;  %2624 = vst.msk [vmem:[#allocation3 + $0x190] sm:$0xff] %vm2613_vm10, %v14447_v58  ;;  %v2845_v0 = vld [vmem:[#allocation2 + $0xa4] sm:$0x1] }
 0x1f8   : > { %v10928_v11 = vcombine.low %v3108_v19, %v3118_v13  ;;  %v3149_v25 = vrot.slane %v3147_v5, 5  ;;  %v3157_v27 = vshrl.u32 %v14662_v53, 16  ;;  %v4237_v57 = vsel %vm12840_vm12, %v4232_v63, %v14627_v20  ;;  %v4313_v55 = vpop.permute.xlu0 %4312  ;;  %2801 = vst.msk [vmem:[#allocation3 + $0x190] sm:$0xff] %vm2790_vm11, %v14480_v61  ;;  %v4669_v62 = vld [vmem:[#allocation3 + $0x118] sm:$0xff] }
 0x1f9   : > { %v3126_v21 = vor.u32 %v3125_v6, %v3122_v45  ;;  %4352 = vst.msk [vmem:[#allocation3 + $0x148] sm:$0xff] %vm2790_vm11, %v4313_v55  ;;  %v3136_v61 = vor.u32 %v3135_v46, %v14666_v23  ;;  %v14695_v22 = vcombine.low %v4237_v57, %v4247_v16  ;;  %v4670_v29 = vld [vmem:[#allocation3 + $0x120] sm:$0xff]  ;;  %v3155_v53 = vrot.slane %v3153_v14, 5  ;;  %v2849_v57 = vld [vmem:[#allocation2 + $0xb4] sm:$0xf] }
 0x1fa   : > { %v3858_v18 = vld [vmem:[#allocation2 + $0xc0] sm:$0xf]  ;;  %3313 = vst.msk [vmem:[#allocation3 + $0x198] sm:$0xff] %vm598_vm6, %v10928_v11  ;;  %v3150_v41 = vor.u32 %v3149_v25, %v3146_v30  ;;  %4982 = vmatprep.mubr.bf16.mxu0 %v4670_v29  ;;  %v12273_v19 = vld [vmem:[#allocation2 + $0xb4] sm:$0xff]   ;;  %v3159_v46 = vrot.slane %v3157_v27, 4  ;;  %v3163_v25 = vshll.u32 %v2845_v0, 16 }
 0x1fb   : > { %v3364_v60 = vld [vmem:[#allocation2 + $0xc0] sm:$0xe]  ;;  %v3859_v35 = vld [vmem:[#allocation2 + $0xc4] sm:$0xf]  ;;  %v4201_v15 = vshrl.u32 %v3858_v18, 16  ;;  %v4204_v58 = vshll.u32 %v3858_v18, 16  ;;  %4983 = vmatmul.mubr.bf16.gmra.mrb[28].mxu0 %v4669_v62 }
 0x1fc   : > { %v12245_v39 = vld [vmem:[#allocation2 + $0xc0] sm:$0xff]   ;;  %v3860_v7 = vld [vmem:[#allocation2 + $0xc8] sm:$0x1]  ;;  %v4210_v40 = vshll.u32 %v3859_v35, 16  ;;  %v4214_v44 = vshrl.u32 %v3859_v35, 16  ;;  %v10949_v36 = vrot.slane %v3364_v60, 9 }
 0x1fd   : > { %3633 = vst.msk [vmem:[#allocation3 + $0x198] sm:$0xff] %vm2289_vm2, %v14460_v4  ;;  %3780 = vrot.lane.b32.xlu0 %v12245_v39, %s12671_s14  ;;  %v4203_v20 = vrot.slane %v4201_v15, 4  ;;  %v4220_v3 = vshll.u32 %v3860_v7, 16  ;;  %v3365_v32 = vld [vmem:[#allocation2 + $0xc4] sm:$0xf]  ;;  %v4206_v10 = vrot.slane %v4204_v58, 5  ;;  %v3160_v15 = vor.u32 %v3159_v46, %v3155_v53 }
 0x1fe   : > { %v3366_v9 = vld [vmem:[#allocation2 + $0xc8] sm:$0x1]  ;;  %3810 = vst.msk [vmem:[#allocation3 + $0x198] sm:$0xff] %vm2613_vm10, %v14530_v52  ;;  %v4212_v42 = vrot.slane %v4210_v40, 5  ;;  %v4216_v24 = vrot.slane %v4214_v44, 4  ;;  %v3522_v38 = vrot.slane %v3365_v32, 5 }
 0x1ff   : > { %v4222_v54 = vrot.slane %v4220_v3, 5  ;;  %v3525_v4 = vrot.slane %v3366_v9, 5  ;;  %v12257_v17 = vld [vmem:[#allocation2 + $0xc0] sm:$0xff]   ;;  %v3127_v51 = vrot.slane %v3126_v21, 4  ;;  %v4207_v47 = vor.u32 %v4206_v10, %v4203_v20  ;;  %v2846_v30 = vld [vmem:[#allocation2 + $0xa8] sm:$0xf] }
 0x200   : > { %v4217_v26 = vor.u32 %v4216_v24, %v4212_v42  ;;  %v14699_v34 = vsel %vm12813_vm9, %v10949_v36, %v3522_v38  ;;  %v3524_v52 = vrot.slane %v3522_v38, 4  ;;  %2772 = vrot.lane.b32.xlu1 %v12257_v17, %s12673_s20  ;;  %v3137_v48 = vrot.slane %v3136_v61, 4  ;;  %v4673_v14 = vld [vmem:[#allocation3 + $0x148] sm:$0xff]  ;;  %v2847_v18 = vld [vmem:[#allocation2 + $0xac] sm:$0xf]  ;;  %1757 = vst.msk [vmem:[#allocation3 + $0x258] sm:$0xff] %vm598_vm6, %v12273_v19 }
 0x201   : > { %v3132_v63 = vsel %vm12840_vm12, %v3127_v51, %v14666_v23  ;;  %v3151_v45 = vrot.slane %v3150_v41, 4  ;;  %v4208_v6 = vrot.slane %v4207_v47, 4  ;;  %v2848_v60 = vld [vmem:[#allocation2 + $0xb0] sm:$0x1]  ;;  %4990 = vmatprep.mubr.bf16.mxu0 %v4673_v14  ;;  %v3165_v16 = vrot.slane %v3163_v25, 5  ;;  %v4672_v51 = vld [vmem:[#allocation3 + $0x140] sm:$0xff] }
 0x202   : > { %v4218_v5 = vrot.slane %v4217_v26, 4  ;;  %v3526_v13 = vsel %vm12813_vm9, %v3524_v52, %v3525_v4  ;;  %v3142_v23 = vsel %vm12840_vm12, %v3137_v48, %v14672_v43  ;;  %v3168_v21 = vshrl.u32 %v2846_v30, 16  ;;  %v2850_v7 = vld [vmem:[#allocation2 + $0xb8] sm:$0xf]  ;;  %v2851_v20 = vld [vmem:[#allocation2 + $0xbc] sm:$0x1] }
 0x203   : > { %v10965_v56 = vcombine.low %v14699_v34, %v3526_v13  ;;  %v3156_v11 = vsel %vm12840_vm12, %v3151_v45, %v3155_v53  ;;  %v4213_v27 = vsel %vm12840_vm12, %v4208_v6, %v4212_v42  ;;  %v10929_v35 = vcombine.low %v3132_v63, %v3142_v23  ;;  %v4397_v41 = vld [vmem:[#allocation2 + $0xac] sm:$0xf]  ;;  %v4396_v4 = vld [vmem:[#allocation2 + $0xa8] sm:$0xe]  ;;  %4991 = vmatmul.mubr.bf16.gmra.mrb[32].mxu0 %v4672_v51  ;;  %v4398_v63 = vld [vmem:[#allocation2 + $0xb0] sm:$0x1]  ;;  %v14728_v53 = vpop.permute.xlu1 %2591 }
 0x204   : > { %v4223_v39 = vsel %vm12840_vm12, %v4218_v5, %v4222_v54  ;;  %v3171_v55 = vshll.u32 %v2846_v30, 16  ;;  %v3161_v58 = vrot.slane %v3160_v15, 4  ;;  %v3177_v40 = vshll.u32 %v2847_v18, 16  ;;  %v12253_v48 = vld [vmem:[#allocation2 + $0xcc] sm:$0xff]   ;;  %v4399_v5 = vld [vmem:[#allocation2 + $0xb4] sm:$0xe] }
 0x205   : > { %v10996_v43 = vcombine.low %v4213_v27, %v4223_v39  ;;  %3314 = vst.msk [vmem:[#allocation3 + $0x1c0] sm:$0xff] %vm598_vm6, %v10929_v35  ;;  %v3181_v44 = vshrl.u32 %v2847_v18, 16  ;;  %v3187_v36 = vshll.u32 %v2848_v60, 16  ;;  %v3170_v3 = vrot.slane %v3168_v21, 4  ;;  %v3777_v42 = vpop.permute.xlu0 %3776  ;;  %v4401_v25 = vld [vmem:[#allocation2 + $0xbc] sm:$0x1] }
 0x206   : > { %3634 = vst.msk [vmem:[#allocation3 + $0x1c0] sm:$0xff] %vm2289_vm2, %v14566_v33  ;;  %v3173_v32 = vrot.slane %v3171_v55, 5  ;;  %v3192_v9 = vshrl.u32 %v2849_v57, 16  ;;  %v3195_v61 = vshll.u32 %v2849_v57, 16  ;;  %v3166_v10 = vsel %vm12840_vm12, %v3161_v58, %v3165_v16  ;;  %v2852_v27 = vld [vmem:[#allocation2 + $0xc0] sm:$0xf] }
 0x207   : > { %4324 = vrot.lane.b32.xlu0 %v10996_v43, %s12673_s20  ;;  %3811 = vst.msk [vmem:[#allocation3 + $0x1c0] sm:$0xff] %vm2613_vm10, %v14645_v59  ;;  %v3179_v24 = vrot.slane %v3177_v40, 5  ;;  %v3183_v38 = vrot.slane %v3181_v44, 4  ;;  %v3189_v54 = vrot.slane %v3187_v36, 5  ;;  %v10930_v17 = vcombine.low %v3156_v11, %v3166_v10  ;;  %v4400_v59 = vld [vmem:[#allocation2 + $0xb8] sm:$0xf] }
 0x208   : > { %v3174_v47 = vor.u32 %v3173_v32, %v3170_v3  ;;  %v3194_v33 = vrot.slane %v3192_v9, 4  ;;  %v3197_v26 = vrot.slane %v3195_v61, 5  ;;  %v3201_v52 = vshll.u32 %v2850_v7, 16  ;;  %v2853_v57 = vld [vmem:[#allocation2 + $0xc4] sm:$0xf] }
 0x209   : > { %v3184_v34 = vor.u32 %v3183_v38, %v3179_v24  ;;  %v3205_v0 = vshrl.u32 %v2850_v7, 16  ;;  %v3211_v29 = vshll.u32 %v2851_v20, 16  ;;  %3315 = vst.msk [vmem:[#allocation3 + $0x1e8] sm:$0xff] %vm598_vm6, %v10930_v17  ;;  %v11010_v19 = vrot.slane %v4396_v4, 9  ;;  %v4315_v13 = vpop.permute.xlu0 %4314  ;;  %v2854_v7 = vld [vmem:[#allocation2 + $0xc8] sm:$0x1] }
 0x20a   : > { %v3175_v45 = vrot.slane %v3174_v47, 4  ;;  %v3198_v62 = vor.u32 %v3197_v26, %v3194_v33  ;;  %v4542_v6 = vrot.slane %v4397_v41, 5  ;;  %3635 = vst.msk [vmem:[#allocation3 + $0x1e8] sm:$0xff] %vm2289_vm2, %v14668_v2  ;;  %v3203_v30 = vrot.slane %v3201_v52, 5  ;;  %v4402_v58 = vld [vmem:[#allocation2 + $0xc0] sm:$0xe] }
 0x20b   : > { %3605 = vrot.lane.b32.xlu0 %v10965_v56, %s12672_s15  ;;  %v3185_v46 = vrot.slane %v3184_v34, 4  ;;  %v3207_v23 = vrot.slane %v3205_v0, 4  ;;  %v3213_v11 = vrot.slane %v3211_v29, 5  ;;  %3812 = vst.msk [vmem:[#allocation3 + $0x1e8] sm:$0xff] %vm2613_vm10, %v3777_v42  ;;  %v4545_v35 = vrot.slane %v4398_v63, 5 }
 0x20c   : > { %4353 = vst.msk [vmem:[#allocation3 + $0x170] sm:$0xff] %vm2790_vm11, %v4315_v13  ;;  %v3180_v56 = vsel %vm12840_vm12, %v3175_v45, %v3179_v24  ;;  %v3199_v14 = vrot.slane %v3198_v62, 4  ;;  %v4543_v18 = vsel %vm12813_vm9, %v11010_v19, %v4542_v6  ;;  %v4544_v60 = vrot.slane %v4542_v6, 4  ;;  %v4403_v32 = vld [vmem:[#allocation2 + $0xc4] sm:$0xf] }
 0x20d   : > { %v3190_v2 = vsel %vm12840_vm12, %v3185_v46, %v3189_v54  ;;  %v3208_v39 = vor.u32 %v3207_v23, %v3203_v30  ;;  %v11011_v15 = vrot.slane %v4399_v5, 9  ;;  %v4549_v21 = vrot.slane %v4400_v59, 5  ;;  %v3602_v40 = vpop.permute.xlu0 %3601  ;;  %v4404_v24 = vld [vmem:[#allocation2 + $0xc8] sm:$0x1]  ;;  %v4405_v38 = vld [vmem:[#allocation2 + $0xcc] sm:$0xe] }
 0x20e   : > { %v10931_v43 = vcombine.low %v3180_v56, %v3190_v2  ;;  %v3204_v16 = vsel %vm12840_vm12, %v3199_v14, %v3203_v30  ;;  %v4552_v55 = vrot.slane %v4401_v25, 5  ;;  %v4546_v36 = vsel %vm12813_vm9, %v4544_v60, %v4545_v35  ;;  %v4406_v47 = vld [vmem:[#allocation2 + $0xd0] sm:$0xf]  ;;  %v4407_v0 = vld [vmem:[#allocation2 + $0xd4] sm:$0x1]  ;;  %v4675_v19 = vld [vmem:[#allocation3 + $0x168] sm:$0xff] }
 0x20f   : > { %3782 = vrot.lane.b32.xlu0 %v12253_v48, %s12671_s14  ;;  %v3209_v44 = vrot.slane %v3208_v39, 4  ;;  %v3216_v20 = vshrl.u32 %v2852_v27, 16  ;;  %v3219_v3 = vshll.u32 %v2852_v27, 16  ;;  %v2264_v9 = vpop.permute.xlu1 %2263  ;;  %v11026_v61 = vcombine.low %v4543_v18, %v4546_v36  ;;  %v4361_v29 = vld [vmem:[#allocation2 + $0x1c] sm:$0xf] }
 0x210   : > { %3316 = vst.msk [vmem:[#allocation3 + $0x210] sm:$0xff] %vm598_vm6, %v10931_v43  ;;  %v4550_v41 = vsel %vm12813_vm9, %v11011_v15, %v4549_v21  ;;  %v4551_v10 = vrot.slane %v4549_v21, 4  ;;  %v3225_v42 = vshll.u32 %v2853_v57, 16  ;;  %v3229_v51 = vshrl.u32 %v2853_v57, 16  ;;  %v4362_v25 = vld [vmem:[#allocation2 + $0x20] sm:$0x1] }
 0x211   : > { %3636 = vst.msk [vmem:[#allocation3 + $0x210] sm:$0xff] %vm2289_vm2, %v3602_v40  ;;  %2301 = vst.msk [vmem:[#allocation3 + $0x1b8] sm:$0xff] %vm2289_vm2, %v2264_v9  ;;  %v3214_v54 = vsel %vm12840_vm12, %v3209_v44, %v3213_v11  ;;  %v3218_v4 = vrot.slane %v3216_v20, 4  ;;  %v3221_v17 = vrot.slane %v3219_v3, 5  ;;  %v3235_v52 = vshll.u32 %v2854_v7, 16  ;;  %v4317_v63 = vpop.permute.xlu0 %4316 }
 0x212   : > { %2625 = vst.msk [vmem:[#allocation3 + $0x1b8] sm:$0xff] %vm2613_vm10, %v14542_v37  ;;  %v10932_v33 = vcombine.low %v3204_v16, %v3214_v54  ;;  %v4553_v26 = vsel %vm12813_vm9, %v4551_v10, %v4552_v55  ;;  %v3227_v34 = vrot.slane %v3225_v42, 5  ;;  %v3231_v45 = vrot.slane %v3229_v51, 4  ;;  %v4360_v37 = vld [vmem:[#allocation2 + $0x18] sm:$0xe]  ;;  %v4678_v42 = vld [vmem:[#allocation3 + $0x190] sm:$0xff] }
 0x213   : > { %4326 = vrot.lane.b32.xlu0 %v14695_v22, %s12673_s20  ;;  %4644 = vst.msk [vmem:[#allocation3 + $0x1f0] sm:$0xff] %vm598_vm6, %v11026_v61  ;;  %v4676_v59 = vld [vmem:[#allocation3 + $0x170] sm:$0xff]  ;;  %v11027_v48 = vcombine.low %v4550_v41, %v4553_v26  ;;  %v3222_v22 = vor.u32 %v3221_v17, %v3218_v4  ;;  %v11012_v62 = vrot.slane %v4402_v58, 9  ;;  %v3237_v6 = vrot.slane %v3235_v52, 5  ;;  %v4363_v2 = vld [vmem:[#allocation2 + $0x24] sm:$0xe] }
 0x214   : > { %2802 = vst.msk [vmem:[#allocation3 + $0x1b8] sm:$0xff] %vm2790_vm11, %v14580_v8  ;;  %4354 = vst.msk [vmem:[#allocation3 + $0x198] sm:$0xff] %vm2790_vm11, %v4317_v63  ;;  %4998 = vmatprep.mubr.bf16.mxu0 %v4676_v59  ;;  %v4556_v5 = vrot.slane %v4403_v32, 5  ;;  %v4559_v13 = vrot.slane %v4404_v24, 5  ;;  %v11013_v46 = vrot.slane %v4405_v38, 9  ;;  %v3232_v8 = vor.u32 %v3231_v45, %v3227_v34 }
 0x215   : > { %3317 = vst.msk [vmem:[#allocation3 + $0x238] sm:$0xff] %vm598_vm6, %v10932_v33  ;;  %4999 = vmatmul.mubr.bf16.gmra.mrb[36].mxu0 %v4675_v19  ;;  %4645 = vst.msk [vmem:[#allocation3 + $0x218] sm:$0xff] %vm598_vm6, %v11027_v48  ;;  %v3223_v30 = vrot.slane %v3222_v22, 4  ;;  %v4563_v23 = vrot.slane %v4406_v47, 5  ;;  %v4566_v11 = vrot.slane %v4407_v0, 5  ;;  %v10998_v60 = vrot.slane %v4360_v37, 9  ;;  %v14786_v37 = vpop.permute.xlu1 %2768 }
 0x216   : > { %v4364_v56 = vld [vmem:[#allocation2 + $0x28] sm:$0xf]  ;;  %v4557_v14 = vsel %vm12813_vm9, %v11012_v62, %v4556_v5  ;;  %v4558_v18 = vrot.slane %v4556_v5, 4  ;;  %v4458_v27 = vrot.slane %v4361_v29, 5  ;;  %v3233_v35 = vrot.slane %v3232_v8, 4 }
 0x217   : > { %v3228_v39 = vsel %vm12840_vm12, %v3223_v30, %v3227_v34  ;;  %v4564_v15 = vsel %vm12813_vm9, %v11013_v46, %v4563_v23  ;;  %v4565_v57 = vrot.slane %v4563_v23, 4  ;;  %v4365_v43 = vld [vmem:[#allocation2 + $0x2c] sm:$0x1]  ;;  %v4367_v16 = vld [vmem:[#allocation2 + $0x34] sm:$0xf]  ;;  %v4461_v58 = vrot.slane %v4362_v25, 5 }
 0x218   : > { %v4560_v21 = vsel %vm12813_vm9, %v4558_v18, %v4559_v13  ;;  %v4459_v55 = vsel %vm12813_vm9, %v10998_v60, %v4458_v27  ;;  %v4460_v7 = vrot.slane %v4458_v27, 4  ;;  %v4366_v40 = vld [vmem:[#allocation2 + $0x30] sm:$0xe]  ;;  %v4368_v44 = vld [vmem:[#allocation2 + $0x38] sm:$0x1]  ;;  %v3238_v3 = vsel %vm12840_vm12, %v3233_v35, %v3237_v6 }
 0x219   : > { %v4370_v36 = vld [vmem:[#allocation2 + $0x40] sm:$0xf]  ;;  %v11028_v32 = vcombine.low %v4557_v14, %v4560_v21  ;;  %v4567_v9 = vsel %vm12813_vm9, %v4565_v57, %v4566_v11  ;;  %v10999_v61 = vrot.slane %v4363_v2, 9  ;;  %v4369_v41 = vld [vmem:[#allocation2 + $0x3c] sm:$0xe]  ;;  %v10933_v24 = vcombine.low %v3228_v39, %v3238_v3 }
 0x21a   : > { %v4686_v20 = vld [vmem:[#allocation3 + $0x1f0] sm:$0xff]  ;;  %v4371_v10 = vld [vmem:[#allocation2 + $0x44] sm:$0x1]  ;;  %v11029_v38 = vcombine.low %v4564_v15, %v4567_v9  ;;  %v4462_v54 = vsel %vm12813_vm9, %v4460_v7, %v4461_v58  ;;  %v4465_v4 = vrot.slane %v4364_v56, 5  ;;  %v4468_v26 = vrot.slane %v4365_v43, 5 }
 0x21b   : > { %11913 = vmatprep.mubr.msk.bf16.mxu1 %vm598_vm6, %v4686_v20  ;;  %v4372_v17 = vld [vmem:[#allocation2 + $0x48] sm:$0xe]  ;;  %v4373_v51 = vld [vmem:[#allocation2 + $0x4c] sm:$0xf]  ;;  %v4679_v47 = vld [vmem:[#allocation3 + $0x198] sm:$0xff]  ;;  %4646 = vst.msk [vmem:[#allocation3 + $0x240] sm:$0xff] %vm598_vm6, %v11028_v32  ;;  %v11014_v33 = vcombine.low %v4459_v55, %v4462_v54 }
 0x21c   : > { %v11000_v34 = vrot.slane %v4366_v40, 9  ;;  %v4472_v52 = vrot.slane %v4367_v16, 5  ;;  %v4374_v0 = vld [vmem:[#allocation2 + $0x50] sm:$0x1]  ;;  %5006 = vmatprep.mubr.bf16.mxu0 %v4679_v47  ;;  %3318 = vst.msk [vmem:[#allocation3 + $0x260] sm:$0xff] %vm598_vm6, %v10933_v24  ;;  %4647 = vst.msk [vmem:[#allocation3 + $0x268] sm:$0xff] %vm598_vm6, %v11029_v38  ;;  %v4466_v63 = vsel %vm12813_vm9, %v10999_v61, %v4465_v4 }
 0x21d   : > { %v4689_v29 = vld [vmem:[#allocation3 + $0x218] sm:$0xff]  ;;  %v4467_v59 = vrot.slane %v4465_v4, 4  ;;  %v4475_v48 = vrot.slane %v4368_v44, 5  ;;  %v11001_v22 = vrot.slane %v4369_v41, 9  ;;  %v4376_v62 = vld [vmem:[#allocation2 + $0x58] sm:$0xf]  ;;  %5007 = vmatmul.mubr.bf16.gmra.mrb[40].mxu0 %v4678_v42 }
 0x21e   : > { %v4375_v45 = vld [vmem:[#allocation2 + $0x54] sm:$0xe]  ;;  %11914 = vmatmul.mubr.msk.bf16.vlgmr.msra.gmra.mrb[0].mxu1 %vm598_vm6, %v4689_v29  ;;  %4632 = vst.msk [vmem:[#allocation3 + $0x10] sm:$0xff] %vm598_vm6, %v11014_v33  ;;  %v4473_v19 = vsel %vm12813_vm9, %v11000_v34, %v4472_v52  ;;  %v4474_v6 = vrot.slane %v4472_v52, 4  ;;  %v4479_v5 = vrot.slane %v4370_v36, 5  ;;  %v4482_v13 = vrot.slane %v4371_v10, 5 }
 0x21f   : > { %v4377_v46 = vld [vmem:[#allocation2 + $0x5c] sm:$0x1]  ;;  %v4469_v30 = vsel %vm12813_vm9, %v4467_v59, %v4468_v26  ;;  %v11002_v8 = vrot.slane %v4372_v17, 9  ;;  %v4486_v23 = vrot.slane %v4373_v51, 5  ;;  %v4489_v11 = vrot.slane %v4374_v0, 5 }
 0x220   : > { %v4379_v25 = vld [vmem:[#allocation2 + $0x64] sm:$0xf]  ;;  %v11015_v56 = vcombine.low %v4466_v63, %v4469_v30  ;;  %v4476_v14 = vsel %vm12813_vm9, %v4474_v6, %v4475_v48  ;;  %v4480_v18 = vsel %vm12813_vm9, %v11001_v22, %v4479_v5  ;;  %v4481_v60 = vrot.slane %v4479_v5, 4  ;;  %v4378_v27 = vld [vmem:[#allocation2 + $0x60] sm:$0xe] }
 0x221   : > { %v4380_v2 = vld [vmem:[#allocation2 + $0x68] sm:$0x1]  ;;  %v11016_v39 = vcombine.low %v4473_v19, %v4476_v14  ;;  %v4487_v35 = vsel %vm12813_vm9, %v11002_v8, %v4486_v23  ;;  %v4488_v15 = vrot.slane %v4486_v23, 4  ;;  %v11003_v57 = vrot.slane %v4375_v45, 9  ;;  %v4381_v43 = vld [vmem:[#allocation2 + $0x6c] sm:$0xe] }
 0x222   : > { %v4382_v16 = vld [vmem:[#allocation2 + $0x70] sm:$0xf]  ;;  %4633 = vst.msk [vmem:[#allocation3 + $0x38] sm:$0xff] %vm598_vm6, %v11015_v56  ;;  %v4483_v21 = vsel %vm12813_vm9, %v4481_v60, %v4482_v13  ;;  %v4493_v55 = vrot.slane %v4376_v62, 5  ;;  %v4496_v7 = vrot.slane %v4377_v46, 5  ;;  %v11004_v58 = vrot.slane %v4378_v27, 9 }
 0x223   : > { %v4383_v40 = vld [vmem:[#allocation2 + $0x74] sm:$0x1]  ;;  %v4692_v44 = vld [vmem:[#allocation3 + $0x240] sm:$0xff]  ;;  %4634 = vst.msk [vmem:[#allocation3 + $0x60] sm:$0xff] %vm598_vm6, %v11016_v39  ;;  %v11017_v36 = vcombine.low %v4480_v18, %v4483_v21  ;;  %v4490_v20 = vsel %vm12813_vm9, %v4488_v15, %v4489_v11  ;;  %v4500_v3 = vrot.slane %v4379_v25, 5  ;;  %v4503_v32 = vrot.slane %v4380_v2, 5 }
 0x224   : > { %v2266_v9 = vpop.permute.xlu1 %2265  ;;  %11917 = vmatprep.mubr.msk.bf16.mxu1 %vm598_vm6, %v4692_v44  ;;  %v4695_v61 = vld [vmem:[#allocation3 + $0x268] sm:$0xff]  ;;  %v11018_v41 = vcombine.low %v4487_v35, %v4490_v20  ;;  %v4494_v10 = vsel %vm12813_vm9, %v11003_v57, %v4493_v55  ;;  %v4495_v42 = vrot.slane %v4493_v55, 4  ;;  %v11005_v24 = vrot.slane %v4381_v43, 9  ;;  %v4385_v47 = vld [vmem:[#allocation2 + $0x7c] sm:$0xf] }
 0x225   : > { %2302 = vst.msk [vmem:[#allocation3 + $0x1e0] sm:$0xff] %vm2289_vm2, %v2266_v9  ;;  %v4501_v38 = vsel %vm12813_vm9, %v11004_v58, %v4500_v3  ;;  %v4502_v54 = vrot.slane %v4500_v3, 4  ;;  %v4507_v4 = vrot.slane %v4382_v16, 5  ;;  %v4510_v17 = vrot.slane %v4383_v40, 5  ;;  %v4384_v29 = vld [vmem:[#allocation2 + $0x78] sm:$0xe] }
 0x226   : > { %4635 = vst.msk [vmem:[#allocation3 + $0x88] sm:$0xff] %vm598_vm6, %v11017_v36  ;;  %11918 = vmatmul.mubr.msk.bf16.gmra.mrb[4].mxu1 %vm598_vm6, %v4695_v61  ;;  %4636 = vst.msk [vmem:[#allocation3 + $0xb0] sm:$0xff] %vm598_vm6, %v11018_v41  ;;  %v4497_v51 = vsel %vm12813_vm9, %v4495_v42, %v4496_v7  ;;  %v4386_v63 = vld [vmem:[#allocation2 + $0x80] sm:$0x1]  ;;  %v4514_v59 = vrot.slane %v4385_v47, 5  ;;  %vm12675_vm5 = vmmov 0  }
 0x227   : > { %2626 = vst.msk [vmem:[#allocation3 + $0x1e0] sm:$0xff] %vm2613_vm10, %v14615_v31  ;;  %v11019_v33 = vcombine.low %v4494_v10, %v4497_v51  ;;  %v4504_v26 = vsel %vm12813_vm9, %v4502_v54, %v4503_v32  ;;  %v4508_v34 = vsel %vm12813_vm9, %v11005_v24, %v4507_v4  ;;  %v4509_v52 = vrot.slane %v4507_v4, 4  ;;  %v4388_v31 = vld [vmem:[#allocation2 + $0x88] sm:$0xf]  ;;  %v4387_v62 = vld [vmem:[#allocation2 + $0x84] sm:$0xe] }
 0x228   : > { %2803 = vst.msk [vmem:[#allocation3 + $0x1e0] sm:$0xff] %vm2790_vm11, %v14654_v50  ;;  %v11020_v0 = vcombine.low %v4501_v38, %v4504_v26  ;;  %v4521_v48 = vrot.slane %v4388_v31, 5  ;;  %v11006_v50 = vrot.slane %v4384_v29, 9  ;;  %v4517_v45 = vrot.slane %v4386_v63, 5  ;;  %v4389_v5 = vld [vmem:[#allocation2 + $0x8c] sm:$0x1] }
 0x229   : > { %4637 = vst.msk [vmem:[#allocation3 + $0xd8] sm:$0xff] %vm598_vm6, %v11019_v33  ;;  %v4511_v22 = vsel %vm12813_vm9, %v4509_v52, %v4510_v17  ;;  %v4516_v6 = vrot.slane %v4514_v59, 4  ;;  %v11007_v13 = vrot.slane %v4387_v62, 9  ;;  %v4524_v8 = vrot.slane %v4389_v5, 5  ;;  %v4391_v18 = vld [vmem:[#allocation2 + $0x94] sm:$0xf] }
 0x22a   : > { %4638 = vst.msk [vmem:[#allocation3 + $0x100] sm:$0xff] %vm598_vm6, %v11020_v0  ;;  %v11021_v19 = vcombine.low %v4508_v34, %v4511_v22  ;;  %v4523_v46 = vrot.slane %v4521_v48, 4  ;;  %v4515_v30 = vsel %vm12813_vm9, %v11006_v50, %v4514_v59  ;;  %v4528_v60 = vrot.slane %v4391_v18, 5  ;;  %v4394_v27 = vld [vmem:[#allocation2 + $0xa0] sm:$0xf]  ;;  %v4681_v38 = vld [vmem:[#allocation3 + $0x1b8] sm:$0xff] }
 0x22b   : > { %v4518_v23 = vsel %vm12813_vm9, %v4516_v6, %v4517_v45  ;;  %v4522_v11 = vsel %vm12813_vm9, %v11007_v13, %v4521_v48  ;;  %v4390_v2 = vld [vmem:[#allocation2 + $0x90] sm:$0xe]  ;;  %v4392_v39 = vld [vmem:[#allocation2 + $0x98] sm:$0x1]  ;;  %v4535_v35 = vrot.slane %v4394_v27, 5  ;;  %vm5230_vm13 = vcmask 523264  }
 0x22c   : > { %4639 = vst.msk [vmem:[#allocation3 + $0x128] sm:$0xff] %vm598_vm6, %v11021_v19  ;;  %v11022_v25 = vcombine.low %v4515_v30, %v4518_v23  ;;  %v4525_v56 = vsel %vm12813_vm9, %v4523_v46, %v4524_v8  ;;  %v11008_v15 = vrot.slane %v4390_v2, 9  ;;  %v4530_v57 = vrot.slane %v4528_v60, 4  ;;  %v4393_v16 = vld [vmem:[#allocation2 + $0x9c] sm:$0xe] }
 0x22d   : > { %v11023_v14 = vcombine.low %v4522_v11, %v4525_v56  ;;  %v4531_v43 = vrot.slane %v4392_v39, 5  ;;  %v4395_v55 = vld [vmem:[#allocation2 + $0xa4] sm:$0x1]  ;;  %v11009_v7 = vrot.slane %v4393_v16, 9  ;;  %v4537_v58 = vrot.slane %v4535_v35, 4 }
 0x22e   : > { %4640 = vst.msk [vmem:[#allocation3 + $0x150] sm:$0xff] %vm598_vm6, %v11022_v25  ;;  %v4529_v40 = vsel %vm12813_vm9, %v11008_v15, %v4528_v60  ;;  %v4538_v36 = vrot.slane %v4395_v55, 5 }
 0x22f   : > { %4641 = vst.msk [vmem:[#allocation3 + $0x178] sm:$0xff] %vm598_vm6, %v11023_v14  ;;  %v4532_v44 = vsel %vm12813_vm9, %v4530_v57, %v4531_v43  ;;  %v4536_v3 = vsel %vm12813_vm9, %v11009_v7, %v4535_v35  ;;  %v4684_v17 = vld [vmem:[#allocation3 + $0x1e0] sm:$0xff]  ;;  %v4650_v35 = vld [vmem:[#allocation3 + $0x10] sm:$0xff]  ;;  %v4653_v7 = vld [vmem:[#allocation3 + $0x38] sm:$0xff] }
 0x230   : > { %v3779_v21 = vpop.permute.xlu0 %3778  ;;  %v11024_v20 = vcombine.low %v4529_v40, %v4532_v44  ;;  %v4539_v32 = vsel %vm12813_vm9, %v4537_v58, %v4538_v36  ;;  %v4656_v58 = vld [vmem:[#allocation3 + $0x60] sm:$0xff] }
 0x231   : > { %3813 = vst.msk [vmem:[#allocation3 + $0x210] sm:$0xff] %vm2613_vm10, %v3779_v21  ;;  %v11025_v41 = vcombine.low %v4536_v3, %v4539_v32  ;;  %v4659_v3 = vld [vmem:[#allocation3 + $0x88] sm:$0xff] }
 0x232   : > { %4642 = vst.msk [vmem:[#allocation3 + $0x1a0] sm:$0xff] %vm598_vm6, %v11024_v20 }
 0x233   : > { %4643 = vst.msk [vmem:[#allocation3 + $0x1c8] sm:$0xff] %vm598_vm6, %v11025_v41  ;;  %v4665_v41 = vld [vmem:[#allocation3 + $0xd8] sm:$0xff] }
 0x234   : > { %v4319_v9 = vpop.permute.xlu0 %4318 }
 0x235   : > { %v2268_v61 = vpop.permute.xlu1 %2267  ;;  %4355 = vst.msk [vmem:[#allocation3 + $0x1c0] sm:$0xff] %vm2790_vm11, %v4319_v9  ;;  %v4662_v9 = vld [vmem:[#allocation3 + $0xb0] sm:$0xff] }
 0x236   : > { %2303 = vst.msk [vmem:[#allocation3 + $0x208] sm:$0xff] %vm2289_vm2, %v2268_v61 }
 0x237   : > { %2627 = vst.msk [vmem:[#allocation3 + $0x208] sm:$0xff] %vm2613_vm10, %v14728_v53 }
 0x238   : > { %2804 = vst.msk [vmem:[#allocation3 + $0x208] sm:$0xff] %vm2790_vm11, %v14786_v37  ;;  %v3604_v10 = vpop.permute.xlu0 %3603 }
 0x239   : > { %3637 = vst.msk [vmem:[#allocation3 + $0x238] sm:$0xff] %vm2289_vm2, %v3604_v10  ;;  %v4668_v10 = vld [vmem:[#allocation3 + $0x100] sm:$0xff] }
 0x23c   : > { %v4321_v42 = vpop.permute.xlu0 %4320  ;;  %v4682_v24 = vld [vmem:[#allocation3 + $0x1c0] sm:$0xff] }
 0x23d   : > { %4356 = vst.msk [vmem:[#allocation3 + $0x1e8] sm:$0xff] %vm2790_vm11, %v4321_v42  ;;  %5014 = vmatprep.mubr.bf16.mxu0 %v4682_v24 }
 0x23e   : > { %5015 = vmatmul.mubr.bf16.gmra.mrb[44].mxu0 %v4681_v38 }
 0x23f   : > { %v4687_v33 = vld [vmem:[#allocation3 + $0x208] sm:$0xff] }
 0x240   : > { %v4323_v54 = vpop.permute.xlu0 %4322 }
 0x241   : > { %4357 = vst.msk [vmem:[#allocation3 + $0x210] sm:$0xff] %vm2790_vm11, %v4323_v54 }
 0x244   : > { %v2270_v4 = vpop.permute.xlu1 %2269  ;;  %v4685_v53 = vld [vmem:[#allocation3 + $0x1e8] sm:$0xff] }
 0x245   : > { %2304 = vst.msk [vmem:[#allocation3 + $0x230] sm:$0xff] %vm2289_vm2, %v2270_v4  ;;  %5022 = vmatprep.mubr.bf16.mxu0 %v4685_v53  ;;  %v4671_v53 = vld [vmem:[#allocation3 + $0x128] sm:$0xff] }
 0x246   : > { %5023 = vmatmul.mubr.bf16.gmra.mrb[48].mxu0 %v4684_v17 }
 0x248   : > { %v4688_v51 = vld [vmem:[#allocation3 + $0x210] sm:$0xff] }
 0x249   : > { %v2594_v37 = vpop.permute.xlu1 %2593  ;;  %5030 = vmatprep.mubr.bf16.mxu0 %v4688_v51  ;;  %v4677_v51 = vld [vmem:[#allocation3 + $0x178] sm:$0xff] }
 0x24a   : > { %2628 = vst.msk [vmem:[#allocation3 + $0x230] sm:$0xff] %vm2613_vm10, %v2594_v37  ;;  %v4674_v37 = vld [vmem:[#allocation3 + $0x150] sm:$0xff] }
 0x24d   : > { %v2771_v47 = vpop.permute.xlu1 %2770 }
 0x24e   : > { %2805 = vst.msk [vmem:[#allocation3 + $0x230] sm:$0xff] %vm2790_vm11, %v2771_v47  ;;  %5031 = vmatmul.mubr.bf16.gmra.mrb[52].mxu0 %v4687_v33  ;;  %v4680_v47 = vld [vmem:[#allocation3 + $0x1a0] sm:$0xff] }
 0x255   : > { %v4690_v23 = vld [vmem:[#allocation3 + $0x230] sm:$0xff] }
 0x25a   : > { %v2272_v26 = vpop.permute.xlu1 %2271 }
 0x25b   : > { %2305 = vst.msk [vmem:[#allocation3 + $0x258] sm:$0xff] %vm2289_vm2, %v2272_v26 }
 0x25e   : > { %v2596_v34 = vpop.permute.xlu1 %2595 }
 0x25f   : > { %2629 = vst.msk [vmem:[#allocation3 + $0x258] sm:$0xff] %vm2613_vm10, %v2596_v34 }
 0x26e   : > { %v11481_v31 = vpop.f32.mrb[0].mxu0 }
 0x26f   : > { %v3781_v52 = vpop.permute.xlu0 %3780  ;;  %v11482_v0 = vpop.f32.mrb[1].mxu0 }
 0x270   : > { %3814 = vst.msk [vmem:[#allocation3 + $0x238] sm:$0xff] %vm2613_vm10, %v3781_v52  ;;  %v14866_v29 = vadd.f32 %v11482_v0, %v11481_v31  ;;  %v11484_v63 = vpop.f32.mrb[2].mxu0 }
 0x271   : > { %v11485_v59 = vpop.f32.mrb[3].mxu0 }
 0x272   : > { %v2773_v48 = vpop.permute.xlu1 %2772  ;;  %v14868_v22 = vadd.f32 %v11485_v59, %v11484_v63  ;;  %v4683_v63 = vld [vmem:[#allocation3 + $0x1c8] sm:$0xff] }
 0x273   : > { %2806 = vst.msk [vmem:[#allocation3 + $0x258] sm:$0xff] %vm2790_vm11, %v2773_v48 }
 0x278   : > { %v11487_v45 = vpop.f32.mrb[4].mxu0 }
 0x279   : > { %v4325_v50 = vpop.permute.xlu0 %4324  ;;  %v11488_v62 = vpop.f32.mrb[5].mxu0 }
 0x27a   : > { %4358 = vst.msk [vmem:[#allocation3 + $0x238] sm:$0xff] %vm2790_vm11, %v4325_v50  ;;  %v14872_v19 = vadd.f32 %v11488_v62, %v11487_v45  ;;  %v11490_v6 = vpop.f32.mrb[6].mxu0  ;;  %v4693_v2 = vld [vmem:[#allocation3 + $0x258] sm:$0xff] }
 0x27b   : > { %v11491_v5 = vpop.f32.mrb[7].mxu0 }
 0x27c   : > { %v14874_v46 = vadd.f32 %v11491_v5, %v11490_v6 }
 0x27d   : > { %v3606_v13 = vpop.permute.xlu0 %3605 }
 0x27e   : > { %3638 = vst.msk [vmem:[#allocation3 + $0x260] sm:$0xff] %vm2289_vm2, %v3606_v13 }
 0x281   : > { %v3783_v30 = vpop.permute.xlu0 %3782  ;;  %v4691_v8 = vld [vmem:[#allocation3 + $0x238] sm:$0xff] }
 0x282   : > { %3815 = vst.msk [vmem:[#allocation3 + $0x260] sm:$0xff] %vm2613_vm10, %v3783_v30  ;;  %5038 = vmatprep.mubr.bf16.mxu0 %v4691_v8 }
 0x283   : > { %5039 = vmatmul.mubr.bf16.gmra.mrb[56].mxu0 %v4690_v23 }
 0x284   : > { %v11493_v11 = vpop.f32.mrb[8].mxu0 }
 0x285   : > { %v4327_v25 = vpop.permute.xlu0 %4326  ;;  %v11494_v56 = vpop.f32.mrb[9].mxu0 }
 0x286   : > { %4359 = vst.msk [vmem:[#allocation3 + $0x260] sm:$0xff] %vm2790_vm11, %v4327_v25  ;;  %v14879_v14 = vadd.f32 %v11494_v56, %v11493_v11  ;;  %v11496_v18 = vpop.f32.mrb[10].mxu0 }
 0x287   : > { %v11497_v60 = vpop.f32.mrb[11].mxu0 }
 0x288   : > { %v14881_v27 = vadd.f32 %v11497_v60, %v11496_v18 }
 0x28d   : > { %v4694_v39 = vld [vmem:[#allocation3 + $0x260] sm:$0xff]  ;;  %v11499_v15 = vpop.f32.mrb[12].mxu0 }
 0x28e   : > { %5046 = vmatprep.mubr.bf16.mxu0 %v4694_v39  ;;  %v11500_v57 = vpop.f32.mrb[13].mxu0 }
 0x28f   : > { %5047 = vmatmul.mubr.bf16.gmra.mrb[60].mxu0 %v4693_v2  ;;  %v14884_v43 = vadd.f32 %v11500_v57, %v11499_v15  ;;  %v11502_v16 = vpop.f32.mrb[14].mxu0 }
 0x290   : > { %11889 = vmatprep.mubr.msk.bf16.mxu0 %vm598_vm6, %v4650_v35  ;;  %v11503_v21 = vpop.f32.mrb[15].mxu0 }
 0x291   : > { %v14886_v55 = vadd.f32 %v11503_v21, %v11502_v16 }
 0x297   : > { %11890 = vmatmul.mubr.msk.bf16.vlgmr.msra.gmra.mrb[64].mxu0 %vm598_vm6, %v4653_v7 }
 0x298   : > { %11893 = vmatprep.mubr.msk.bf16.mxu0 %vm598_vm6, %v4656_v58  ;;  %v11505_v40 = vpop.f32.mrb[16].mxu0 }
 0x299   : > { %v11506_v44 = vpop.f32.mrb[17].mxu0 }
 0x29a   : > { %v14890_v36 = vadd.f32 %v11506_v44, %v11505_v40  ;;  %v11508_v20 = vpop.f32.mrb[18].mxu0 }
 0x29b   : > { %v11509_v32 = vpop.f32.mrb[19].mxu0 }
 0x29c   : > { %v14892_v61 = vadd.f32 %v11509_v32, %v11508_v20 }
 0x29f   : > { %11894 = vmatmul.mubr.msk.bf16.gmra.mrb[68].mxu0 %vm598_vm6, %v4659_v3 }
 0x2a0   : > { %11897 = vmatprep.mubr.msk.bf16.mxu0 %vm598_vm6, %v4662_v9 }
 0x2a7   : > { %11898 = vmatmul.mubr.msk.bf16.gmra.mrb[72].mxu0 %vm598_vm6, %v4665_v41  ;;  %v11511_v42 = vpop.f32.mrb[20].mxu0 }
 0x2a8   : > { %11901 = vmatprep.mubr.msk.bf16.mxu0 %vm598_vm6, %v4668_v10  ;;  %v11512_v24 = vpop.f32.mrb[21].mxu0 }
 0x2a9   : > { %v14898_v38 = vadd.f32 %v11512_v24, %v11511_v42  ;;  %v11514_v54 = vpop.f32.mrb[22].mxu0 }
 0x2aa   : > { %v11515_v4 = vpop.f32.mrb[23].mxu0 }
 0x2ab   : > { %v14900_v17 = vadd.f32 %v11515_v4, %v11514_v54 }
 0x2af   : > { %11902 = vmatmul.mubr.msk.bf16.gmra.mrb[76].mxu0 %vm598_vm6, %v4671_v53 }
 0x2b0   : > { %11905 = vmatprep.mubr.msk.bf16.mxu0 %vm598_vm6, %v4674_v37 }
 0x2b6   : > { %v11517_v33 = vpop.f32.mrb[24].mxu0 }
 0x2b7   : > { %11906 = vmatmul.mubr.msk.bf16.gmra.mrb[80].mxu0 %vm598_vm6, %v4677_v51  ;;  %v11518_v26 = vpop.f32.mrb[25].mxu0 }
 0x2b8   : > { %11909 = vmatprep.mubr.msk.bf16.mxu0 %vm598_vm6, %v4680_v47  ;;  %v14906_v34 = vadd.f32 %v11518_v26, %v11517_v33  ;;  %v11520_v52 = vpop.f32.mrb[26].mxu0 }
 0x2b9   : > { %v11521_v31 = vpop.f32.mrb[27].mxu0 }
 0x2ba   : > { %v14908_v0 = vadd.f32 %v11521_v31, %v11520_v52  ;;  %v14938_v52 = vld [vmem:[%s17206_s4] ss:$0 sm:$0xff] }
 0x2bf   : > { %11910 = vmatmul.mubr.msk.bf16.gmra.mrb[84].mxu0 %vm598_vm6, %v4683_v63 }
 0x2ce   : > { %v11523_v59 = vpop.f32.mrb[28].mxu0 }
 0x2cf   : > { %v11524_v48 = vpop.f32.mrb[29].mxu0 }
 0x2d0   : > { %v14911_v50 = vadd.f32 %v11524_v48, %v11523_v59  ;;  %v11526_v45 = vpop.f32.mrb[30].mxu0 }
 0x2d1   : > { %v11527_v62 = vpop.f32.mrb[31].mxu0 }
 0x2d2   : > { %v14913_v6 = vadd.f32 %v11527_v62, %v11526_v45 }
 0x2d6   : > { %v11529_v5 = vpop.f32.mrb[32].mxu0 }
 0x2d7   : > { %v11530_v13 = vpop.f32.mrb[33].mxu0 }
 0x2d8   : > { %v14915_v30 = vadd.f32 %v11530_v13, %v11529_v5  ;;  %v11532_v8 = vpop.f32.mrb[34].mxu0 }
 0x2d9   : > { %v11533_v23 = vpop.f32.mrb[35].mxu0 }
 0x2da   : > { %v14917_v11 = vadd.f32 %v11533_v23, %v11532_v8 }
 0x2e8   : > { %v11535_v25 = vpop.f32.mrb[36].mxu0 }
 0x2e9   : > { %v11536_v56 = vpop.f32.mrb[37].mxu0 }
 0x2ea   : > { %v14919_v18 = vadd.f32 %v11536_v56, %v11535_v25  ;;  %v11538_v60 = vpop.f32.mrb[38].mxu0 }
 0x2eb   : > { %v11539_v2 = vpop.f32.mrb[39].mxu0 }
 0x2ec   : > { %v14921_v39 = vadd.f32 %v11539_v2, %v11538_v60 }
 0x2f0   : > { %v11541_v35 = vpop.f32.mrb[40].mxu0 }
 0x2f1   : > { %v11915_v15 = vpop.f32.mrb[0].mxu1  ;;  %v11542_v57 = vpop.f32.mrb[41].mxu0 }
 0x2f2   : > { %v5185_v16 = vpop.f32.mrb[1].mxu1  ;;  %v14923_v21 = vadd.f32 %v11542_v57, %v11541_v35  ;;  %v11544_v7 = vpop.f32.mrb[42].mxu0  ;;  %v5218_v35 = vld [vmem:[%s17209_s7] sm:$0xff]  ;;  %v5219_v57 = vld [vmem:[%s17209_s7 + $0x8] sm:$0xff] }
 0x2f3   : > { %v11916_v58 = vpop.f32.mrb[2].mxu1  ;;  %v11545_v40 = vpop.f32.mrb[43].mxu0 }
 0x2f4   : > { %v5188_v44 = vpop.f32.mrb[3].mxu1  ;;  %v14925_v20 = vadd.f32 %v11545_v40, %v11544_v7  ;;  %v12674_v40 = vmov 0.0|0.0  }
 0x2f5   : > { %12057 = vmatprep.subr.bf16.mxu1 %v12674_v40 }
 0x2f9   : > { %v14927_v3 = vpop.f32.mrb[4].mxu1 }
 0x2fa   : > { %v5201_v32 = vpop.f32.mrb[5].mxu1 }
 0x2fb   : > { %v14929_v9 = vpop.f32.mrb[6].mxu1 }
 0x2fc   : > { %v5204_v41 = vpop.f32.mrb[7].mxu1 }
 0x311   : > { %v11547_v10 = vpop.f32.mrb[44].mxu0 }
 0x312   : > { %v11548_v42 = vpop.f32.mrb[45].mxu0 }
 0x313   : > { %v14931_v24 = vadd.f32 %v11548_v42, %v11547_v10  ;;  %v11550_v54 = vpop.f32.mrb[46].mxu0  ;;  %v5223_v42 = vld [vmem:[%s17209_s7 + $0x28] sm:$0xff] }
 0x314   : > { %v11551_v4 = vpop.f32.mrb[47].mxu0 }
 0x315   : > { %v14933_v53 = vadd.f32 %v11551_v4, %v11550_v54  ;;  %v12676_v54 = vmov 0.0  }
 0x316   : > { %11937 = vmatprep.mubr.msk.f32.mxu1 %vm12675_vm5, %v12676_v54 }
 0x319   : > { %v11553_v37 = vpop.f32.mrb[48].mxu0 }
 0x31a   : > { %v11554_v51 = vpop.f32.mrb[49].mxu0 }
 0x31b   : > { %v11555_v47 = vadd.f32 %v11554_v51, %v11553_v37  ;;  %v11556_v33 = vpop.f32.mrb[50].mxu0  ;;  %v5224_v37 = vld [vmem:[%s17209_s7 + $0x30] sm:$0xff]  ;;  %v5225_v51 = vld [vmem:[%s17209_s7 + $0x38] sm:$0xff] }
 0x31c   : > { %v11557_v26 = vpop.f32.mrb[51].mxu0 }
 0x31d   : > { %v11558_v31 = vadd.f32 %v11557_v26, %v11556_v33  ;;  %v5025_v63 = vadd.f32 %v11555_v47, %v14938_v52  ;;  %v14990_v47 = vpack.c.bf16 %v5225_v51, %v5224_v37  ;;  %v4929_v51 = vadd.f32 %v14866_v29, %v14938_v52 }
 0x31f   : > { %v14941_v59 = vadd.f32 %v5185_v16, %v5025_v63  ;;  %v5028_v48 = vadd.f32 %v11558_v31, %v14938_v52  ;;  %v14956_v16 = vpack.c.bf16 %v5219_v57, %v5218_v35 }
 0x321   : > { %v14944_v45 = vadd.f32 %v5188_v44, %v5028_v48  ;;  %v11559_v62 = vpop.f32.mrb[52].mxu0  ;;  %v5221_v44 = vld [vmem:[%s17209_s7 + $0x18] sm:$0xff]  ;;  %12059 = vmatpush3.bf16.msra.mxu1 %v14956_v16 }
 0x322   : > { %v11560_v5 = vpop.f32.mrb[53].mxu0  ;;  %12060 = vmatprep.subr.bf16.mxu1 %v12674_v40 }
 0x323   : > { %v11561_v13 = vadd.f32 %v11560_v5, %v11559_v62  ;;  %v11562_v8 = vpop.f32.mrb[54].mxu0 }
 0x324   : > { %v11563_v23 = vpop.f32.mrb[55].mxu0 }
 0x325   : > { %v5033_v25 = vadd.f32 %v11561_v13, %v14938_v52  ;;  %v11564_v56 = vadd.f32 %v11563_v23, %v11562_v8 }
 0x327   : > { %v14947_v60 = vadd.f32 %v11915_v15, %v5033_v25  ;;  %v5036_v2 = vadd.f32 %v11564_v56, %v14938_v52  ;;  %v5220_v15 = vld [vmem:[%s17209_s7 + $0x10] sm:$0xff] }
 0x328   : > { %v14968_v10 = vpack.c.bf16 %v5221_v44, %v5220_v15 }
 0x329   : > { %v14958_v7 = vadd.f32 %v11916_v58, %v5036_v2  ;;  %v5222_v58 = vld [vmem:[%s17209_s7 + $0x20] sm:$0xff] }
 0x32a   : > { %12062 = vmatpush3.bf16.msra.mxu1 %v14968_v10  ;;  %v14980_v4 = vpack.c.bf16 %v5223_v42, %v5222_v58 }
 0x32b   : > { %12063 = vmatprep.subr.bf16.mxu1 %v12674_v40 }
 0x32e   : > { %12065 = vmatpush3.bf16.msra.mxu1 %v14980_v4 }
 0x32f   : > { %12066 = vmatprep.subr.bf16.mxu1 %v12674_v40 }
 0x332   : > { %12068 = vmatpush3.bf16.msra.mxu1 %v14990_v47 }
 0x333   : > { %12069 = vmatprep.subr.bf16.mxu1 %v12674_v40 }
 0x356   : > { %v11565_v33 = vpop.f32.mrb[56].mxu0 }
 0x357   : > { %v11566_v26 = vpop.f32.mrb[57].mxu0 }
 0x358   : > { %v11567_v31 = vadd.f32 %v11566_v26, %v11565_v33  ;;  %v11568_v63 = vpop.f32.mrb[58].mxu0 }
 0x359   : > { %v11569_v48 = vpop.f32.mrb[59].mxu0 }
 0x35a   : > { %v11570_v62 = vadd.f32 %v11569_v48, %v11568_v63  ;;  %v5041_v5 = vadd.f32 %v11567_v31, %v14938_v52  ;;  %v4940_v31 = vadd.f32 %v14874_v46, %v14938_v52  ;;  %v4932_v48 = vadd.f32 %v14868_v22, %v14938_v52 }
 0x35c   : > { %v14996_v13 = vadd.f32 %v5201_v32, %v5041_v5  ;;  %v5044_v8 = vadd.f32 %v11570_v62, %v14938_v52  ;;  %v4937_v32 = vadd.f32 %v14872_v19, %v14938_v52 }
 0x35e   : > { %v14999_v23 = vadd.f32 %v5204_v41, %v5044_v8 }
 0x362   : > { %v11571_v25 = vpop.f32.mrb[60].mxu0 }
 0x363   : > { %v11572_v56 = vpop.f32.mrb[61].mxu0 }
 0x364   : > { %v11573_v2 = vadd.f32 %v11572_v56, %v11571_v25  ;;  %v11574_v35 = vpop.f32.mrb[62].mxu0 }
 0x365   : > { %v11575_v57 = vpop.f32.mrb[63].mxu0 }
 0x366   : > { %v5049_v15 = vadd.f32 %v11573_v2, %v14938_v52  ;;  %v11576_v44 = vadd.f32 %v11575_v57, %v11574_v35  ;;  %v4953_v2 = vadd.f32 %v14884_v43, %v14938_v52 }
 0x368   : > { %v15003_v58 = vadd.f32 %v14927_v3, %v5049_v15  ;;  %v5052_v42 = vadd.f32 %v11576_v44, %v14938_v52 }
 0x36a   : > { %v15009_v37 = vadd.f32 %v14929_v9, %v5052_v42  ;;  %v11891_v41 = vpop.f32.mrb[64].mxu0  ;;  %v4945_v42 = vadd.f32 %v14879_v14, %v14938_v52 }
 0x36b   : > { %v15013_v33 = vadd.f32 %v11891_v41, %v4937_v32  ;;  %v5089_v26 = vpop.f32.mrb[65].mxu0 }
 0x36c   : > { %v15017_v3 = vadd.f32 %v5089_v26, %v4929_v51  ;;  %v11892_v63 = vpop.f32.mrb[66].mxu0 }
 0x36d   : > { %v15021_v19 = vadd.f32 %v11892_v63, %v4940_v31  ;;  %v5092_v9 = vpop.f32.mrb[67].mxu0  ;;  %v5302_v29 = vmul.f32 %v15013_v33, %v15013_v33  ;;  %v5234_v35 = vsel %vm5230_vm13, %v15013_v33, 0.0  ;;  %v4948_v31 = vadd.f32 %v14881_v27, %v14938_v52 }
 0x36e   : > { %v5300_v62 = vmul.f32 %v15017_v3, %v15017_v3  ;;  %v15025_v5 = vadd.f32 %v5092_v9, %v4932_v48  ;;  %v5231_v46 = vsel %vm5230_vm13, %v15017_v3, 0.0  ;;  %v4956_v9 = vadd.f32 %v14886_v55, %v14938_v52 }
 0x36f   : > { %v5303_v25 = vmul.f32 %v15021_v19, %v15021_v19  ;;  %v5335_v43 = vsel %vm5230_vm13, %v5302_v29, 0.0  ;;  %v5236_v63 = vsel %vm5230_vm13, %v15021_v19, 0.0 }
 0x370   : > { %v5232_v8 = vsel %vm5230_vm13, %v15025_v5, 0.0  ;;  %v5301_v22 = vmul.f32 %v15025_v5, %v15025_v5  ;;  %v5332_v57 = vsel %vm5230_vm13, %v5300_v62, 0.0 }
 0x371   : > { %v5233_v56 = vadd.f32 %v5232_v8, %v5231_v46  ;;  %v5337_v14 = vsel %vm5230_vm13, %v5303_v25, 0.0 }
 0x372   : > { %v5333_v15 = vsel %vm5230_vm13, %v5301_v22, 0.0  ;;  %v11895_v44 = vpop.f32.mrb[68].mxu0 }
 0x373   : > { %v5235_v32 = vadd.f32 %v5234_v35, %v5233_v56  ;;  %v5334_v41 = vadd.f32 %v5333_v15, %v5332_v57  ;;  %v15045_v51 = vadd.f32 %v11895_v44, %v4953_v2  ;;  %v5105_v26 = vpop.f32.mrb[69].mxu0  ;;  %v4969_v15 = vadd.f32 %v14898_v38, %v14938_v52 }
 0x374   : > { %v15052_v48 = vadd.f32 %v5105_v26, %v4945_v42  ;;  %v11896_v62 = vpop.f32.mrb[70].mxu0 }
 0x375   : > { %v5336_v46 = vadd.f32 %v5335_v43, %v5334_v41  ;;  %v5237_v8 = vadd.f32 %v5236_v63, %v5235_v32  ;;  %v5108_v22 = vpop.f32.mrb[71].mxu0  ;;  %v15061_v29 = vadd.f32 %v11896_v62, %v4956_v9  ;;  %v5306_v44 = vmul.f32 %v15045_v51, %v15045_v51 }
 0x376   : > { %v5238_v56 = vsel %vm5230_vm13, %v15052_v48, 0.0  ;;  %v5304_v27 = vmul.f32 %v15052_v48, %v15052_v48  ;;  %v15063_v2 = vadd.f32 %v5108_v22, %v4948_v31  ;;  %v5242_v26 = vsel %vm5230_vm13, %v15045_v51, 0.0 }
 0x377   : > { %v5239_v35 = vadd.f32 %v5238_v56, %v5237_v8  ;;  %v5338_v57 = vadd.f32 %v5337_v14, %v5336_v46  ;;  %v4961_v43 = vadd.f32 %v14890_v36, %v14938_v52  ;;  %v4972_v63 = vadd.f32 %v14900_v17, %v14938_v52 }
 0x378   : > { %v5339_v55 = vsel %vm5230_vm13, %v5304_v27, 0.0  ;;  %v5240_v25 = vsel %vm5230_vm13, %v15063_v2, 0.0  ;;  %v5305_v41 = vmul.f32 %v15063_v2, %v15063_v2  ;;  %v5307_v38 = vmul.f32 %v15061_v29, %v15061_v29 }
 0x379   : > { %v5340_v42 = vadd.f32 %v5339_v55, %v5338_v57  ;;  %v5241_v32 = vadd.f32 %v5240_v25, %v5239_v35  ;;  %v5244_v8 = vsel %vm5230_vm13, %v15061_v29, 0.0  ;;  %v4964_v36 = vadd.f32 %v14892_v61, %v14938_v52 }
 0x37a   : > { %v11899_v31 = vpop.f32.mrb[72].mxu0  ;;  %v5341_v62 = vsel %vm5230_vm13, %v5305_v41, 0.0  ;;  %v5343_v17 = vsel %vm5230_vm13, %v5306_v44, 0.0  ;;  %v5345_v41 = vsel %vm5230_vm13, %v5307_v38, 0.0 }
 0x37b   : > { %v5243_v9 = vadd.f32 %v5242_v26, %v5241_v32  ;;  %v15083_v14 = vadd.f32 %v11899_v31, %v4969_v15  ;;  %v5121_v46 = vpop.f32.mrb[73].mxu0  ;;  %v5342_v22 = vadd.f32 %v5341_v62, %v5340_v42  ;;  %v4985_v62 = vadd.f32 %v14911_v50, %v14938_v52 }
 0x37c   : > { %v15087_v56 = vadd.f32 %v5121_v46, %v4961_v43  ;;  %v11900_v27 = vpop.f32.mrb[74].mxu0  ;;  %v4988_v50 = vadd.f32 %v14913_v6, %v14938_v52 }
 0x37d   : > { %v5245_v35 = vadd.f32 %v5244_v8, %v5243_v9  ;;  %v15092_v57 = vadd.f32 %v11900_v27, %v4972_v63  ;;  %v5124_v55 = vpop.f32.mrb[75].mxu0  ;;  %v5344_v25 = vadd.f32 %v5343_v17, %v5342_v22  ;;  %v5310_v63 = vmul.f32 %v15083_v14, %v15083_v14 }
 0x37e   : > { %v5246_v15 = vsel %vm5230_vm13, %v15087_v56, 0.0  ;;  %v5308_v32 = vmul.f32 %v15087_v56, %v15087_v56  ;;  %v15098_v42 = vadd.f32 %v5124_v55, %v4964_v36  ;;  %v5250_v38 = vsel %vm5230_vm13, %v15083_v14, 0.0 }
 0x37f   : > { %v5247_v26 = vadd.f32 %v5246_v15, %v5245_v35  ;;  %v5346_v31 = vadd.f32 %v5345_v41, %v5344_v25  ;;  %v4977_v27 = vadd.f32 %v14906_v34, %v14938_v52  ;;  %v5311_v36 = vmul.f32 %v15092_v57, %v15092_v57 }
 0x380   : > { %v5347_v61 = vsel %vm5230_vm13, %v5308_v32, 0.0  ;;  %v5248_v44 = vsel %vm5230_vm13, %v15098_v42, 0.0  ;;  %v5309_v43 = vmul.f32 %v15098_v42, %v15098_v42  ;;  %v5252_v25 = vsel %vm5230_vm13, %v15092_v57, 0.0 }
 0x381   : > { %v5249_v9 = vadd.f32 %v5248_v44, %v5247_v26  ;;  %v5348_v46 = vadd.f32 %v5347_v61, %v5346_v31  ;;  %v4980_v34 = vadd.f32 %v14908_v0, %v14938_v52  ;;  %v5351_v26 = vsel %vm5230_vm13, %v5310_v63, 0.0 }
 0x382   : > { %v5349_v8 = vsel %vm5230_vm13, %v5309_v43, 0.0  ;;  %v11903_v22 = vpop.f32.mrb[76].mxu0 }
 0x383   : > { %v5251_v17 = vadd.f32 %v5250_v38, %v5249_v9  ;;  %v15117_v35 = vadd.f32 %v11903_v22, %v4985_v62  ;;  %v5137_v55 = vpop.f32.mrb[77].mxu0  ;;  %v5350_v15 = vadd.f32 %v5349_v8, %v5348_v46  ;;  %v5353_v38 = vsel %vm5230_vm13, %v5311_v36, 0.0 }
 0x384   : > { %v15123_v32 = vadd.f32 %v5137_v55, %v4977_v27  ;;  %v11904_v41 = vpop.f32.mrb[78].mxu0  ;;  %v5001_v55 = vadd.f32 %v14919_v18, %v14938_v52  ;;  %v5004_v18 = vadd.f32 %v14921_v39, %v14938_v52 }
 0x385   : > { %v5253_v31 = vadd.f32 %v5252_v25, %v5251_v17  ;;  %v15128_v61 = vadd.f32 %v11904_v41, %v4988_v50  ;;  %v5140_v44 = vpop.f32.mrb[79].mxu0  ;;  %v5352_v43 = vadd.f32 %v5351_v26, %v5350_v15  ;;  %v5314_v27 = vmul.f32 %v15117_v35, %v15117_v35 }
 0x386   : > { %v5254_v6 = vsel %vm5230_vm13, %v15123_v32, 0.0  ;;  %v5312_v9 = vmul.f32 %v15123_v32, %v15123_v32  ;;  %v15134_v62 = vadd.f32 %v5140_v44, %v4980_v34  ;;  %v5258_v36 = vsel %vm5230_vm13, %v15117_v35, 0.0 }
 0x387   : > { %v5255_v46 = vadd.f32 %v5254_v6, %v5253_v31  ;;  %v5354_v8 = vadd.f32 %v5353_v38, %v5352_v43  ;;  %v4993_v41 = vadd.f32 %v14915_v30, %v14938_v52  ;;  %v5315_v34 = vmul.f32 %v15128_v61, %v15128_v61 }
 0x388   : > { %v5355_v0 = vsel %vm5230_vm13, %v5312_v9, 0.0  ;;  %v5256_v63 = vsel %vm5230_vm13, %v15134_v62, 0.0  ;;  %v5313_v22 = vmul.f32 %v15134_v62, %v15134_v62  ;;  %v5260_v43 = vsel %vm5230_vm13, %v15128_v61, 0.0 }
 0x389   : > { %v5257_v17 = vadd.f32 %v5256_v63, %v5255_v46  ;;  %v5356_v50 = vadd.f32 %v5355_v0, %v5354_v8  ;;  %v4996_v30 = vadd.f32 %v14917_v11, %v14938_v52  ;;  %v5359_v46 = vsel %vm5230_vm13, %v5314_v27, 0.0 }
 0x38a   : > { %v5357_v25 = vsel %vm5230_vm13, %v5313_v22, 0.0  ;;  %v11907_v15 = vpop.f32.mrb[80].mxu0 }
 0x38b   : > { %v5259_v26 = vadd.f32 %v5258_v36, %v5257_v17  ;;  %v15153_v31 = vadd.f32 %v11907_v15, %v5001_v55  ;;  %v5153_v44 = vpop.f32.mrb[81].mxu0  ;;  %v5358_v6 = vadd.f32 %v5357_v25, %v5356_v50  ;;  %v5361_v36 = vsel %vm5230_vm13, %v5315_v34, 0.0 }
 0x38c   : > { %v15159_v9 = vadd.f32 %v5153_v44, %v4993_v41  ;;  %v11908_v38 = vpop.f32.mrb[82].mxu0  ;;  %v5017_v44 = vadd.f32 %v14931_v24, %v14938_v52  ;;  %v5020_v24 = vadd.f32 %v14933_v53, %v14938_v52 }
 0x38d   : > { %v5261_v8 = vadd.f32 %v5260_v43, %v5259_v26  ;;  %v15164_v0 = vadd.f32 %v11908_v38, %v5004_v18  ;;  %v5156_v63 = vpop.f32.mrb[83].mxu0  ;;  %v5360_v22 = vadd.f32 %v5359_v46, %v5358_v6  ;;  %v5318_v41 = vmul.f32 %v15153_v31, %v15153_v31 }
 0x38e   : > { %v5262_v39 = vsel %vm5230_vm13, %v15159_v9, 0.0  ;;  %v5316_v17 = vmul.f32 %v15159_v9, %v15159_v9  ;;  %v15170_v55 = vadd.f32 %v5156_v63, %v4996_v30  ;;  %v5266_v34 = vsel %vm5230_vm13, %v15153_v31, 0.0 }
 0x38f   : > { %v5263_v50 = vadd.f32 %v5262_v39, %v5261_v8  ;;  %v5362_v25 = vadd.f32 %v5361_v36, %v5360_v22  ;;  %v5009_v38 = vadd.f32 %v14923_v21, %v14938_v52  ;;  %v5319_v30 = vmul.f32 %v15164_v0, %v15164_v0 }
 0x390   : > { %v5363_v11 = vsel %vm5230_vm13, %v5316_v17, 0.0  ;;  %v5264_v27 = vsel %vm5230_vm13, %v15170_v55, 0.0  ;;  %v5317_v15 = vmul.f32 %v15170_v55, %v15170_v55  ;;  %v5268_v22 = vsel %vm5230_vm13, %v15164_v0, 0.0 }
 0x391   : > { %v5265_v26 = vadd.f32 %v5264_v27, %v5263_v50  ;;  %v5364_v18 = vadd.f32 %v5363_v11, %v5362_v25  ;;  %v5012_v21 = vadd.f32 %v14925_v20, %v14938_v52  ;;  %v5367_v50 = vsel %vm5230_vm13, %v5318_v41, 0.0 }
 0x392   : > { %v5365_v43 = vsel %vm5230_vm13, %v5317_v15, 0.0  ;;  %v11911_v6 = vpop.f32.mrb[84].mxu0 }
 0x393   : > { %v5267_v46 = vadd.f32 %v5266_v34, %v5265_v26  ;;  %v15189_v8 = vadd.f32 %v11911_v6, %v5017_v44  ;;  %v5169_v63 = vpop.f32.mrb[85].mxu0  ;;  %v5366_v39 = vadd.f32 %v5365_v43, %v5364_v18  ;;  %v5369_v34 = vsel %vm5230_vm13, %v5319_v30, 0.0 }
 0x394   : > { %v15195_v17 = vadd.f32 %v5169_v63, %v5009_v38  ;;  %v11912_v36 = vpop.f32.mrb[86].mxu0 }
 0x395   : > { %v5269_v25 = vadd.f32 %v5268_v22, %v5267_v46  ;;  %v15200_v11 = vadd.f32 %v11912_v36, %v5020_v24  ;;  %v5172_v27 = vpop.f32.mrb[87].mxu0  ;;  %v5368_v15 = vadd.f32 %v5367_v50, %v5366_v39  ;;  %v5322_v6 = vmul.f32 %v15189_v8, %v15189_v8 }
 0x396   : > { %v5270_v53 = vsel %vm5230_vm13, %v15195_v17, 0.0  ;;  %v5320_v26 = vmul.f32 %v15195_v17, %v15195_v17  ;;  %v15206_v44 = vadd.f32 %v5172_v27, %v5012_v21  ;;  %v5274_v46 = vsel %vm5230_vm13, %v15189_v8, 0.0 }
 0x397   : > { %v5271_v18 = vadd.f32 %v5270_v53, %v5269_v25  ;;  %v5370_v43 = vadd.f32 %v5369_v34, %v5368_v15  ;;  %v5323_v24 = vmul.f32 %v15200_v11, %v15200_v11  ;;  %v5276_v39 = vsel %vm5230_vm13, %v15200_v11, 0.0 }
 0x398   : > { %v5371_v20 = vsel %vm5230_vm13, %v5320_v26, 0.0  ;;  %v5272_v52 = vsel %vm5230_vm13, %v15206_v44, 0.0  ;;  %v5321_v41 = vmul.f32 %v15206_v44, %v15206_v44  ;;  %v5324_v21 = vmul.f32 %v14941_v59, %v14941_v59 }
 0x399   : > { %v5273_v38 = vadd.f32 %v5272_v52, %v5271_v18  ;;  %v5372_v63 = vadd.f32 %v5371_v20, %v5370_v43  ;;  %v5375_v50 = vsel %vm5230_vm13, %v5322_v6, 0.0  ;;  %v5278_v27 = vsel %vm5230_vm13, %v14941_v59, 0.0 }
 0x39a   : > { %v5373_v30 = vsel %vm5230_vm13, %v5321_v41, 0.0  ;;  %v5325_v53 = vmul.f32 %v14944_v45, %v14944_v45  ;;  %v5377_v26 = vsel %vm5230_vm13, %v5323_v24, 0.0  ;;  %v5280_v18 = vsel %vm5230_vm13, %v14944_v45, 0.0 }
 0x39b   : > { %v5275_v22 = vadd.f32 %v5274_v46, %v5273_v38  ;;  %v5374_v36 = vadd.f32 %v5373_v30, %v5372_v63  ;;  %v5379_v20 = vsel %vm5230_vm13, %v5324_v21, 0.0  ;;  %v5326_v52 = vmul.f32 %v14947_v60, %v14947_v60 }
 0x39c   : > { %v5282_v6 = vsel %vm5230_vm13, %v14947_v60, 0.0  ;;  %v5381_v46 = vsel %vm5230_vm13, %v5325_v53, 0.0  ;;  %v5327_v63 = vmul.f32 %v14958_v7, %v14958_v7  ;;  %v5284_v24 = vsel %vm5230_vm13, %v14958_v7, 0.0 }
 0x39d   : > { %v5277_v25 = vadd.f32 %v5276_v39, %v5275_v22  ;;  %v5376_v15 = vadd.f32 %v5375_v50, %v5374_v36  ;;  %v5383_v39 = vsel %vm5230_vm13, %v5326_v52, 0.0  ;;  %v5328_v36 = vmul.f32 %v14996_v13, %v14996_v13 }
 0x39e   : > { %v5286_v50 = vsel %vm5230_vm13, %v14996_v13, 0.0  ;;  %v5290_v52 = vsel %vm5230_vm13, %v15003_v58, 0.0 }
 0x39f   : > { %v5279_v34 = vadd.f32 %v5278_v27, %v5277_v25  ;;  %v5378_v43 = vadd.f32 %v5377_v26, %v5376_v15  ;;  %v5385_v27 = vsel %vm5230_vm13, %v5327_v63, 0.0  ;;  %v5329_v15 = vmul.f32 %v14999_v23, %v14999_v23 }
 0x3a0   : > { %v5288_v26 = vsel %vm5230_vm13, %v14999_v23, 0.0  ;;  %v5331_v63 = vmul.f32 %v15009_v37, %v15009_v37 }
 0x3a1   : > { %v5281_v41 = vadd.f32 %v5280_v18, %v5279_v34  ;;  %v5380_v38 = vadd.f32 %v5379_v20, %v5378_v43  ;;  %v5387_v18 = vsel %vm5230_vm13, %v5328_v36, 0.0  ;;  %v5330_v43 = vmul.f32 %v15003_v58, %v15003_v58 }
 0x3a3   : > { %v5283_v30 = vadd.f32 %v5282_v6, %v5281_v41  ;;  %v5382_v22 = vadd.f32 %v5381_v46, %v5380_v38  ;;  %v5389_v6 = vsel %vm5230_vm13, %v5329_v15, 0.0  ;;  %v5292_v46 = vsel %vm5230_vm13, %v15009_v37, 0.0 }
 0x3a5   : > { %v5285_v21 = vadd.f32 %v5284_v24, %v5283_v30  ;;  %v5384_v25 = vadd.f32 %v5383_v39, %v5382_v22  ;;  %v5391_v24 = vsel %vm5230_vm13, %v5330_v43, 0.0 }
 0x3a7   : > { %v5287_v53 = vadd.f32 %v5286_v50, %v5285_v21  ;;  %v5386_v34 = vadd.f32 %v5385_v27, %v5384_v25  ;;  %v5393_v21 = vsel %vm5230_vm13, %v5331_v63, 0.0 }
 0x3a9   : > { %v5289_v20 = vadd.f32 %v5288_v26, %v5287_v53  ;;  %v5388_v41 = vadd.f32 %v5387_v18, %v5386_v34 }
 0x3ab   : > { %v5291_v38 = vadd.f32 %v5290_v52, %v5289_v20  ;;  %v5390_v30 = vadd.f32 %v5389_v6, %v5388_v41  ;;  %v5227_v41 = vld [vmem:[%s17210_s8 + $0x8] sm:$0xff] }
 0x3ad   : > { %v5293_v22 = vadd.f32 %v5292_v46, %v5291_v38  ;;  %v5392_v39 = vadd.f32 %v5391_v24, %v5390_v30 }
 0x3af   : > { %v5294_v36 = vrot.slane %v5293_v22, 4  ;;  %v5394_v25 = vadd.f32 %v5393_v21, %v5392_v39 }
 0x3b1   : > { %v5295_v50 = vadd.f32 %v5294_v36, %v5293_v22  ;;  %v5395_v15 = vrot.slane %v5394_v25, 4 }
 0x3b3   : > { %v5296_v27 = vrot.slane %v5295_v50, 2  ;;  %v5396_v18 = vadd.f32 %v5395_v15, %v5394_v25  ;;  %v6677_v15 = vld [vmem:[#allocation2 + $0x4] sm:$0xf] }
 0x3b5   : > { %v5297_v53 = vadd.f32 %v5296_v27, %v5295_v50  ;;  %v5397_v43 = vrot.slane %v5396_v18, 2 }
 0x3b7   : > { %v5298_v26 = vrot.slane %v5297_v53, 1  ;;  %v5398_v20 = vadd.f32 %v5397_v43, %v5396_v18  ;;  %v6734_v18 = vshll.u32 %v6677_v15, 16  ;;  %v6678_v43 = vld [vmem:[#allocation2 + $0x8] sm:$0x1] }
 0x3b9   : > { %v5299_v34 = vadd.f32 %v5298_v26, %v5297_v53  ;;  %v5399_v52 = vrot.slane %v5398_v20, 1  ;;  %v6676_v53 = vld [vmem:[#allocation2] sm:$0xf] }
 0x3ba   : > { %v6725_v26 = vshrl.u32 %v6676_v53, 16 }
 0x3bb   : > { %11938 = vmatmul.mubr.msk.f32.vlgmr.msra.gmra.mrb[8].mxu1 %vm5230_vm13, %v5299_v34  ;;  %v6728_v34 = vshll.u32 %v6676_v53, 16  ;;  %v17320_v53 = vld [vmem:[#allocation8_spill] sm:$0xff] }
 0x3bc   : > { %12071 = vmatpush3.bf16.msra.mxu1 %v14956_v16  ;;  %11956 = vmatprep.mubr.msk.f32.mxu1 %vm12675_vm5, %v12676_v54  ;;  %v5226_v16 = vld [vmem:[%s17210_s8] sm:$0xff] }
 0x3bd   : > { %12072 = vmatprep.subr.bf16.mxu1 %v12674_v40  ;;  %v12082_v6 = vpack.c.bf16 %v5227_v41, %v5226_v16  ;;  %v6744_v41 = vshll.u32 %v6678_v43, 16 }
 0x3c0   : > { %12074 = vmatpush3.bf16.msra.mxu1 %v14968_v10  ;;  %v5400_v10 = vadd.f32 %v5399_v52, %v5398_v20  ;;  %v6730_v20 = vrot.slane %v6728_v34, 5  ;;  %v6736_v52 = vrot.slane %v6734_v18, 5 }
 0x3c1   : > { %12075 = vmatprep.subr.bf16.mxu1 %v12674_v40 }
 0x3c4   : > { %12077 = vmatpush3.bf16.msra.mxu1 %v14980_v4  ;;  %v5228_v4 = vld [vmem:[%s17210_s8 + $0x10] sm:$0xff] }
 0x3c5   : > { %12078 = vmatprep.subr.bf16.mxu1 %v12674_v40 }
 0x3c8   : > { %12080 = vmatpush3.bf16.msra.mxu1 %v14990_v47  ;;  %v5229_v47 = vld [vmem:[%s17210_s8 + $0x18] sm:$0xff] }
 0x3c9   : > { %12081 = vmatprep.subr.bf16.mxu1 %v12674_v40  ;;  %v12085_v38 = vpack.c.bf16 %v5229_v47, %v5228_v4  ;;  %v6746_v4 = vrot.slane %v6744_v41, 5 }
 0x3cb   : > { %11957 = vmatmul.mubr.msk.f32.vlgmr.msra.gmra.mrb[10].mxu1 %vm5230_vm13, %v5400_v10 }
 0x3cc   : > { %12083 = vmatpush3.bf16.msra.mxu1 %v12082_v6  ;;  %11967 = vmatprep.mubr.msk.f32.mxu1 %vm12675_vm5, %v12676_v54 }
 0x3cd   : > { %12084 = vmatprep.subr.bf16.mxu1 %v12674_v40 }
 0x3d0   : > { %12086 = vmatpush3.bf16.msra.mxu1 %v12085_v38 }
 0x3d1   : > { %12087 = vmatprep.subr.bf16.mxu1 %v12674_v40 }
 0x48e   : > { %v5470_v46 = vpop.f32.mrb[8].mxu1 }
 0x48f   : > { %v5474_v63 = vmul.f32 0.001953125, %v5470_v46  ;;  %v11939_v30 = vpop.f32.mrb[9].mxu1 }
 0x491   : > { %11968 = vmatmul.mubr.msk.f32.vlgmr.msra.gmra.mrb[12].mxu1 %vm598_vm6, %v5474_v63  ;;  %v5549_v22 = vmul.f32 %v5474_v63, %v5474_v63 }
 0x492   : > { %12089 = vmatpush3.bf16.msra.mxu1 %v12082_v6  ;;  %11978 = vmatprep.mubr.msk.f32.mxu1 %vm12675_vm5, %v12676_v54  ;;  %v6738_v54 = vshrl.u32 %v6677_v15, 16 }
 0x493   : > { %12090 = vmatprep.subr.bf16.mxu1 %v12674_v40  ;;  %v6727_v40 = vrot.slane %v6725_v26, 4 }
 0x494   : > { %v6740_v16 = vrot.slane %v6738_v54, 4 }
 0x495   : > { %v6731_v6 = vor.u32 %v6730_v20, %v6727_v40 }
 0x496   : > { %12092 = vmatpush3.bf16.msra.mxu1 %v12085_v38  ;;  %v6741_v10 = vor.u32 %v6740_v16, %v6736_v52 }
 0x497   : > { %v6732_v47 = vrot.slane %v6731_v6, 4 }
 0x498   : > { %v6742_v38 = vrot.slane %v6741_v10, 4 }
 0x499   : > { %v6737_v46 = vsel %vm12840_vm12, %v6732_v47, %v6736_v52 }
 0x49a   : > { %v6747_v63 = vsel %vm12840_vm12, %v6742_v38, %v6746_v4 }
 0x49b   : > { %v11149_v30 = vcombine.low %v6737_v46, %v6747_v63 }
 0x49d   : > { %7156 = vrot.lane.b32.xlu1 %v11149_v30, %s12671_s14 }
 0x49e   : > { %v5544_v24 = vpop.f32.mrb[10].mxu1 }
 0x49f   : > { %v5548_v39 = vmul.f32 0.001953125, %v5544_v24  ;;  %v11958_v36 = vpop.f32.mrb[11].mxu1 }
 0x4a1   : > { %v5550_v21 = vsub.f32 %v5548_v39, %v5549_v22  ;;  %v5216_v39 = vld [vmem:[%s17207_s5] sm:$0x1] }
 0x4a3   : > { %v5551_v50 = vmax.f32 %v5550_v21, 0.0 }
 0x4a5   : > { %v5552_v25 = vadd.f32 1e-06, %v5551_v50 }
 0x4a7   : > { %12490 = vrsqrt.f32 %v5552_v25  ;;  %v5217_v25 = vld [vmem:[%s17208_s6] sm:$0x1] }
 0x4b1   : > { %v12491_v27 = vpop.eup %12490 }
 0x4b2   : > { %11979 = vmatmul.mubr.msk.f32.vlgmr.msra.gmra.mrb[14].mxu1 %vm598_vm6, %v12491_v27 }
 0x564   : > { %v5623_v24 = vpop.f32.mrb[12].mxu1 }
 0x565   : > { %v11969_v22 = vpop.f32.mrb[13].mxu1 }
 0x585   : > { %v5696_v36 = vpop.f32.mrb[14].mxu1 }
 0x586   : > { %v5700_v21 = vmul.f32 %v5696_v36, %v5216_v39  ;;  %v11980_v50 = vpop.f32.mrb[15].mxu1 }
 0x588   : > { %v5701_v27 = vmul.f32 %v5700_v21, %v5623_v24  ;;  %v5706_v15 = vrot.slane %v5700_v21, %v17320_v53 }
 0x58a   : > { %v5702_v26 = vsub.f32 %v5217_v25, %v5701_v27  ;;  %v5707_v34 = vmul.f32 %v5706_v15, %v15017_v3  ;;  %v5708_v18 = vmul.f32 %v5706_v15, %v15025_v5  ;;  %v5709_v54 = vmul.f32 %v5706_v15, %v15013_v33 }
 0x58b   : > { %v5710_v43 = vmul.f32 %v5706_v15, %v15021_v19  ;;  %v5711_v40 = vmul.f32 %v5706_v15, %v15052_v48  ;;  %v5712_v20 = vmul.f32 %v5706_v15, %v15063_v2  ;;  %v5713_v52 = vmul.f32 %v5706_v15, %v15045_v51 }
 0x58c   : > { %v5743_v16 = vrot.slane %v5702_v26, %v17320_v53  ;;  %v5714_v41 = vmul.f32 %v5706_v15, %v15061_v29  ;;  %v5715_v6 = vmul.f32 %v5706_v15, %v15087_v56  ;;  %v5716_v3 = vmul.f32 %v5706_v15, %v15098_v42 }
 0x58d   : > { %v5717_v5 = vmul.f32 %v5706_v15, %v15083_v14  ;;  %v5718_v33 = vmul.f32 %v5706_v15, %v15092_v57  ;;  %v5719_v19 = vmul.f32 %v5706_v15, %v15123_v32  ;;  %v5720_v48 = vmul.f32 %v5706_v15, %v15134_v62 }
 0x58e   : > { %v5721_v2 = vmul.f32 %v5706_v15, %v15117_v35  ;;  %v5722_v51 = vmul.f32 %v5706_v15, %v15128_v61  ;;  %v5723_v10 = vmul.f32 %v5706_v15, %v15159_v9  ;;  %v5724_v29 = vmul.f32 %v5706_v15, %v15170_v55 }
 0x58f   : > { %v5725_v56 = vmul.f32 %v5706_v15, %v15153_v31  ;;  %v5726_v42 = vmul.f32 %v5706_v15, %v15164_v0  ;;  %v5727_v14 = vmul.f32 %v5706_v15, %v15195_v17  ;;  %v5728_v57 = vmul.f32 %v5706_v15, %v15206_v44 }
 0x590   : > { %v5729_v32 = vmul.f32 %v5706_v15, %v15189_v8  ;;  %v5730_v62 = vmul.f32 %v5706_v15, %v15200_v11  ;;  %v5731_v35 = vmul.f32 %v5706_v15, %v14941_v59  ;;  %v5732_v61 = vmul.f32 %v5706_v15, %v14944_v45 }
 0x591   : > { %v5733_v9 = vmul.f32 %v5706_v15, %v14947_v60  ;;  %v5734_v55 = vmul.f32 %v5706_v15, %v14958_v7  ;;  %v5735_v31 = vmul.f32 %v5706_v15, %v14996_v13  ;;  %v5736_v0 = vmul.f32 %v5706_v15, %v14999_v23 }
 0x592   : > { %v5737_v17 = vmul.f32 %v5706_v15, %v15003_v58  ;;  %v5738_v44 = vmul.f32 %v5706_v15, %v15009_v37  ;;  %v15343_v4 = vadd.f32 %v5743_v16, %v5707_v34  ;;  %v15345_v8 = vadd.f32 %v5743_v16, %v5708_v18 }
 0x593   : > { %v15347_v11 = vadd.f32 %v5743_v16, %v5709_v54  ;;  %v15349_v59 = vadd.f32 %v5743_v16, %v5710_v43  ;;  %v15351_v45 = vadd.f32 %v5743_v16, %v5711_v40  ;;  %v15353_v60 = vadd.f32 %v5743_v16, %v5712_v20 }
 0x594   : > { %v15355_v7 = vadd.f32 %v5743_v16, %v5713_v52  ;;  %v15357_v13 = vadd.f32 %v5743_v16, %v5714_v41  ;;  %v15359_v23 = vadd.f32 %v5743_v16, %v5715_v6  ;;  %v15361_v58 = vadd.f32 %v5743_v16, %v5716_v3 }
 0x595   : > { %v15363_v37 = vadd.f32 %v5743_v16, %v5717_v5  ;;  %v15365_v47 = vadd.f32 %v5743_v16, %v5718_v33  ;;  %v15367_v38 = vadd.f32 %v5743_v16, %v5719_v19  ;;  %v15369_v46 = vadd.f32 %v5743_v16, %v5720_v48 }
 0x596   : > { %v15371_v63 = vadd.f32 %v5743_v16, %v5721_v2  ;;  %v15373_v30 = vadd.f32 %v5743_v16, %v5722_v51  ;;  %v15375_v24 = vadd.f32 %v5743_v16, %v5723_v10  ;;  %v15377_v22 = vadd.f32 %v5743_v16, %v5724_v29 }
 0x597   : > { %v15379_v39 = vadd.f32 %v5743_v16, %v5725_v56  ;;  %v15381_v36 = vadd.f32 %v5743_v16, %v5726_v42  ;;  %v15383_v21 = vadd.f32 %v5743_v16, %v5727_v14  ;;  %v15385_v50 = vadd.f32 %v5743_v16, %v5728_v57 }
 0x598   : > { %v15387_v25 = vadd.f32 %v5743_v16, %v5729_v32  ;;  %v15389_v27 = vadd.f32 %v5743_v16, %v5730_v62  ;;  %v15391_v53 = vadd.f32 %v5743_v16, %v5731_v35  ;;  %v15393_v15 = vadd.f32 %v5743_v16, %v5732_v61 }
 0x599   : > { %v15395_v26 = vadd.f32 %v5743_v16, %v5733_v9  ;;  %v15397_v34 = vadd.f32 %v5743_v16, %v5734_v55  ;;  %v15399_v18 = vadd.f32 %v5743_v16, %v5735_v31  ;;  %v15401_v54 = vadd.f32 %v5743_v16, %v5736_v0 }
 0x59a   : > { %17321 = vst [vmem:[#allocation10_spill] sm:$0xff] %v15389_v27  ;;  %17322 = vst [vmem:[#allocation15_spill] sm:$0xff] %v15391_v53  ;;  %v15403_v43 = vadd.f32 %v5743_v16, %v5737_v17  ;;  %v15405_v40 = vadd.f32 %v5743_v16, %v5738_v44  ;;  %v11069_v20 = vmul.f32 -1.442695, %v15343_v4  ;;  %v11070_v52 = vmul.f32 -1.442695, %v15345_v8 }
 0x59b   : > { %17323 = vst [vmem:[#allocation13_spill] sm:$0xff] %v15393_v15  ;;  %17324 = vst [vmem:[#allocation16_spill] sm:$0xff] %v15395_v26  ;;  %v11071_v41 = vmul.f32 -1.442695, %v15347_v11  ;;  %v11072_v6 = vmul.f32 -1.442695, %v15349_v59 }
 0x59c   : > { %17325 = vst [vmem:[#allocation11_spill] sm:$0xff] %v15397_v34  ;;  %17326 = vst [vmem:[#allocation17_spill] sm:$0xff] %v15399_v18  ;;  %12492 = vpow2.f32 %v11069_v20  ;;  %v11073_v3 = vmul.f32 -1.442695, %v15351_v45  ;;  %v11074_v5 = vmul.f32 -1.442695, %v15353_v60 }
 0x59d   : > { %17327 = vst [vmem:[#allocation5_spill] sm:$0xff] %v15401_v54  ;;  %17328 = vst [vmem:[#allocation19_spill] sm:$0xff] %v15403_v43  ;;  %12494 = vpow2.f32 %v11070_v52  ;;  %v11075_v33 = vmul.f32 -1.442695, %v15355_v7  ;;  %v11076_v16 = vmul.f32 -1.442695, %v15357_v13 }
 0x59e   : > { %17329 = vst [vmem:[#allocation12_spill] sm:$0xff] %v15405_v40  ;;  %12496 = vpow2.f32 %v11071_v41  ;;  %v11077_v19 = vmul.f32 -1.442695, %v15359_v23  ;;  %v11078_v48 = vmul.f32 -1.442695, %v15361_v58 }
 0x59f   : > { %12498 = vpow2.f32 %v11072_v6  ;;  %v11079_v2 = vmul.f32 -1.442695, %v15363_v37  ;;  %v11080_v51 = vmul.f32 -1.442695, %v15365_v47  ;;  %v11081_v10 = vmul.f32 -1.442695, %v15367_v38 }
 0x5a0   : > { %12500 = vpow2.f32 %v11073_v3  ;;  %v11082_v14 = vmul.f32 -1.442695, %v15369_v46  ;;  %v11083_v62 = vmul.f32 -1.442695, %v15371_v63  ;;  %v11084_v61 = vmul.f32 -1.442695, %v15373_v30 }
 0x5a1   : > { %12502 = vpow2.f32 %v11074_v5  ;;  %v11085_v55 = vmul.f32 -1.442695, %v15375_v24  ;;  %v11086_v0 = vmul.f32 -1.442695, %v15377_v22  ;;  %v11087_v44 = vmul.f32 -1.442695, %v15379_v39 }
 0x5a2   : > { %12504 = vpow2.f32 %v11075_v33  ;;  %v11088_v52 = vmul.f32 -1.442695, %v15381_v36  ;;  %v11089_v6 = vmul.f32 -1.442695, %v15383_v21  ;;  %v11090_v5 = vmul.f32 -1.442695, %v15385_v50 }
 0x5a3   : > { %12506 = vpow2.f32 %v11076_v16  ;;  %v11091_v16 = vmul.f32 -1.442695, %v15387_v25 }
 0x5a4   : > { %12508 = vpow2.f32 %v11077_v19 }
 0x5a5   : > { %12510 = vpow2.f32 %v11078_v48  ;;  %v11092_v48 = vmul.f32 -1.442695, %v15389_v27 }
 0x5a6   : > { %v12493_v29 = vpop.eup %12492  ;;  %12512 = vpow2.f32 %v11079_v2 }
 0x5a7   : > { %v12495_v56 = vpop.eup %12494  ;;  %v5873_v42 = vadd.f32 1.0, %v12493_v29  ;;  %12514 = vpow2.f32 %v11080_v51  ;;  %v11093_v51 = vmul.f32 -1.442695, %v15391_v53  ;;  %v11094_v29 = vmul.f32 -1.442695, %v15393_v15 }
 0x5a8   : > { %v12497_v57 = vpop.eup %12496  ;;  %v5874_v32 = vadd.f32 1.0, %v12495_v56  ;;  %12516 = vpow2.f32 %v11081_v10 }
 0x5a9   : > { %v12499_v35 = vpop.eup %12498  ;;  %12518 = vrcp.f32 %v5873_v42 }
 0x5aa   : > { %v15423_v9 = vpop.eup %12500  ;;  %12520 = vrcp.f32 %v5874_v32 }
 0x5ab   : > { %v15426_v31 = vpop.eup %12502  ;;  %12522 = vpow2.f32 %v11082_v14  ;;  %v11095_v14 = vmul.f32 -1.442695, %v15395_v26 }
 0x5ac   : > { %v15429_v17 = vpop.eup %12504  ;;  %12524 = vpow2.f32 %v11083_v62 }
 0x5ad   : > { %v15432_v20 = vpop.eup %12506  ;;  %12526 = vpow2.f32 %v11084_v61  ;;  %v11096_v61 = vmul.f32 -1.442695, %v15397_v34  ;;  %v5879_v53 = vadd.f32 1.0, %v15429_v17 }
 0x5ae   : > { %v15435_v41 = vpop.eup %12508  ;;  %12528 = vpow2.f32 %v11085_v55 }
 0x5af   : > { %v15438_v3 = vpop.eup %12510  ;;  %12530 = vpow2.f32 %v11086_v0 }
 0x5b0   : > { %v15441_v33 = vpop.eup %12512  ;;  %12532 = vpow2.f32 %v11087_v44  ;;  %v11097_v44 = vmul.f32 -1.442695, %v15399_v18 }
 0x5b1   : > { %v15444_v19 = vpop.eup %12514  ;;  %12534 = vpow2.f32 %v11088_v52 }
 0x5b2   : > { %v15447_v2 = vpop.eup %12516  ;;  %12536 = vpow2.f32 %v11089_v6 }
 0x5b3   : > { %v12519_v10 = vpop.eup %12518  ;;  %12538 = vpow2.f32 %v11090_v5  ;;  %v11098_v5 = vmul.f32 -1.442695, %v15401_v54 }
 0x5b4   : > { %v12521_v56 = vpop.eup %12520  ;;  %v5969_v42 = vmul.f32 %v12519_v10, %v15343_v4  ;;  %12540 = vpow2.f32 %v11091_v16  ;;  %v11099_v16 = vmul.f32 -1.442695, %v15403_v43  ;;  %v6420_v43 = vld [vmem:[#allocation2 + $0xc] sm:$0xf] }
 0x5b5   : > { %v12523_v32 = vpop.eup %12522  ;;  %v5970_v62 = vmul.f32 %v12521_v56, %v15345_v8  ;;  %12542 = vpow2.f32 %v11092_v48  ;;  %v11100_v56 = vmul.f32 -1.442695, %v15405_v40  ;;  %v5875_v48 = vadd.f32 1.0, %v12497_v57  ;;  %v6424_v57 = vld [vmem:[#allocation2 + $0x14] sm:$0x1] }
 0x5b6   : > { %v12525_v55 = vpop.eup %12524  ;;  %v11433_v0 = vpack.c.bf16 %v5969_v42, %v5969_v42  ;;  %12544 = vpow2.f32 %v11093_v51  ;;  %v5876_v51 = vadd.f32 1.0, %v12499_v35  ;;  %v5877_v40 = vadd.f32 1.0, %v15423_v9 }
 0x5b7   : > { %v12527_v52 = vpop.eup %12526  ;;  %v11434_v6 = vpack.c.bf16 %v5970_v62, %v5970_v62  ;;  %12546 = vpow2.f32 %v11094_v29  ;;  %v17330_v29 = vmov 0  ;;  %v5878_v35 = vadd.f32 1.0, %v15426_v31 }
 0x5b8   : > { %v12529_v4 = vpop.eup %12528  ;;  %v6099_v10 = vshrl.u32 %v11433_v0, 16  ;;  %12548 = vpow2.f32 %v11095_v14  ;;  %v6102_v18 = vshll.u32 %v11433_v0, 16  ;;  %v17331_v29 = vsel %vm15461_vm14, 4294967295, %v17330_v29 }
 0x5b9   : > { %v12531_v28 = vpop.eup %12530  ;;  %v6107_v8 = vshrl.u32 %v11434_v6, 16  ;;  %12550 = vpow2.f32 %v11096_v61  ;;  %17332 = vst [vmem:[#allocation18_spill] sm:$0xff] %v17331_v29  ;;  %v6110_v54 = vshll.u32 %v11434_v6, 16  ;;  %v5880_v9 = vadd.f32 1.0, %v15432_v20 }
 0x5ba   : > { %v12533_v42 = vpop.eup %12532  ;;  %v6101_v34 = vrot.slane %v6099_v10, 7  ;;  %12552 = vpow2.f32 %v11097_v44  ;;  %v5882_v31 = vadd.f32 1.0, %v15438_v3  ;;  %v5885_v20 = vadd.f32 1.0, %v15447_v2 }
 0x5bb   : > { %v12535_v62 = vpop.eup %12534  ;;  %v6109_v14 = vrot.slane %v6107_v8, 7  ;;  %12554 = vpow2.f32 %v11098_v5  ;;  %v5881_v5 = vadd.f32 1.0, %v15435_v41  ;;  %v5887_v8 = vadd.f32 1.0, %v12525_v55 }
 0x5bc   : > { %v12537_v61 = vpop.eup %12536  ;;  %v6104_v26 = vor.u32 %v6102_v18, %v6101_v34  ;;  %v6105_v10 = vrot.slane %v6101_v34, 4  ;;  %12556 = vpow2.f32 %v11099_v16  ;;  %v5886_v16 = vadd.f32 1.0, %v12523_v32 }
 0x5bd   : > { %v12539_v0 = vpop.eup %12538  ;;  %v6112_v44 = vor.u32 %v6110_v54, %v6109_v14  ;;  %v6114_v15 = vrot.slane %v6109_v14, 4  ;;  %12558 = vpow2.f32 %v11100_v56  ;;  %v5888_v56 = vadd.f32 1.0, %v12527_v52 }
 0x5be   : > { %v12541_v27 = vpop.eup %12540  ;;  %v6421_v6 = vsel %vm15461_vm14, %v6104_v26, %v6420_v43  ;;  %12560 = vrcp.f32 %v5875_v48  ;;  %v5883_v26 = vadd.f32 1.0, %v15441_v33  ;;  %v5884_v43 = vadd.f32 1.0, %v15444_v19 }
 0x5bf   : > { %v12543_v18 = vpop.eup %12542  ;;  %v6113_v34 = vsel %vm13311_vm1, %v6105_v10, %v6112_v44  ;;  %6422 = vst [vmem:[#allocation2 + $0xc] sm:$0xf] %v6421_v6  ;;  %v6425_v54 = vsel %vm12763_vm3, %v6114_v15, %v6424_v57  ;;  %12562 = vrcp.f32 %v5876_v51  ;;  %v5889_v48 = vadd.f32 1.0, %v12529_v4 }
 0x5c0   : > { %v12545_v17 = vpop.eup %12544  ;;  %6423 = vst.msk [vmem:[#allocation2 + $0x10] sm:$0xf] %vm442_vm0, %v6113_v34  ;;  %6426 = vst [vmem:[#allocation2 + $0x14] sm:$0x1] %v6425_v54  ;;  %12564 = vrcp.f32 %v5877_v40  ;;  %v5890_v51 = vadd.f32 1.0, %v12531_v28  ;;  %v5891_v3 = vadd.f32 1.0, %v12533_v42 }
 0x5c1   : > { %v12547_v41 = vpop.eup %12546  ;;  %12566 = vrcp.f32 %v5878_v35  ;;  %v15481_v57 = vadd.f32 1.0, %v12535_v62  ;;  %v15483_v33 = vadd.f32 1.0, %v12537_v61  ;;  %v15485_v19 = vadd.f32 1.0, %v12539_v0 }
 0x5c2   : > { %v12549_v15 = vpop.eup %12548  ;;  %12568 = vrcp.f32 %v5879_v53  ;;  %v15487_v40 = vadd.f32 1.0, %v12541_v27  ;;  %v15489_v32 = vadd.f32 1.0, %v12543_v18  ;;  %v15491_v55 = vadd.f32 1.0, %v12545_v17 }
 0x5c3   : > { %v12551_v14 = vpop.eup %12550  ;;  %12570 = vrcp.f32 %v5880_v9  ;;  %v15493_v28 = vadd.f32 1.0, %v12547_v41  ;;  %v15495_v53 = vadd.f32 1.0, %v12549_v15 }
 0x5c4   : > { %v12553_v2 = vpop.eup %12552  ;;  %12572 = vrcp.f32 %v5881_v5  ;;  %v15497_v4 = vadd.f32 1.0, %v12551_v14 }
 0x5c5   : > { %v12555_v52 = vpop.eup %12554  ;;  %12574 = vrcp.f32 %v5882_v31  ;;  %v15499_v62 = vadd.f32 1.0, %v12553_v2 }
 0x5c6   : > { %v12557_v42 = vpop.eup %12556  ;;  %v15501_v61 = vadd.f32 1.0, %v12555_v52  ;;  %12576 = vrcp.f32 %v5883_v26  ;;  %v6679_v27 = vld [vmem:[#allocation2 + $0xc] sm:$0xf] }
 0x5c7   : > { %v12559_v10 = vpop.eup %12558  ;;  %v12274_v35 = vld [vmem:[#allocation2 + $0xc] sm:$0xff]   ;;  %v15503_v0 = vadd.f32 1.0, %v12557_v42  ;;  %12578 = vrcp.f32 %v5884_v43  ;;  %v6749_v5 = vshrl.u32 %v6679_v27, 16  ;;  %v6752_v18 = vshll.u32 %v6679_v27, 16 }
 0x5c8   : > { %v15505_v44 = vld [vmem:[#allocation2 + $0x10] sm:$0xf]  ;;  %v12561_v6 = vpop.eup %12560  ;;  %v15507_v9 = vadd.f32 1.0, %v12559_v10  ;;  %12580 = vrcp.f32 %v5885_v20  ;;  %7621 = vrot.lane.b32.xlu0 %v12274_v35, %s12671_s14 }
 0x5c9   : > { %v12563_v34 = vpop.eup %12562  ;;  %v5971_v54 = vmul.f32 %v12561_v6, %v15347_v11  ;;  %12582 = vrcp.f32 %v5886_v16  ;;  %v6758_v31 = vshll.u32 %v15505_v44, 16  ;;  %v6762_v17 = vshrl.u32 %v15505_v44, 16 }
 0x5ca   : > { %v12565_v26 = vpop.eup %12564  ;;  %v5972_v43 = vmul.f32 %v12563_v34, %v15349_v59  ;;  %12584 = vrcp.f32 %v5887_v8  ;;  %v15514_v41 = vrot.slane %v6749_v5, 4  ;;  %v6754_v15 = vrot.slane %v6752_v18, 5 }
 0x5cb   : > { %v12567_v20 = vpop.eup %12566  ;;  %v11435_v14 = vpack.c.bf16 %v5971_v54, %v5971_v54  ;;  %v5973_v2 = vmul.f32 %v12565_v26, %v15351_v45  ;;  %12586 = vrcp.f32 %v5888_v56  ;;  %v15517_v52 = vrot.slane %v6758_v31, 5 }
 0x5cc   : > { %v15519_v11 = vpop.eup %12568  ;;  %v11436_v16 = vpack.c.bf16 %v5972_v43, %v5972_v43  ;;  %v5974_v42 = vmul.f32 %v12567_v20, %v15353_v60  ;;  %12588 = vrcp.f32 %v5889_v48  ;;  %v6755_v27 = vor.u32 %v6754_v15, %v15514_v41  ;;  %v6427_v48 = vld [vmem:[#allocation2 + $0x18] sm:$0xf] }
 0x5cd   : > { %v15523_v59 = vpop.eup %12570  ;;  %v6116_v8 = vshrl.u32 %v11435_v14, 16  ;;  %v6119_v10 = vshll.u32 %v11435_v14, 16  ;;  %v11437_v35 = vpack.c.bf16 %v5973_v2, %v5973_v2  ;;  %12590 = vrcp.f32 %v5890_v51  ;;  %v6431_v2 = vld [vmem:[#allocation2 + $0x20] sm:$0x1] }
 0x5ce   : > { %v15525_v6 = vpop.eup %12572  ;;  %v6124_v45 = vshrl.u32 %v11436_v16, 16  ;;  %v6127_v56 = vshll.u32 %v11436_v16, 16  ;;  %v11438_v5 = vpack.c.bf16 %v5974_v42, %v5974_v42  ;;  %12592 = vrcp.f32 %v5891_v3  ;;  %v6434_v16 = vld [vmem:[#allocation2 + $0x24] sm:$0xf] }
 0x5cf   : > { %v12575_v18 = vpop.eup %12574  ;;  %v6118_v34 = vrot.slane %v6116_v8, 7  ;;  %v6133_v54 = vshrl.u32 %v11437_v35, 16  ;;  %v6136_v31 = vshll.u32 %v11437_v35, 16  ;;  %12594 = vrcp.f32 %v15481_v57 }
 0x5d0   : > { %v12577_v60 = vpop.eup %12576  ;;  %v6126_v26 = vrot.slane %v6124_v45, 7  ;;  %v6141_v43 = vshrl.u32 %v11438_v5, 16  ;;  %v6144_v41 = vshll.u32 %v11438_v5, 16  ;;  %12596 = vrcp.f32 %v15483_v33 }
 0x5d1   : > { %v12579_v51 = vpop.eup %12578  ;;  %v6121_v15 = vor.u32 %v6119_v10, %v6118_v34  ;;  %v6122_v20 = vrot.slane %v6118_v34, 4  ;;  %v6135_v14 = vrot.slane %v6133_v54, 7  ;;  %12598 = vrcp.f32 %v15485_v19  ;;  %v6681_v10 = vld [vmem:[#allocation2 + $0x14] sm:$0x1] }
 0x5d2   : > { %v12581_v3 = vpop.eup %12580  ;;  %v6129_v42 = vor.u32 %v6127_v56, %v6126_v26  ;;  %v6131_v8 = vrot.slane %v6126_v26, 4  ;;  %v15530_v35 = vrot.slane %v6141_v43, 7  ;;  %12600 = vrcp.f32 %v15487_v40 }
 0x5d3   : > { %v12583_v57 = vpop.eup %12582  ;;  %v6428_v45 = vsel %vm15461_vm14, %v6121_v15, %v6427_v48  ;;  %v6138_v33 = vor.u32 %v6136_v31, %v6135_v14  ;;  %v6139_v5 = vrot.slane %v6135_v14, 4  ;;  %12602 = vrcp.f32 %v15489_v32 }
 0x5d4   : > { %v12585_v34 = vpop.eup %12584  ;;  %v6130_v19 = vsel %vm13311_vm1, %v6122_v20, %v6129_v42  ;;  %6429 = vst [vmem:[#allocation2 + $0x18] sm:$0xf] %v6428_v45  ;;  %v6146_v56 = vor.u32 %v6144_v41, %v15530_v35  ;;  %12604 = vrcp.f32 %v15491_v55  ;;  %v6148_v40 = vrot.slane %v15530_v35, 4  ;;  %v6438_v42 = vld [vmem:[#allocation2 + $0x2c] sm:$0x1] }
 0x5d5   : > { %v12587_v54 = vpop.eup %12586  ;;  %6430 = vst.msk [vmem:[#allocation2 + $0x1c] sm:$0xf] %vm442_vm0, %v6130_v19  ;;  %v6435_v31 = vsel %vm15461_vm14, %v6138_v33, %v6434_v16  ;;  %12606 = vrcp.f32 %v15493_v28  ;;  %v6432_v32 = vsel %vm12763_vm3, %v6131_v8, %v6431_v2  ;;  %v6756_v48 = vrot.slane %v6755_v27, 4 }
 0x5d6   : > { %v12589_v26 = vpop.eup %12588  ;;  %v6147_v43 = vsel %vm13311_vm1, %v6139_v5, %v6146_v56  ;;  %6436 = vst [vmem:[#allocation2 + $0x24] sm:$0xf] %v6435_v31  ;;  %12608 = vrcp.f32 %v15495_v53  ;;  %v6764_v55 = vrot.slane %v6762_v17, 4  ;;  %v6768_v41 = vshll.u32 %v6681_v10, 16  ;;  %6433 = vst [vmem:[#allocation2 + $0x20] sm:$0x1] %v6432_v32 }
 0x5d7   : > { %v12591_v15 = vpop.eup %12590  ;;  %6437 = vst.msk [vmem:[#allocation2 + $0x28] sm:$0xf] %vm442_vm0, %v6147_v43  ;;  %12610 = vrcp.f32 %v15497_v4  ;;  %v6761_v28 = vsel %vm12840_vm12, %v6756_v48, %v15517_v52  ;;  %v5975_v27 = vmul.f32 %v15519_v11, %v15355_v7  ;;  %v5976_v53 = vmul.f32 %v15523_v59, %v15357_v13  ;;  %v17335_v5 = vld [vmem:[#allocation13_spill] sm:$0xff] }
 0x5d8   : > { %v12593_v20 = vpop.eup %12592  ;;  %12612 = vrcp.f32 %v15499_v62  ;;  %v6765_v44 = vor.u32 %v6764_v55, %v15517_v52  ;;  %v6770_v17 = vrot.slane %v6768_v41, 5  ;;  %v5977_v14 = vmul.f32 %v15525_v6, %v15359_v23  ;;  %v17337_v55 = vld [vmem:[#allocation11_spill] sm:$0xff] }
 0x5d9   : > { %v12595_v4 = vpop.eup %12594  ;;  %12614 = vrcp.f32 %v15501_v61  ;;  %v5978_v2 = vmul.f32 %v12575_v18, %v15361_v58  ;;  %v5979_v16 = vmul.f32 %v12577_v60, %v15363_v37  ;;  %v5980_v7 = vmul.f32 %v12579_v51, %v15365_v47  ;;  %v17333_v51 = vld [vmem:[#allocation10_spill] sm:$0xff] }
 0x5da   : > { %v12597_v11 = vpop.eup %12596  ;;  %12616 = vrcp.f32 %v15503_v0  ;;  %v6766_v13 = vrot.slane %v6765_v44, 4  ;;  %v5981_v62 = vmul.f32 %v12581_v3, %v15367_v38  ;;  %v5982_v52 = vmul.f32 %v12583_v57, %v15369_v46  ;;  %v17338_v44 = vld [vmem:[#allocation17_spill] sm:$0xff] }
 0x5db   : > { %v12599_v59 = vpop.eup %12598  ;;  %12618 = vrcp.f32 %v15507_v9  ;;  %v5983_v23 = vmul.f32 %v12585_v34, %v15371_v63  ;;  %v5984_v58 = vmul.f32 %v12587_v54, %v15373_v30  ;;  %v5985_v37 = vmul.f32 %v12589_v26, %v15375_v24  ;;  %v17336_v54 = vld [vmem:[#allocation16_spill] sm:$0xff] }
 0x5dc   : > { %v12601_v61 = vpop.eup %12600  ;;  %v12275_v47 = vld [vmem:[#allocation2 + $0x18] sm:$0xff]   ;;  %v6771_v0 = vsel %vm12840_vm12, %v6766_v13, %v6770_v17  ;;  %v5986_v6 = vmul.f32 %v12591_v15, %v15377_v22  ;;  %v5987_v38 = vmul.f32 %v12593_v20, %v15379_v39  ;;  %v5988_v46 = vmul.f32 %v12595_v4, %v15381_v36  ;;  %v17334_v36 = vld [vmem:[#allocation15_spill] sm:$0xff] }
 0x5dd   : > { %v12603_v18 = vpop.eup %12602  ;;  %v11150_v60 = vcombine.low %v6761_v28, %v6771_v0  ;;  %v5989_v9 = vmul.f32 %v12597_v11, %v15383_v21  ;;  %v5990_v63 = vmul.f32 %v12599_v59, %v15385_v50  ;;  %v5991_v30 = vmul.f32 %v12601_v61, %v15387_v25  ;;  %7623 = vrot.lane.b32.xlu0 %v12275_v47, %s12671_s14  ;;  %v6441_v20 = vld [vmem:[#allocation2 + $0x30] sm:$0xf] }
 0x5de   : > { %v12605_v24 = vpop.eup %12604  ;;  %v5992_v3 = vmul.f32 %v12603_v18, %v17333_v51  ;;  %v6439_v22 = vsel %vm12763_vm3, %v6148_v40, %v6438_v42  ;;  %v11439_v8 = vpack.c.bf16 %v5975_v27, %v5975_v27  ;;  %v11440_v39 = vpack.c.bf16 %v5976_v53, %v5976_v53  ;;  %v12276_v33 = vld [vmem:[#allocation2 + $0x24] sm:$0xff]   ;;  %v17340_v61 = vld [vmem:[#allocation19_spill] sm:$0xff] }
 0x5df   : > { %v12607_v35 = vpop.eup %12606  ;;  %7158 = vrot.lane.b32.xlu1 %v11150_v60, %s12671_s14  ;;  %v5993_v57 = vmul.f32 %v12605_v24, %v17334_v36  ;;  %v15590_v21 = vpack.c.bf16 %v5977_v14, %v5977_v14  ;;  %v15592_v50 = vpack.c.bf16 %v5978_v2, %v5978_v2  ;;  %v15594_v25 = vpack.c.bf16 %v5979_v16, %v5979_v16 }
 0x5e0   : > { %6440 = vst [vmem:[#allocation2 + $0x2c] sm:$0x1] %v6439_v22  ;;  %v12609_v45 = vpop.eup %12608  ;;  %v5994_v10 = vmul.f32 %v12607_v35, %v17335_v5  ;;  %v6150_v34 = vshrl.u32 %v11439_v8, 16  ;;  %v6153_v19 = vshll.u32 %v11439_v8, 16  ;;  %v6158_v56 = vshrl.u32 %v11440_v39, 16 }
 0x5e1   : > { %v12611_v40 = vpop.eup %12610  ;;  %v5995_v31 = vmul.f32 %v12609_v45, %v17336_v54  ;;  %v6161_v32 = vshll.u32 %v11440_v39, 16  ;;  %v15598_v48 = vpack.c.bf16 %v5980_v7, %v5980_v7  ;;  %v15600_v26 = vpack.c.bf16 %v5981_v62, %v5981_v62  ;;  %7625 = vrot.lane.b32.xlu0 %v12276_v33, %s12671_s14  ;;  %v17339_v7 = vld [vmem:[#allocation5_spill] sm:$0xff]  ;;  %v6682_v22 = vld [vmem:[#allocation2 + $0x18] sm:$0xf]  ;;  %v6683_v8 = vld [vmem:[#allocation2 + $0x1c] sm:$0xf] }
 0x5e2   : > { %v12613_v43 = vpop.eup %12612  ;;  %v5996_v41 = vmul.f32 %v12611_v40, %v17337_v55  ;;  %v6152_v15 = vrot.slane %v6150_v34, 7  ;;  %v6160_v28 = vrot.slane %v6158_v56, 7  ;;  %v15604_v27 = vpack.c.bf16 %v5982_v52, %v5982_v52  ;;  %v6684_v45 = vld [vmem:[#allocation2 + $0x20] sm:$0x1] }
 0x5e3   : > { %v12615_v53 = vpop.eup %12614  ;;  %v5997_v17 = vmul.f32 %v12613_v43, %v17338_v44  ;;  %v15607_v14 = vpack.c.bf16 %v5983_v23, %v5983_v23  ;;  %v15609_v4 = vpack.c.bf16 %v5984_v58, %v5984_v58  ;;  %v15611_v2 = vpack.c.bf16 %v5985_v37, %v5985_v37  ;;  %v17341_v23 = vld [vmem:[#allocation12_spill] sm:$0xff] }
 0x5e4   : > { %v12617_v16 = vpop.eup %12616  ;;  %v5998_v11 = vmul.f32 %v12615_v53, %v17339_v7  ;;  %v6155_v13 = vor.u32 %v6153_v19, %v6152_v15  ;;  %v6156_v62 = vrot.slane %v6152_v15, 4  ;;  %v6163_v59 = vor.u32 %v6161_v32, %v6160_v28 }
 0x5e5   : > { %v12619_v42 = vpop.eup %12618  ;;  %v5999_v52 = vmul.f32 %v12617_v16, %v17340_v61  ;;  %v15615_v47 = vpack.c.bf16 %v5986_v6, %v5986_v6  ;;  %v15617_v0 = vpack.c.bf16 %v5987_v38, %v5987_v38  ;;  %v15619_v18 = vpack.c.bf16 %v5988_v46, %v5988_v46 }
 0x5e6   : > { %v6000_v58 = vmul.f32 %v12619_v42, %v17341_v23  ;;  %v6164_v37 = vsel %vm13311_vm1, %v6156_v62, %v6163_v59  ;;  %v6442_v60 = vsel %vm15461_vm14, %v6155_v13, %v6441_v20  ;;  %v15626_v24 = vpack.c.bf16 %v5989_v9, %v5989_v9 }
 0x5e7   : > { %6443 = vst [vmem:[#allocation2 + $0x30] sm:$0xf] %v6442_v60  ;;  %6444 = vst.msk [vmem:[#allocation2 + $0x34] sm:$0xf] %vm442_vm0, %v6164_v37  ;;  %v15629_v51 = vpack.c.bf16 %v5990_v63, %v5990_v63  ;;  %v15631_v6 = vpack.c.bf16 %v5991_v30, %v5991_v30  ;;  %v15633_v38 = vpack.c.bf16 %v5992_v3, %v5992_v3  ;;  %v6165_v3 = vrot.slane %v6160_v28, 4 }
 0x5e8   : > { %v15635_v46 = vpack.c.bf16 %v5993_v57, %v5993_v57  ;;  %v15637_v39 = vpack.c.bf16 %v5994_v10, %v5994_v10  ;;  %v15639_v35 = vpack.c.bf16 %v5995_v31, %v5995_v31  ;;  %v15641_v36 = vpack.c.bf16 %v5996_v41, %v5996_v41  ;;  %v6445_v10 = vld [vmem:[#allocation2 + $0x38] sm:$0x1] }
 0x5e9   : > { %v15643_v9 = vpack.c.bf16 %v5997_v17, %v5997_v17  ;;  %v15645_v33 = vpack.c.bf16 %v5998_v11, %v5998_v11  ;;  %v15647_v63 = vpack.c.bf16 %v5999_v52, %v5999_v52  ;;  %v15649_v30 = vpack.c.bf16 %v6000_v58, %v6000_v58 }
 0x5ea   : > { %v6773_v57 = vshrl.u32 %v6682_v22, 16  ;;  %v6776_v5 = vshll.u32 %v6682_v22, 16  ;;  %v6782_v34 = vshll.u32 %v6683_v8, 16  ;;  %v6786_v19 = vshrl.u32 %v6683_v8, 16 }
 0x5eb   : > { %17342 = vst [vmem:[#allocation9_spill] sm:$0xff] %v15649_v30  ;;  %v6792_v56 = vshll.u32 %v6684_v45, 16  ;;  %v6167_v40 = vshrl.u32 %v15590_v21, 16  ;;  %v6170_v54 = vshll.u32 %v15590_v21, 16  ;;  %v6175_v31 = vshrl.u32 %v15592_v50, 16 }
 0x5ec   : > { %v6775_v32 = vrot.slane %v6773_v57, 4  ;;  %v6778_v43 = vrot.slane %v6776_v5, 5  ;;  %v6784_v55 = vrot.slane %v6782_v34, 5  ;;  %v6788_v41 = vrot.slane %v6786_v19, 4  ;;  %v6448_v19 = vld [vmem:[#allocation2 + $0x3c] sm:$0xf] }
 0x5ed   : > { %v6794_v15 = vrot.slane %v6792_v56, 5  ;;  %v6178_v53 = vshll.u32 %v15592_v50, 16  ;;  %v6184_v28 = vshrl.u32 %v15594_v25, 16  ;;  %v6192_v7 = vshrl.u32 %v15598_v48, 16 }
 0x5ee   : > { %v12277_v44 = vld [vmem:[#allocation2 + $0x30] sm:$0xff]   ;;  %v6779_v17 = vor.u32 %v6778_v43, %v6775_v32  ;;  %v6789_v16 = vor.u32 %v6788_v41, %v6784_v55  ;;  %v6446_v11 = vsel %vm12763_vm3, %v6165_v3, %v6445_v10  ;;  %v6201_v62 = vshrl.u32 %v15600_v26, 16 }
 0x5ef   : > { %v6209_v42 = vshrl.u32 %v15604_v27, 16  ;;  %6447 = vst [vmem:[#allocation2 + $0x38] sm:$0x1] %v6446_v11  ;;  %7627 = vrot.lane.b32.xlu0 %v12277_v44, %s12671_s14  ;;  %v6218_v58 = vshrl.u32 %v15607_v14, 16  ;;  %v6226_v60 = vshrl.u32 %v15609_v4, 16  ;;  %v6235_v8 = vshrl.u32 %v15611_v2, 16 }
 0x5f0   : > { %v6780_v61 = vrot.slane %v6779_v17, 4  ;;  %v6790_v52 = vrot.slane %v6789_v16, 4  ;;  %v6243_v5 = vshrl.u32 %v15615_v47, 16  ;;  %v6252_v10 = vshrl.u32 %v15617_v0, 16 }
 0x5f1   : > { %v6260_v32 = vshrl.u32 %v15619_v18, 16  ;;  %v6286_v17 = vshrl.u32 %v15631_v6, 16  ;;  %v6294_v11 = vshrl.u32 %v15633_v38, 16  ;;  %v6320_v41 = vshrl.u32 %v15639_v35, 16 }
 0x5f2   : > { %v6785_v45 = vsel %vm12840_vm12, %v6780_v61, %v6784_v55  ;;  %v6795_v3 = vsel %vm12840_vm12, %v6790_v52, %v6794_v15  ;;  %v6269_v55 = vshrl.u32 %v15626_v24, 16  ;;  %v6277_v15 = vshrl.u32 %v15629_v51, 16  ;;  %v12290_v61 = vld [vmem:[%s17211_s9 + $0x40] sm:$0xff]  }
 0x5f3   : > { %v11151_v34 = vcombine.low %v6785_v45, %v6795_v3  ;;  %v6303_v52 = vshrl.u32 %v15635_v46, 16  ;;  %v6311_v3 = vshrl.u32 %v15637_v39, 16  ;;  %v6328_v43 = vshrl.u32 %v15641_v36, 16  ;;  %v12291_v45 = vld [vmem:[%s17211_s9] sm:$0xff]   ;;  %11623 = vmatprep.subr.bf16.mxu1 %v12290_v61 }
 0x5f4   : > { %v6337_v56 = vshrl.u32 %v15643_v9, 16  ;;  %v6345_v57 = vshrl.u32 %v15645_v33, 16  ;;  %v6354_v22 = vshrl.u32 %v15647_v63, 16  ;;  %v6362_v37 = vshrl.u32 %v15649_v30, 16  ;;  %11624 = vmatpush3.bf16.msra.mxu1 %v12291_v45 }
 0x5f5   : > { %7160 = vrot.lane.b32.xlu1 %v11151_v34, %s12671_s14  ;;  %v6169_v16 = vrot.slane %v6167_v40, 7  ;;  %v15711_v23 = vrot.slane %v6175_v31, 7  ;;  %v15719_v34 = vrot.slane %v6184_v28, 7  ;;  %v15721_v59 = vrot.slane %v6192_v7, 7 }
 0x5f6   : > { %v15723_v44 = vrot.slane %v6201_v62, 7  ;;  %v15725_v13 = vrot.slane %v6209_v42, 7  ;;  %v15733_v30 = vrot.slane %v6218_v58, 7  ;;  %v15735_v28 = vrot.slane %v6226_v60, 7  ;;  %v6685_v42 = vld [vmem:[#allocation2 + $0x24] sm:$0xf] }
 0x5f7   : > { %v6172_v40 = vor.u32 %v6170_v54, %v6169_v16  ;;  %v6173_v31 = vrot.slane %v6169_v16, 4  ;;  %v6180_v20 = vor.u32 %v6178_v53, %v15711_v23  ;;  %v15737_v7 = vrot.slane %v6235_v8, 7  ;;  %v6686_v58 = vld [vmem:[#allocation2 + $0x28] sm:$0xf] }
 0x5f8   : > { %v15739_v62 = vrot.slane %v6243_v5, 7  ;;  %v15745_v50 = vrot.slane %v6252_v10, 7  ;;  %v15747_v53 = vrot.slane %v6260_v32, 7  ;;  %v15750_v60 = vrot.slane %v6269_v55, 7  ;;  %v12292_v55 = vld [vmem:[%s17211_s9 + $0x48] sm:$0xff]  }
 0x5f9   : > { %v6181_v21 = vsel %vm13311_vm1, %v6173_v31, %v6180_v20  ;;  %v6449_v54 = vsel %vm15461_vm14, %v6172_v40, %v6448_v19  ;;  %v15752_v8 = vrot.slane %v6277_v15, 7  ;;  %v15754_v5 = vrot.slane %v6286_v17, 7  ;;  %v6687_v20 = vld [vmem:[#allocation2 + $0x2c] sm:$0x1]  ;;  %11625 = vmatprep.subr.bf16.mxu1 %v12292_v55 }
 0x5fa   : > { %6450 = vst [vmem:[#allocation2 + $0x3c] sm:$0xf] %v6449_v54  ;;  %6451 = vst.msk [vmem:[#allocation2 + $0x40] sm:$0xf] %vm442_vm0, %v6181_v21  ;;  %v15756_v16 = vrot.slane %v6294_v11, 7  ;;  %v15758_v61 = vrot.slane %v6303_v52, 7 }
 0x5fb   : > { %v15760_v19 = vrot.slane %v6311_v3, 7  ;;  %v15762_v10 = vrot.slane %v6320_v41, 7  ;;  %v15764_v32 = vrot.slane %v6328_v43, 7  ;;  %v12293_v15 = vld [vmem:[%s17211_s9 + $0x8] sm:$0xff]   ;;  %v15772_v17 = vrot.slane %v6337_v56, 7 }
 0x5fc   : > { %v15774_v11 = vrot.slane %v6345_v57, 7  ;;  %v15776_v52 = vrot.slane %v6354_v22, 7  ;;  %v15778_v45 = vrot.slane %v6362_v37, 7  ;;  %v6797_v41 = vshrl.u32 %v6685_v42, 16  ;;  %11626 = vmatpush3.bf16.msra.mxu1 %v12293_v15 }
 0x5fd   : > { %v6800_v3 = vshll.u32 %v6685_v42, 16  ;;  %v6806_v43 = vshll.u32 %v6686_v58, 16  ;;  %v6810_v40 = vshrl.u32 %v6686_v58, 16  ;;  %v6816_v31 = vshll.u32 %v6687_v20, 16 }
 0x5fe   : > { %v17343_v21 = vshll.u32 %v15594_v25, 16  ;;  %v17345_v57 = vshll.u32 %v15598_v48, 16  ;;  %v6799_v37 = vrot.slane %v6797_v41, 4  ;;  %v17346_v25 = vshll.u32 %v15600_v26, 16 }
 0x5ff   : > { %v6802_v1 = vrot.slane %v6800_v3, 5  ;;  %v6808_v42 = vrot.slane %v6806_v43, 5  ;;  %v6812_v29 = vrot.slane %v6810_v40, 4  ;;  %v6818_v58 = vrot.slane %v6816_v31, 5 }
 0x600   : > { %v15783_v54 = vor.u32 %v17343_v21, %v15719_v34  ;;  %v15789_v22 = vor.u32 %v17345_v57, %v15721_v59  ;;  %v15795_v55 = vor.u32 %v17346_v25, %v15723_v44  ;;  %v17347_v15 = vshll.u32 %v15604_v27, 16 }
 0x601   : > { %v12278_v56 = vld [vmem:[#allocation2 + $0x3c] sm:$0xff]   ;;  %v6813_v48 = vor.u32 %v6812_v29, %v6808_v42  ;;  %v17348_v43 = vshll.u32 %v15607_v14, 16  ;;  %v17349_v31 = vshll.u32 %v15609_v4, 16  ;;  %v6241_v14 = vrot.slane %v15737_v7, 4 }
 0x602   : > { %17344 = vst [vmem:[#allocation14_spill] sm:$0xff] %v15783_v54  ;;  %v6803_v54 = vor.u32 %v6802_v1, %v6799_v37  ;;  %v15801_v41 = vor.u32 %v17347_v15, %v15725_v13  ;;  %7629 = vrot.lane.b32.xlu0 %v12278_v56, %s12671_s14  ;;  %v17350_v37 = vshll.u32 %v15611_v2, 16  ;;  %v12294_v15 = vld [vmem:[%s17211_s9 + $0x50] sm:$0xff]   ;;  %v17351_v4 = vshll.u32 %v15615_v47, 16 }
 0x603   : > { %v15807_v40 = vor.u32 %v17348_v43, %v15733_v30  ;;  %v15813_v57 = vor.u32 %v17349_v31, %v15735_v28  ;;  %v6814_v27 = vrot.slane %v6813_v48, 4  ;;  %v6258_v2 = vrot.slane %v15745_v50, 4  ;;  %11627 = vmatprep.subr.bf16.mxu1 %v12294_v15  ;;  %v6462_v1 = vld [vmem:[#allocation2 + $0x54] sm:$0xf] }
 0x604   : > { %v6804_v29 = vrot.slane %v6803_v54, 4  ;;  %v15820_v25 = vor.u32 %v17350_v37, %v15737_v7  ;;  %v6248_v43 = vor.u32 %v17351_v4, %v15739_v62  ;;  %v17352_v54 = vshll.u32 %v15617_v0, 16  ;;  %v12295_v0 = vld [vmem:[%s17211_s9 + $0x10] sm:$0xff]  }
 0x605   : > { %v6819_v48 = vsel %vm12840_vm12, %v6814_v27, %v6818_v58  ;;  %v17353_v37 = vshll.u32 %v15619_v18, 16  ;;  %v17355_v58 = vshll.u32 %v15629_v51, 16  ;;  %v17356_v27 = vshll.u32 %v15631_v6, 16  ;;  %11628 = vmatpush3.bf16.msra.mxu1 %v12295_v0  ;;  %v12297_v51 = vld [vmem:[%s17211_s9 + $0x18] sm:$0xff]  }
 0x606   : > { %v15833_v56 = vor.u32 %v17352_v54, %v15745_v50  ;;  %v6809_v7 = vsel %vm12840_vm12, %v6804_v29, %v6808_v42  ;;  %v17354_v50 = vshll.u32 %v15626_v24, 16  ;;  %v6275_v42 = vrot.slane %v15750_v60, 4 }
 0x607   : > { %v6265_v47 = vor.u32 %v17353_v37, %v15747_v53  ;;  %v11152_v54 = vcombine.low %v6809_v7, %v6819_v48  ;;  %v6282_v18 = vor.u32 %v17355_v58, %v15752_v8  ;;  %v15860_v15 = vor.u32 %v17356_v27, %v15754_v5  ;;  %v6455_v58 = vld [vmem:[#allocation2 + $0x48] sm:$0xf]  ;;  %v6452_v27 = vld [vmem:[#allocation2 + $0x44] sm:$0x1] }
 0x608   : > { %v15850_v31 = vor.u32 %v17354_v50, %v15750_v60  ;;  %v6292_v7 = vrot.slane %v15754_v5, 4  ;;  %v17357_v24 = vshll.u32 %v15633_v38, 16  ;;  %v12296_v60 = vld [vmem:[%s17211_s9 + $0x58] sm:$0xff]   ;;  %v17358_v5 = vshll.u32 %v15635_v46, 16 }
 0x609   : > { %7162 = vrot.lane.b32.xlu1 %v11152_v54, %s12671_s14  ;;  %v6309_v38 = vrot.slane %v15758_v61, 4  ;;  %v17359_v0 = vshll.u32 %v15637_v39, 16  ;;  %v17360_v54 = vshll.u32 %v15639_v35, 16  ;;  %v6326_v6 = vrot.slane %v15762_v10, 4  ;;  %11629 = vmatprep.subr.bf16.mxu1 %v12296_v60 }
 0x60a   : > { %v6299_v48 = vor.u32 %v17357_v24, %v15756_v16  ;;  %v15877_v37 = vor.u32 %v17358_v5, %v15758_v61  ;;  %v17361_v46 = vshll.u32 %v15641_v36, 16  ;;  %v6459_v61 = vld [vmem:[#allocation2 + $0x50] sm:$0x1]  ;;  %v6343_v24 = vrot.slane %v15772_v17, 4  ;;  %v6473_v36 = vld [vmem:[#allocation2 + $0x68] sm:$0x1]  ;;  %11630 = vmatpush3.bf16.msra.mxu1 %v12297_v51 }
 0x60b   : > { %v6316_v50 = vor.u32 %v17359_v0, %v15760_v19  ;;  %v15887_v29 = vor.u32 %v17360_v54, %v15762_v10  ;;  %v17362_v0 = vshll.u32 %v15643_v9, 16  ;;  %v17363_v35 = vshll.u32 %v15645_v33, 16  ;;  %v15903_v10 = vld [vmem:[#allocation2 + $0x60] sm:$0xf]  ;;  %v6466_v33 = vld [vmem:[#allocation2 + $0x5c] sm:$0x1] }
 0x60c   : > { %v6333_v5 = vor.u32 %v17361_v46, %v15764_v32  ;;  %v17364_v46 = vshll.u32 %v15647_v63, 16  ;;  %v6360_v9 = vrot.slane %v15776_v52, 4  ;;  %v6369_v20 = vrot.slane %v15778_v45, 4 }
 0x60d   : > { %v15897_v4 = vor.u32 %v17362_v0, %v15772_v17  ;;  %v6350_v54 = vor.u32 %v17363_v35, %v15774_v11  ;;  %v17365_v0 = vld [vmem:[#allocation9_spill] sm:$0xff]  ;;  %v15915_v35 = vld [vmem:[#allocation2 + $0x78] sm:$0xf]  ;;  %v17367_v26 = vrot.slane %v15711_v23, 4  ;;  %v17369_v63 = vrot.slane %v15719_v34, 4 }
 0x60e   : > { %v15909_v39 = vor.u32 %v17364_v46, %v15776_v52  ;;  %v17366_v17 = vshll.u32 %v17365_v0, 16  ;;  %v17370_v46 = vld [vmem:[#allocation14_spill] sm:$0xff]  ;;  %v17372_v23 = vrot.slane %v15723_v44, 4  ;;  %v17373_v34 = vrot.slane %v15733_v30, 4  ;;  %v12298_v44 = vld [vmem:[%s17211_s9 + $0x60] sm:$0xff]  }
 0x60f   : > { %v6453_v21 = vsel %vm12763_vm3, %v17367_v26, %v6452_v27  ;;  %v6198_v52 = vsel %vm13311_vm1, %v17369_v63, %v15789_v22  ;;  %v6456_v51 = vsel %vm15461_vm14, %v17370_v46, %v6455_v58  ;;  %v6249_v58 = vsel %vm13311_vm1, %v6241_v14, %v6248_v43  ;;  %v6508_v63 = vld [vmem:[#allocation2 + $0xa4] sm:$0x1]  ;;  %v15953_v30 = vld [vmem:[#allocation2 + $0xa8] sm:$0xf]  ;;  %11631 = vmatprep.subr.bf16.mxu1 %v12298_v44 }
 0x610   : > { %v6367_v3 = vor.u32 %v17366_v17, %v15778_v45  ;;  %v15930_v17 = vld [vmem:[#allocation2 + $0x9c] sm:$0xf]  ;;  %6457 = vst [vmem:[#allocation2 + $0x48] sm:$0xf] %v6456_v51  ;;  %6458 = vst.msk [vmem:[#allocation2 + $0x4c] sm:$0xf] %vm442_vm0, %v6198_v52  ;;  %v6215_v26 = vsel %vm13311_vm1, %v17372_v23, %v15801_v41  ;;  %v6232_v22 = vsel %vm13311_vm1, %v17373_v34, %v15813_v57 }
 0x611   : > { %v6266_v27 = vsel %vm13311_vm1, %v6258_v2, %v6265_v47  ;;  %6454 = vst [vmem:[#allocation2 + $0x44] sm:$0x1] %v6453_v21  ;;  %v12299_v41 = vld [vmem:[%s17211_s9 + $0x20] sm:$0xff]   ;;  %v6480_v57 = vld [vmem:[#allocation2 + $0x74] sm:$0x1]  ;;  %v6283_v14 = vsel %vm13311_vm1, %v6275_v42, %v6282_v18  ;;  %v6300_v21 = vsel %vm13311_vm1, %v6292_v7, %v6299_v48  ;;  %v6317_v43 = vsel %vm13311_vm1, %v6309_v38, %v6316_v50 }
 0x612   : > { %v6487_v52 = vld [vmem:[#allocation2 + $0x80] sm:$0x1]  ;;  %v6490_v46 = vld [vmem:[#allocation2 + $0x84] sm:$0xf]  ;;  %v6334_v2 = vsel %vm13311_vm1, %v6326_v6, %v6333_v5  ;;  %6465 = vst.msk [vmem:[#allocation2 + $0x58] sm:$0xf] %vm442_vm0, %v6215_v26  ;;  %v6351_v18 = vsel %vm13311_vm1, %v6343_v24, %v6350_v54  ;;  %v6368_v7 = vsel %vm13311_vm1, %v6360_v9, %v6367_v3  ;;  %v6463_v38 = vsel %vm15461_vm14, %v15795_v55, %v6462_v1 }
 0x613   : > { %6472 = vst.msk [vmem:[#allocation2 + $0x64] sm:$0xf] %vm442_vm0, %v6232_v22  ;;  %6479 = vst.msk [vmem:[#allocation2 + $0x70] sm:$0xf] %vm442_vm0, %v6249_v58  ;;  %v6497_v47 = vld [vmem:[#allocation2 + $0x90] sm:$0xf]  ;;  %v6470_v55 = vsel %vm15461_vm14, %v15807_v40, %v15903_v10  ;;  %11632 = vmatpush3.bf16.msra.mxu1 %v12299_v41  ;;  %v6484_v10 = vsel %vm15461_vm14, %v15833_v56, %v15915_v35 }
 0x614   : > { %6486 = vst.msk [vmem:[#allocation2 + $0x7c] sm:$0xf] %vm442_vm0, %v6266_v27  ;;  %v6501_v51 = vld [vmem:[#allocation2 + $0x98] sm:$0x1]  ;;  %v6494_v42 = vld [vmem:[#allocation2 + $0x8c] sm:$0x1] }
 0x615   : > { %v17374_v48 = vrot.slane %v15721_v59, 4  ;;  %6493 = vst.msk [vmem:[#allocation2 + $0x88] sm:$0xf] %vm442_vm0, %v6283_v14  ;;  %6500 = vst.msk [vmem:[#allocation2 + $0x94] sm:$0xf] %vm442_vm0, %v6300_v21  ;;  %v17375_v59 = vrot.slane %v15725_v13, 4 }
 0x616   : > { %6507 = vst.msk [vmem:[#allocation2 + $0xa0] sm:$0xf] %vm442_vm0, %v6317_v43  ;;  %6514 = vst.msk [vmem:[#allocation2 + $0xac] sm:$0xf] %vm442_vm0, %v6334_v2  ;;  %v6518_v3 = vld [vmem:[#allocation2 + $0xb4] sm:$0xf] }
 0x617   : > { %v6460_v6 = vsel %vm12763_vm3, %v17374_v48, %v6459_v61  ;;  %v6522_v50 = vld [vmem:[#allocation2 + $0xbc] sm:$0x1]  ;;  %v6467_v24 = vsel %vm12763_vm3, %v17375_v59, %v6466_v33  ;;  %v17376_v1 = vrot.slane %v15735_v28, 4  ;;  %v6477_v61 = vsel %vm15461_vm14, %v15820_v25, %v6476_v49  ;;  %6464 = vst [vmem:[#allocation2 + $0x54] sm:$0xf] %v6463_v38  ;;  %v12300_v58 = vld [vmem:[%s17211_s9 + $0x68] sm:$0xff]  }
 0x618   : > { %6461 = vst [vmem:[#allocation2 + $0x50] sm:$0x1] %v6460_v6  ;;  %6521 = vst.msk [vmem:[#allocation2 + $0xb8] sm:$0xf] %vm442_vm0, %v6351_v18  ;;  %v6525_v13 = vld [vmem:[#allocation2 + $0xc0] sm:$0xf]  ;;  %11633 = vmatprep.subr.bf16.mxu1 %v12300_v58 }
 0x619   : > { %v6474_v5 = vsel %vm12763_vm3, %v17376_v1, %v6473_v36  ;;  %6528 = vst.msk [vmem:[#allocation2 + $0xc4] sm:$0xf] %vm442_vm0, %v6368_v7  ;;  %v6529_v54 = vld [vmem:[#allocation2 + $0xc8] sm:$0x1]  ;;  %v17377_v40 = vrot.slane %v15739_v62, 4  ;;  %v17378_v49 = vrot.slane %v15747_v53, 4  ;;  %v6491_v36 = vsel %vm15461_vm14, %v15850_v31, %v6490_v46 }
 0x61a   : > { %v6688_v9 = vld [vmem:[#allocation2 + $0x30] sm:$0xf]  ;;  %6468 = vst [vmem:[#allocation2 + $0x5c] sm:$0x1] %v6467_v24  ;;  %6471 = vst [vmem:[#allocation2 + $0x60] sm:$0xf] %v6470_v55  ;;  %v6498_v53 = vsel %vm15461_vm14, %v15860_v15, %v6497_v47  ;;  %v6505_v31 = vsel %vm15461_vm14, %v15877_v37, %v15930_v17  ;;  %v6512_v15 = vsel %vm15461_vm14, %v15887_v29, %v15953_v30 }
 0x61b   : > { %v6481_v28 = vsel %vm12763_vm3, %v17377_v40, %v6480_v57  ;;  %v6488_v25 = vsel %vm12763_vm3, %v17378_v49, %v6487_v52  ;;  %6475 = vst [vmem:[#allocation2 + $0x68] sm:$0x1] %v6474_v5  ;;  %6478 = vst [vmem:[#allocation2 + $0x6c] sm:$0xf] %v6477_v61  ;;  %v17379_v62 = vrot.slane %v15752_v8, 4  ;;  %v17380_v56 = vrot.slane %v15756_v16, 4 }
 0x61c   : > { %v6689_v23 = vld [vmem:[#allocation2 + $0x34] sm:$0xf]  ;;  %v6690_v26 = vld [vmem:[#allocation2 + $0x38] sm:$0x1]  ;;  %6482 = vst [vmem:[#allocation2 + $0x74] sm:$0x1] %v6481_v28  ;;  %v6519_v17 = vsel %vm15461_vm14, %v15897_v4, %v6518_v3  ;;  %v6526_v4 = vsel %vm15461_vm14, %v15909_v39, %v6525_v13  ;;  %v6530_v41 = vsel %vm12763_vm3, %v6369_v20, %v6529_v54 }
 0x61d   : > { %v6495_v33 = vsel %vm12763_vm3, %v17379_v62, %v6494_v42  ;;  %v6502_v35 = vsel %vm12763_vm3, %v17380_v56, %v6501_v51  ;;  %6485 = vst [vmem:[#allocation2 + $0x78] sm:$0xf] %v6484_v10  ;;  %6489 = vst [vmem:[#allocation2 + $0x80] sm:$0x1] %v6488_v25  ;;  %v6691_v8 = vld [vmem:[#allocation2 + $0x3c] sm:$0xf] }
 0x61e   : > { %6492 = vst [vmem:[#allocation2 + $0x84] sm:$0xf] %v6491_v36  ;;  %v17381_v34 = vrot.slane %v15760_v19, 4  ;;  %v17382_v22 = vrot.slane %v15764_v32, 4  ;;  %6496 = vst [vmem:[#allocation2 + $0x8c] sm:$0x1] %v6495_v33 }
 0x61f   : > { %6499 = vst [vmem:[#allocation2 + $0x90] sm:$0xf] %v6498_v53  ;;  %6503 = vst [vmem:[#allocation2 + $0x98] sm:$0x1] %v6502_v35  ;;  %v6692_v19 = vld [vmem:[#allocation2 + $0x40] sm:$0xf] }
 0x620   : > { %v6509_v16 = vsel %vm12763_vm3, %v17381_v34, %v6508_v63  ;;  %v6516_v37 = vsel %vm12763_vm3, %v17382_v22, %v6515_v12  ;;  %6506 = vst [vmem:[#allocation2 + $0x9c] sm:$0xf] %v6505_v31  ;;  %v12301_v32 = vld [vmem:[%s17211_s9 + $0x28] sm:$0xff]   ;;  %v17383_v27 = vrot.slane %v15774_v11, 4  ;;  %v6821_v63 = vshrl.u32 %v6688_v9, 16  ;;  %v12280_v43 = vld [vmem:[#allocation2 + $0x54] sm:$0xff]  }
 0x621   : > { %v12279_v29 = vld [vmem:[#allocation2 + $0x48] sm:$0xff]   ;;  %6510 = vst [vmem:[#allocation2 + $0xa4] sm:$0x1] %v6509_v16  ;;  %6513 = vst [vmem:[#allocation2 + $0xa8] sm:$0xf] %v6512_v15  ;;  %v6824_v30 = vshll.u32 %v6688_v9, 16  ;;  %11634 = vmatpush3.bf16.msra.mxu1 %v12301_v32 }
 0x622   : > { %v6523_v44 = vsel %vm12763_vm3, %v17383_v27, %v6522_v50  ;;  %6517 = vst [vmem:[#allocation2 + $0xb0] sm:$0x1] %v6516_v37  ;;  %6520 = vst [vmem:[#allocation2 + $0xb4] sm:$0xf] %v6519_v17  ;;  %v6830_v52 = vshll.u32 %v6689_v23, 16  ;;  %v6834_v11 = vshrl.u32 %v6689_v23, 16  ;;  %7631 = vrot.lane.b32.xlu0 %v12279_v29, %s12671_s14 }
 0x623   : > { %v6840_v57 = vshll.u32 %v6690_v26, 16  ;;  %6524 = vst [vmem:[#allocation2 + $0xbc] sm:$0x1] %v6523_v44  ;;  %6527 = vst [vmem:[#allocation2 + $0xc0] sm:$0xf] %v6526_v4  ;;  %v6823_v39 = vrot.slane %v6821_v63, 4 }
 0x624   : > { %6531 = vst [vmem:[#allocation2 + $0xc8] sm:$0x1] %v6530_v41  ;;  %v6693_v45 = vld [vmem:[#allocation2 + $0x44] sm:$0x1]  ;;  %v6845_v0 = vshrl.u32 %v6691_v8, 16  ;;  %v6848_v60 = vshll.u32 %v6691_v8, 16 }
 0x625   : > { %v6854_v20 = vshll.u32 %v6692_v19, 16  ;;  %v6826_v46 = vrot.slane %v6824_v30, 5  ;;  %v6832_v14 = vrot.slane %v6830_v52, 5  ;;  %v6836_v21 = vrot.slane %v6834_v11, 4  ;;  %v6694_v3 = vld [vmem:[#allocation2 + $0x48] sm:$0xf] }
 0x626   : > { %v6847_v2 = vrot.slane %v6845_v0, 4  ;;  %v6850_v47 = vrot.slane %v6848_v60, 5  ;;  %v6858_v42 = vshrl.u32 %v6692_v19, 16  ;;  %v6864_v48 = vshll.u32 %v6693_v45, 16  ;;  %7633 = vrot.lane.b32.xlu0 %v12280_v43, %s12671_s14  ;;  %v6695_v50 = vld [vmem:[#allocation2 + $0x4c] sm:$0xf] }
 0x627   : > { %v6856_v51 = vrot.slane %v6854_v20, 5  ;;  %v6827_v18 = vor.u32 %v6826_v46, %v6823_v39  ;;  %v6837_v7 = vor.u32 %v6836_v21, %v6832_v14  ;;  %v6842_v6 = vrot.slane %v6840_v57, 5  ;;  %v6696_v1 = vld [vmem:[#allocation2 + $0x50] sm:$0x1]  ;;  %v12281_v54 = vld [vmem:[#allocation2 + $0x60] sm:$0xff]   ;;  %v12283_v11 = vld [vmem:[#allocation2 + $0x78] sm:$0xff]  }
 0x628   : > { %v6851_v38 = vor.u32 %v6850_v47, %v6847_v2  ;;  %v6860_v12 = vrot.slane %v6858_v42, 4  ;;  %v6866_v55 = vrot.slane %v6864_v48, 5  ;;  %v6869_v5 = vshrl.u32 %v6694_v3, 16  ;;  %v6697_v62 = vld [vmem:[#allocation2 + $0x54] sm:$0xf]  ;;  %v12282_v31 = vld [vmem:[#allocation2 + $0x6c] sm:$0xff]  }
 0x629   : > { %v6828_v59 = vrot.slane %v6827_v18, 4  ;;  %v6838_v24 = vrot.slane %v6837_v7, 4  ;;  %v6872_v40 = vshll.u32 %v6694_v3, 16  ;;  %v6878_v28 = vshll.u32 %v6695_v50, 16  ;;  %v6698_v23 = vld [vmem:[#allocation2 + $0x58] sm:$0xf] }
 0x62a   : > { %v6852_v61 = vrot.slane %v6851_v38, 4  ;;  %v6861_v13 = vor.u32 %v6860_v12, %v6856_v51  ;;  %v6871_v36 = vrot.slane %v6869_v5, 4  ;;  %v6882_v9 = vshrl.u32 %v6695_v50, 16  ;;  %7635 = vrot.lane.b32.xlu0 %v12281_v54, %s12671_s14  ;;  %v6699_v26 = vld [vmem:[#allocation2 + $0x5c] sm:$0x1]  ;;  %v12284_v5 = vld [vmem:[#allocation2 + $0x84] sm:$0xff]  }
 0x62b   : > { %v6833_v49 = vsel %vm12840_vm12, %v6828_v59, %v6832_v14  ;;  %v6843_v25 = vsel %vm12840_vm12, %v6838_v24, %v6842_v6  ;;  %v6874_v35 = vrot.slane %v6872_v40, 5  ;;  %v6880_v8 = vrot.slane %v6878_v28, 5  ;;  %v6700_v58 = vld [vmem:[#allocation2 + $0x60] sm:$0xf]  ;;  %v6701_v4 = vld [vmem:[#allocation2 + $0x64] sm:$0xf] }
 0x62c   : > { %v11153_v33 = vcombine.low %v6833_v49, %v6843_v25  ;;  %v6857_v53 = vsel %vm12840_vm12, %v6852_v61, %v6856_v51  ;;  %v6862_v56 = vrot.slane %v6861_v13, 4  ;;  %v6884_v34 = vrot.slane %v6882_v9, 4  ;;  %v6702_v14 = vld [vmem:[#allocation2 + $0x68] sm:$0x1]  ;;  %v6703_v43 = vld [vmem:[#allocation2 + $0x6c] sm:$0xf] }
 0x62d   : > { %v6888_v16 = vshll.u32 %v6696_v1, 16  ;;  %v6893_v15 = vshrl.u32 %v6697_v62, 16  ;;  %v6875_v37 = vor.u32 %v6874_v35, %v6871_v36  ;;  %v6896_v17 = vshll.u32 %v6697_v62, 16  ;;  %v6704_v18 = vld [vmem:[#allocation2 + $0x70] sm:$0xf] }
 0x62e   : > { %7164 = vrot.lane.b32.xlu1 %v11153_v33, %s12671_s14  ;;  %v6867_v22 = vsel %vm12840_vm12, %v6862_v56, %v6866_v55  ;;  %v6902_v19 = vshll.u32 %v6698_v23, 16  ;;  %v6885_v29 = vor.u32 %v6884_v34, %v6880_v8  ;;  %7637 = vrot.lane.b32.xlu0 %v12282_v31, %s12671_s14  ;;  %v6906_v52 = vshrl.u32 %v6698_v23, 16  ;;  %v6705_v59 = vld [vmem:[#allocation2 + $0x74] sm:$0x1]  ;;  %v6706_v54 = vld [vmem:[#allocation2 + $0x78] sm:$0xf] }
 0x62f   : > { %v11154_v32 = vcombine.low %v6857_v53, %v6867_v22  ;;  %v6890_v27 = vrot.slane %v6888_v16, 5  ;;  %v6895_v44 = vrot.slane %v6893_v15, 4  ;;  %v6876_v41 = vrot.slane %v6875_v37, 4  ;;  %v6707_v36 = vld [vmem:[#allocation2 + $0x7c] sm:$0xf] }
 0x630   : > { %v6898_v63 = vrot.slane %v6896_v17, 5  ;;  %v6904_v30 = vrot.slane %v6902_v19, 5  ;;  %v6886_v57 = vrot.slane %v6885_v29, 4  ;;  %v6912_v39 = vshll.u32 %v6699_v26, 16  ;;  %v12285_v26 = vld [vmem:[#allocation2 + $0x90] sm:$0xff]   ;;  %v12302_v17 = vld [vmem:[#allocation2] sm:$0xff]  }
 0x631   : > { %v6917_v45 = vshrl.u32 %v6700_v58, 16  ;;  %v6920_v0 = vshll.u32 %v6700_v58, 16  ;;  %v6881_v60 = vsel %vm12840_vm12, %v6876_v41, %v6880_v8  ;;  %v6908_v46 = vrot.slane %v6906_v52, 4  ;;  %v6708_v8 = vld [vmem:[#allocation2 + $0x80] sm:$0x1]  ;;  %6660 = vst.msk [vmem:[#allocation3] sm:$0xff] %vm5230_vm13, %v12302_v17 }
 0x632   : > { %7166 = vrot.lane.b32.xlu1 %v11154_v32, %s12671_s14  ;;  %v6899_v20 = vor.u32 %v6898_v63, %v6895_v44  ;;  %v6926_v21 = vshll.u32 %v6701_v4, 16  ;;  %v6891_v2 = vsel %vm12840_vm12, %v6886_v57, %v6890_v27  ;;  %v6914_v47 = vrot.slane %v6912_v39, 5  ;;  %7639 = vrot.lane.b32.xlu0 %v12283_v11, %s12671_s14  ;;  %v6709_v37 = vld [vmem:[#allocation2 + $0x84] sm:$0xf]  ;;  %v6710_v27 = vld [vmem:[#allocation2 + $0x88] sm:$0xf] }
 0x633   : > { %v6919_v51 = vrot.slane %v6917_v45, 4  ;;  %v6922_v42 = vrot.slane %v6920_v0, 5  ;;  %v11155_v7 = vcombine.low %v6881_v60, %v6891_v2  ;;  %v6909_v6 = vor.u32 %v6908_v46, %v6904_v30  ;;  %v12303_v52 = vld [vmem:[%s17211_s9 + $0x70] sm:$0xff]   ;;  %v12305_v2 = vld [vmem:[%s17211_s9 + $0x78] sm:$0xff]  }
 0x634   : > { %v6900_v48 = vrot.slane %v6899_v20, 4  ;;  %v6928_v38 = vrot.slane %v6926_v21, 5  ;;  %v6930_v3 = vshrl.u32 %v6701_v4, 16  ;;  %v6936_v50 = vshll.u32 %v6702_v14, 16  ;;  %v12304_v0 = vld [vmem:[%s17211_s9 + $0x30] sm:$0xff]   ;;  %11635 = vmatprep.subr.bf16.mxu1 %v12303_v52 }
 0x635   : > { %v6923_v12 = vor.u32 %v6922_v42, %v6919_v51  ;;  %v6941_v24 = vshrl.u32 %v6703_v43, 16  ;;  %v6910_v1 = vrot.slane %v6909_v6, 4  ;;  %v6944_v61 = vshll.u32 %v6703_v43, 16  ;;  %v6711_v21 = vld [vmem:[#allocation2 + $0x8c] sm:$0x1]  ;;  %11636 = vmatpush3.bf16.msra.mxu1 %v12304_v0 }
 0x636   : > { %7168 = vrot.lane.b32.xlu1 %v11155_v7, %s12671_s14  ;;  %v6905_v55 = vsel %vm12840_vm12, %v6900_v48, %v6904_v30  ;;  %v6950_v13 = vshll.u32 %v6704_v18, 16  ;;  %v6932_v28 = vrot.slane %v6930_v3, 4  ;;  %v6938_v49 = vrot.slane %v6936_v50, 5  ;;  %7641 = vrot.lane.b32.xlu0 %v12284_v5, %s12671_s14  ;;  %v12286_v30 = vld [vmem:[#allocation2 + $0x9c] sm:$0xff]   ;;  %v6712_v43 = vld [vmem:[#allocation2 + $0x90] sm:$0xf] }
 0x637   : > { %v6924_v40 = vrot.slane %v6923_v12, 4  ;;  %v6943_v25 = vrot.slane %v6941_v24, 4  ;;  %v6915_v9 = vsel %vm12840_vm12, %v6910_v1, %v6914_v47  ;;  %v6946_v62 = vrot.slane %v6944_v61, 5  ;;  %v6713_v7 = vld [vmem:[#allocation2 + $0x94] sm:$0xf]  ;;  %v12306_v48 = vld [vmem:[%s17211_s9 + $0x38] sm:$0xff]   ;;  %11637 = vmatprep.subr.bf16.mxu1 %v12305_v2 }
 0x638   : > { %v6952_v33 = vrot.slane %v6950_v13, 5  ;;  %v6954_v53 = vshrl.u32 %v6704_v18, 16  ;;  %v11156_v56 = vcombine.low %v6905_v55, %v6915_v9  ;;  %v6933_v31 = vor.u32 %v6932_v28, %v6928_v38  ;;  %v12307_v50 = vld [vmem:[%s17211_s9 + $0x100] sm:$0xff]   ;;  %v12308_v5 = vld [vmem:[#allocation2 + $0xc] sm:$0xff]   ;;  %v6714_v9 = vld [vmem:[#allocation2 + $0x98] sm:$0x1] }
 0x639   : > { %v6929_v35 = vsel %vm12840_vm12, %v6924_v40, %v6928_v38  ;;  %v6960_v23 = vshll.u32 %v6705_v59, 16  ;;  %v6947_v34 = vor.u32 %v6946_v62, %v6943_v25  ;;  %v6965_v15 = vshrl.u32 %v6706_v54, 16  ;;  %v12287_v28 = vld [vmem:[#allocation2 + $0xa8] sm:$0xff]   ;;  %11638 = vmatpush3.bf16.msra.mxu1 %v12306_v48  ;;  %6661 = vst.msk [vmem:[#allocation3 + $0x28] sm:$0xff] %vm5230_vm13, %v12308_v5  ;;  %v12311_v5 = vld [vmem:[#allocation2 + $0x30] sm:$0xff]  }
 0x63a   : > { %v6956_v16 = vrot.slane %v6954_v53, 4  ;;  %v6968_v22 = vshll.u32 %v6706_v54, 16  ;;  %7170 = vrot.lane.b32.xlu1 %v11156_v56, %s12671_s14  ;;  %v6934_v19 = vrot.slane %v6933_v31, 4  ;;  %v6974_v32 = vshll.u32 %v6707_v36, 16  ;;  %7643 = vrot.lane.b32.xlu0 %v12285_v26, %s12671_s14  ;;  %v6715_v53 = vld [vmem:[#allocation2 + $0x9c] sm:$0xf] }
 0x63b   : > { %v6962_v58 = vrot.slane %v6960_v23, 5  ;;  %v6978_v29 = vshrl.u32 %v6707_v36, 16  ;;  %v6948_v44 = vrot.slane %v6947_v34, 4  ;;  %v6967_v41 = vrot.slane %v6965_v15, 4  ;;  %v6716_v15 = vld [vmem:[#allocation2 + $0xa0] sm:$0xf]  ;;  %11981 = vmatprep.subr.bf16.mxu1 %v12307_v50 }
 0x63c   : > { %v6957_v4 = vor.u32 %v6956_v16, %v6952_v33  ;;  %v6970_v63 = vrot.slane %v6968_v22, 5  ;;  %v6939_v11 = vsel %vm12840_vm12, %v6934_v19, %v6938_v49  ;;  %v6976_v57 = vrot.slane %v6974_v32, 5  ;;  %v12309_v49 = vld [vmem:[#allocation2 + $0x18] sm:$0xff]   ;;  %6664 = vst.msk [vmem:[#allocation3 + $0xa0] sm:$0xff] %vm5230_vm13, %v12311_v5 }
 0x63d   : > { %v6980_v39 = vrot.slane %v6978_v29, 4  ;;  %v6984_v45 = vshll.u32 %v6708_v8, 16  ;;  %v11157_v60 = vcombine.low %v6929_v35, %v6939_v11  ;;  %v6953_v20 = vsel %vm12840_vm12, %v6948_v44, %v6952_v33  ;;  %6662 = vst.msk [vmem:[#allocation3 + $0x50] sm:$0xff] %vm5230_vm13, %v12309_v49  ;;  %v12288_v19 = vld [vmem:[#allocation2 + $0xb4] sm:$0xff]   ;;  %v6717_v44 = vld [vmem:[#allocation2 + $0xa4] sm:$0x1] }
 0x63e   : > { %v6958_v46 = vrot.slane %v6957_v4, 4  ;;  %v6971_v14 = vor.u32 %v6970_v63, %v6967_v41  ;;  %v6989_v42 = vshrl.u32 %v6709_v37, 16  ;;  %v6992_v18 = vshll.u32 %v6709_v37, 16  ;;  %7645 = vrot.lane.b32.xlu0 %v12286_v30, %s12671_s14  ;;  %v6718_v41 = vld [vmem:[#allocation2 + $0xa8] sm:$0xf] }
 0x63f   : > { %v6981_v47 = vor.u32 %v6980_v39, %v6976_v57  ;;  %v6986_v51 = vrot.slane %v6984_v45, 5  ;;  %7172 = vrot.lane.b32.xlu1 %v11157_v60, %s12671_s14  ;;  %v6998_v12 = vshll.u32 %v6710_v27, 16  ;;  %v7002_v3 = vshrl.u32 %v6710_v27, 16 }
 0x640   : > { %v6963_v6 = vsel %vm12840_vm12, %v6958_v46, %v6962_v58  ;;  %v6972_v38 = vrot.slane %v6971_v14, 4  ;;  %v6991_v55 = vrot.slane %v6989_v42, 4  ;;  %v6994_v1 = vrot.slane %v6992_v18, 5  ;;  %v6720_v18 = vld [vmem:[#allocation2 + $0xb0] sm:$0x1] }
 0x641   : > { %v11158_v59 = vcombine.low %v6953_v20, %v6963_v6  ;;  %v6982_v24 = vrot.slane %v6981_v47, 4  ;;  %v7000_v13 = vrot.slane %v6998_v12, 5  ;;  %v7004_v54 = vrot.slane %v7002_v3, 4  ;;  %v6719_v20 = vld [vmem:[#allocation2 + $0xac] sm:$0xf] }
 0x642   : > { %v6977_v61 = vsel %vm12840_vm12, %v6972_v38, %v6976_v57  ;;  %v7008_v40 = vshll.u32 %v6711_v21, 16  ;;  %v6995_v36 = vor.u32 %v6994_v1, %v6991_v55  ;;  %v7013_v62 = vshrl.u32 %v6712_v43, 16  ;;  %7647 = vrot.lane.b32.xlu0 %v12287_v28, %s12671_s14  ;;  %v12310_v57 = vld [vmem:[#allocation2 + $0x24] sm:$0xff]   ;;  %v8661_v3 = vld [vmem:[#allocation2 + $0x18] sm:$0xf] }
 0x643   : > { %v6987_v25 = vsel %vm12840_vm12, %v6982_v24, %v6986_v51  ;;  %v7016_v33 = vshll.u32 %v6712_v43, 16  ;;  %7174 = vrot.lane.b32.xlu1 %v11158_v59, %s12671_s14  ;;  %v7005_v35 = vor.u32 %v7004_v54, %v7000_v13  ;;  %v7022_v23 = vshll.u32 %v6713_v7, 16  ;;  %v12289_v43 = vld [vmem:[#allocation2 + $0xc0] sm:$0xff]   ;;  %6663 = vst.msk [vmem:[#allocation3 + $0x78] sm:$0xff] %vm5230_vm13, %v12310_v57  ;;  %v8662_v1 = vld [vmem:[#allocation2 + $0x1c] sm:$0xf] }
 0x644   : > { %v11159_v56 = vcombine.low %v6977_v61, %v6987_v25  ;;  %v7010_v31 = vrot.slane %v7008_v40, 5  ;;  %v6996_v26 = vrot.slane %v6995_v36, 4  ;;  %v7015_v8 = vrot.slane %v7013_v62, 4  ;;  %v8663_v36 = vld [vmem:[#allocation2 + $0x20] sm:$0x1] }
 0x645   : > { %v7018_v34 = vrot.slane %v7016_v33, 5  ;;  %v7026_v16 = vshrl.u32 %v6713_v7, 16  ;;  %v7006_v22 = vrot.slane %v7005_v35, 4  ;;  %v7024_v37 = vrot.slane %v7022_v23, 5 }
 0x646   : > { %v7032_v17 = vshll.u32 %v6714_v9, 16  ;;  %v7037_v58 = vshrl.u32 %v6715_v53, 16  ;;  %v7001_v32 = vsel %vm12840_vm12, %v6996_v26, %v7000_v13  ;;  %v7040_v4 = vshll.u32 %v6715_v53, 16  ;;  %7649 = vrot.lane.b32.xlu0 %v12288_v19, %s12671_s14  ;;  %v12313_v19 = vld [vmem:[#allocation2 + $0x48] sm:$0xff]  }
 0x647   : > { %v7019_v29 = vor.u32 %v7018_v34, %v7015_v8  ;;  %v7028_v27 = vrot.slane %v7026_v16, 4  ;;  %7176 = vrot.lane.b32.xlu1 %v11159_v56, %s12671_s14  ;;  %v7011_v63 = vsel %vm12840_vm12, %v7006_v22, %v7010_v31  ;;  %v7046_v11 = vshll.u32 %v6716_v15, 16  ;;  %v6721_v8 = vld [vmem:[#allocation2 + $0xb4] sm:$0xf]  ;;  %v12312_v34 = vld [vmem:[#allocation2 + $0x3c] sm:$0xff]   ;;  %6666 = vst.msk [vmem:[#allocation3 + $0xf0] sm:$0xff] %vm5230_vm13, %v12313_v19 }
 0x648   : > { %v7034_v30 = vrot.slane %v7032_v17, 5  ;;  %v7039_v52 = vrot.slane %v7037_v58, 4  ;;  %v11160_v39 = vcombine.low %v7001_v32, %v7011_v63  ;;  %v7042_v60 = vrot.slane %v7040_v4, 5  ;;  %v6722_v17 = vld [vmem:[#allocation2 + $0xb8] sm:$0xf]  ;;  %6665 = vst.msk [vmem:[#allocation3 + $0xc8] sm:$0xff] %vm5230_vm13, %v12312_v34 }
 0x649   : > { %v7020_v45 = vrot.slane %v7019_v29, 4  ;;  %v7029_v0 = vor.u32 %v7028_v27, %v7024_v37  ;;  %v7048_v46 = vrot.slane %v7046_v11, 5  ;;  %v7050_v14 = vshrl.u32 %v6716_v15, 16  ;;  %v12317_v34 = vld [vmem:[#allocation2 + $0x6c] sm:$0xff]  }
 0x64a   : > { %v7056_v21 = vshll.u32 %v6717_v44, 16  ;;  %v7061_v2 = vshrl.u32 %v6718_v41, 16  ;;  %v7043_v42 = vor.u32 %v7042_v60, %v7039_v52  ;;  %v7064_v7 = vshll.u32 %v6718_v41, 16  ;;  %7651 = vrot.lane.b32.xlu0 %v12289_v43, %s12671_s14  ;;  %v6723_v41 = vld [vmem:[#allocation2 + $0xbc] sm:$0x1]  ;;  %v12314_v52 = vld [vmem:[#allocation2 + $0x54] sm:$0xff]  }
 0x64b   : > { %v7025_v47 = vsel %vm12840_vm12, %v7020_v45, %v7024_v37  ;;  %v7030_v51 = vrot.slane %v7029_v0, 4  ;;  %7178 = vrot.lane.b32.xlu1 %v11160_v39, %s12671_s14  ;;  %v7052_v48 = vrot.slane %v7050_v14, 4  ;;  %v7070_v12 = vshll.u32 %v6719_v20, 16  ;;  %v8664_v0 = vld [vmem:[#allocation2 + $0x24] sm:$0xf]  ;;  %6667 = vst.msk [vmem:[#allocation3 + $0x118] sm:$0xff] %vm5230_vm13, %v12314_v52 }
 0x64c   : > { %v7058_v6 = vrot.slane %v7056_v21, 5  ;;  %v7063_v38 = vrot.slane %v7061_v2, 4  ;;  %v7044_v59 = vrot.slane %v7043_v42, 4  ;;  %v7066_v24 = vrot.slane %v7064_v7, 5  ;;  %v8665_v21 = vld [vmem:[#allocation2 + $0x28] sm:$0xf] }
 0x64d   : > { %v7035_v50 = vsel %vm12840_vm12, %v7030_v51, %v7034_v30  ;;  %v7074_v55 = vshrl.u32 %v6719_v20, 16  ;;  %v7053_v13 = vor.u32 %v7052_v48, %v7048_v46  ;;  %v7072_v54 = vrot.slane %v7070_v12, 5  ;;  %v12315_v43 = vld [vmem:[#allocation2 + $0x60] sm:$0xff]   ;;  %v8666_v48 = vld [vmem:[#allocation2 + $0x2c] sm:$0x1]  ;;  %6669 = vst.msk [vmem:[#allocation3 + $0x168] sm:$0xff] %vm5230_vm13, %v12317_v34 }
 0x64e   : > { %v11161_v61 = vcombine.low %v7025_v47, %v7035_v50  ;;  %v7080_v40 = vshll.u32 %v6720_v18, 16  ;;  %v7049_v28 = vsel %vm12840_vm12, %v7044_v59, %v7048_v46  ;;  %v7067_v49 = vor.u32 %v7066_v24, %v7063_v38  ;;  %6668 = vst.msk [vmem:[#allocation3 + $0x140] sm:$0xff] %vm5230_vm13, %v12315_v43  ;;  %v8197_v24 = vld [vmem:[#allocation2 + $0xc] sm:$0xe]  ;;  %v8201_v52 = vld [vmem:[#allocation2 + $0x1c] sm:$0xf] }
 0x64f   : > { %v7076_v25 = vrot.slane %v7074_v55, 4  ;;  %v8710_v9 = vshrl.u32 %v8661_v3, 16  ;;  %v7054_v62 = vrot.slane %v7053_v13, 4  ;;  %v8713_v53 = vshll.u32 %v8661_v3, 16  ;;  %v8198_v55 = vld [vmem:[#allocation2 + $0x10] sm:$0xf] }
 0x650   : > { %7180 = vrot.lane.b32.xlu1 %v11161_v61, %s12671_s14  ;;  %v7082_v33 = vrot.slane %v7080_v40, 5  ;;  %v8719_v56 = vshll.u32 %v8662_v1, 16  ;;  %v7068_v35 = vrot.slane %v7067_v49, 4  ;;  %v8723_v26 = vshrl.u32 %v8662_v1, 16 }
 0x651   : > { %v7077_v31 = vor.u32 %v7076_v25, %v7072_v54  ;;  %v8712_v23 = vrot.slane %v8710_v9, 4  ;;  %v7059_v16 = vsel %vm12840_vm12, %v7054_v62, %v7058_v6  ;;  %v8715_v15 = vrot.slane %v8713_v53, 5  ;;  %v8667_v53 = vld [vmem:[#allocation2 + $0x30] sm:$0xf] }
 0x652   : > { %v8721_v22 = vrot.slane %v8719_v56, 5  ;;  %v8729_v37 = vshll.u32 %v8663_v36, 16  ;;  %v11162_v58 = vcombine.low %v7049_v28, %v7059_v16  ;;  %v7073_v32 = vsel %vm12840_vm12, %v7068_v35, %v7072_v54  ;;  %v8199_v54 = vld [vmem:[#allocation2 + $0x14] sm:$0x1] }
 0x653   : > { %v7078_v29 = vrot.slane %v7077_v31, 4  ;;  %v8725_v27 = vrot.slane %v8723_v26, 4  ;;  %v8716_v44 = vor.u32 %v8715_v15, %v8712_v23  ;;  %v7085_v63 = vshrl.u32 %v6721_v8, 16  ;;  %v8668_v56 = vld [vmem:[#allocation2 + $0x34] sm:$0xf] }
 0x654   : > { %v8731_v4 = vrot.slane %v8729_v37, 5  ;;  %v7088_v30 = vshll.u32 %v6721_v8, 16  ;;  %7182 = vrot.lane.b32.xlu1 %v11162_v58, %s12671_s14  ;;  %v7094_v39 = vshll.u32 %v6722_v17, 16  ;;  %v7098_v45 = vshrl.u32 %v6722_v17, 16  ;;  %v8669_v8 = vld [vmem:[#allocation2 + $0x38] sm:$0x1] }
 0x655   : > { %v7083_v11 = vsel %vm12840_vm12, %v7078_v29, %v7082_v33  ;;  %v8726_v57 = vor.u32 %v8725_v27, %v8721_v22  ;;  %v8717_v20 = vrot.slane %v8716_v44, 4  ;;  %v7087_v46 = vrot.slane %v7085_v63, 4  ;;  %v8200_v27 = vld [vmem:[#allocation2 + $0x18] sm:$0xe] }
 0x656   : > { %v11163_v60 = vcombine.low %v7073_v32, %v7083_v11  ;;  %v7090_v14 = vrot.slane %v7088_v30, 5  ;;  %v7096_v47 = vrot.slane %v7094_v39, 5  ;;  %v7100_v51 = vrot.slane %v7098_v45, 4  ;;  %v12318_v44 = vld [vmem:[#allocation2 + $0x78] sm:$0xff]   ;;  %v8202_v11 = vld [vmem:[#allocation2 + $0x20] sm:$0x1] }
 0x657   : > { %v8727_v2 = vrot.slane %v8726_v57, 4  ;;  %v7104_v42 = vshll.u32 %v6723_v41, 16  ;;  %v8722_v18 = vsel %vm12840_vm12, %v8717_v20, %v8721_v22  ;;  %v8734_v6 = vshrl.u32 %v8664_v0, 16  ;;  %6670 = vst.msk [vmem:[#allocation3 + $0x190] sm:$0xff] %vm5230_vm13, %v12318_v44  ;;  %v12319_v20 = vld [vmem:[%s17211_s9 + $0xc0] sm:$0xff]  }
 0x658   : > { %v7091_v7 = vor.u32 %v7090_v14, %v7087_v46  ;;  %v8737_v38 = vshll.u32 %v8664_v0, 16  ;;  %7184 = vrot.lane.b32.xlu1 %v11163_v60, %s12671_s14  ;;  %v7101_v3 = vor.u32 %v7100_v51, %v7096_v47  ;;  %v8743_v59 = vshll.u32 %v8665_v21, 16  ;;  %v8670_v60 = vld [vmem:[#allocation2 + $0x3c] sm:$0xf]  ;;  %11735 = vmatprep.subr.bf16.mxu0 %v12319_v20 }
 0x659   : > { %v8732_v12 = vsel %vm12840_vm12, %v8727_v2, %v8731_v4  ;;  %v7106_v50 = vrot.slane %v7104_v42, 5  ;;  %v8736_v61 = vrot.slane %v8734_v6, 4  ;;  %v8747_v49 = vshrl.u32 %v8665_v21, 16  ;;  %v8671_v2 = vld [vmem:[#allocation2 + $0x40] sm:$0xf] }
 0x65a   : > { %v11277_v1 = vcombine.low %v8722_v18, %v8732_v12  ;;  %v7092_v5 = vrot.slane %v7091_v7, 4  ;;  %v8739_v13 = vrot.slane %v8737_v38, 5  ;;  %v7102_v40 = vrot.slane %v7101_v3, 4  ;;  %v8672_v6 = vld [vmem:[#allocation2 + $0x44] sm:$0x1] }
 0x65b   : > { %v8745_v28 = vrot.slane %v8743_v59, 5  ;;  %v8753_v25 = vshll.u32 %v8666_v48, 16  ;;  %v11229_v62 = vrot.slane %v8197_v24, 9  ;;  %v8295_v33 = vrot.slane %v8198_v55, 5  ;;  %v8203_v55 = vld [vmem:[#allocation2 + $0x24] sm:$0xe] }
 0x65c   : > { %9141 = vrot.lane.b32.xlu0 %v11277_v1, %s12671_s14  ;;  %v7097_v36 = vsel %vm12840_vm12, %v7092_v5, %v7096_v47  ;;  %v8740_v9 = vor.u32 %v8739_v13, %v8736_v61  ;;  %v7107_v35 = vsel %vm12840_vm12, %v7102_v40, %v7106_v50  ;;  %v8749_v31 = vrot.slane %v8747_v49, 4  ;;  %v12320_v1 = vld [vmem:[%s17211_s9 + $0x80] sm:$0xff]   ;;  %v8204_v40 = vld [vmem:[#allocation2 + $0x28] sm:$0xf] }
 0x65d   : > { %v8755_v23 = vrot.slane %v8753_v25, 5  ;;  %v8298_v26 = vrot.slane %v8199_v54, 5  ;;  %v11164_v16 = vcombine.low %v7097_v36, %v7107_v35  ;;  %v8296_v37 = vsel %vm12813_vm9, %v11229_v62, %v8295_v33  ;;  %v8673_v62 = vld [vmem:[#allocation2 + $0x48] sm:$0xf]  ;;  %11736 = vmatpush3.bf16.msra.mxu0 %v12320_v1  ;;  %v12327_v1 = vld [vmem:[#allocation2 + $0x9c] sm:$0xff]  }
 0x65e   : > { %v8741_v15 = vrot.slane %v8740_v9, 4  ;;  %v8297_v17 = vrot.slane %v8295_v33, 4  ;;  %v8750_v19 = vor.u32 %v8749_v31, %v8745_v28  ;;  %v8758_v58 = vshrl.u32 %v8667_v53, 16  ;;  %v8205_v9 = vld [vmem:[#allocation2 + $0x2c] sm:$0x1]  ;;  %6673 = vst.msk [vmem:[#allocation3 + $0x208] sm:$0xff] %vm5230_vm13, %v12327_v1 }
 0x65f   : > { %v8761_v32 = vshll.u32 %v8667_v53, 16  ;;  %v8767_v29 = vshll.u32 %v8668_v56, 16  ;;  %7186 = vrot.lane.b32.xlu1 %v11164_v16, %s12671_s14  ;;  %v8771_v63 = vshrl.u32 %v8668_v56, 16  ;;  %v8777_v30 = vshll.u32 %v8669_v8, 16  ;;  %v8674_v31 = vld [vmem:[#allocation2 + $0x4c] sm:$0xf] }
 0x660   : > { %v8746_v4 = vsel %vm12840_vm12, %v8741_v15, %v8745_v28  ;;  %v8299_v41 = vsel %vm12813_vm9, %v8297_v17, %v8298_v26  ;;  %v8751_v57 = vrot.slane %v8750_v19, 4  ;;  %v8760_v45 = vrot.slane %v8758_v58, 4  ;;  %v8206_v15 = vld [vmem:[#allocation2 + $0x30] sm:$0xe] }
 0x661   : > { %v11245_v39 = vcombine.low %v8296_v37, %v8299_v41  ;;  %v8763_v0 = vrot.slane %v8761_v32, 5  ;;  %v8769_v46 = vrot.slane %v8767_v29, 5  ;;  %v8773_v14 = vrot.slane %v8771_v63, 4  ;;  %v12322_v37 = vld [vmem:[%s17211_s9 + $0xc8] sm:$0xff]   ;;  %v8675_v32 = vld [vmem:[#allocation2 + $0x50] sm:$0x1] }
 0x662   : > { %v8779_v21 = vrot.slane %v8777_v30, 5  ;;  %v11230_v43 = vrot.slane %v8200_v27, 9  ;;  %v8756_v47 = vsel %vm12840_vm12, %v8751_v57, %v8755_v23  ;;  %v8302_v42 = vrot.slane %v8201_v52, 5  ;;  %v12321_v23 = vld [vmem:[#allocation2 + $0x84] sm:$0xff]   ;;  %v8207_v30 = vld [vmem:[#allocation2 + $0x34] sm:$0xf]  ;;  %11737 = vmatprep.subr.bf16.mxu0 %v12322_v37 }
 0x663   : > { %v8764_v51 = vor.u32 %v8763_v0, %v8760_v45  ;;  %v8305_v18 = vrot.slane %v8202_v11, 5  ;;  %v11278_v7 = vcombine.low %v8746_v4, %v8756_v47  ;;  %8453 = vrot.lane.b32.xlu1 %v11245_v39, %s12671_s14  ;;  %v8774_v48 = vor.u32 %v8773_v14, %v8769_v46  ;;  %6671 = vst.msk [vmem:[#allocation3 + $0x1b8] sm:$0xff] %vm5230_vm13, %v12321_v23  ;;  %v12323_v27 = vld [vmem:[%s17211_s9 + $0x88] sm:$0xff]   ;;  %v12324_v52 = vld [vmem:[#allocation2 + $0x90] sm:$0xff]   ;;  %v8208_v0 = vld [vmem:[#allocation2 + $0x38] sm:$0x1] }
 0x664   : > { %v8782_v38 = vshrl.u32 %v8670_v60, 16  ;;  %v8785_v12 = vshll.u32 %v8670_v60, 16  ;;  %v8303_v50 = vsel %vm12813_vm9, %v11230_v43, %v8302_v42  ;;  %v8304_v59 = vrot.slane %v8302_v42, 4  ;;  %11738 = vmatpush3.bf16.msra.mxu0 %v12323_v27  ;;  %v12325_v60 = vld [vmem:[%s17211_s9 + $0xd0] sm:$0xff]   ;;  %6672 = vst.msk [vmem:[#allocation3 + $0x1e0] sm:$0xff] %vm5230_vm13, %v12324_v52  ;;  %v12329_v37 = vld [vmem:[%s17211_s9 + $0x98] sm:$0xff]  }
 0x665   : > { %v8765_v3 = vrot.slane %v8764_v51, 4  ;;  %v8791_v24 = vshll.u32 %v8671_v2, 16  ;;  %9143 = vrot.lane.b32.xlu0 %v11278_v7, %s12671_s14  ;;  %v8775_v5 = vrot.slane %v8774_v48, 4  ;;  %v8795_v54 = vshrl.u32 %v8671_v2, 16  ;;  %v8676_v43 = vld [vmem:[#allocation2 + $0x54] sm:$0xf]  ;;  %11739 = vmatprep.subr.bf16.mxu0 %v12325_v60 }
 0x666   : > { %v8784_v61 = vrot.slane %v8782_v38, 4  ;;  %v8787_v13 = vrot.slane %v8785_v12, 5  ;;  %v8306_v49 = vsel %vm12813_vm9, %v8304_v59, %v8305_v18  ;;  %v8801_v36 = vshll.u32 %v8672_v6, 16  ;;  %v12326_v2 = vld [vmem:[%s17211_s9 + $0x90] sm:$0xff]   ;;  %v8677_v7 = vld [vmem:[#allocation2 + $0x58] sm:$0xf] }
 0x667   : > { %v8770_v28 = vsel %vm12840_vm12, %v8765_v3, %v8769_v46  ;;  %v8793_v25 = vrot.slane %v8791_v24, 5  ;;  %v8780_v33 = vsel %vm12840_vm12, %v8775_v5, %v8779_v21  ;;  %v11246_v53 = vcombine.low %v8303_v50, %v8306_v49  ;;  %v8678_v59 = vld [vmem:[#allocation2 + $0x5c] sm:$0x1]  ;;  %v8679_v23 = vld [vmem:[#allocation2 + $0x60] sm:$0xf]  ;;  %v12330_v27 = vld [vmem:[#allocation2 + $0xa8] sm:$0xff]  }
 0x668   : > { %v8788_v56 = vor.u32 %v8787_v13, %v8784_v61  ;;  %v8797_v35 = vrot.slane %v8795_v54, 4  ;;  %v11279_v26 = vcombine.low %v8770_v28, %v8780_v33  ;;  %v8803_v8 = vrot.slane %v8801_v36, 5  ;;  %11740 = vmatpush3.bf16.msra.mxu0 %v12326_v2  ;;  %v12328_v28 = vld [vmem:[%s17211_s9 + $0xd8] sm:$0xff]   ;;  %v12331_v52 = vld [vmem:[%s17211_s9 + $0xe0] sm:$0xff]   ;;  %6674 = vst.msk [vmem:[#allocation3 + $0x230] sm:$0xff] %vm5230_vm13, %v12330_v27  ;;  %v16241_v2 = vpop.permute.xlu0 %7621 }
 0x669   : > { %v11231_v34 = vrot.slane %v8203_v55, 9  ;;  %v8309_v16 = vrot.slane %v8204_v40, 5  ;;  %8455 = vrot.lane.b32.xlu1 %v11246_v53, %s12671_s14  ;;  %v8312_v58 = vrot.slane %v8205_v9, 5  ;;  %v8806_v29 = vshrl.u32 %v8673_v62, 16  ;;  %v8209_v40 = vld [vmem:[#allocation2 + $0x3c] sm:$0xe]  ;;  %11741 = vmatprep.subr.bf16.mxu0 %v12328_v28 }
 0x66a   : > { %v8789_v17 = vrot.slane %v8788_v56, 4  ;;  %v8798_v19 = vor.u32 %v8797_v35, %v8793_v25  ;;  %9145 = vrot.lane.b32.xlu0 %v11279_v26, %s12671_s14  ;;  %v8809_v41 = vshll.u32 %v8673_v62, 16  ;;  %v8815_v63 = vshll.u32 %v8674_v31, 16  ;;  %v8210_v62 = vld [vmem:[#allocation2 + $0x40] sm:$0xf] }
 0x66b   : > { %v8310_v44 = vsel %vm12813_vm9, %v11231_v34, %v8309_v16  ;;  %v8311_v4 = vrot.slane %v8309_v16, 4  ;;  %v8808_v39 = vrot.slane %v8806_v29, 4  ;;  %v8819_v45 = vshrl.u32 %v8674_v31, 16  ;;  %v8211_v31 = vld [vmem:[#allocation2 + $0x44] sm:$0x1] }
 0x66c   : > { %v8794_v11 = vsel %vm12840_vm12, %v8789_v17, %v8793_v25  ;;  %v8799_v57 = vrot.slane %v8798_v19, 4  ;;  %v8811_v46 = vrot.slane %v8809_v41, 5  ;;  %v8817_v14 = vrot.slane %v8815_v63, 5  ;;  %v8681_v29 = vld [vmem:[#allocation2 + $0x68] sm:$0x1]  ;;  %11742 = vmatpush3.bf16.msra.mxu0 %v12329_v37  ;;  %v12332_v60 = vld [vmem:[%s17211_s9 + $0xa0] sm:$0xff]  }
 0x66d   : > { %v8313_v20 = vsel %vm12813_vm9, %v8311_v4, %v8312_v58  ;;  %v8825_v21 = vshll.u32 %v8675_v32, 16  ;;  %v8821_v42 = vrot.slane %v8819_v45, 4  ;;  %v11232_v18 = vrot.slane %v8206_v15, 9  ;;  %v8680_v15 = vld [vmem:[#allocation2 + $0x64] sm:$0xf]  ;;  %11743 = vmatprep.subr.bf16.mxu0 %v12331_v52 }
 0x66e   : > { %v8804_v47 = vsel %vm12840_vm12, %v8799_v57, %v8803_v8  ;;  %v11247_v51 = vcombine.low %v8310_v44, %v8313_v20  ;;  %v8812_v6 = vor.u32 %v8811_v46, %v8808_v39  ;;  %v8316_v12 = vrot.slane %v8207_v30, 5  ;;  %v8212_v30 = vld [vmem:[#allocation2 + $0x48] sm:$0xe] }
 0x66f   : > { %v11280_v48 = vcombine.low %v8794_v11, %v8804_v47  ;;  %v8827_v38 = vrot.slane %v8825_v21, 5  ;;  %v8822_v3 = vor.u32 %v8821_v42, %v8817_v14  ;;  %v8319_v50 = vrot.slane %v8208_v0, 5  ;;  %v8213_v0 = vld [vmem:[#allocation2 + $0x4c] sm:$0xf]  ;;  %v12333_v47 = vld [vmem:[#allocation2 + $0x18] sm:$0xff]  }
 0x670   : > { %8457 = vrot.lane.b32.xlu1 %v11247_v51, %s12671_s14  ;;  %v8830_v24 = vshrl.u32 %v8676_v43, 16  ;;  %v8833_v55 = vshll.u32 %v8676_v43, 16  ;;  %v8813_v5 = vrot.slane %v8812_v6, 4  ;;  %v8317_v61 = vsel %vm12813_vm9, %v11232_v18, %v8316_v12  ;;  %v8214_v43 = vld [vmem:[#allocation2 + $0x50] sm:$0x1]  ;;  %v12334_v6 = vld [vmem:[#allocation2 + $0xb4] sm:$0xff]   ;;  %11744 = vmatpush3.bf16.msra.mxu0 %v12332_v60 }
 0x671   : > { %9147 = vrot.lane.b32.xlu0 %v11280_v48, %s12671_s14  ;;  %v8318_v13 = vrot.slane %v8316_v12, 4  ;;  %v8839_v54 = vshll.u32 %v8677_v7, 16  ;;  %v8823_v49 = vrot.slane %v8822_v3, 4  ;;  %v8843_v9 = vshrl.u32 %v8677_v7, 16  ;;  %v8682_v48 = vld [vmem:[#allocation2 + $0x6c] sm:$0xf] }
 0x672   : > { %v8832_v25 = vrot.slane %v8830_v24, 4  ;;  %v8835_v36 = vrot.slane %v8833_v55, 5  ;;  %v8818_v33 = vsel %vm12840_vm12, %v8813_v5, %v8817_v14  ;;  %v8849_v35 = vshll.u32 %v8678_v59, 16  ;;  %v8683_v59 = vld [vmem:[#allocation2 + $0x70] sm:$0xf]  ;;  %8645 = vst.msk [vmem:[#allocation3 + $0x18] sm:$0xff] %vm5230_vm13, %v12333_v47 }
 0x673   : > { %v8320_v53 = vsel %vm12813_vm9, %v8318_v13, %v8319_v50  ;;  %v8841_v56 = vrot.slane %v8839_v54, 5  ;;  %v8828_v26 = vsel %vm12840_vm12, %v8823_v49, %v8827_v38  ;;  %v8845_v16 = vrot.slane %v8843_v9, 4  ;;  %6675 = vst.msk [vmem:[#allocation3 + $0x258] sm:$0xff] %vm5230_vm13, %v12334_v6  ;;  %v8684_v54 = vld [vmem:[#allocation2 + $0x74] sm:$0x1]  ;;  %v12335_v49 = vld [vmem:[%s17211_s9 + $0xe8] sm:$0xff]  }
 0x674   : > { %v11248_v8 = vcombine.low %v8317_v61, %v8320_v53  ;;  %v8836_v34 = vor.u32 %v8835_v36, %v8832_v25  ;;  %v11281_v17 = vcombine.low %v8818_v33, %v8828_v26  ;;  %v8851_v19 = vrot.slane %v8849_v35, 5  ;;  %v8215_v33 = vld [vmem:[#allocation2 + $0x54] sm:$0xe]  ;;  %v12336_v53 = vld [vmem:[%s17211_s9 + $0xa8] sm:$0xff]   ;;  %v8216_v26 = vld [vmem:[#allocation2 + $0x58] sm:$0xf]  ;;  %11745 = vmatprep.subr.bf16.mxu0 %v12335_v49 }
 0x675   : > { %v11233_v58 = vrot.slane %v8209_v40, 9  ;;  %v8323_v32 = vrot.slane %v8210_v62, 5  ;;  %v8846_v4 = vor.u32 %v8845_v16, %v8841_v56  ;;  %v8326_v41 = vrot.slane %v8211_v31, 5  ;;  %11746 = vmatpush3.bf16.msra.mxu0 %v12336_v53 }
 0x676   : > { %8459 = vrot.lane.b32.xlu1 %v11248_v8, %s12671_s14  ;;  %v8837_v44 = vrot.slane %v8836_v34, 4  ;;  %v8854_v63 = vshrl.u32 %v8679_v23, 16  ;;  %9149 = vrot.lane.b32.xlu0 %v11281_v17, %s12671_s14  ;;  %v8857_v39 = vshll.u32 %v8679_v23, 16  ;;  %v8863_v45 = vshll.u32 %v8680_v15, 16  ;;  %v16259_v8 = vpop.permute.xlu0 %7623  ;;  %v8217_v17 = vld [vmem:[#allocation2 + $0x5c] sm:$0x1] }
 0x677   : > { %v8324_v11 = vsel %vm12813_vm9, %v11233_v58, %v8323_v32  ;;  %v8325_v57 = vrot.slane %v8323_v32, 4  ;;  %v8847_v46 = vrot.slane %v8846_v4, 4  ;;  %v8867_v21 = vshrl.u32 %v8680_v15, 16  ;;  %v12337_v4 = vld [vmem:[#allocation2 + $0x24] sm:$0xff]  }
 0x678   : > { %v8842_v20 = vsel %vm12840_vm12, %v8837_v44, %v8841_v56  ;;  %v8856_v14 = vrot.slane %v8854_v63, 4  ;;  %v8859_v42 = vrot.slane %v8857_v39, 5  ;;  %v8865_v18 = vrot.slane %v8863_v45, 5  ;;  %v8686_v44 = vld [vmem:[#allocation2 + $0x7c] sm:$0xf]  ;;  %8646 = vst.msk [vmem:[#allocation3 + $0x40] sm:$0xff] %vm5230_vm13, %v12337_v4 }
 0x679   : > { %v8327_v51 = vsel %vm12813_vm9, %v8325_v57, %v8326_v41  ;;  %v8873_v7 = vshll.u32 %v8681_v29, 16  ;;  %v8852_v38 = vsel %vm12840_vm12, %v8847_v46, %v8851_v19  ;;  %v8869_v3 = vrot.slane %v8867_v21, 4  ;;  %v8685_v19 = vld [vmem:[#allocation2 + $0x78] sm:$0xf]  ;;  %v12338_v57 = vld [vmem:[%s17211_s9 + $0xf0] sm:$0xff]  }
 0x67a   : > { %v11249_v12 = vcombine.low %v8324_v11, %v8327_v51  ;;  %v11234_v50 = vrot.slane %v8212_v30, 9  ;;  %v11282_v24 = vcombine.low %v8842_v20, %v8852_v38  ;;  %v8860_v55 = vor.u32 %v8859_v42, %v8856_v14  ;;  %v8687_v11 = vld [vmem:[#allocation2 + $0x80] sm:$0x1]  ;;  %v8218_v20 = vld [vmem:[#allocation2 + $0x60] sm:$0xe]  ;;  %v12339_v46 = vld [vmem:[%s17211_s9 + $0xb0] sm:$0xff]   ;;  %11747 = vmatprep.subr.bf16.mxu0 %v12338_v57 }
 0x67b   : > { %v8875_v1 = vrot.slane %v8873_v7, 5  ;;  %v8330_v5 = vrot.slane %v8213_v0, 5  ;;  %v8870_v61 = vor.u32 %v8869_v3, %v8865_v18  ;;  %v8333_v13 = vrot.slane %v8214_v43, 5  ;;  %v8219_v51 = vld [vmem:[#allocation2 + $0x64] sm:$0xf]  ;;  %v12340_v42 = vld [vmem:[#allocation2 + $0x30] sm:$0xff]   ;;  %11748 = vmatpush3.bf16.msra.mxu0 %v12339_v46 }
 0x67c   : > { %8461 = vrot.lane.b32.xlu1 %v11249_v12, %s12671_s14  ;;  %v8878_v40 = vshrl.u32 %v8682_v48, 16  ;;  %v8881_v28 = vshll.u32 %v8682_v48, 16  ;;  %9151 = vrot.lane.b32.xlu0 %v11282_v24, %s12671_s14  ;;  %v8861_v25 = vrot.slane %v8860_v55, 4  ;;  %v8887_v62 = vshll.u32 %v8683_v59, 16  ;;  %v8220_v38 = vld [vmem:[#allocation2 + $0x68] sm:$0x1]  ;;  %v16280_v12 = vpop.permute.xlu0 %7625 }
 0x67d   : > { %v8331_v36 = vsel %vm12813_vm9, %v11234_v50, %v8330_v5  ;;  %v8332_v9 = vrot.slane %v8330_v5, 4  ;;  %v8871_v56 = vrot.slane %v8870_v61, 4  ;;  %v8891_v23 = vshrl.u32 %v8683_v59, 16  ;;  %v8688_v55 = vld [vmem:[#allocation2 + $0x84] sm:$0xf]  ;;  %8647 = vst.msk [vmem:[#allocation3 + $0x68] sm:$0xff] %vm5230_vm13, %v12340_v42 }
 0x67e   : > { %v8880_v35 = vrot.slane %v8878_v40, 4  ;;  %v8883_v31 = vrot.slane %v8881_v28, 5  ;;  %v8866_v34 = vsel %vm12840_vm12, %v8861_v25, %v8865_v18  ;;  %v8889_v15 = vrot.slane %v8887_v62, 5  ;;  %v8689_v40 = vld [vmem:[#allocation2 + $0x88] sm:$0xf] }
 0x67f   : > { %v8334_v16 = vsel %vm12813_vm9, %v8332_v9, %v8333_v13  ;;  %v8897_v37 = vshll.u32 %v8684_v54, 16  ;;  %v8876_v58 = vsel %vm12840_vm12, %v8871_v56, %v8875_v1  ;;  %v8893_v27 = vrot.slane %v8891_v23, 4  ;;  %v12342_v1 = vld [vmem:[%s17211_s9 + $0xf8] sm:$0xff]   ;;  %v8690_v9 = vld [vmem:[#allocation2 + $0x8c] sm:$0x1] }
 0x680   : > { %v11250_v32 = vcombine.low %v8331_v36, %v8334_v16  ;;  %v8884_v29 = vor.u32 %v8883_v31, %v8880_v35  ;;  %v11283_v41 = vcombine.low %v8866_v34, %v8876_v58  ;;  %v11235_v30 = vrot.slane %v8215_v33, 9  ;;  %11749 = vmatprep.subr.bf16.mxu0 %v12342_v1  ;;  %v8221_v35 = vld [vmem:[#allocation2 + $0x6c] sm:$0xe]  ;;  %v12343_v31 = vld [vmem:[%s17211_s9 + $0xb8] sm:$0xff]   ;;  %v8226_v1 = vld [vmem:[#allocation2 + $0x80] sm:$0x1] }
 0x681   : > { %v8899_v63 = vrot.slane %v8897_v37, 5  ;;  %v8337_v52 = vrot.slane %v8216_v26, 5  ;;  %v8894_v45 = vor.u32 %v8893_v27, %v8889_v15  ;;  %v8340_v0 = vrot.slane %v8217_v17, 5  ;;  %v12344_v37 = vld [vmem:[#allocation2 + $0x3c] sm:$0xff]   ;;  %v16297_v27 = vpop.permute.xlu1 %7156  ;;  %11750 = vmatpush3.bf16.msra.mxu0 %v12343_v31 }
 0x682   : > { %8463 = vrot.lane.b32.xlu1 %v11250_v32, %s12671_s14  ;;  %v8885_v39 = vrot.slane %v8884_v29, 4  ;;  %v8902_v60 = vshrl.u32 %v8685_v19, 16  ;;  %9153 = vrot.lane.b32.xlu0 %v11283_v41, %s12671_s14  ;;  %v8905_v43 = vshll.u32 %v8685_v19, 16  ;;  %v8911_v47 = vshll.u32 %v8686_v44, 16  ;;  %v8223_v29 = vld [vmem:[#allocation2 + $0x74] sm:$0x1] }
 0x683   : > { %v8338_v14 = vsel %vm12813_vm9, %v11235_v30, %v8337_v52  ;;  %v8339_v21 = vrot.slane %v8337_v52, 4  ;;  %v8895_v7 = vrot.slane %v8894_v45, 4  ;;  %v8915_v6 = vshrl.u32 %v8686_v44, 16  ;;  %v16299_v44 = vpop.permute.xlu0 %7627  ;;  %v8691_v52 = vld [vmem:[#allocation2 + $0x90] sm:$0xf]  ;;  %8648 = vst.msk [vmem:[#allocation3 + $0x90] sm:$0xff] %vm5230_vm13, %v12344_v37 }
 0x684   : > { %v8890_v18 = vsel %vm12840_vm12, %v8885_v39, %v8889_v15  ;;  %v8904_v48 = vrot.slane %v8902_v60, 4  ;;  %v8907_v50 = vrot.slane %v8905_v43, 5  ;;  %v8913_v59 = vrot.slane %v8911_v47, 5  ;;  %v8222_v15 = vld [vmem:[#allocation2 + $0x70] sm:$0xf] }
 0x685   : > { %v8341_v3 = vsel %vm12813_vm9, %v8339_v21, %v8340_v0  ;;  %v8921_v24 = vshll.u32 %v8687_v11, 16  ;;  %v8900_v5 = vsel %vm12840_vm12, %v8895_v7, %v8899_v63  ;;  %v8917_v13 = vrot.slane %v8915_v6, 4  ;;  %v8692_v11 = vld [vmem:[#allocation2 + $0x94] sm:$0xf]  ;;  %v8693_v60 = vld [vmem:[#allocation2 + $0x98] sm:$0x1] }
 0x686   : > { %v11251_v61 = vcombine.low %v8338_v14, %v8341_v3  ;;  %v11236_v54 = vrot.slane %v8218_v20, 9  ;;  %v11284_v28 = vcombine.low %v8890_v18, %v8900_v5  ;;  %v8908_v49 = vor.u32 %v8907_v50, %v8904_v48  ;;  %v12345_v20 = vld [vmem:[#allocation2 + $0x48] sm:$0xff]   ;;  %v8224_v47 = vld [vmem:[#allocation2 + $0x78] sm:$0xe]  ;;  %v8225_v6 = vld [vmem:[#allocation2 + $0x7c] sm:$0xf] }
 0x687   : > { %v8923_v25 = vrot.slane %v8921_v24, 5  ;;  %v8344_v36 = vrot.slane %v8219_v51, 5  ;;  %v8918_v62 = vor.u32 %v8917_v13, %v8913_v59  ;;  %v8347_v33 = vrot.slane %v8220_v38, 5  ;;  %v12346_v51 = vld [vmem:[#allocation2 + $0x54] sm:$0xff]   ;;  %v16309_v38 = vpop.permute.xlu1 %7158  ;;  %8649 = vst.msk [vmem:[#allocation3 + $0xb8] sm:$0xff] %vm5230_vm13, %v12345_v20  ;;  %v12347_v3 = vld [vmem:[#allocation2 + $0x60] sm:$0xff]  }
 0x688   : > { %8465 = vrot.lane.b32.xlu1 %v11251_v61, %s12671_s14  ;;  %v8926_v53 = vshrl.u32 %v8688_v55, 16  ;;  %v8929_v56 = vshll.u32 %v8688_v55, 16  ;;  %9155 = vrot.lane.b32.xlu0 %v11284_v28, %s12671_s14  ;;  %v8909_v23 = vrot.slane %v8908_v49, 4  ;;  %v8935_v16 = vshll.u32 %v8689_v40, 16  ;;  %v8694_v5 = vld [vmem:[#allocation2 + $0x9c] sm:$0xf]  ;;  %v16318_v49 = vpop.permute.xlu0 %7629 }
 0x689   : > { %v8345_v26 = vsel %vm12813_vm9, %v11236_v54, %v8344_v36  ;;  %v8346_v34 = vrot.slane %v8344_v36, 4  ;;  %v8919_v17 = vrot.slane %v8918_v62, 4  ;;  %v8939_v32 = vshrl.u32 %v8689_v40, 16  ;;  %8650 = vst.msk [vmem:[#allocation3 + $0xe0] sm:$0xff] %vm5230_vm13, %v12346_v51  ;;  %v12348_v61 = vld [vmem:[#allocation2 + $0x6c] sm:$0xff]   ;;  %8651 = vst.msk [vmem:[#allocation3 + $0x108] sm:$0xff] %vm5230_vm13, %v12347_v3 }
 0x68a   : > { %v8928_v19 = vrot.slane %v8926_v53, 4  ;;  %v8931_v58 = vrot.slane %v8929_v56, 5  ;;  %v8914_v4 = vsel %vm12840_vm12, %v8909_v23, %v8913_v59  ;;  %v8937_v63 = vrot.slane %v8935_v16, 5  ;;  %8652 = vst.msk [vmem:[#allocation3 + $0x130] sm:$0xff] %vm5230_vm13, %v12348_v61  ;;  %v12350_v53 = vld [vmem:[#allocation2 + $0x84] sm:$0xff]  }
 0x68b   : > { %v8348_v41 = vsel %vm12813_vm9, %v8346_v34, %v8347_v33  ;;  %v8945_v30 = vshll.u32 %v8690_v9, 16  ;;  %v8924_v57 = vsel %vm12840_vm12, %v8919_v17, %v8923_v25  ;;  %v8941_v0 = vrot.slane %v8939_v32, 4  ;;  %v12349_v25 = vld [vmem:[#allocation2 + $0x78] sm:$0xff]   ;;  %v8696_v17 = vld [vmem:[#allocation2 + $0xa4] sm:$0x1]  ;;  %8654 = vst.msk [vmem:[#allocation3 + $0x180] sm:$0xff] %vm5230_vm13, %v12350_v53 }
 0x68c   : > { %v11252_v39 = vcombine.low %v8345_v26, %v8348_v41  ;;  %v8932_v45 = vor.u32 %v8931_v58, %v8928_v19  ;;  %v11285_v46 = vcombine.low %v8914_v4, %v8924_v57  ;;  %v11237_v21 = vrot.slane %v8221_v35, 9  ;;  %v8695_v26 = vld [vmem:[#allocation2 + $0xa0] sm:$0xf]  ;;  %8653 = vst.msk [vmem:[#allocation3 + $0x158] sm:$0xff] %vm5230_vm13, %v12349_v25  ;;  %v8227_v4 = vld [vmem:[#allocation2 + $0x84] sm:$0xe] }
 0x68d   : > { %v8947_v14 = vrot.slane %v8945_v30, 5  ;;  %v8351_v43 = vrot.slane %v8222_v15, 5  ;;  %v8942_v18 = vor.u32 %v8941_v0, %v8937_v63  ;;  %v8354_v7 = vrot.slane %v8223_v29, 5  ;;  %v8228_v41 = vld [vmem:[#allocation2 + $0x88] sm:$0xf]  ;;  %v12351_v30 = vld [vmem:[#allocation2 + $0x90] sm:$0xff]  }
 0x68e   : > { %8467 = vrot.lane.b32.xlu1 %v11252_v39, %s12671_s14  ;;  %v8933_v42 = vrot.slane %v8932_v45, 4  ;;  %v8950_v48 = vshrl.u32 %v8691_v52, 16  ;;  %9157 = vrot.lane.b32.xlu0 %v11285_v46, %s12671_s14  ;;  %v8953_v24 = vshll.u32 %v8691_v52, 16  ;;  %v8959_v55 = vshll.u32 %v8692_v11, 16  ;;  %v8229_v45 = vld [vmem:[#allocation2 + $0x8c] sm:$0x1] }
 0x68f   : > { %v8352_v50 = vsel %vm12813_vm9, %v11237_v21, %v8351_v43  ;;  %v8353_v59 = vrot.slane %v8351_v43, 4  ;;  %v8943_v54 = vrot.slane %v8942_v18, 4  ;;  %v8963_v28 = vshrl.u32 %v8692_v11, 16  ;;  %8655 = vst.msk [vmem:[#allocation3 + $0x1a8] sm:$0xff] %vm5230_vm13, %v12351_v30  ;;  %v8698_v18 = vld [vmem:[#allocation2 + $0xac] sm:$0xf] }
 0x690   : > { %v8938_v13 = vsel %vm12840_vm12, %v8933_v42, %v8937_v63  ;;  %v8952_v40 = vrot.slane %v8950_v48, 4  ;;  %v8955_v9 = vrot.slane %v8953_v24, 5  ;;  %v8961_v62 = vrot.slane %v8959_v55, 5  ;;  %v16329_v63 = vpop.permute.xlu1 %7160  ;;  %v8230_v61 = vld [vmem:[#allocation2 + $0x90] sm:$0xe] }
 0x691   : > { %v8355_v36 = vsel %vm12813_vm9, %v8353_v59, %v8354_v7  ;;  %v8969_v33 = vshll.u32 %v8693_v60, 16  ;;  %v8948_v56 = vsel %vm12840_vm12, %v8943_v54, %v8947_v14  ;;  %v8965_v31 = vrot.slane %v8963_v28, 4  ;;  %v8697_v14 = vld [vmem:[#allocation2 + $0xa8] sm:$0xf]  ;;  %v12353_v59 = vld [vmem:[#allocation2 + $0x9c] sm:$0xff]  }
 0x692   : > { %v11253_v35 = vcombine.low %v8352_v50, %v8355_v36  ;;  %v11238_v23 = vrot.slane %v8224_v47, 9  ;;  %v11286_v34 = vcombine.low %v8938_v13, %v8948_v56  ;;  %v8956_v16 = vor.u32 %v8955_v9, %v8952_v40  ;;  %v8699_v50 = vld [vmem:[#allocation2 + $0xb0] sm:$0x1]  ;;  %v12354_v13 = vld [vmem:[#allocation2 + $0xa8] sm:$0xff]   ;;  %v8231_v36 = vld [vmem:[#allocation2 + $0x94] sm:$0xf] }
 0x693   : > { %v8971_v15 = vrot.slane %v8969_v33, 5  ;;  %v8358_v37 = vrot.slane %v8225_v6, 5  ;;  %v8966_v19 = vor.u32 %v8965_v31, %v8961_v62  ;;  %v8361_v58 = vrot.slane %v8226_v1, 5  ;;  %8656 = vst.msk [vmem:[#allocation3 + $0x1d0] sm:$0xff] %vm5230_vm13, %v12353_v59  ;;  %v12355_v33 = vld [vmem:[#allocation2 + $0xb4] sm:$0xff]   ;;  %8657 = vst.msk [vmem:[#allocation3 + $0x1f8] sm:$0xff] %vm5230_vm13, %v12354_v13 }
 0x694   : > { %8469 = vrot.lane.b32.xlu1 %v11253_v35, %s12671_s14  ;;  %v8974_v32 = vshrl.u32 %v8694_v5, 16  ;;  %v8977_v29 = vshll.u32 %v8694_v5, 16  ;;  %9159 = vrot.lane.b32.xlu0 %v11286_v34, %s12671_s14  ;;  %v8957_v52 = vrot.slane %v8956_v16, 4  ;;  %v8983_v39 = vshll.u32 %v8695_v26, 16  ;;  %v16334_v21 = vpop.permute.xlu0 %7631  ;;  %v7163_v9 = vpop.permute.xlu1 %7162  ;;  %v12356_v34 = vld [vmem:[#allocation2 + $0xc0] sm:$0xff]   ;;  %8658 = vst.msk [vmem:[#allocation3 + $0x220] sm:$0xff] %vm5230_vm13, %v12355_v33 }
 0x695   : > { %v8359_v11 = vsel %vm12813_vm9, %v11238_v23, %v8358_v37  ;;  %v8360_v57 = vrot.slane %v8358_v37, 4  ;;  %v8967_v0 = vrot.slane %v8966_v19, 4  ;;  %v8987_v46 = vshrl.u32 %v8695_v26, 16  ;;  %v8232_v23 = vld [vmem:[#allocation2 + $0x98] sm:$0x1]  ;;  %8659 = vst.msk [vmem:[#allocation3 + $0x248] sm:$0xff] %vm5230_vm13, %v12356_v34 }
 0x696   : > { %v8976_v60 = vrot.slane %v8974_v32, 4  ;;  %v8979_v20 = vrot.slane %v8977_v29, 5  ;;  %v8962_v43 = vsel %vm12840_vm12, %v8957_v52, %v8961_v62  ;;  %v8985_v51 = vrot.slane %v8983_v39, 5  ;;  %v7221_v26 = vld [vmem:[#allocation2] sm:$0xe] }
 0x697   : > { %v8362_v47 = vsel %vm12813_vm9, %v8360_v57, %v8361_v58  ;;  %v8993_v42 = vshll.u32 %v8696_v17, 16  ;;  %v8972_v7 = vsel %vm12840_vm12, %v8967_v0, %v8971_v15  ;;  %v8989_v3 = vrot.slane %v8987_v46, 4  ;;  %v7223_v57 = vld [vmem:[#allocation2 + $0x8] sm:$0x1]  ;;  %v8700_v39 = vld [vmem:[#allocation2 + $0xb4] sm:$0xf] }
 0x698   : > { %v11254_v48 = vcombine.low %v8359_v11, %v8362_v47  ;;  %v8980_v6 = vor.u32 %v8979_v20, %v8976_v60  ;;  %v11287_v24 = vcombine.low %v8962_v43, %v8972_v7  ;;  %v11239_v1 = vrot.slane %v8227_v4, 9  ;;  %v16344_v62 = vpop.permute.xlu0 %7633  ;;  %v7222_v4 = vld [vmem:[#allocation2 + $0x4] sm:$0xf] }
 0x699   : > { %v8995_v55 = vrot.slane %v8993_v42, 5  ;;  %v8365_v5 = vrot.slane %v8228_v41, 5  ;;  %v8990_v40 = vor.u32 %v8989_v3, %v8985_v51  ;;  %v8368_v28 = vrot.slane %v8229_v45, 5  ;;  %v8702_v3 = vld [vmem:[#allocation2 + $0xbc] sm:$0x1] }
 0x69a   : > { %8471 = vrot.lane.b32.xlu1 %v11254_v48, %s12671_s14  ;;  %v8981_v54 = vrot.slane %v8980_v6, 4  ;;  %v8998_v25 = vshrl.u32 %v8697_v14, 16  ;;  %9161 = vrot.lane.b32.xlu0 %v11287_v24, %s12671_s14  ;;  %v9001_v35 = vshll.u32 %v8697_v14, 16  ;;  %v9007_v31 = vshll.u32 %v8698_v18, 16 }
 0x69b   : > { %v8366_v53 = vsel %vm12813_vm9, %v11239_v1, %v8365_v5  ;;  %v8367_v56 = vrot.slane %v8365_v5, 4  ;;  %v8991_v15 = vrot.slane %v8990_v40, 4  ;;  %v9011_v17 = vshrl.u32 %v8698_v18, 16  ;;  %v8234_v5 = vld [vmem:[#allocation2 + $0xa0] sm:$0xf] }
 0x69c   : > { %v8986_v16 = vsel %vm12840_vm12, %v8981_v54, %v8985_v51  ;;  %v9000_v37 = vrot.slane %v8998_v25, 4  ;;  %v9003_v58 = vrot.slane %v9001_v35, 5  ;;  %v9009_v32 = vrot.slane %v9007_v31, 5  ;;  %v16359_v45 = vpop.permute.xlu0 %7635  ;;  %v8701_v51 = vld [vmem:[#allocation2 + $0xb8] sm:$0xf] }
 0x69d   : > { %v8369_v19 = vsel %vm12813_vm9, %v8367_v56, %v8368_v28  ;;  %v9017_v29 = vshll.u32 %v8699_v50, 16  ;;  %v8996_v41 = vsel %vm12840_vm12, %v8991_v15, %v8995_v55  ;;  %v9013_v52 = vrot.slane %v9011_v17, 4  ;;  %v8233_v50 = vld [vmem:[#allocation2 + $0x9c] sm:$0xe] }
 0x69e   : > { %v11255_v30 = vcombine.low %v8366_v53, %v8369_v19  ;;  %v11240_v11 = vrot.slane %v8230_v61, 9  ;;  %v11288_v0 = vcombine.low %v8986_v16, %v8996_v41  ;;  %v9004_v60 = vor.u32 %v9003_v58, %v9000_v37  ;;  %v7224_v37 = vld [vmem:[#allocation2 + $0xc] sm:$0xe] }
 0x69f   : > { %v9019_v20 = vrot.slane %v9017_v29, 5  ;;  %v8372_v46 = vrot.slane %v8231_v36, 5  ;;  %v9014_v14 = vor.u32 %v9013_v52, %v9009_v32  ;;  %v8375_v43 = vrot.slane %v8232_v23, 5  ;;  %v8235_v36 = vld [vmem:[#allocation2 + $0xa4] sm:$0x1] }
 0x6a0   : > { %8473 = vrot.lane.b32.xlu1 %v11255_v30, %s12671_s14  ;;  %vm7204_vm0 = vcmask 1048064   ;;  %v11165_v47 = vrot.slane %v7221_v26, 9  ;;  %v7165_v42 = vpop.permute.xlu1 %7164  ;;  %9163 = vrot.lane.b32.xlu0 %v11288_v0, %s12671_s14  ;;  %v9005_v18 = vrot.slane %v9004_v60, 4  ;;  %v7319_v6 = vrot.slane %v7222_v4, 5  ;;  %v16373_v61 = vpop.permute.xlu0 %7637  ;;  %v7226_v23 = vld [vmem:[#allocation2 + $0x14] sm:$0x1] }
 0x6a1   : > { %v8373_v7 = vsel %vm12813_vm9, %v11240_v11, %v8372_v46  ;;  %v8374_v48 = vrot.slane %v8372_v46, 4  ;;  %7205 = vst.msk [vmem:[#allocation3] sm:$0xff] %vm7204_vm0, %v16297_v27  ;;  %7206 = vst.msk [vmem:[#allocation3 + $0x28] sm:$0xff] %vm7204_vm0, %v16309_v38  ;;  %v9015_v59 = vrot.slane %v9014_v14, 4  ;;  %v7322_v24 = vrot.slane %v7223_v57, 5 }
 0x6a2   : > { %7207 = vst.msk [vmem:[#allocation3 + $0x50] sm:$0xff] %vm7204_vm0, %v16329_v63  ;;  %7208 = vst.msk [vmem:[#allocation3 + $0x78] sm:$0xff] %vm7204_vm0, %v7163_v9  ;;  %v9022_v55 = vshrl.u32 %v8700_v39, 16  ;;  %v9025_v1 = vshll.u32 %v8700_v39, 16  ;;  %v9010_v27 = vsel %vm12840_vm12, %v9005_v18, %v9009_v32  ;;  %v7320_v63 = vsel %vm12813_vm9, %v11165_v47, %v7319_v6  ;;  %v7225_v9 = vld [vmem:[#allocation2 + $0x10] sm:$0xf] }
 0x6a3   : > { %7209 = vst.msk [vmem:[#allocation3 + $0xa0] sm:$0xff] %vm7204_vm0, %v7165_v42  ;;  %v8376_v38 = vsel %vm12813_vm9, %v8374_v48, %v8375_v43  ;;  %v7321_v13 = vrot.slane %v7319_v6, 4  ;;  %v9020_v54 = vsel %vm12840_vm12, %v9015_v59, %v9019_v20  ;;  %v9031_v35 = vshll.u32 %v8701_v51, 16  ;;  %v8703_v4 = vld [vmem:[#allocation2 + $0xc0] sm:$0xf] }
 0x6a4   : > { %v11256_v40 = vcombine.low %v8373_v7, %v8376_v38  ;;  %v9024_v28 = vrot.slane %v9022_v55, 4  ;;  %v9027_v25 = vrot.slane %v9025_v1, 5  ;;  %v7167_v33 = vpop.permute.xlu1 %7166  ;;  %v11289_v53 = vcombine.low %v9010_v27, %v9020_v54  ;;  %v16387_v17 = vpop.permute.xlu0 %7639  ;;  %v8704_v57 = vld [vmem:[#allocation2 + $0xc4] sm:$0xf]  ;;  %v8705_v14 = vld [vmem:[#allocation2 + $0xc8] sm:$0x1] }
 0x6a5   : > { %v7323_v56 = vsel %vm12813_vm9, %v7321_v13, %v7322_v24  ;;  %v9035_v31 = vshrl.u32 %v8701_v51, 16  ;;  %7210 = vst.msk [vmem:[#allocation3 + $0xc8] sm:$0xff] %vm7204_vm0, %v7167_v33  ;;  %v9041_v16 = vshll.u32 %v8702_v3, 16  ;;  %v11241_v15 = vrot.slane %v8233_v50, 9  ;;  %v8236_v43 = vld [vmem:[#allocation2 + $0xa8] sm:$0xe] }
 0x6a6   : > { %8475 = vrot.lane.b32.xlu1 %v11256_v40, %s12671_s14  ;;  %v11181_v26 = vcombine.low %v7320_v63, %v7323_v56  ;;  %v9028_v34 = vor.u32 %v9027_v25, %v9024_v28  ;;  %9165 = vrot.lane.b32.xlu0 %v11289_v53, %s12671_s14  ;;  %v9033_v19 = vrot.slane %v9031_v35, 5  ;;  %v8379_v32 = vrot.slane %v8234_v5, 5  ;;  %v8237_v7 = vld [vmem:[#allocation2 + $0xac] sm:$0xf]  ;;  %v8238_v48 = vld [vmem:[#allocation2 + $0xb0] sm:$0x1] }
 0x6a7   : > { %v9037_v58 = vrot.slane %v9035_v31, 4  ;;  %v8382_v29 = vrot.slane %v8235_v36, 5  ;;  %v9043_v30 = vrot.slane %v9041_v16, 5  ;;  %v7326_v52 = vrot.slane %v7225_v9, 5  ;;  %v7227_v6 = vld [vmem:[#allocation2 + $0x18] sm:$0xe] }
 0x6a8   : > { %7493 = vst.msk [vmem:[#allocation3 + $0x8] sm:$0xff] %vm5230_vm13, %v11181_v26  ;;  %v9029_v41 = vrot.slane %v9028_v34, 4  ;;  %v7329_v11 = vrot.slane %v7226_v23, 5  ;;  %v7169_v39 = vpop.permute.xlu1 %7168  ;;  %v8380_v60 = vsel %vm12813_vm9, %v11241_v15, %v8379_v32  ;;  %v8381_v20 = vrot.slane %v8379_v32, 4  ;;  %v7228_v55 = vld [vmem:[#allocation2 + $0x1c] sm:$0xf] }
 0x6a9   : > { %7669 = vst.msk [vmem:[#allocation3 + $0x8] sm:$0xff] %vm7204_vm0, %v16241_v2  ;;  %v9038_v0 = vor.u32 %v9037_v58, %v9033_v19  ;;  %v11166_v46 = vrot.slane %v7224_v37, 9  ;;  %7211 = vst.msk [vmem:[#allocation3 + $0xf0] sm:$0xff] %vm7204_vm0, %v7169_v39  ;;  %v7328_v51 = vrot.slane %v7326_v52, 4  ;;  %v9046_v42 = vshrl.u32 %v8703_v4, 16  ;;  %v16398_v2 = vpop.permute.xlu0 %7641  ;;  %v9493_v37 = vld [vmem:[#allocation3] sm:$0xff] }
 0x6aa   : > { %v9034_v47 = vsel %vm12840_vm12, %v9029_v41, %v9033_v19  ;;  %v9049_v18 = vshll.u32 %v8703_v4, 16  ;;  %v8383_v50 = vsel %vm12813_vm9, %v8381_v20, %v8382_v29  ;;  %v9055_v24 = vshll.u32 %v8704_v57, 16  ;;  %v7229_v1 = vld [vmem:[#allocation2 + $0x20] sm:$0x1]  ;;  %v8239_v13 = vld [vmem:[#allocation2 + $0xb4] sm:$0xe] }
 0x6ab   : > { %v9039_v3 = vrot.slane %v9038_v0, 4  ;;  %v7327_v59 = vsel %vm12813_vm9, %v11166_v46, %v7326_v52  ;;  %v11257_v5 = vcombine.low %v8380_v60, %v8383_v50  ;;  %v7330_v27 = vsel %vm12813_vm9, %v7328_v51, %v7329_v11  ;;  %v8240_v36 = vld [vmem:[#allocation2 + $0xb8] sm:$0xf]  ;;  %v8241_v31 = vld [vmem:[#allocation2 + $0xbc] sm:$0x1] }
 0x6ac   : > { %v9048_v38 = vrot.slane %v9046_v42, 4  ;;  %v9051_v63 = vrot.slane %v9049_v18, 5  ;;  %v11182_v40 = vcombine.low %v7327_v59, %v7330_v27  ;;  %v16408_v28 = vrot.slane %v9055_v24, 5  ;;  %v7171_v9 = vpop.permute.xlu1 %7170  ;;  %v16411_v23 = vld [vmem:[#allocation2 + $0x24] sm:$0xe] }
 0x6ad   : > { %v9044_v54 = vsel %vm12840_vm12, %v9039_v3, %v9043_v30  ;;  %v9059_v25 = vshrl.u32 %v8704_v57, 16  ;;  %8477 = vrot.lane.b32.xlu1 %v11257_v5, %s12671_s14  ;;  %v9065_v56 = vshll.u32 %v8705_v14, 16  ;;  %v11242_v35 = vrot.slane %v8236_v43, 9  ;;  %7212 = vst.msk [vmem:[#allocation3 + $0x118] sm:$0xff] %vm7204_vm0, %v7171_v9  ;;  %v7231_v41 = vld [vmem:[#allocation2 + $0x28] sm:$0xf]  ;;  %v16421_v52 = vpop.permute.xlu0 %7643 }
 0x6ae   : > { %v11290_v33 = vcombine.low %v9034_v47, %v9044_v54  ;;  %v9052_v53 = vor.u32 %v9051_v63, %v9048_v38  ;;  %7494 = vst.msk [vmem:[#allocation3 + $0x30] sm:$0xff] %vm5230_vm13, %v11182_v40  ;;  %v8386_v34 = vrot.slane %v8237_v7, 5  ;;  %v8389_v16 = vrot.slane %v8238_v48, 5  ;;  %v12316_v30 = vld [vmem:[%s17211_s9 + $0x108] sm:$0xff]   ;;  %v8242_v60 = vld [vmem:[#allocation2 + $0xc0] sm:$0xe] }
 0x6af   : > { %v9061_v26 = vrot.slane %v9059_v25, 4  ;;  %v11167_v15 = vrot.slane %v7227_v6, 9  ;;  %7670 = vst.msk [vmem:[#allocation3 + $0x30] sm:$0xff] %vm7204_vm0, %v16259_v8  ;;  %v9067_v58 = vrot.slane %v9065_v56, 5  ;;  %v7333_v32 = vrot.slane %v7228_v55, 5  ;;  %v12628_v48 = vld [vmem:[%s17211_s9 + $0x100] sm:$0xff]  }
 0x6b0   : > { %9167 = vrot.lane.b32.xlu0 %v11290_v33, %s12671_s14  ;;  %v9053_v19 = vrot.slane %v9052_v53, 4  ;;  %v7336_v29 = vrot.slane %v7229_v1, 5  ;;  %v9494_v4 = vld [vmem:[#allocation3 + $0x8] sm:$0xff]  ;;  %v8387_v57 = vsel %vm12813_vm9, %v11242_v35, %v8386_v34  ;;  %v8388_v39 = vrot.slane %v8386_v34, 4  ;;  %v16426_v0 = vld [vmem:[#allocation2 + $0x2c] sm:$0x1] }
 0x6b1   : > { %v9062_v11 = vor.u32 %v9061_v26, %v16408_v28  ;;  %9947 = vmatprep.mubr.bf16.mxu1 %v9494_v4  ;;  %v11243_v8 = vrot.slane %v8239_v13, 9  ;;  %v7334_v46 = vsel %vm12813_vm9, %v11167_v15, %v7333_v32  ;;  %v7335_v14 = vrot.slane %v7333_v32, 4  ;;  %v8243_v47 = vld [vmem:[#allocation2 + $0xc4] sm:$0xf]  ;;  %v16433_v51 = vld [vmem:[#allocation2 + $0xc8] sm:$0x1]  ;;  %v7173_v42 = vpop.permute.xlu1 %7172 }
 0x6b2   : > { %v9058_v20 = vsel %vm12840_vm12, %v9053_v19, %v16408_v28  ;;  %9948 = vmatmul.mubr.bf16.vlgmr.msra.gmra.mrb[16].mxu1 %v9493_v37  ;;  %v8393_v43 = vrot.slane %v8240_v36, 5  ;;  %v8390_v7 = vsel %vm12813_vm9, %v8388_v39, %v8389_v16  ;;  %v8396_v6 = vrot.slane %v8241_v31, 5  ;;  %v7233_v50 = vld [vmem:[#allocation2 + $0x30] sm:$0xe]  ;;  %7213 = vst.msk [vmem:[#allocation3 + $0x140] sm:$0xff] %vm7204_vm0, %v7173_v42  ;;  %v16457_v31 = vpop.permute.xlu0 %7645  ;;  %v9498_v37 = vld [vmem:[#allocation3 + $0x28] sm:$0xff] }
 0x6b3   : > { %v9063_v18 = vrot.slane %v9062_v11, 4  ;;  %11982 = vmatpush3.bf16.msra.mxu1 %v12628_v48  ;;  %v11168_v3 = vrot.slane %v16411_v23, 9  ;;  %v11258_v59 = vcombine.low %v8387_v57, %v8390_v7  ;;  %v7337_v24 = vsel %vm12813_vm9, %v7335_v14, %v7336_v29  ;;  %v7234_v5 = vld [vmem:[#allocation2 + $0x34] sm:$0xf]  ;;  %v16446_v27 = vld [vmem:[#allocation2 + $0x38] sm:$0x1] }
 0x6b4   : > { %v8394_v55 = vsel %vm12813_vm9, %v11243_v8, %v8393_v43  ;;  %v8395_v1 = vrot.slane %v8393_v43, 4  ;;  %11983 = vmatprep.subr.bf16.mxu1 %v12316_v30  ;;  %v12341_v38 = vld [vmem:[%s17211_s9 + $0x110] sm:$0xff]   ;;  %v11183_v13 = vcombine.low %v7334_v46, %v7337_v24  ;;  %v7340_v54 = vrot.slane %v7231_v41, 5  ;;  %v7236_v28 = vld [vmem:[#allocation2 + $0x3c] sm:$0xe] }
 0x6b5   : > { %v9068_v63 = vsel %vm12840_vm12, %v9063_v18, %v9067_v58  ;;  %v7343_v40 = vrot.slane %v16426_v0, 5  ;;  %v7237_v25 = vld [vmem:[#allocation2 + $0x40] sm:$0xf]  ;;  %8479 = vrot.lane.b32.xlu1 %v11258_v59, %s12671_s14  ;;  %v11244_v33 = vrot.slane %v8242_v60, 9  ;;  %v8400_v53 = vrot.slane %v8243_v47, 5  ;;  %v7175_v35 = vpop.permute.xlu1 %7174  ;;  %v12352_v8 = vld [vmem:[%s17211_s9 + $0x118] sm:$0xff]  }
 0x6b6   : > { %v11291_v36 = vcombine.low %v9058_v20, %v9068_v63  ;;  %v8397_v9 = vsel %vm12813_vm9, %v8395_v1, %v8396_v6  ;;  %v7238_v56 = vld [vmem:[#allocation2 + $0x44] sm:$0x1]  ;;  %7495 = vst.msk [vmem:[#allocation3 + $0x58] sm:$0xff] %vm5230_vm13, %v11183_v13  ;;  %v7341_v26 = vsel %vm12813_vm9, %v11168_v3, %v7340_v54  ;;  %v7342_v34 = vrot.slane %v7340_v54, 4  ;;  %v9499_v16 = vld [vmem:[#allocation3 + $0x30] sm:$0xff]  ;;  %v16493_v63 = vpop.permute.xlu0 %7647 }
 0x6b7   : > { %v11259_v23 = vcombine.low %v8394_v55, %v8397_v9  ;;  %v8403_v15 = vrot.slane %v16433_v51, 5  ;;  %v7239_v19 = vld [vmem:[#allocation2 + $0x48] sm:$0xe]  ;;  %v7240_v58 = vld [vmem:[#allocation2 + $0x4c] sm:$0xf]  ;;  %7214 = vst.msk [vmem:[#allocation3 + $0x168] sm:$0xff] %vm7204_vm0, %v7175_v35  ;;  %11984 = vmatpush3.bf16.msra.mxu1 %v12316_v30  ;;  %9955 = vmatprep.mubr.bf16.mxu1 %v9499_v16  ;;  %v8401_v29 = vsel %vm12813_vm9, %v11244_v33, %v8400_v53 }
 0x6b8   : > { %v16463_v32 = vld [vmem:[#allocation2 + $0x50] sm:$0x1]  ;;  %9169 = vrot.lane.b32.xlu0 %v11291_v36, %s12671_s14  ;;  %7671 = vst.msk [vmem:[#allocation3 + $0x58] sm:$0xff] %vm7204_vm0, %v16280_v12  ;;  %v8402_v4 = vrot.slane %v8400_v53, 4  ;;  %v11169_v41 = vrot.slane %v7233_v50, 9  ;;  %v7347_v11 = vrot.slane %v7234_v5, 5  ;;  %v7344_v30 = vsel %vm12813_vm9, %v7342_v34, %v7343_v40  ;;  %11985 = vmatprep.subr.bf16.mxu1 %v12341_v38 }
 0x6b9   : > { %v7242_v57 = vld [vmem:[#allocation2 + $0x54] sm:$0xe]  ;;  %v7243_v39 = vld [vmem:[#allocation2 + $0x58] sm:$0xf]  ;;  %v7350_v0 = vrot.slane %v16446_v27, 5  ;;  %v11170_v60 = vrot.slane %v7236_v28, 9  ;;  %8481 = vrot.lane.b32.xlu1 %v11259_v23, %s12671_s14  ;;  %v11184_v46 = vcombine.low %v7341_v26, %v7344_v30  ;;  %v7177_v18 = vpop.permute.xlu1 %7176 }
 0x6ba   : > { %v7354_v12 = vrot.slane %v7237_v25, 5  ;;  %v16477_v20 = vld [vmem:[#allocation2 + $0x5c] sm:$0x1]  ;;  %v8404_v14 = vsel %vm12813_vm9, %v8402_v4, %v8403_v15  ;;  %v7348_v43 = vsel %vm12813_vm9, %v11169_v41, %v7347_v11  ;;  %v7349_v47 = vrot.slane %v7347_v11, 4  ;;  %9956 = vmatmul.mubr.bf16.gmra.mrb[20].mxu1 %v9498_v37  ;;  %v7245_v51 = vld [vmem:[#allocation2 + $0x60] sm:$0xe] }
 0x6bb   : > { %v7246_v42 = vld [vmem:[#allocation2 + $0x64] sm:$0xf]  ;;  %v11260_v7 = vcombine.low %v8401_v29, %v8404_v14  ;;  %v7357_v3 = vrot.slane %v7238_v56, 5  ;;  %v16486_v50 = vld [vmem:[#allocation2 + $0x68] sm:$0x1]  ;;  %7215 = vst.msk [vmem:[#allocation3 + $0x190] sm:$0xff] %vm7204_vm0, %v7177_v18  ;;  %11986 = vmatpush3.bf16.msra.mxu1 %v12341_v38 }
 0x6bc   : > { %v7355_v48 = vsel %vm12813_vm9, %v11170_v60, %v7354_v12  ;;  %v7356_v6 = vrot.slane %v7354_v12, 4  ;;  %v7248_v59 = vld [vmem:[#allocation2 + $0x6c] sm:$0xe]  ;;  %7496 = vst.msk [vmem:[#allocation3 + $0x80] sm:$0xff] %vm5230_vm13, %v11184_v46  ;;  %v7351_v24 = vsel %vm12813_vm9, %v7349_v47, %v7350_v0  ;;  %v11171_v55 = vrot.slane %v7239_v19, 9  ;;  %11987 = vmatprep.subr.bf16.mxu1 %v12352_v8  ;;  %v12357_v13 = vld [vmem:[%s17213_s11] sm:$0xff]  }
 0x6bd   : > { %v7361_v1 = vrot.slane %v7240_v58, 5  ;;  %v7364_v5 = vrot.slane %v16463_v32, 5  ;;  %v7249_v27 = vld [vmem:[#allocation2 + $0x70] sm:$0xf]  ;;  %7672 = vst.msk [vmem:[#allocation3 + $0x80] sm:$0xff] %vm7204_vm0, %v16299_v44  ;;  %v11185_v38 = vcombine.low %v7348_v43, %v7351_v24  ;;  %v11172_v40 = vrot.slane %v7242_v57, 9  ;;  %8483 = vrot.lane.b32.xlu1 %v11260_v7, %s12671_s14  ;;  %v7179_v44 = vpop.permute.xlu1 %7178 }
 0x6be   : > { %v7358_v54 = vsel %vm12813_vm9, %v7356_v6, %v7357_v3  ;;  %v7368_v28 = vrot.slane %v7243_v39, 5  ;;  %v7250_v25 = vld [vmem:[#allocation2 + $0x74] sm:$0x1]  ;;  %v7371_v53 = vrot.slane %v16477_v20, 5  ;;  %v7251_v56 = vld [vmem:[#allocation2 + $0x78] sm:$0xe] }
 0x6bf   : > { %v11186_v36 = vcombine.low %v7355_v48, %v7358_v54  ;;  %v7362_v9 = vsel %vm12813_vm9, %v11171_v55, %v7361_v1  ;;  %v7363_v33 = vrot.slane %v7361_v1, 4  ;;  %v7252_v35 = vld [vmem:[#allocation2 + $0x7c] sm:$0xf]  ;;  %v16506_v23 = vld [vmem:[#allocation2 + $0x80] sm:$0x1]  ;;  %7497 = vst.msk [vmem:[#allocation3 + $0xa8] sm:$0xff] %vm5230_vm13, %v11185_v38  ;;  %11988 = vmatpush3.bf16.msra.mxu1 %v12352_v8 }
 0x6c0   : > { %v9504_v26 = vld [vmem:[#allocation3 + $0x58] sm:$0xff]  ;;  %v7369_v34 = vsel %vm12813_vm9, %v11172_v40, %v7368_v28  ;;  %v7370_v16 = vrot.slane %v7368_v28, 4  ;;  %v11173_v15 = vrot.slane %v7245_v51, 9  ;;  %v7375_v37 = vrot.slane %v7246_v42, 5  ;;  %v7254_v19 = vld [vmem:[#allocation2 + $0x84] sm:$0xe]  ;;  %12021 = vmatprep.subr.bf16.mxu1 %v12357_v13  ;;  %v16526_v51 = vpop.permute.xlu0 %7649 }
 0x6c1   : > { %v7255_v58 = vld [vmem:[#allocation2 + $0x88] sm:$0xf]  ;;  %7216 = vst.msk [vmem:[#allocation3 + $0x1b8] sm:$0xff] %vm7204_vm0, %v7179_v44  ;;  %7673 = vst.msk [vmem:[#allocation3 + $0xa8] sm:$0xff] %vm7204_vm0, %v16318_v49  ;;  %9963 = vmatprep.mubr.bf16.mxu1 %v9504_v26  ;;  %v7365_v32 = vsel %vm12813_vm9, %v7363_v33, %v7364_v5  ;;  %v7378_v29 = vrot.slane %v16486_v50, 5  ;;  %v11174_v4 = vrot.slane %v7248_v59, 9 }
 0x6c2   : > { %7498 = vst.msk [vmem:[#allocation3 + $0xd0] sm:$0xff] %vm5230_vm13, %v11186_v36  ;;  %v7382_v41 = vrot.slane %v7249_v27, 5  ;;  %v7256_v11 = vld [vmem:[#allocation2 + $0x8c] sm:$0x1]  ;;  %v11187_v57 = vcombine.low %v7362_v9, %v7365_v32  ;;  %v7372_v49 = vsel %vm12813_vm9, %v7370_v16, %v7371_v53  ;;  %v7376_v8 = vsel %vm12813_vm9, %v11173_v15, %v7375_v37  ;;  %v7257_v0 = vld [vmem:[#allocation2 + $0x90] sm:$0xe]  ;;  %v7181_v47 = vpop.permute.xlu1 %7180 }
 0x6c3   : > { %7674 = vst.msk [vmem:[#allocation3 + $0xd0] sm:$0xff] %vm7204_vm0, %v16334_v21  ;;  %v9503_v39 = vld [vmem:[#allocation3 + $0x50] sm:$0xff]  ;;  %v7377_v30 = vrot.slane %v7375_v37, 4  ;;  %v7258_v60 = vld [vmem:[#allocation2 + $0x94] sm:$0xf]  ;;  %v11188_v12 = vcombine.low %v7369_v34, %v7372_v49  ;;  %v7385_v14 = vrot.slane %v7250_v25, 5 }
 0x6c4   : > { %9964 = vmatmul.mubr.bf16.gmra.mrb[24].mxu1 %v9503_v39  ;;  %v7383_v20 = vsel %vm12813_vm9, %v11174_v4, %v7382_v41  ;;  %v7384_v46 = vrot.slane %v7382_v41, 4  ;;  %v7259_v43 = vld [vmem:[#allocation2 + $0x98] sm:$0x1]  ;;  %v7260_v21 = vld [vmem:[#allocation2 + $0x9c] sm:$0xe]  ;;  %7499 = vst.msk [vmem:[#allocation3 + $0xf8] sm:$0xff] %vm5230_vm13, %v11187_v57  ;;  %v16557_v37 = vpop.permute.xlu0 %7651 }
 0x6c5   : > { %v7379_v42 = vsel %vm12813_vm9, %v7377_v30, %v7378_v29  ;;  %v11175_v18 = vrot.slane %v7251_v56, 9  ;;  %v7389_v7 = vrot.slane %v7252_v35, 5  ;;  %v7392_v48 = vrot.slane %v16506_v23, 5  ;;  %v7261_v6 = vld [vmem:[#allocation2 + $0xa0] sm:$0xf]  ;;  %7217 = vst.msk [vmem:[#allocation3 + $0x1e0] sm:$0xff] %vm7204_vm0, %v7181_v47 }
 0x6c6   : > { %7675 = vst.msk [vmem:[#allocation3 + $0xf8] sm:$0xff] %vm7204_vm0, %v16344_v62  ;;  %v9509_v3 = vld [vmem:[#allocation3 + $0x80] sm:$0xff]  ;;  %v11189_v50 = vcombine.low %v7376_v8, %v7379_v42  ;;  %v7386_v59 = vsel %vm12813_vm9, %v7384_v46, %v7385_v14  ;;  %v11176_v24 = vrot.slane %v7254_v19, 9  ;;  %v7396_v55 = vrot.slane %v7255_v58, 5  ;;  %v7262_v1 = vld [vmem:[#allocation2 + $0xa4] sm:$0x1]  ;;  %v7183_v35 = vpop.permute.xlu1 %7182 }
 0x6c7   : > { %7500 = vst.msk [vmem:[#allocation3 + $0x120] sm:$0xff] %vm5230_vm13, %v11188_v12  ;;  %9971 = vmatprep.mubr.bf16.mxu1 %v9509_v3  ;;  %v11190_v5 = vcombine.low %v7383_v20, %v7386_v59  ;;  %v7390_v27 = vsel %vm12813_vm9, %v11175_v18, %v7389_v7  ;;  %v7391_v13 = vrot.slane %v7389_v7, 4  ;;  %v7399_v62 = vrot.slane %v7256_v11, 5  ;;  %v7263_v38 = vld [vmem:[#allocation2 + $0xa8] sm:$0xe]  ;;  %v9508_v44 = vld [vmem:[#allocation3 + $0x78] sm:$0xff] }
 0x6c8   : > { %7676 = vst.msk [vmem:[#allocation3 + $0x120] sm:$0xff] %vm7204_vm0, %v16359_v45  ;;  %v7264_v54 = vld [vmem:[#allocation2 + $0xac] sm:$0xf]  ;;  %v7397_v40 = vsel %vm12813_vm9, %v11176_v24, %v7396_v55  ;;  %v7398_v28 = vrot.slane %v7396_v55, 4  ;;  %v11177_v25 = vrot.slane %v7257_v0, 9  ;;  %v7403_v36 = vrot.slane %v7258_v60, 5 }
 0x6c9   : > { %7501 = vst.msk [vmem:[#allocation3 + $0x148] sm:$0xff] %vm5230_vm13, %v11189_v50  ;;  %v7265_v9 = vld [vmem:[#allocation2 + $0xb0] sm:$0x1]  ;;  %7502 = vst.msk [vmem:[#allocation3 + $0x170] sm:$0xff] %vm5230_vm13, %v11190_v5  ;;  %v7393_v45 = vsel %vm12813_vm9, %v7391_v13, %v7392_v48  ;;  %v7406_v33 = vrot.slane %v7259_v43, 5  ;;  %v11178_v53 = vrot.slane %v7260_v21, 9 }
 0x6ca   : > { %7677 = vst.msk [vmem:[#allocation3 + $0x148] sm:$0xff] %vm7204_vm0, %v16373_v61  ;;  %v7410_v56 = vrot.slane %v7261_v6, 5  ;;  %v7266_v23 = vld [vmem:[#allocation2 + $0xb4] sm:$0xe]  ;;  %7678 = vst.msk [vmem:[#allocation3 + $0x170] sm:$0xff] %vm7204_vm0, %v16387_v17  ;;  %v11191_v26 = vcombine.low %v7390_v27, %v7393_v45  ;;  %v7400_v34 = vsel %vm12813_vm9, %v7398_v28, %v7399_v62  ;;  %v7404_v61 = vsel %vm12813_vm9, %v11177_v25, %v7403_v36  ;;  %v9514_v4 = vld [vmem:[#allocation3 + $0xa8] sm:$0xff]  ;;  %v7185_v12 = vpop.permute.xlu1 %7184 }
 0x6cb   : > { %v7405_v16 = vrot.slane %v7403_v36, 4  ;;  %7218 = vst.msk [vmem:[#allocation3 + $0x208] sm:$0xff] %vm7204_vm0, %v7183_v35  ;;  %v7267_v15 = vld [vmem:[#allocation2 + $0xb8] sm:$0xf]  ;;  %v11192_v19 = vcombine.low %v7397_v40, %v7400_v34  ;;  %v7413_v29 = vrot.slane %v7262_v1, 5  ;;  %v11179_v11 = vrot.slane %v7263_v38, 9 }
 0x6cc   : > { %v7411_v58 = vsel %vm12813_vm9, %v11178_v53, %v7410_v56  ;;  %v7412_v32 = vrot.slane %v7410_v56, 4  ;;  %v7268_v17 = vld [vmem:[#allocation2 + $0xbc] sm:$0x1]  ;;  %9972 = vmatmul.mubr.bf16.gmra.mrb[28].mxu1 %v9508_v44  ;;  %7503 = vst.msk [vmem:[#allocation3 + $0x198] sm:$0xff] %vm5230_vm13, %v11191_v26  ;;  %v7417_v57 = vrot.slane %v7264_v54, 5  ;;  %v7420_v39 = vrot.slane %v7265_v9, 5 }
 0x6cd   : > { %v7407_v41 = vsel %vm12813_vm9, %v7405_v16, %v7406_v33  ;;  %v7685_v49 = vld [vmem:[#allocation2 + $0xc] sm:$0xf]  ;;  %9979 = vmatprep.mubr.bf16.mxu1 %v9514_v4  ;;  %7679 = vst.msk [vmem:[#allocation3 + $0x198] sm:$0xff] %vm7204_vm0, %v16398_v2  ;;  %v11180_v0 = vrot.slane %v7266_v23, 9  ;;  %v7424_v60 = vrot.slane %v7267_v15, 5  ;;  %v7427_v2 = vrot.slane %v7268_v17, 5 }
 0x6ce   : > { %7504 = vst.msk [vmem:[#allocation3 + $0x1c0] sm:$0xff] %vm5230_vm13, %v11192_v19  ;;  %v11193_v8 = vcombine.low %v7404_v61, %v7407_v41  ;;  %v7414_v30 = vsel %vm12813_vm9, %v7412_v32, %v7413_v29  ;;  %v7686_v20 = vld [vmem:[#allocation2 + $0x10] sm:$0xf]  ;;  %v7687_v46 = vld [vmem:[#allocation2 + $0x14] sm:$0x1]  ;;  %v7418_v43 = vsel %vm12813_vm9, %v11179_v11, %v7417_v57  ;;  %v7419_v21 = vrot.slane %v7417_v57, 4  ;;  %v9142_v6 = vpop.permute.xlu0 %9141 }
 0x6cf   : > { %7680 = vst.msk [vmem:[#allocation3 + $0x1c0] sm:$0xff] %vm7204_vm0, %v16421_v52  ;;  %v11194_v14 = vcombine.low %v7411_v58, %v7414_v30  ;;  %7219 = vst.msk [vmem:[#allocation3 + $0x230] sm:$0xff] %vm7204_vm0, %v7185_v12  ;;  %v7688_v47 = vld [vmem:[#allocation2 + $0x18] sm:$0xf]  ;;  %v7425_v42 = vsel %vm12813_vm9, %v11180_v0, %v7424_v60  ;;  %v7426_v18 = vrot.slane %v7424_v60, 4  ;;  %v7734_v7 = vshrl.u32 %v7685_v49, 16 }
 0x6d0   : > { %7505 = vst.msk [vmem:[#allocation3 + $0x1e8] sm:$0xff] %vm5230_vm13, %v11193_v8  ;;  %v7737_v48 = vshll.u32 %v7685_v49, 16  ;;  %v7421_v52 = vsel %vm12813_vm9, %v7419_v21, %v7420_v39  ;;  %v7743_v3 = vshll.u32 %v7686_v20, 16  ;;  %v7747_v50 = vshrl.u32 %v7686_v20, 16  ;;  %v7689_v24 = vld [vmem:[#allocation2 + $0x1c] sm:$0xf] }
 0x6d1   : > { %7681 = vst.msk [vmem:[#allocation3 + $0x1e8] sm:$0xff] %vm7204_vm0, %v16457_v31  ;;  %v7753_v59 = vshll.u32 %v7687_v46, 16  ;;  %v11195_v55 = vcombine.low %v7418_v43, %v7421_v52  ;;  %v7428_v1 = vsel %vm12813_vm9, %v7426_v18, %v7427_v2  ;;  %9189 = vst.msk [vmem:[#allocation3 + $0x18] sm:$0xff] %vm7204_vm0, %v9142_v6  ;;  %v7736_v31 = vrot.slane %v7734_v7, 4  ;;  %v7690_v27 = vld [vmem:[#allocation2 + $0x20] sm:$0x1]  ;;  %v7187_v53 = vpop.permute.xlu1 %7186 }
 0x6d2   : > { %7506 = vst.msk [vmem:[#allocation3 + $0x210] sm:$0xff] %vm5230_vm13, %v11194_v14  ;;  %v7739_v5 = vrot.slane %v7737_v48, 5  ;;  %v8706_v13 = vld [vmem:[#allocation2 + $0xcc] sm:$0xf]  ;;  %v11196_v62 = vcombine.low %v7425_v42, %v7428_v1  ;;  %v7745_v38 = vrot.slane %v7743_v3, 5  ;;  %v7749_v54 = vrot.slane %v7747_v50, 4 }
 0x6d3   : > { %7682 = vst.msk [vmem:[#allocation3 + $0x210] sm:$0xff] %vm7204_vm0, %v16493_v63  ;;  %v7755_v40 = vrot.slane %v7753_v59, 5  ;;  %v8707_v28 = vld [vmem:[#allocation2 + $0xd0] sm:$0xf]  ;;  %v9513_v25 = vld [vmem:[#allocation3 + $0xa0] sm:$0xff]  ;;  %v7758_v63 = vshrl.u32 %v7688_v47, 16 }
 0x6d4   : > { %7507 = vst.msk [vmem:[#allocation3 + $0x238] sm:$0xff] %vm5230_vm13, %v11195_v55  ;;  %v7740_v36 = vor.u32 %v7739_v5, %v7736_v31  ;;  %v7761_v9 = vshll.u32 %v7688_v47, 16  ;;  %v7767_v45 = vshll.u32 %v7689_v24, 16  ;;  %9980 = vmatmul.mubr.bf16.gmra.mrb[32].mxu1 %v9513_v25  ;;  %v9519_v33 = vld [vmem:[#allocation3 + $0xd0] sm:$0xff]  ;;  %7508 = vst.msk [vmem:[#allocation3 + $0x260] sm:$0xff] %vm5230_vm13, %v11196_v62  ;;  %v7750_v56 = vor.u32 %v7749_v54, %v7745_v38  ;;  %v9518_v60 = vld [vmem:[#allocation3 + $0xc8] sm:$0xff] }
 0x6d5   : > { %7683 = vst.msk [vmem:[#allocation3 + $0x238] sm:$0xff] %vm7204_vm0, %v16526_v51  ;;  %v7771_v35 = vshrl.u32 %v7689_v24, 16  ;;  %v7777_v23 = vshll.u32 %v7690_v27, 16  ;;  %v9070_v44 = vshrl.u32 %v8706_v13, 16  ;;  %9987 = vmatprep.mubr.bf16.mxu1 %v9519_v33  ;;  %7684 = vst.msk [vmem:[#allocation3 + $0x260] sm:$0xff] %vm7204_vm0, %v16557_v37  ;;  %v7760_v34 = vrot.slane %v7758_v63, 4  ;;  %v8454_v57 = vpop.permute.xlu1 %8453 }
 0x6d6   : > { %7220 = vst.msk [vmem:[#allocation3 + $0x258] sm:$0xff] %vm7204_vm0, %v7187_v53  ;;  %v7741_v26 = vrot.slane %v7740_v36, 4  ;;  %v7763_v61 = vrot.slane %v7761_v9, 5  ;;  %v7769_v16 = vrot.slane %v7767_v45, 5  ;;  %v8708_v15 = vld [vmem:[#allocation2 + $0xd4] sm:$0x1] }
 0x6d7   : > { %v7751_v19 = vrot.slane %v7750_v56, 4  ;;  %v7773_v51 = vrot.slane %v7771_v35, 4  ;;  %v7779_v58 = vrot.slane %v7777_v23, 5  ;;  %v9072_v32 = vrot.slane %v9070_v44, 4  ;;  %v7691_v11 = vld [vmem:[#allocation2 + $0x24] sm:$0xf]  ;;  %v9144_v43 = vpop.permute.xlu0 %9143 }
 0x6d8   : > { %v7746_v29 = vsel %vm12840_vm12, %v7741_v26, %v7745_v38  ;;  %v7764_v17 = vor.u32 %v7763_v61, %v7760_v34  ;;  %v9073_v4 = vshll.u32 %v8706_v13, 16  ;;  %v9079_v41 = vshll.u32 %v8707_v28, 16  ;;  %v9496_v39 = vld [vmem:[#allocation3 + $0x18] sm:$0xff]  ;;  %v7692_v0 = vld [vmem:[#allocation2 + $0x28] sm:$0xf]  ;;  %9190 = vst.msk [vmem:[#allocation3 + $0x40] sm:$0xff] %vm7204_vm0, %v9144_v43 }
 0x6d9   : > { %v7756_v37 = vsel %vm12840_vm12, %v7751_v19, %v7755_v40  ;;  %v7774_v49 = vor.u32 %v7773_v51, %v7769_v16  ;;  %v9083_v8 = vshrl.u32 %v8707_v28, 16  ;;  %v9089_v30 = vshll.u32 %v8708_v15, 16  ;;  %10108 = vmatprep.mubr.bf16.mxu0 %v9496_v39  ;;  %v7693_v48 = vld [vmem:[#allocation2 + $0x2c] sm:$0x1]  ;;  %v7694_v3 = vld [vmem:[#allocation2 + $0x30] sm:$0xf] }
 0x6da   : > { %v11213_v12 = vcombine.low %v7746_v29, %v7756_v37  ;;  %v7765_v20 = vrot.slane %v7764_v17, 4  ;;  %v9075_v46 = vrot.slane %v9073_v4, 5  ;;  %v9081_v14 = vrot.slane %v9079_v41, 5  ;;  %v9524_v50 = vld [vmem:[#allocation3 + $0xf8] sm:$0xff]  ;;  %v7696_v45 = vld [vmem:[#allocation2 + $0x38] sm:$0x1] }
 0x6db   : > { %v7775_v21 = vrot.slane %v7774_v49, 4  ;;  %v9085_v2 = vrot.slane %v9083_v8, 4  ;;  %v9091_v47 = vrot.slane %v9089_v30, 5  ;;  %v7782_v42 = vshrl.u32 %v7691_v11, 16  ;;  %v7695_v31 = vld [vmem:[#allocation2 + $0x34] sm:$0xf]  ;;  %v8456_v38 = vpop.permute.xlu1 %8455 }
 0x6dc   : > { %8181 = vst.msk [vmem:[#allocation3 + $0x10] sm:$0xff] %vm5230_vm13, %v11213_v12  ;;  %v7770_v18 = vsel %vm12840_vm12, %v7765_v20, %v7769_v16  ;;  %v9076_v7 = vor.u32 %v9075_v46, %v9072_v32  ;;  %v7785_v52 = vshll.u32 %v7691_v11, 16  ;;  %v7791_v6 = vshll.u32 %v7692_v0, 16  ;;  %9988 = vmatmul.mubr.bf16.gmra.mrb[36].mxu1 %v9518_v60  ;;  %v9146_v36 = vpop.permute.xlu0 %9145  ;;  %v7697_v56 = vld [vmem:[#allocation2 + $0x3c] sm:$0xf]  ;;  %v9523_v41 = vld [vmem:[#allocation3 + $0xf0] sm:$0xff] }
 0x6dd   : > { %8501 = vst.msk [vmem:[#allocation3 + $0x10] sm:$0xff] %vm7204_vm0, %v8454_v57  ;;  %v7780_v59 = vsel %vm12840_vm12, %v7775_v21, %v7779_v58  ;;  %v9086_v24 = vor.u32 %v9085_v2, %v9081_v14  ;;  %v7784_v55 = vrot.slane %v7782_v42, 4  ;;  %v7795_v1 = vshrl.u32 %v7692_v0, 16  ;;  %9995 = vmatprep.mubr.bf16.mxu1 %v9524_v50  ;;  %9191 = vst.msk [vmem:[#allocation3 + $0x68] sm:$0xff] %vm7204_vm0, %v9146_v36  ;;  %v7698_v34 = vld [vmem:[#allocation2 + $0x40] sm:$0xf] }
 0x6de   : > { %v11214_v5 = vcombine.low %v7770_v18, %v7780_v59  ;;  %v9077_v27 = vrot.slane %v9076_v7, 4  ;;  %v7787_v13 = vrot.slane %v7785_v52, 5  ;;  %v7793_v62 = vrot.slane %v7791_v6, 5  ;;  %v7699_v51 = vld [vmem:[#allocation2 + $0x44] sm:$0x1]  ;;  %v9529_v30 = vld [vmem:[#allocation3 + $0x120] sm:$0xff] }
 0x6df   : > { %v9087_v54 = vrot.slane %v9086_v24, 4  ;;  %v7797_v40 = vrot.slane %v7795_v1, 4  ;;  %v7801_v28 = vshll.u32 %v7693_v48, 16  ;;  %v7806_v25 = vshrl.u32 %v7694_v3, 16  ;;  %v7700_v4 = vld [vmem:[#allocation2 + $0x48] sm:$0xf] }
 0x6e0   : > { %8182 = vst.msk [vmem:[#allocation3 + $0x38] sm:$0xff] %vm5230_vm13, %v11214_v5  ;;  %v9082_v63 = vsel %vm12840_vm12, %v9077_v27, %v9081_v14  ;;  %v7788_v9 = vor.u32 %v7787_v13, %v7784_v55  ;;  %v7809_v33 = vshll.u32 %v7694_v3, 16  ;;  %v7815_v53 = vshll.u32 %v7695_v31, 16  ;;  %v7701_v8 = vld [vmem:[#allocation2 + $0x4c] sm:$0xf]  ;;  %v9501_v12 = vld [vmem:[#allocation3 + $0x40] sm:$0xff] }
 0x6e1   : > { %8502 = vst.msk [vmem:[#allocation3 + $0x38] sm:$0xff] %vm7204_vm0, %v8456_v38  ;;  %v9092_v35 = vsel %vm12840_vm12, %v9087_v54, %v9091_v47  ;;  %v7798_v23 = vor.u32 %v7797_v40, %v7793_v62  ;;  %v7803_v44 = vrot.slane %v7801_v28, 5  ;;  %v7808_v26 = vrot.slane %v7806_v25, 4  ;;  %v12359_v18 = vld [vmem:[#allocation2 + $0xcc] sm:$0xff]   ;;  %v7703_v1 = vld [vmem:[#allocation2 + $0x54] sm:$0xf] }
 0x6e2   : > { %v11292_v61 = vcombine.low %v9082_v63, %v9092_v35  ;;  %v7789_v16 = vrot.slane %v7788_v9, 4  ;;  %v7811_v15 = vrot.slane %v7809_v33, 5  ;;  %v16612_v19 = vrot.slane %v7815_v53, 5  ;;  %v8458_v60 = vpop.permute.xlu1 %8457  ;;  %v7702_v59 = vld [vmem:[#allocation2 + $0x50] sm:$0x1]  ;;  %8660 = vst.msk [vmem:[#allocation3 + $0x270] sm:$0xff] %vm5230_vm13, %v12359_v18 }
 0x6e3   : > { %v7799_v58 = vrot.slane %v7798_v23, 4  ;;  %v7819_v32 = vshrl.u32 %v7695_v31, 16  ;;  %v7825_v29 = vshll.u32 %v7696_v45, 16  ;;  %v7830_v17 = vshrl.u32 %v7697_v56, 16  ;;  %v9148_v43 = vpop.permute.xlu0 %9147  ;;  %v9528_v28 = vld [vmem:[#allocation3 + $0x118] sm:$0xff] }
 0x6e4   : > { %9171 = vrot.lane.b32.xlu0 %v11292_v61, %s12671_s14  ;;  %v7794_v11 = vsel %vm12840_vm12, %v7789_v16, %v7793_v62  ;;  %v9495_v37 = vld [vmem:[#allocation3 + $0x10] sm:$0xff]  ;;  %v7812_v57 = vor.u32 %v7811_v15, %v7808_v26  ;;  %v7833_v39 = vshll.u32 %v7697_v56, 16  ;;  %v7839_v49 = vshll.u32 %v7698_v34, 16  ;;  %9996 = vmatmul.mubr.bf16.gmra.mrb[40].mxu1 %v9523_v41  ;;  %9192 = vst.msk [vmem:[#allocation3 + $0x90] sm:$0xff] %vm7204_vm0, %v9148_v43  ;;  %v7704_v45 = vld [vmem:[#allocation2 + $0x58] sm:$0xf] }
 0x6e5   : > { %v7804_v0 = vsel %vm12840_vm12, %v7799_v58, %v7803_v44  ;;  %10109 = vmatmul.mubr.bf16.vlgmr.msra.gmra.mrb[88].mxu0 %v9495_v37  ;;  %v7821_v20 = vrot.slane %v7819_v32, 4  ;;  %v7827_v46 = vrot.slane %v7825_v29, 5  ;;  %v7832_v14 = vrot.slane %v7830_v17, 4  ;;  %10003 = vmatprep.mubr.bf16.mxu1 %v9529_v30  ;;  %v7706_v61 = vld [vmem:[#allocation2 + $0x60] sm:$0xf] }
 0x6e6   : > { %v11215_v21 = vcombine.low %v7794_v11, %v7804_v0  ;;  %10116 = vmatprep.mubr.bf16.mxu0 %v9501_v12  ;;  %v7813_v2 = vrot.slane %v7812_v57, 4  ;;  %v7835_v47 = vrot.slane %v7833_v39, 5  ;;  %v7841_v42 = vrot.slane %v7839_v49, 5  ;;  %v9534_v16 = vld [vmem:[#allocation3 + $0x148] sm:$0xff]  ;;  %v7708_v12 = vld [vmem:[#allocation2 + $0x68] sm:$0x1] }
 0x6e7   : > { %v7822_v7 = vor.u32 %v7821_v20, %v16612_v19  ;;  %v7843_v48 = vshrl.u32 %v7698_v34, 16  ;;  %v7849_v52 = vshll.u32 %v7699_v51, 16  ;;  %v7854_v6 = vshrl.u32 %v7700_v4, 16  ;;  %v7705_v34 = vld [vmem:[#allocation2 + $0x5c] sm:$0x1] }
 0x6e8   : > { %8183 = vst.msk [vmem:[#allocation3 + $0x60] sm:$0xff] %vm5230_vm13, %v11215_v21  ;;  %v7818_v3 = vsel %vm12840_vm12, %v7813_v2, %v16612_v19  ;;  %v7836_v50 = vor.u32 %v7835_v47, %v7832_v14  ;;  %v7857_v24 = vshll.u32 %v7700_v4, 16  ;;  %v7863_v55 = vshll.u32 %v7701_v8, 16  ;;  %v8460_v36 = vpop.permute.xlu1 %8459  ;;  %v9150_v53 = vpop.permute.xlu0 %9149  ;;  %v9500_v23 = vld [vmem:[#allocation3 + $0x38] sm:$0xff]  ;;  %v9506_v19 = vld [vmem:[#allocation3 + $0x68] sm:$0xff] }
 0x6e9   : > { %8503 = vst.msk [vmem:[#allocation3 + $0x60] sm:$0xff] %vm7204_vm0, %v8458_v60  ;;  %v7823_v31 = vrot.slane %v7822_v7, 4  ;;  %v7845_v5 = vrot.slane %v7843_v48, 4  ;;  %v7851_v27 = vrot.slane %v7849_v52, 5  ;;  %v7856_v13 = vrot.slane %v7854_v6, 4  ;;  %9193 = vst.msk [vmem:[#allocation3 + $0xb8] sm:$0xff] %vm7204_vm0, %v9150_v53 }
 0x6ea   : > { %v7837_v62 = vrot.slane %v7836_v50, 4  ;;  %v7859_v38 = vrot.slane %v7857_v24, 5  ;;  %v7865_v54 = vrot.slane %v7863_v55, 5  ;;  %v7867_v40 = vshrl.u32 %v7701_v8, 16  ;;  %v7707_v39 = vld [vmem:[#allocation2 + $0x64] sm:$0xf] }
 0x6eb   : > { %v7828_v25 = vsel %vm12840_vm12, %v7823_v31, %v7827_v46  ;;  %v7846_v63 = vor.u32 %v7845_v5, %v7841_v42  ;;  %v7873_v9 = vshll.u32 %v7702_v59, 16  ;;  %v7878_v33 = vshrl.u32 %v7703_v1, 16  ;;  %v7709_v2 = vld [vmem:[#allocation2 + $0x6c] sm:$0xf]  ;;  %v7710_v59 = vld [vmem:[#allocation2 + $0x70] sm:$0xf] }
 0x6ec   : > { %v11216_v56 = vcombine.low %v7818_v3, %v7828_v25  ;;  %v7842_v35 = vsel %vm12840_vm12, %v7837_v62, %v7841_v42  ;;  %v7860_v44 = vor.u32 %v7859_v38, %v7856_v13  ;;  %v7869_v26 = vrot.slane %v7867_v40, 4  ;;  %10004 = vmatmul.mubr.bf16.gmra.mrb[44].mxu1 %v9528_v28  ;;  %v7711_v24 = vld [vmem:[#allocation2 + $0x74] sm:$0x1]  ;;  %v9533_v55 = vld [vmem:[#allocation3 + $0x140] sm:$0xff]  ;;  %v9539_v62 = vld [vmem:[#allocation3 + $0x170] sm:$0xff] }
 0x6ed   : > { %v7847_v15 = vrot.slane %v7846_v63, 4  ;;  %10117 = vmatmul.mubr.bf16.gmra.mrb[92].mxu0 %v9500_v23  ;;  %v7875_v51 = vrot.slane %v7873_v9, 5  ;;  %v7880_v58 = vrot.slane %v7878_v33, 4  ;;  %v7881_v32 = vshll.u32 %v7703_v1, 16  ;;  %10011 = vmatprep.mubr.bf16.mxu1 %v9534_v16  ;;  %v9511_v40 = vld [vmem:[#allocation3 + $0x90] sm:$0xff] }
 0x6ee   : > { %8184 = vst.msk [vmem:[#allocation3 + $0x88] sm:$0xff] %vm5230_vm13, %v11216_v56  ;;  %10124 = vmatprep.mubr.bf16.mxu0 %v9506_v19  ;;  %v7861_v29 = vrot.slane %v7860_v44, 4  ;;  %v7870_v17 = vor.u32 %v7869_v26, %v7865_v54  ;;  %v7887_v4 = vshll.u32 %v7704_v45, 16  ;;  %v7891_v41 = vshrl.u32 %v7704_v45, 16  ;;  %v8462_v20 = vpop.permute.xlu1 %8461  ;;  %v9152_v47 = vpop.permute.xlu0 %9151  ;;  %v7712_v33 = vld [vmem:[#allocation2 + $0x78] sm:$0xf] }
 0x6ef   : > { %8504 = vst.msk [vmem:[#allocation3 + $0x88] sm:$0xff] %vm7204_vm0, %v8460_v36  ;;  %v7852_v11 = vsel %vm12840_vm12, %v7847_v15, %v7851_v27  ;;  %v7883_v37 = vrot.slane %v7881_v32, 5  ;;  %v7897_v57 = vshll.u32 %v7705_v34, 16  ;;  %v7902_v49 = vshrl.u32 %v7706_v61, 16  ;;  %9194 = vst.msk [vmem:[#allocation3 + $0xe0] sm:$0xff] %vm7204_vm0, %v9152_v47 }
 0x6f0   : > { %v11217_v8 = vcombine.low %v7842_v35, %v7852_v11  ;;  %v7866_v30 = vsel %vm12840_vm12, %v7861_v29, %v7865_v54  ;;  %v7871_v0 = vrot.slane %v7870_v17, 4  ;;  %v7889_v60 = vrot.slane %v7887_v4, 5  ;;  %v9505_v1 = vld [vmem:[#allocation3 + $0x60] sm:$0xff]  ;;  %v7714_v29 = vld [vmem:[#allocation2 + $0x80] sm:$0x1] }
 0x6f1   : > { %v7884_v46 = vor.u32 %v7883_v37, %v7880_v58  ;;  %v7893_v14 = vrot.slane %v7891_v41, 4  ;;  %v7899_v43 = vrot.slane %v7897_v57, 5  ;;  %v7904_v21 = vrot.slane %v7902_v49, 4  ;;  %v7713_v26 = vld [vmem:[#allocation2 + $0x7c] sm:$0xf] }
 0x6f2   : > { %8185 = vst.msk [vmem:[#allocation3 + $0xb0] sm:$0xff] %vm5230_vm13, %v11217_v8  ;;  %v7876_v42 = vsel %vm12840_vm12, %v7871_v0, %v7875_v51  ;;  %v7905_v18 = vshll.u32 %v7706_v61, 16  ;;  %v7911_v7 = vshll.u32 %v7707_v39, 16  ;;  %v7915_v48 = vshrl.u32 %v7707_v39, 16  ;;  %v7715_v57 = vld [vmem:[#allocation2 + $0x84] sm:$0xf] }
 0x6f3   : > { %8505 = vst.msk [vmem:[#allocation3 + $0xb0] sm:$0xff] %vm7204_vm0, %v8462_v20  ;;  %v11218_v52 = vcombine.low %v7866_v30, %v7876_v42  ;;  %v7885_v6 = vrot.slane %v7884_v46, 4  ;;  %v7894_v3 = vor.u32 %v7893_v14, %v7889_v60  ;;  %v7921_v50 = vshll.u32 %v7708_v12, 16  ;;  %v9538_v39 = vld [vmem:[#allocation3 + $0x168] sm:$0xff]  ;;  %v9544_v12 = vld [vmem:[#allocation3 + $0x198] sm:$0xff] }
 0x6f4   : > { %v7907_v31 = vrot.slane %v7905_v18, 5  ;;  %v7913_v5 = vrot.slane %v7911_v7, 5  ;;  %v7917_v27 = vrot.slane %v7915_v48, 4  ;;  %v7926_v13 = vshrl.u32 %v7709_v2, 16  ;;  %10012 = vmatmul.mubr.bf16.gmra.mrb[48].mxu1 %v9533_v55  ;;  %v8464_v53 = vpop.permute.xlu1 %8463  ;;  %v9154_v34 = vpop.permute.xlu0 %9153  ;;  %v9516_v18 = vld [vmem:[#allocation3 + $0xb8] sm:$0xff] }
 0x6f5   : > { %8186 = vst.msk [vmem:[#allocation3 + $0xd8] sm:$0xff] %vm5230_vm13, %v11218_v52  ;;  %v7890_v38 = vsel %vm12840_vm12, %v7885_v6, %v7889_v60  ;;  %v7895_v54 = vrot.slane %v7894_v3, 4  ;;  %10125 = vmatmul.mubr.bf16.gmra.mrb[96].mxu0 %v9505_v1  ;;  %v7923_v28 = vrot.slane %v7921_v50, 5  ;;  %v7929_v25 = vshll.u32 %v7709_v2, 16  ;;  %10019 = vmatprep.mubr.bf16.mxu1 %v9539_v62  ;;  %v7716_v60 = vld [vmem:[#allocation2 + $0x88] sm:$0xf] }
 0x6f6   : > { %10132 = vmatprep.mubr.bf16.mxu0 %v9511_v40  ;;  %v7908_v36 = vor.u32 %v7907_v31, %v7904_v21  ;;  %v7918_v63 = vor.u32 %v7917_v27, %v7913_v5  ;;  %v7928_v9 = vrot.slane %v7926_v13, 4  ;;  %v7935_v45 = vshll.u32 %v7710_v59, 16  ;;  %8506 = vst.msk [vmem:[#allocation3 + $0xd8] sm:$0xff] %vm7204_vm0, %v8464_v53  ;;  %9195 = vst.msk [vmem:[#allocation3 + $0x108] sm:$0xff] %vm7204_vm0, %v9154_v34  ;;  %v9510_v20 = vld [vmem:[#allocation3 + $0x88] sm:$0xff] }
 0x6f7   : > { %v7900_v56 = vsel %vm12840_vm12, %v7895_v54, %v7899_v43  ;;  %v7931_v35 = vrot.slane %v7929_v25, 5  ;;  %v7939_v23 = vshrl.u32 %v7710_v59, 16  ;;  %v7945_v44 = vshll.u32 %v7711_v24, 16  ;;  %v7717_v7 = vld [vmem:[#allocation2 + $0x8c] sm:$0x1] }
 0x6f8   : > { %v11219_v61 = vcombine.low %v7890_v38, %v7900_v56  ;;  %v7909_v16 = vrot.slane %v7908_v36, 4  ;;  %v7919_v15 = vrot.slane %v7918_v63, 4  ;;  %v7937_v19 = vrot.slane %v7935_v45, 5  ;;  %v7718_v55 = vld [vmem:[#allocation2 + $0x90] sm:$0xf] }
 0x6f9   : > { %v7932_v51 = vor.u32 %v7931_v35, %v7928_v9  ;;  %v7941_v58 = vrot.slane %v7939_v23, 4  ;;  %v7947_v32 = vrot.slane %v7945_v44, 5  ;;  %v7950_v17 = vshrl.u32 %v7712_v33, 16  ;;  %v7719_v13 = vld [vmem:[#allocation2 + $0x94] sm:$0xf]  ;;  %v9543_v35 = vld [vmem:[#allocation3 + $0x190] sm:$0xff] }
 0x6fa   : > { %8187 = vst.msk [vmem:[#allocation3 + $0x100] sm:$0xff] %vm5230_vm13, %v11219_v61  ;;  %v7914_v4 = vsel %vm12840_vm12, %v7909_v16, %v7913_v5  ;;  %v7924_v41 = vsel %vm12840_vm12, %v7919_v15, %v7923_v28  ;;  %v7953_v11 = vshll.u32 %v7712_v33, 16  ;;  %v7959_v37 = vshll.u32 %v7713_v26, 16  ;;  %v8466_v2 = vpop.permute.xlu1 %8465  ;;  %v9156_v6 = vpop.permute.xlu0 %9155  ;;  %v7720_v33 = vld [vmem:[#allocation2 + $0x98] sm:$0x1] }
 0x6fb   : > { %v11220_v49 = vcombine.low %v7914_v4, %v7924_v41  ;;  %v7933_v8 = vrot.slane %v7932_v51, 4  ;;  %v7942_v30 = vor.u32 %v7941_v58, %v7937_v19  ;;  %v7952_v0 = vrot.slane %v7950_v17, 4  ;;  %8507 = vst.msk [vmem:[#allocation3 + $0x100] sm:$0xff] %vm7204_vm0, %v8466_v2  ;;  %9196 = vst.msk [vmem:[#allocation3 + $0x130] sm:$0xff] %vm7204_vm0, %v9156_v6  ;;  %v7721_v16 = vld [vmem:[#allocation2 + $0x9c] sm:$0xf] }
 0x6fc   : > { %v7955_v46 = vrot.slane %v7953_v11, 5  ;;  %v7961_v14 = vrot.slane %v7959_v37, 5  ;;  %v7963_v43 = vshrl.u32 %v7713_v26, 16  ;;  %v7969_v21 = vshll.u32 %v7714_v29, 16  ;;  %10020 = vmatmul.mubr.bf16.gmra.mrb[52].mxu1 %v9538_v39  ;;  %v9515_v51 = vld [vmem:[#allocation3 + $0xb0] sm:$0xff]  ;;  %v9549_v4 = vld [vmem:[#allocation3 + $0x1c0] sm:$0xff] }
 0x6fd   : > { %8188 = vst.msk [vmem:[#allocation3 + $0x128] sm:$0xff] %vm5230_vm13, %v11220_v49  ;;  %v7938_v47 = vsel %vm12840_vm12, %v7933_v8, %v7937_v19  ;;  %v7943_v42 = vrot.slane %v7942_v30, 4  ;;  %10133 = vmatmul.mubr.bf16.gmra.mrb[100].mxu0 %v9510_v20  ;;  %v7974_v48 = vshrl.u32 %v7715_v57, 16  ;;  %v7977_v52 = vshll.u32 %v7715_v57, 16  ;;  %10027 = vmatprep.mubr.bf16.mxu1 %v9544_v12  ;;  %v7722_v17 = vld [vmem:[#allocation2 + $0xa0] sm:$0xf] }
 0x6fe   : > { %10140 = vmatprep.mubr.bf16.mxu0 %v9516_v18  ;;  %v7956_v3 = vor.u32 %v7955_v46, %v7952_v0  ;;  %v7965_v50 = vrot.slane %v7963_v43, 4  ;;  %v7971_v59 = vrot.slane %v7969_v21, 5  ;;  %v7983_v24 = vshll.u32 %v7716_v60, 16  ;;  %v9521_v57 = vld [vmem:[#allocation3 + $0xe0] sm:$0xff]  ;;  %v7723_v30 = vld [vmem:[#allocation2 + $0xa4] sm:$0x1] }
 0x6ff   : > { %v7948_v1 = vsel %vm12840_vm12, %v7943_v42, %v7947_v32  ;;  %v7976_v31 = vrot.slane %v7974_v48, 4  ;;  %v7979_v5 = vrot.slane %v7977_v52, 5  ;;  %v7987_v27 = vshrl.u32 %v7716_v60, 16  ;;  %v7724_v43 = vld [vmem:[#allocation2 + $0xa8] sm:$0xf] }
 0x700   : > { %v11221_v62 = vcombine.low %v7938_v47, %v7948_v1  ;;  %v7957_v38 = vrot.slane %v7956_v3, 4  ;;  %v7966_v54 = vor.u32 %v7965_v50, %v7961_v14  ;;  %v7985_v40 = vrot.slane %v7983_v24, 5  ;;  %v8468_v23 = vpop.permute.xlu1 %8467  ;;  %v9158_v15 = vpop.permute.xlu0 %9157  ;;  %v7725_v18 = vld [vmem:[#allocation2 + $0xac] sm:$0xf]  ;;  %v9548_v50 = vld [vmem:[#allocation3 + $0x1b8] sm:$0xff] }
 0x701   : > { %v7980_v28 = vor.u32 %v7979_v5, %v7976_v31  ;;  %v7989_v25 = vrot.slane %v7987_v27, 4  ;;  %v7993_v36 = vshll.u32 %v7717_v7, 16  ;;  %v7998_v63 = vshrl.u32 %v7718_v55, 16  ;;  %8508 = vst.msk [vmem:[#allocation3 + $0x128] sm:$0xff] %vm7204_vm0, %v8468_v23  ;;  %9197 = vst.msk [vmem:[#allocation3 + $0x158] sm:$0xff] %vm7204_vm0, %v9158_v15 }
 0x702   : > { %8189 = vst.msk [vmem:[#allocation3 + $0x150] sm:$0xff] %vm5230_vm13, %v11221_v62  ;;  %v7962_v9 = vsel %vm12840_vm12, %v7957_v38, %v7961_v14  ;;  %v7967_v45 = vrot.slane %v7966_v54, 4  ;;  %v8001_v53 = vshll.u32 %v7718_v55, 16  ;;  %v8007_v56 = vshll.u32 %v7719_v13, 16  ;;  %v7726_v62 = vld [vmem:[#allocation2 + $0xb0] sm:$0x1] }
 0x703   : > { %v7981_v44 = vrot.slane %v7980_v28, 4  ;;  %v7990_v26 = vor.u32 %v7989_v25, %v7985_v40  ;;  %v7995_v34 = vrot.slane %v7993_v36, 5  ;;  %v8000_v61 = vrot.slane %v7998_v63, 4  ;;  %v7727_v54 = vld [vmem:[#allocation2 + $0xb4] sm:$0xf] }
 0x704   : > { %v7972_v19 = vsel %vm12840_vm12, %v7967_v45, %v7971_v59  ;;  %v8003_v58 = vrot.slane %v8001_v53, 5  ;;  %v8009_v32 = vrot.slane %v8007_v56, 5  ;;  %v8011_v29 = vshrl.u32 %v7719_v13, 16  ;;  %10028 = vmatmul.mubr.bf16.gmra.mrb[56].mxu1 %v9543_v35  ;;  %v9520_v28 = vld [vmem:[#allocation3 + $0xd8] sm:$0xff]  ;;  %v9554_v45 = vld [vmem:[#allocation3 + $0x1e8] sm:$0xff] }
 0x705   : > { %v11222_v41 = vcombine.low %v7962_v9, %v7972_v19  ;;  %v7986_v11 = vsel %vm12840_vm12, %v7981_v44, %v7985_v40  ;;  %v7991_v37 = vrot.slane %v7990_v26, 4  ;;  %10141 = vmatmul.mubr.bf16.gmra.mrb[104].mxu0 %v9515_v51  ;;  %v8017_v39 = vshll.u32 %v7720_v33, 16  ;;  %10035 = vmatprep.mubr.bf16.mxu1 %v9549_v4  ;;  %v7728_v9 = vld [vmem:[#allocation2 + $0xb8] sm:$0xf]  ;;  %v9526_v35 = vld [vmem:[#allocation3 + $0x108] sm:$0xff] }
 0x706   : > { %10148 = vmatprep.mubr.bf16.mxu0 %v9521_v57  ;;  %v8004_v49 = vor.u32 %v8003_v58, %v8000_v61  ;;  %v8013_v8 = vrot.slane %v8011_v29, 4  ;;  %v8022_v0 = vshrl.u32 %v7721_v16, 16  ;;  %v8025_v60 = vshll.u32 %v7721_v16, 16  ;;  %v8470_v7 = vpop.permute.xlu1 %8469  ;;  %v9160_v59 = vpop.permute.xlu0 %9159  ;;  %v7729_v51 = vld [vmem:[#allocation2 + $0xbc] sm:$0x1] }
 0x707   : > { %8190 = vst.msk [vmem:[#allocation3 + $0x178] sm:$0xff] %vm5230_vm13, %v11222_v41  ;;  %v7996_v12 = vsel %vm12840_vm12, %v7991_v37, %v7995_v34  ;;  %v8019_v20 = vrot.slane %v8017_v39, 5  ;;  %v8031_v46 = vshll.u32 %v7722_v17, 16  ;;  %v8035_v14 = vshrl.u32 %v7722_v17, 16  ;;  %v7730_v29 = vld [vmem:[#allocation2 + $0xc0] sm:$0xf] }
 0x708   : > { %v11223_v21 = vcombine.low %v7986_v11, %v7996_v12  ;;  %v8005_v2 = vrot.slane %v8004_v49, 4  ;;  %v8014_v47 = vor.u32 %v8013_v8, %v8009_v32  ;;  %v8024_v42 = vrot.slane %v8022_v0, 4  ;;  %8509 = vst.msk [vmem:[#allocation3 + $0x150] sm:$0xff] %vm7204_vm0, %v8470_v7  ;;  %9198 = vst.msk [vmem:[#allocation3 + $0x180] sm:$0xff] %vm7204_vm0, %v9160_v59  ;;  %v7731_v57 = vld [vmem:[#allocation2 + $0xc4] sm:$0xf] }
 0x709   : > { %v8027_v48 = vrot.slane %v8025_v60, 5  ;;  %v8033_v52 = vrot.slane %v8031_v46, 5  ;;  %v8037_v6 = vrot.slane %v8035_v14, 4  ;;  %v8041_v3 = vshll.u32 %v7723_v30, 16  ;;  %v9553_v14 = vld [vmem:[#allocation3 + $0x1e0] sm:$0xff] }
 0x70a   : > { %8191 = vst.msk [vmem:[#allocation3 + $0x1a0] sm:$0xff] %vm5230_vm13, %v11223_v21  ;;  %v8010_v24 = vsel %vm12840_vm12, %v8005_v2, %v8009_v32  ;;  %v8015_v55 = vrot.slane %v8014_v47, 4  ;;  %v8046_v1 = vshrl.u32 %v7724_v43, 16  ;;  %v8049_v31 = vshll.u32 %v7724_v43, 16 }
 0x70b   : > { %v8028_v5 = vor.u32 %v8027_v48, %v8024_v42  ;;  %v8038_v27 = vor.u32 %v8037_v6, %v8033_v52  ;;  %v8043_v13 = vrot.slane %v8041_v3, 5  ;;  %v8055_v38 = vshll.u32 %v7725_v18, 16  ;;  %v9205_v42 = vld [vmem:[#allocation2 + $0x18] sm:$0xe]  ;;  %v9206_v3 = vld [vmem:[#allocation2 + $0x1c] sm:$0xf] }
 0x70c   : > { %v8020_v40 = vsel %vm12840_vm12, %v8015_v55, %v8019_v20  ;;  %v8048_v25 = vrot.slane %v8046_v1, 4  ;;  %v8051_v36 = vrot.slane %v8049_v31, 5  ;;  %v8059_v63 = vshrl.u32 %v7725_v18, 16  ;;  %10036 = vmatmul.mubr.bf16.gmra.mrb[60].mxu1 %v9548_v50  ;;  %v8472_v16 = vpop.permute.xlu1 %8471  ;;  %v9162_v17 = vpop.permute.xlu0 %9161  ;;  %v7732_v20 = vld [vmem:[#allocation2 + $0xc8] sm:$0x1]  ;;  %v9525_v48 = vld [vmem:[#allocation3 + $0x100] sm:$0xff] }
 0x70d   : > { %v11224_v33 = vcombine.low %v8010_v24, %v8020_v40  ;;  %v8029_v53 = vrot.slane %v8028_v5, 4  ;;  %v8039_v56 = vrot.slane %v8038_v27, 4  ;;  %10149 = vmatmul.mubr.bf16.gmra.mrb[108].mxu0 %v9520_v28  ;;  %v8057_v23 = vrot.slane %v8055_v38, 5  ;;  %10043 = vmatprep.mubr.bf16.mxu1 %v9554_v45  ;;  %8510 = vst.msk [vmem:[#allocation3 + $0x178] sm:$0xff] %vm7204_vm0, %v8472_v16  ;;  %9199 = vst.msk [vmem:[#allocation3 + $0x1a8] sm:$0xff] %vm7204_vm0, %v9162_v17  ;;  %v9559_v50 = vld [vmem:[#allocation3 + $0x210] sm:$0xff] }
 0x70e   : > { %10156 = vmatprep.mubr.bf16.mxu0 %v9526_v35  ;;  %v8052_v44 = vor.u32 %v8051_v36, %v8048_v25  ;;  %v8061_v26 = vrot.slane %v8059_v63, 4  ;;  %v8065_v34 = vshll.u32 %v7726_v62, 16  ;;  %v8070_v61 = vshrl.u32 %v7727_v54, 16  ;;  %v9531_v31 = vld [vmem:[#allocation3 + $0x130] sm:$0xff]  ;;  %v9207_v27 = vld [vmem:[#allocation2 + $0x20] sm:$0x1] }
 0x70f   : > { %8192 = vst.msk [vmem:[#allocation3 + $0x1c8] sm:$0xff] %vm5230_vm13, %v11224_v33  ;;  %v8034_v15 = vsel %vm12840_vm12, %v8029_v53, %v8033_v52  ;;  %v8044_v19 = vsel %vm12840_vm12, %v8039_v56, %v8043_v13  ;;  %v8073_v58 = vshll.u32 %v7727_v54, 16  ;;  %v8079_v32 = vshll.u32 %v7728_v9, 16  ;;  %v9208_v28 = vld [vmem:[#allocation2 + $0x24] sm:$0xe] }
 0x710   : > { %v11225_v4 = vcombine.low %v8034_v15, %v8044_v19  ;;  %v8053_v41 = vrot.slane %v8052_v44, 4  ;;  %v8062_v11 = vor.u32 %v8061_v26, %v8057_v23  ;;  %v8067_v37 = vrot.slane %v8065_v34, 5  ;;  %v9209_v45 = vld [vmem:[#allocation2 + $0x28] sm:$0xf]  ;;  %v9210_v33 = vld [vmem:[#allocation2 + $0x2c] sm:$0x1] }
 0x711   : > { %v8072_v39 = vrot.slane %v8070_v61, 4  ;;  %v8075_v49 = vrot.slane %v8073_v58, 5  ;;  %v8081_v8 = vrot.slane %v8079_v32, 5  ;;  %v8083_v30 = vshrl.u32 %v7728_v9, 16  ;;  %v9212_v44 = vld [vmem:[#allocation2 + $0x34] sm:$0xf] }
 0x712   : > { %8193 = vst.msk [vmem:[#allocation3 + $0x1f0] sm:$0xff] %vm5230_vm13, %v11225_v4  ;;  %v8058_v0 = vsel %vm12840_vm12, %v8053_v41, %v8057_v23  ;;  %v8063_v60 = vrot.slane %v8062_v11, 4  ;;  %v8089_v12 = vshll.u32 %v7729_v51, 16  ;;  %v8094_v46 = vshrl.u32 %v7730_v29, 16  ;;  %v8474_v59 = vpop.permute.xlu1 %8473  ;;  %v9164_v13 = vpop.permute.xlu0 %9163  ;;  %v9211_v23 = vld [vmem:[#allocation2 + $0x30] sm:$0xe] }
 0x713   : > { %v8076_v43 = vor.u32 %v8075_v49, %v8072_v39  ;;  %v8085_v21 = vrot.slane %v8083_v30, 4  ;;  %v8097_v2 = vshll.u32 %v7730_v29, 16  ;;  %v8103_v47 = vshll.u32 %v7731_v57, 16  ;;  %8511 = vst.msk [vmem:[#allocation3 + $0x1a0] sm:$0xff] %vm7204_vm0, %v8474_v59  ;;  %9200 = vst.msk [vmem:[#allocation3 + $0x1d0] sm:$0xff] %vm7204_vm0, %v9164_v13 }
 0x714   : > { %v8068_v18 = vsel %vm12840_vm12, %v8063_v60, %v8067_v37  ;;  %v8091_v7 = vrot.slane %v8089_v12, 5  ;;  %v8096_v52 = vrot.slane %v8094_v46, 4  ;;  %v8107_v6 = vshrl.u32 %v7731_v57, 16  ;;  %10044 = vmatmul.mubr.bf16.gmra.mrb[64].mxu1 %v9553_v14  ;;  %v9213_v15 = vld [vmem:[#allocation2 + $0x38] sm:$0x1] }
 0x715   : > { %v11226_v24 = vcombine.low %v8058_v0, %v8068_v18  ;;  %v8077_v55 = vrot.slane %v8076_v43, 4  ;;  %v8086_v1 = vor.u32 %v8085_v21, %v8081_v8  ;;  %10157 = vmatmul.mubr.bf16.gmra.mrb[112].mxu0 %v9525_v48  ;;  %v8099_v5 = vrot.slane %v8097_v2, 5  ;;  %10051 = vmatprep.mubr.bf16.mxu1 %v9559_v50  ;;  %v9214_v29 = vld [vmem:[#allocation2 + $0x3c] sm:$0xe]  ;;  %v9215_v17 = vld [vmem:[#allocation2 + $0x40] sm:$0xf] }
 0x716   : > { %10164 = vmatprep.mubr.bf16.mxu0 %v9531_v31  ;;  %v8105_v62 = vrot.slane %v8103_v47, 5  ;;  %v8109_v38 = vrot.slane %v8107_v6, 4  ;;  %v8113_v54 = vshll.u32 %v7732_v20, 16  ;;  %v11293_v40 = vrot.slane %v9205_v42, 9  ;;  %v9216_v39 = vld [vmem:[#allocation2 + $0x44] sm:$0x1] }
 0x717   : > { %8194 = vst.msk [vmem:[#allocation3 + $0x218] sm:$0xff] %vm5230_vm13, %v11226_v24  ;;  %v8082_v25 = vsel %vm12840_vm12, %v8077_v55, %v8081_v8  ;;  %v8087_v36 = vrot.slane %v8086_v1, 4  ;;  %v8100_v63 = vor.u32 %v8099_v5, %v8096_v52  ;;  %v9303_v9 = vrot.slane %v9206_v3, 5  ;;  %v9217_v49 = vld [vmem:[#allocation2 + $0x48] sm:$0xe]  ;;  %v9558_v0 = vld [vmem:[#allocation3 + $0x208] sm:$0xff] }
 0x718   : > { %v8110_v53 = vor.u32 %v8109_v38, %v8105_v62  ;;  %v8115_v56 = vrot.slane %v8113_v54, 5  ;;  %v9306_v35 = vrot.slane %v9207_v27, 5  ;;  %v11294_v16 = vrot.slane %v9208_v28, 9  ;;  %v8476_v4 = vpop.permute.xlu1 %8475  ;;  %v9218_v8 = vld [vmem:[#allocation2 + $0x4c] sm:$0xf]  ;;  %v9166_v30 = vpop.permute.xlu0 %9165  ;;  %v9530_v20 = vld [vmem:[#allocation3 + $0x128] sm:$0xff] }
 0x719   : > { %v8092_v26 = vsel %vm12840_vm12, %v8087_v36, %v8091_v7  ;;  %v8101_v34 = vrot.slane %v8100_v63, 4  ;;  %v9305_v61 = vrot.slane %v9303_v9, 4  ;;  %v9304_v58 = vsel %vm12813_vm9, %v11293_v40, %v9303_v9  ;;  %8512 = vst.msk [vmem:[#allocation3 + $0x1c8] sm:$0xff] %vm7204_vm0, %v8476_v4  ;;  %v9219_v43 = vld [vmem:[#allocation2 + $0x50] sm:$0x1]  ;;  %9201 = vst.msk [vmem:[#allocation3 + $0x1f8] sm:$0xff] %vm7204_vm0, %v9166_v30 }
 0x71a   : > { %v11227_v19 = vcombine.low %v8082_v25, %v8092_v26  ;;  %v8111_v51 = vrot.slane %v8110_v53, 4  ;;  %v9310_v32 = vrot.slane %v9209_v45, 5  ;;  %v11295_v37 = vrot.slane %v9211_v23, 9  ;;  %v9564_v21 = vld [vmem:[#allocation3 + $0x238] sm:$0xff]  ;;  %v9221_v50 = vld [vmem:[#allocation2 + $0x58] sm:$0xf] }
 0x71b   : > { %v8106_v41 = vsel %vm12840_vm12, %v8101_v34, %v8105_v62  ;;  %v9307_v11 = vsel %vm12813_vm9, %v9305_v61, %v9306_v35  ;;  %v9317_v57 = vrot.slane %v9212_v44, 5  ;;  %v9313_v14 = vrot.slane %v9210_v33, 5  ;;  %v9536_v47 = vld [vmem:[#allocation3 + $0x158] sm:$0xff]  ;;  %v9222_v59 = vld [vmem:[#allocation2 + $0x5c] sm:$0x1] }
 0x71c   : > { %8195 = vst.msk [vmem:[#allocation3 + $0x240] sm:$0xff] %vm5230_vm13, %v11227_v19  ;;  %v8116_v60 = vsel %vm12840_vm12, %v8111_v51, %v8115_v56  ;;  %v11309_v12 = vcombine.low %v9304_v58, %v9307_v11  ;;  %v9312_v46 = vrot.slane %v9310_v32, 4  ;;  %10052 = vmatmul.mubr.bf16.gmra.mrb[68].mxu1 %v9558_v0  ;;  %v9311_v42 = vsel %vm12813_vm9, %v11294_v16, %v9310_v32  ;;  %v9220_v48 = vld [vmem:[#allocation2 + $0x54] sm:$0xe]  ;;  %v9223_v5 = vld [vmem:[#allocation2 + $0x60] sm:$0xe] }
 0x71d   : > { %v11228_v2 = vcombine.low %v8106_v41, %v8116_v60  ;;  %10165 = vmatmul.mubr.bf16.gmra.mrb[116].mxu0 %v9530_v20  ;;  %v9319_v18 = vrot.slane %v9317_v57, 4  ;;  %v9320_v7 = vrot.slane %v9213_v15, 5  ;;  %10059 = vmatprep.mubr.bf16.mxu1 %v9564_v21  ;;  %v9318_v52 = vsel %vm12813_vm9, %v11295_v37, %v9317_v57  ;;  %v9224_v27 = vld [vmem:[#allocation2 + $0x64] sm:$0xf]  ;;  %v9225_v40 = vld [vmem:[#allocation2 + $0x68] sm:$0x1] }
 0x71e   : > { %9477 = vst.msk [vmem:[#allocation3 + $0x20] sm:$0xff] %vm5230_vm13, %v11309_v12  ;;  %10172 = vmatprep.mubr.bf16.mxu0 %v9536_v47  ;;  %v9314_v10 = vsel %vm12813_vm9, %v9312_v46, %v9313_v14  ;;  %v11296_v6 = vrot.slane %v9214_v29, 9  ;;  %v9324_v3 = vrot.slane %v9215_v17, 5  ;;  %v11297_v1 = vrot.slane %v9217_v49, 9  ;;  %v9226_v28 = vld [vmem:[#allocation2 + $0x6c] sm:$0xe] }
 0x71f   : > { %8196 = vst.msk [vmem:[#allocation3 + $0x268] sm:$0xff] %vm5230_vm13, %v11228_v2  ;;  %v11310_v24 = vcombine.low %v9311_v42, %v9314_v10  ;;  %v9321_v55 = vsel %vm12813_vm9, %v9319_v18, %v9320_v7  ;;  %v9331_v31 = vrot.slane %v9218_v8, 5  ;;  %v9327_v54 = vrot.slane %v9216_v39, 5  ;;  %v9227_v45 = vld [vmem:[#allocation2 + $0x70] sm:$0xf]  ;;  %v8478_v34 = vpop.permute.xlu1 %8477  ;;  %v9563_v32 = vld [vmem:[#allocation3 + $0x230] sm:$0xff] }
 0x720   : > { %v11311_v13 = vcombine.low %v9318_v52, %v9321_v55  ;;  %v9325_v62 = vsel %vm12813_vm9, %v11296_v6, %v9324_v3  ;;  %v9326_v38 = vrot.slane %v9324_v3, 4  ;;  %v9334_v36 = vrot.slane %v9219_v43, 5  ;;  %v9228_v23 = vld [vmem:[#allocation2 + $0x74] sm:$0x1]  ;;  %v9229_v44 = vld [vmem:[#allocation2 + $0x78] sm:$0xe] }
 0x721   : > { %9478 = vst.msk [vmem:[#allocation3 + $0x48] sm:$0xff] %vm5230_vm13, %v11310_v24  ;;  %v9333_v25 = vrot.slane %v9331_v31, 4  ;;  %v11298_v63 = vrot.slane %v9220_v48, 9  ;;  %v9338_v9 = vrot.slane %v9221_v50, 5  ;;  %v9332_v53 = vsel %vm12813_vm9, %v11297_v1, %v9331_v31  ;;  %v9230_v26 = vld [vmem:[#allocation2 + $0x7c] sm:$0xf] }
 0x722   : > { %9479 = vst.msk [vmem:[#allocation3 + $0x70] sm:$0xff] %vm5230_vm13, %v11311_v13  ;;  %v9328_v33 = vsel %vm12813_vm9, %v9326_v38, %v9327_v54  ;;  %v11299_v56 = vrot.slane %v9223_v5, 9  ;;  %v9345_v35 = vrot.slane %v9224_v27, 5  ;;  %v9341_v19 = vrot.slane %v9222_v59, 5  ;;  %v9231_v51 = vld [vmem:[#allocation2 + $0x80] sm:$0x1]  ;;  %v9168_v57 = vpop.permute.xlu0 %9167 }
 0x723   : > { %v11312_v61 = vcombine.low %v9325_v62, %v9328_v33  ;;  %v9335_v16 = vsel %vm12813_vm9, %v9333_v25, %v9334_v36  ;;  %v9340_v15 = vrot.slane %v9338_v9, 4  ;;  %v9232_v58 = vld [vmem:[#allocation2 + $0x84] sm:$0xe]  ;;  %8513 = vst.msk [vmem:[#allocation3 + $0x1f0] sm:$0xff] %vm7204_vm0, %v8478_v34  ;;  %v9535_v29 = vld [vmem:[#allocation3 + $0x150] sm:$0xff]  ;;  %v9339_v4 = vsel %vm12813_vm9, %v11298_v63, %v9338_v9  ;;  %v9569_v39 = vld [vmem:[#allocation3 + $0x260] sm:$0xff] }
 0x724   : > { %v11313_v17 = vcombine.low %v9332_v53, %v9335_v16  ;;  %v9347_v41 = vrot.slane %v9345_v35, 4  ;;  %v9348_v11 = vrot.slane %v9225_v40, 5  ;;  %v9233_v37 = vld [vmem:[#allocation2 + $0x88] sm:$0xf]  ;;  %10060 = vmatmul.mubr.bf16.gmra.mrb[72].mxu1 %v9563_v32  ;;  %v9541_v49 = vld [vmem:[#allocation3 + $0x180] sm:$0xff]  ;;  %v9346_v30 = vsel %vm12813_vm9, %v11299_v56, %v9345_v35  ;;  %9202 = vst.msk [vmem:[#allocation3 + $0x220] sm:$0xff] %vm7204_vm0, %v9168_v57 }
 0x725   : > { %10173 = vmatmul.mubr.bf16.gmra.mrb[120].mxu0 %v9535_v29  ;;  %9480 = vst.msk [vmem:[#allocation3 + $0x98] sm:$0xff] %vm5230_vm13, %v11312_v61  ;;  %v9342_v8 = vsel %vm12813_vm9, %v9340_v15, %v9341_v19  ;;  %v11300_v0 = vrot.slane %v9226_v28, 9  ;;  %v9352_v60 = vrot.slane %v9227_v45, 5  ;;  %v9234_v12 = vld [vmem:[#allocation2 + $0x8c] sm:$0x1]  ;;  %10067 = vmatprep.mubr.bf16.mxu1 %v9569_v39  ;;  %v11301_v14 = vrot.slane %v9229_v44, 9 }
 0x726   : > { %10180 = vmatprep.mubr.bf16.mxu0 %v9541_v49  ;;  %9481 = vst.msk [vmem:[#allocation3 + $0xc0] sm:$0xff] %vm5230_vm13, %v11313_v17  ;;  %v11314_v20 = vcombine.low %v9339_v4, %v9342_v8  ;;  %v9349_v46 = vsel %vm12813_vm9, %v9347_v41, %v9348_v11  ;;  %v9359_v43 = vrot.slane %v9230_v26, 5  ;;  %v9235_v21 = vld [vmem:[#allocation2 + $0x90] sm:$0xe]  ;;  %v9236_v2 = vld [vmem:[#allocation2 + $0x94] sm:$0xf] }
 0x727   : > { %v11315_v47 = vcombine.low %v9346_v30, %v9349_v46  ;;  %v9353_v42 = vsel %vm12813_vm9, %v11300_v0, %v9352_v60  ;;  %v9354_v18 = vrot.slane %v9352_v60, 4  ;;  %v9355_v7 = vrot.slane %v9228_v23, 5  ;;  %v9237_v48 = vld [vmem:[#allocation2 + $0x98] sm:$0x1]  ;;  %v9238_v10 = vld [vmem:[#allocation2 + $0x9c] sm:$0xe]  ;;  %v8480_v25 = vpop.permute.xlu1 %8479 }
 0x728   : > { %9482 = vst.msk [vmem:[#allocation3 + $0xe8] sm:$0xff] %vm5230_vm13, %v11314_v20  ;;  %v9361_v52 = vrot.slane %v9359_v43, 4  ;;  %v9362_v6 = vrot.slane %v9231_v51, 5  ;;  %v11302_v3 = vrot.slane %v9232_v58, 9  ;;  %v9366_v50 = vrot.slane %v9233_v37, 5  ;;  %v9568_v56 = vld [vmem:[#allocation3 + $0x258] sm:$0xff] }
 0x729   : > { %v9239_v59 = vld [vmem:[#allocation2 + $0xa0] sm:$0xf]  ;;  %9483 = vst.msk [vmem:[#allocation3 + $0x110] sm:$0xff] %vm5230_vm13, %v11315_v47  ;;  %v9356_v24 = vsel %vm12813_vm9, %v9354_v18, %v9355_v7  ;;  %v9360_v55 = vsel %vm12813_vm9, %v11301_v14, %v9359_v43  ;;  %v11303_v1 = vrot.slane %v9235_v21, 9  ;;  %v9373_v31 = vrot.slane %v9236_v2, 5  ;;  %v9540_v35 = vld [vmem:[#allocation3 + $0x178] sm:$0xff] }
 0x72a   : > { %v9240_v5 = vld [vmem:[#allocation2 + $0xa4] sm:$0x1]  ;;  %v9241_v27 = vld [vmem:[#allocation2 + $0xa8] sm:$0xe]  ;;  %v11316_v13 = vcombine.low %v9353_v42, %v9356_v24  ;;  %v9363_v62 = vsel %vm12813_vm9, %v9361_v52, %v9362_v6  ;;  %v9368_v38 = vrot.slane %v9366_v50, 4  ;;  %v9369_v54 = vrot.slane %v9234_v12, 5  ;;  %v9170_v16 = vpop.permute.xlu0 %9169 }
 0x72b   : > { %v9242_v40 = vld [vmem:[#allocation2 + $0xac] sm:$0xf]  ;;  %v9243_v28 = vld [vmem:[#allocation2 + $0xb0] sm:$0x1]  ;;  %v11317_v36 = vcombine.low %v9360_v55, %v9363_v62  ;;  %v9367_v63 = vsel %vm12813_vm9, %v11302_v3, %v9366_v50  ;;  %v9375_v9 = vrot.slane %v9373_v31, 4  ;;  %v9376_v45 = vrot.slane %v9237_v48, 5  ;;  %v8482_v49 = vpop.permute.xlu1 %8481 }
 0x72c   : > { %v9244_v33 = vld [vmem:[#allocation2 + $0xb4] sm:$0xe]  ;;  %v9245_v53 = vld [vmem:[#allocation2 + $0xb8] sm:$0xf]  ;;  %8514 = vst.msk [vmem:[#allocation3 + $0x218] sm:$0xff] %vm7204_vm0, %v8480_v25  ;;  %v9370_v23 = vsel %vm12813_vm9, %v9368_v38, %v9369_v54  ;;  %v9374_v44 = vsel %vm12813_vm9, %v11303_v1, %v9373_v31  ;;  %v11304_v26 = vrot.slane %v9238_v10, 9  ;;  %10068 = vmatmul.mubr.bf16.gmra.mrb[76].mxu1 %v9568_v56 }
 0x72d   : > { %9484 = vst.msk [vmem:[#allocation3 + $0x138] sm:$0xff] %vm5230_vm13, %v11316_v13  ;;  %v9380_v34 = vrot.slane %v9239_v59, 5  ;;  %v9247_v61 = vld [vmem:[#allocation2 + $0xc0] sm:$0xe]  ;;  %v9497_v15 = vld [vmem:[#allocation3 + $0x20] sm:$0xff]  ;;  %10181 = vmatmul.mubr.bf16.gmra.mrb[124].mxu0 %v9540_v35  ;;  %9485 = vst.msk [vmem:[#allocation3 + $0x160] sm:$0xff] %vm5230_vm13, %v11317_v36  ;;  %v11318_v51 = vcombine.low %v9367_v63, %v9370_v23  ;;  %v9377_v58 = vsel %vm12813_vm9, %v9375_v9, %v9376_v45 }
 0x72e   : > { %v9546_v19 = vld [vmem:[#allocation3 + $0x1a8] sm:$0xff]  ;;  %v11305_v32 = vrot.slane %v9241_v27, 9  ;;  %v9387_v29 = vrot.slane %v9242_v40, 5  ;;  %9203 = vst.msk [vmem:[#allocation3 + $0x248] sm:$0xff] %vm7204_vm0, %v9170_v16  ;;  %11989 = vmatprep.mubr.msk.bf16.mxu1 %vm5230_vm13, %v9497_v15  ;;  %v11319_v4 = vcombine.low %v9374_v44, %v9377_v58  ;;  %v9383_v37 = vrot.slane %v9240_v5, 5  ;;  %8515 = vst.msk [vmem:[#allocation3 + $0x240] sm:$0xff] %vm7204_vm0, %v8482_v49 }
 0x72f   : > { %v9248_v17 = vld [vmem:[#allocation2 + $0xc4] sm:$0xf]  ;;  %10188 = vmatprep.mubr.bf16.mxu0 %v9546_v19  ;;  %v9381_v41 = vsel %vm12813_vm9, %v11304_v26, %v9380_v34  ;;  %v9382_v11 = vrot.slane %v9380_v34, 4  ;;  %v9246_v57 = vld [vmem:[#allocation2 + $0xbc] sm:$0x1]  ;;  %9486 = vst.msk [vmem:[#allocation3 + $0x188] sm:$0xff] %vm5230_vm13, %v11318_v51  ;;  %v8484_v3 = vpop.permute.xlu1 %8483 }
 0x730   : > { %v9249_v39 = vld [vmem:[#allocation2 + $0xc8] sm:$0x1]  ;;  %v9389_v8 = vrot.slane %v9387_v29, 4  ;;  %v9390_v30 = vrot.slane %v9243_v28, 5  ;;  %v11306_v0 = vrot.slane %v9244_v33, 9  ;;  %v9394_v60 = vrot.slane %v9245_v53, 5 }
 0x731   : > { %v9250_v12 = vld [vmem:[#allocation2 + $0xcc] sm:$0xe]  ;;  %9487 = vst.msk [vmem:[#allocation3 + $0x1b0] sm:$0xff] %vm5230_vm13, %v11319_v4  ;;  %v9384_v20 = vsel %vm12813_vm9, %v9382_v11, %v9383_v37  ;;  %v9388_v46 = vsel %vm12813_vm9, %v11305_v32, %v9387_v29  ;;  %v11307_v14 = vrot.slane %v9247_v61, 9  ;;  %v9401_v43 = vrot.slane %v9248_v17, 5  ;;  %v9502_v31 = vld [vmem:[#allocation3 + $0x48] sm:$0xff] }
 0x732   : > { %v9251_v21 = vld [vmem:[#allocation2 + $0xd0] sm:$0xf]  ;;  %v9252_v2 = vld [vmem:[#allocation2 + $0xd4] sm:$0x1]  ;;  %v11320_v47 = vcombine.low %v9381_v41, %v9384_v20  ;;  %v9391_v42 = vsel %vm12813_vm9, %v9389_v8, %v9390_v30  ;;  %v9396_v18 = vrot.slane %v9394_v60, 4  ;;  %v9397_v7 = vrot.slane %v9246_v57, 5 }
 0x733   : > { %v11321_v48 = vcombine.low %v9388_v46, %v9391_v42  ;;  %v9395_v10 = vsel %vm12813_vm9, %v11306_v0, %v9394_v60  ;;  %v9403_v52 = vrot.slane %v9401_v43, 4  ;;  %v9404_v6 = vrot.slane %v9249_v39, 5  ;;  %v12358_v50 = vld [vmem:[%s17213_s11 + $0x8] sm:$0xff]   ;;  %8516 = vst.msk [vmem:[#allocation3 + $0x268] sm:$0xff] %vm7204_vm0, %v8484_v3  ;;  %v9545_v5 = vld [vmem:[#allocation3 + $0x1a0] sm:$0xff]  ;;  %v12629_v25 = vld [vmem:[%s17213_s11] sm:$0xff]  }
 0x734   : > { %9488 = vst.msk [vmem:[#allocation3 + $0x1d8] sm:$0xff] %vm5230_vm13, %v11320_v47  ;;  %v9398_v59 = vsel %vm12813_vm9, %v9396_v18, %v9397_v7  ;;  %v11308_v24 = vrot.slane %v9250_v12, 9  ;;  %v9408_v55 = vrot.slane %v9251_v21, 5  ;;  %v9411_v1 = vrot.slane %v9252_v2, 5  ;;  %11990 = vmatmul.mubr.msk.bf16.vlgmr.msra.gmra.mrb[80].mxu1 %vm5230_vm13, %v9502_v31  ;;  %v9507_v38 = vld [vmem:[#allocation3 + $0x70] sm:$0xff]  ;;  %v9512_v45 = vld [vmem:[#allocation3 + $0x98] sm:$0xff] }
 0x735   : > { %9489 = vst.msk [vmem:[#allocation3 + $0x200] sm:$0xff] %vm5230_vm13, %v11321_v48  ;;  %v11322_v27 = vcombine.low %v9395_v10, %v9398_v59  ;;  %v9402_v13 = vsel %vm12813_vm9, %v11307_v14, %v9401_v43  ;;  %v9405_v62 = vsel %vm12813_vm9, %v9403_v52, %v9404_v6  ;;  %10189 = vmatmul.mubr.bf16.gmra.mrb[128].mxu0 %v9545_v5  ;;  %v9551_v36 = vld [vmem:[#allocation3 + $0x1d0] sm:$0xff]  ;;  %v9550_v33 = vld [vmem:[#allocation3 + $0x1c8] sm:$0xff]  ;;  %v9517_v53 = vld [vmem:[#allocation3 + $0xc0] sm:$0xff] }
 0x736   : > { %v11323_v54 = vcombine.low %v9402_v13, %v9405_v62  ;;  %v9409_v40 = vsel %vm12813_vm9, %v11308_v24, %v9408_v55  ;;  %v9410_v28 = vrot.slane %v9408_v55, 4  ;;  %12022 = vmatpush3.bf16.msra.mxu1 %v12629_v25  ;;  %11993 = vmatprep.mubr.msk.bf16.mxu1 %vm5230_vm13, %v9507_v38  ;;  %v9556_v56 = vld [vmem:[#allocation3 + $0x1f8] sm:$0xff]  ;;  %v9522_v35 = vld [vmem:[#allocation3 + $0xe8] sm:$0xff]  ;;  %v9555_v23 = vld [vmem:[#allocation3 + $0x1f0] sm:$0xff] }
 0x737   : > { %9490 = vst.msk [vmem:[#allocation3 + $0x228] sm:$0xff] %vm5230_vm13, %v11322_v27  ;;  %10196 = vmatprep.mubr.bf16.mxu0 %v9551_v36  ;;  %12023 = vmatprep.subr.bf16.mxu1 %v12358_v50  ;;  %v9527_v22 = vld [vmem:[#allocation3 + $0x110] sm:$0xff]  ;;  %v9561_v44 = vld [vmem:[#allocation3 + $0x220] sm:$0xff]  ;;  %v9532_v26 = vld [vmem:[#allocation3 + $0x138] sm:$0xff] }
 0x738   : > { %9491 = vst.msk [vmem:[#allocation3 + $0x250] sm:$0xff] %vm5230_vm13, %v11323_v54  ;;  %v9412_v63 = vsel %vm12813_vm9, %v9410_v28, %v9411_v1  ;;  %v9560_v34 = vld [vmem:[#allocation3 + $0x218] sm:$0xff]  ;;  %v9537_v61 = vld [vmem:[#allocation3 + $0x160] sm:$0xff]  ;;  %v9566_v16 = vld [vmem:[#allocation3 + $0x248] sm:$0xff] }
 0x739   : > { %v11324_v9 = vcombine.low %v9409_v40, %v9412_v63  ;;  %v9542_v15 = vld [vmem:[#allocation3 + $0x188] sm:$0xff]  ;;  %v9565_v19 = vld [vmem:[#allocation3 + $0x240] sm:$0xff]  ;;  %v9547_v51 = vld [vmem:[#allocation3 + $0x1b0] sm:$0xff] }
 0x73a   : > { %12024 = vmatpush3.bf16.msra.mxu1 %v12358_v50  ;;  %v9570_v4 = vld [vmem:[#allocation3 + $0x268] sm:$0xff]  ;;  %v12631_v39 = vld [vmem:[%s12783_s30 + $0x8] sm:$0xff]  ;;  %v12632_v8 = vld [vmem:[%s12783_s30 + $0x10] sm:$0xff] }
 0x73b   : > { %9492 = vst.msk [vmem:[#allocation3 + $0x278] sm:$0xff] %vm5230_vm13, %v11324_v9  ;;  %v9552_v32 = vld [vmem:[#allocation3 + $0x1d8] sm:$0xff]  ;;  %v12630_v57 = vld [vmem:[%s12783_s30] sm:$0xff]  ;;  %v12633_v30 = vld [vmem:[%s12783_s30 + $0x18] sm:$0xff] }
 0x73c   : > { %11994 = vmatmul.mubr.msk.bf16.gmra.mrb[84].mxu1 %vm5230_vm13, %v9512_v45  ;;  %v9557_v29 = vld [vmem:[#allocation3 + $0x200] sm:$0xff]  ;;  %v10398_v49 = vpack.c.bf16 %v12631_v39, %v12630_v57  ;;  %v10399_v0 = vpack.c.bf16 %v12633_v30, %v12632_v8  ;;  %v12634_v60 = vld [vmem:[%s12783_s30 + $0x20] sm:$0xff]  ;;  %v12635_v12 = vld [vmem:[%s12783_s30 + $0x28] sm:$0xff] }
 0x73d   : > { %10197 = vmatmul.mubr.bf16.gmra.mrb[132].mxu0 %v9550_v33  ;;  %11997 = vmatprep.mubr.msk.bf16.mxu1 %vm5230_vm13, %v9517_v53  ;;  %v10400_v20 = vpack.c.bf16 %v12635_v12, %v12634_v60  ;;  %v12636_v46 = vld [vmem:[%s12783_s30 + $0x30] sm:$0xff]  ;;  %v12637_v14 = vld [vmem:[%s12783_s30 + $0x38] sm:$0xff]  ;;  %v12638_v21 = vld [vmem:[%s12783_s30 + $0x40] sm:$0xff] }
 0x73e   : > { %10204 = vmatprep.mubr.bf16.mxu0 %v9556_v56  ;;  %v9562_v41 = vld [vmem:[#allocation3 + $0x228] sm:$0xff]  ;;  %v10401_v43 = vpack.c.bf16 %v12637_v14, %v12636_v46  ;;  %v12639_v2 = vld [vmem:[%s12783_s30 + $0x48] sm:$0xff]  ;;  %v12640_v42 = vld [vmem:[%s12783_s30 + $0x50] sm:$0xff] }
 0x73f   : > { %v9567_v11 = vld [vmem:[#allocation3 + $0x250] sm:$0xff]  ;;  %v10402_v47 = vpack.c.bf16 %v12639_v2, %v12638_v21  ;;  %v12641_v18 = vld [vmem:[%s12783_s30 + $0x58] sm:$0xff]  ;;  %v12642_v48 = vld [vmem:[%s12783_s30 + $0x60] sm:$0xff] }
 0x740   : > { %v10403_v7 = vpack.c.bf16 %v12641_v18, %v12640_v42  ;;  %v12643_v10 = vld [vmem:[%s12783_s30 + $0x68] sm:$0xff]  ;;  %v12644_v50 = vld [vmem:[%s12783_s30 + $0x70] sm:$0xff]  ;;  %v12645_v59 = vld [vmem:[%s12783_s30 + $0x78] sm:$0xff] }
 0x741   : > { %v10404_v52 = vpack.c.bf16 %v12643_v10, %v12642_v48  ;;  %v10405_v24 = vpack.c.bf16 %v12645_v59, %v12644_v50  ;;  %v12646_v31 = vld [vmem:[%s12783_s30 + $0x80] sm:$0xff]  ;;  %v12647_v5 = vld [vmem:[%s12783_s30 + $0x88] sm:$0xff]  ;;  %v12648_v40 = vld [vmem:[%s12783_s30 + $0x90] sm:$0xff] }
 0x742   : > { %v9572_v37 = vld [vmem:[#allocation3 + $0x278] sm:$0xff]  ;;  %v10406_v27 = vpack.c.bf16 %v12647_v5, %v12646_v31  ;;  %v12649_v28 = vld [vmem:[%s12783_s30 + $0x98] sm:$0xff]  ;;  %v12650_v9 = vld [vmem:[%s12783_s30 + $0xa0] sm:$0xff] }
 0x743   : > { %v10407_v25 = vpack.c.bf16 %v12649_v28, %v12648_v40  ;;  %v12651_v45 = vld [vmem:[%s12783_s30 + $0xa8] sm:$0xff]  ;;  %v12658_v57 = vld [vmem:[%s12783_s30 + $0xe0] sm:$0xff]  ;;  %v12660_v12 = vld [vmem:[%s12783_s30 + $0xf0] sm:$0xff] }
 0x744   : > { %11998 = vmatmul.mubr.msk.bf16.gmra.mrb[88].mxu1 %vm5230_vm13, %v9522_v35  ;;  %v10408_v33 = vpack.c.bf16 %v12651_v45, %v12650_v9  ;;  %v12659_v39 = vld [vmem:[%s12783_s30 + $0xe8] sm:$0xff]  ;;  %v16894_v5 = vld [vmem:[%s17212_s10] ss:$0 sm:$0xff] }
 0x745   : > { %10205 = vmatmul.mubr.bf16.gmra.mrb[136].mxu0 %v9555_v23  ;;  %12001 = vmatprep.mubr.msk.bf16.mxu1 %vm5230_vm13, %v9527_v22  ;;  %v12652_v22 = vld [vmem:[%s12783_s30 + $0xb0] sm:$0xff] }
 0x746   : > { %10212 = vmatprep.mubr.bf16.mxu0 %v9561_v44  ;;  %v12653_v44 = vld [vmem:[%s12783_s30 + $0xb8] sm:$0xff] }
 0x74c   : > { %12002 = vmatmul.mubr.msk.bf16.gmra.mrb[92].mxu1 %vm5230_vm13, %v9532_v26  ;;  %v10409_v26 = vpack.c.bf16 %v12653_v44, %v12652_v22 }
 0x74d   : > { %10213 = vmatmul.mubr.bf16.gmra.mrb[140].mxu0 %v9560_v34  ;;  %12005 = vmatprep.mubr.msk.bf16.mxu1 %vm5230_vm13, %v9537_v61 }
 0x74e   : > { %10220 = vmatprep.mubr.bf16.mxu0 %v9566_v16  ;;  %v12654_v16 = vld [vmem:[%s12783_s30 + $0xc0] sm:$0xff] }
 0x754   : > { %12006 = vmatmul.mubr.msk.bf16.gmra.mrb[96].mxu1 %vm5230_vm13, %v9542_v15  ;;  %v12655_v15 = vld [vmem:[%s12783_s30 + $0xc8] sm:$0xff] }
 0x755   : > { %10221 = vmatmul.mubr.bf16.gmra.mrb[144].mxu0 %v9565_v19  ;;  %12009 = vmatprep.mubr.msk.bf16.mxu1 %vm5230_vm13, %v9547_v51  ;;  %v10410_v19 = vpack.c.bf16 %v12655_v15, %v12654_v16 }
 0x756   : > { %v9172_v58 = vpop.permute.xlu0 %9171 }
 0x757   : > { %9204 = vst.msk [vmem:[#allocation3 + $0x270] sm:$0xff] %vm7204_vm0, %v9172_v58 }
 0x75c   : > { %12010 = vmatmul.mubr.msk.bf16.gmra.mrb[100].mxu1 %vm5230_vm13, %v9552_v32 }
 0x75d   : > { %12013 = vmatprep.mubr.msk.bf16.mxu1 %vm5230_vm13, %v9557_v29 }
 0x75e   : > { %v9571_v17 = vld [vmem:[#allocation3 + $0x270] sm:$0xff] }
 0x75f   : > { %10228 = vmatprep.mubr.bf16.mxu0 %v9571_v17  ;;  %v12656_v17 = vld [vmem:[%s12783_s30 + $0xd0] sm:$0xff] }
 0x760   : > { %10229 = vmatmul.mubr.bf16.gmra.mrb[148].mxu0 %v9570_v4  ;;  %v12657_v4 = vld [vmem:[%s12783_s30 + $0xd8] sm:$0xff] }
 0x764   : > { %12014 = vmatmul.mubr.msk.bf16.gmra.mrb[104].mxu1 %vm5230_vm13, %v9562_v41  ;;  %v10411_v41 = vpack.c.bf16 %v12657_v4, %v12656_v17 }
 0x765   : > { %12017 = vmatprep.mubr.msk.bf16.mxu1 %vm5230_vm13, %v9567_v11 }
 0x76c   : > { %12018 = vmatmul.mubr.msk.bf16.gmra.mrb[108].mxu1 %vm5230_vm13, %v9572_v37 }
 0x76d   : > { %12025 = vmatprep.mubr.msk.bf16.mxu1 %vm598_vm6, %v10398_v49  ;;  %v10412_v49 = vpack.c.bf16 %v12659_v39, %v12658_v57 }
 0x774   : > { %12026 = vmatmul.mubr.msk.bf16.vlgmr.msra.gmra.mrb[80].mxu1 %vm598_vm6, %v10399_v0 }
 0x775   : > { %12029 = vmatprep.mubr.msk.bf16.mxu1 %vm598_vm6, %v10400_v20  ;;  %v12661_v20 = vld [vmem:[%s12783_s30 + $0xf8] sm:$0xff] }
 0x776   : > { %v10413_v46 = vpack.c.bf16 %v12661_v20, %v12660_v12 }
 0x77c   : > { %12030 = vmatmul.mubr.msk.bf16.gmra.mrb[84].mxu1 %vm598_vm6, %v10401_v43 }
 0x77d   : > { %12033 = vmatprep.mubr.msk.bf16.mxu1 %vm598_vm6, %v10402_v47 }
 0x784   : > { %12034 = vmatmul.mubr.msk.bf16.gmra.mrb[88].mxu1 %vm598_vm6, %v10403_v7 }
 0x785   : > { %12037 = vmatprep.mubr.msk.bf16.mxu1 %vm598_vm6, %v10404_v52  ;;  %v11639_v6 = vpop.f32.mrb[16].mxu1 }
 0x786   : > { %v11640_v3 = vpop.f32.mrb[17].mxu1 }
 0x787   : > { %v16840_v55 = vadd.f32 %v11640_v3, %v11639_v6  ;;  %v11642_v1 = vpop.f32.mrb[18].mxu1 }
 0x788   : > { %v11643_v13 = vpop.f32.mrb[19].mxu1 }
 0x789   : > { %v16844_v62 = vadd.f32 %v11643_v13, %v11642_v1 }
 0x78c   : > { %12038 = vmatmul.mubr.msk.bf16.gmra.mrb[92].mxu1 %vm598_vm6, %v10405_v24 }
 0x78d   : > { %12041 = vmatprep.mubr.msk.bf16.mxu1 %vm598_vm6, %v10406_v27  ;;  %v11645_v38 = vpop.f32.mrb[20].mxu1 }
 0x78e   : > { %v11646_v54 = vpop.f32.mrb[21].mxu1 }
 0x78f   : > { %v16850_v36 = vadd.f32 %v11646_v54, %v11645_v38  ;;  %v11648_v63 = vpop.f32.mrb[22].mxu1  ;;  %v9953_v38 = vadd.f32 %v16844_v62, %v16894_v5 }
 0x790   : > { %v11649_v53 = vpop.f32.mrb[23].mxu1 }
 0x791   : > { %v16854_v56 = vadd.f32 %v11649_v53, %v11648_v63 }
 0x793   : > { %v9961_v62 = vadd.f32 %v16854_v56, %v16894_v5  ;;  %v9950_v56 = vadd.f32 %v16840_v55, %v16894_v5 }
 0x794   : > { %12042 = vmatmul.mubr.msk.bf16.gmra.mrb[96].mxu1 %vm598_vm6, %v10407_v25 }
 0x795   : > { %12045 = vmatprep.mubr.msk.bf16.mxu1 %vm598_vm6, %v10408_v33  ;;  %v9958_v33 = vadd.f32 %v16850_v36, %v16894_v5 }
 0x797   : > { %v11651_v35 = vpop.f32.mrb[24].mxu1 }
 0x798   : > { %v11652_v23 = vpop.f32.mrb[25].mxu1 }
 0x799   : > { %v16860_v34 = vadd.f32 %v11652_v23, %v11651_v35  ;;  %v11654_v61 = vpop.f32.mrb[26].mxu1 }
 0x79a   : > { %v11655_v51 = vpop.f32.mrb[27].mxu1 }
 0x79b   : > { %v16864_v58 = vadd.f32 %v11655_v51, %v11654_v61  ;;  %v9966_v17 = vadd.f32 %v16860_v34, %v16894_v5 }
 0x79c   : > { %12046 = vmatmul.mubr.msk.bf16.gmra.mrb[100].mxu1 %vm598_vm6, %v10409_v26 }
 0x79d   : > { %12049 = vmatprep.mubr.msk.bf16.mxu1 %vm598_vm6, %v10410_v19 }
 0x79f   : > { %v11657_v32 = vpop.f32.mrb[28].mxu1 }
 0x7a0   : > { %v11658_v29 = vpop.f32.mrb[29].mxu1 }
 0x7a1   : > { %v16870_v11 = vadd.f32 %v11658_v29, %v11657_v32  ;;  %v11660_v37 = vpop.f32.mrb[30].mxu1 }
 0x7a2   : > { %v11661_v8 = vpop.f32.mrb[31].mxu1 }
 0x7a3   : > { %v16874_v30 = vadd.f32 %v11661_v8, %v11660_v37  ;;  %v9969_v8 = vadd.f32 %v16864_v58, %v16894_v5  ;;  %v9974_v55 = vadd.f32 %v16870_v11, %v16894_v5 }
 0x7a4   : > { %12050 = vmatmul.mubr.msk.bf16.gmra.mrb[104].mxu1 %vm598_vm6, %v10411_v41 }
 0x7a5   : > { %12053 = vmatprep.mubr.msk.bf16.mxu1 %vm598_vm6, %v10412_v49 }
 0x7a7   : > { %v11663_v0 = vpop.f32.mrb[32].mxu1 }
 0x7a8   : > { %v11664_v60 = vpop.f32.mrb[33].mxu1 }
 0x7a9   : > { %v16880_v14 = vadd.f32 %v11664_v60, %v11663_v0  ;;  %v11666_v43 = vpop.f32.mrb[34].mxu1 }
 0x7aa   : > { %v11667_v21 = vpop.f32.mrb[35].mxu1 }
 0x7ab   : > { %v16882_v2 = vadd.f32 %v11667_v21, %v11666_v43 }
 0x7ac   : > { %12054 = vmatmul.mubr.msk.bf16.gmra.mrb[108].mxu1 %vm598_vm6, %v10413_v46 }
 0x7af   : > { %v11669_v47 = vpop.f32.mrb[36].mxu1 }
 0x7b0   : > { %v11670_v42 = vpop.f32.mrb[37].mxu1 }
 0x7b1   : > { %v16885_v18 = vadd.f32 %v11670_v42, %v11669_v47  ;;  %v11672_v7 = vpop.f32.mrb[38].mxu1 }
 0x7b2   : > { %v11673_v48 = vpop.f32.mrb[39].mxu1 }
 0x7b3   : > { %v16887_v10 = vadd.f32 %v11673_v48, %v11672_v7 }
 0x7b7   : > { %v11675_v52 = vpop.f32.mrb[40].mxu1 }
 0x7b8   : > { %v11751_v6 = vpop.f32.mrb[88].mxu0  ;;  %v11676_v3 = vpop.f32.mrb[41].mxu1 }
 0x7b9   : > { %v11752_v50 = vpop.f32.mrb[89].mxu0  ;;  %v16889_v59 = vadd.f32 %v11676_v3, %v11675_v52  ;;  %v11678_v24 = vpop.f32.mrb[42].mxu1  ;;  %v9977_v3 = vadd.f32 %v16874_v30, %v16894_v5 }
 0x7ba   : > { %v11753_v1 = vadd.f32 %v11752_v50, %v11751_v6  ;;  %v11754_v31 = vpop.f32.mrb[90].mxu0  ;;  %v11679_v27 = vpop.f32.mrb[43].mxu1 }
 0x7bb   : > { %v11755_v13 = vpop.f32.mrb[91].mxu0  ;;  %v16898_v54 = vadd.f32 %v11679_v27, %v11678_v24 }
 0x7bc   : > { %v11756_v40 = vadd.f32 %v11755_v13, %v11754_v31  ;;  %v16926_v20 = vadd.f32 %v11753_v1, %v9950_v56 }
 0x7be   : > { %v16900_v28 = vadd.f32 %v11756_v40, %v9953_v38  ;;  %v9982_v40 = vadd.f32 %v16880_v14, %v16894_v5 }
 0x7bf   : > { %v11681_v25 = vpop.f32.mrb[44].mxu1 }
 0x7c0   : > { %v11757_v63 = vpop.f32.mrb[92].mxu0  ;;  %v11682_v9 = vpop.f32.mrb[45].mxu1 }
 0x7c1   : > { %v11758_v45 = vpop.f32.mrb[93].mxu0  ;;  %v16904_v53 = vadd.f32 %v11682_v9, %v11681_v25  ;;  %v11684_v35 = vpop.f32.mrb[46].mxu1 }
 0x7c2   : > { %v11759_v23 = vadd.f32 %v11758_v45, %v11757_v63  ;;  %v11760_v22 = vpop.f32.mrb[94].mxu0  ;;  %v11685_v44 = vpop.f32.mrb[47].mxu1 }
 0x7c3   : > { %v11761_v26 = vpop.f32.mrb[95].mxu0  ;;  %v16908_v61 = vadd.f32 %v11685_v44, %v11684_v35  ;;  %v9985_v35 = vadd.f32 %v16882_v2, %v16894_v5 }
 0x7c4   : > { %v11762_v16 = vadd.f32 %v11761_v26, %v11760_v22  ;;  %v16910_v15 = vadd.f32 %v11759_v23, %v9958_v33 }
 0x7c6   : > { %v16912_v19 = vadd.f32 %v11762_v16, %v9961_v62 }
 0x7c7   : > { %v11687_v51 = vpop.f32.mrb[48].mxu1 }
 0x7c8   : > { %v11763_v32 = vpop.f32.mrb[96].mxu0  ;;  %v11688_v36 = vpop.f32.mrb[49].mxu1 }
 0x7c9   : > { %v11764_v29 = vpop.f32.mrb[97].mxu0  ;;  %v16916_v4 = vadd.f32 %v11688_v36, %v11687_v51  ;;  %v11690_v41 = vpop.f32.mrb[50].mxu1 }
 0x7ca   : > { %v11765_v37 = vadd.f32 %v11764_v29, %v11763_v32  ;;  %v11766_v57 = vpop.f32.mrb[98].mxu0  ;;  %v11691_v39 = vpop.f32.mrb[51].mxu1  ;;  %v9990_v32 = vadd.f32 %v16885_v18, %v16894_v5 }
 0x7cb   : > { %v11767_v49 = vpop.f32.mrb[99].mxu0  ;;  %v16922_v0 = vadd.f32 %v11691_v39, %v11690_v41 }
 0x7cc   : > { %v16924_v60 = vadd.f32 %v11765_v37, %v9966_v17  ;;  %v11768_v12 = vadd.f32 %v11767_v49, %v11766_v57  ;;  %v9993_v57 = vadd.f32 %v16887_v10, %v16894_v5 }
 0x7ce   : > { %v16928_v34 = vadd.f32 %v11768_v12, %v9969_v8 }
 0x7cf   : > { %v11693_v46 = vpop.f32.mrb[52].mxu1 }
 0x7d0   : > { %v11769_v43 = vpop.f32.mrb[100].mxu0  ;;  %v11694_v21 = vpop.f32.mrb[53].mxu1 }
 0x7d1   : > { %v11770_v47 = vpop.f32.mrb[101].mxu0  ;;  %v16932_v42 = vadd.f32 %v11694_v21, %v11693_v46  ;;  %v11696_v7 = vpop.f32.mrb[54].mxu1  ;;  %v9998_v21 = vadd.f32 %v16889_v59, %v16894_v5 }
 0x7d2   : > { %v11771_v58 = vadd.f32 %v11770_v47, %v11769_v43  ;;  %v11772_v48 = vpop.f32.mrb[102].mxu0  ;;  %v11697_v52 = vpop.f32.mrb[55].mxu1 }
 0x7d3   : > { %v11773_v6 = vpop.f32.mrb[103].mxu0  ;;  %v16936_v50 = vadd.f32 %v11697_v52, %v11696_v7  ;;  %v10001_v52 = vadd.f32 %v16898_v54, %v16894_v5 }
 0x7d4   : > { %v16938_v24 = vadd.f32 %v11771_v58, %v9974_v55  ;;  %v11774_v1 = vadd.f32 %v11773_v6, %v11772_v48 }
 0x7d6   : > { %v16940_v31 = vadd.f32 %v11774_v1, %v9977_v3 }
 0x7d7   : > { %v11699_v27 = vpop.f32.mrb[56].mxu1 }
 0x7d8   : > { %v11775_v13 = vpop.f32.mrb[104].mxu0  ;;  %v11700_v11 = vpop.f32.mrb[57].mxu1 }
 0x7d9   : > { %v11776_v38 = vpop.f32.mrb[105].mxu0  ;;  %v16944_v25 = vadd.f32 %v11700_v11, %v11699_v27  ;;  %v11702_v63 = vpop.f32.mrb[58].mxu1 }
 0x7da   : > { %v11777_v9 = vadd.f32 %v11776_v38, %v11775_v13  ;;  %v11778_v45 = vpop.f32.mrb[106].mxu0  ;;  %v11703_v30 = vpop.f32.mrb[59].mxu1 }
 0x7db   : > { %v11779_v33 = vpop.f32.mrb[107].mxu0  ;;  %v16948_v23 = vadd.f32 %v11703_v30, %v11702_v63 }
 0x7dc   : > { %v16950_v22 = vadd.f32 %v11777_v9, %v9982_v40  ;;  %v11780_v44 = vadd.f32 %v11779_v33, %v11778_v45  ;;  %v10006_v40 = vadd.f32 %v16904_v53, %v16894_v5 }
 0x7de   : > { %v16952_v26 = vadd.f32 %v11780_v44, %v9985_v35  ;;  %v10009_v35 = vadd.f32 %v16908_v61, %v16894_v5 }
 0x7df   : > { %v11705_v62 = vpop.f32.mrb[60].mxu1 }
 0x7e0   : > { %v11781_v16 = vpop.f32.mrb[108].mxu0  ;;  %v11706_v14 = vpop.f32.mrb[61].mxu1 }
 0x7e1   : > { %v11782_v51 = vpop.f32.mrb[109].mxu0  ;;  %v16956_v36 = vadd.f32 %v11706_v14, %v11705_v62  ;;  %v11708_v29 = vpop.f32.mrb[62].mxu1 }
 0x7e2   : > { %v11783_v17 = vadd.f32 %v11782_v51, %v11781_v16  ;;  %v11784_v41 = vpop.f32.mrb[110].mxu0  ;;  %v11709_v2 = vpop.f32.mrb[63].mxu1 }
 0x7e3   : > { %v11785_v37 = vpop.f32.mrb[111].mxu0  ;;  %v16960_v56 = vadd.f32 %v11709_v2, %v11708_v29 }
 0x7e4   : > { %v16962_v39 = vadd.f32 %v11783_v17, %v9990_v32  ;;  %v11786_v49 = vadd.f32 %v11785_v37, %v11784_v41  ;;  %v10014_v17 = vadd.f32 %v16916_v4, %v16894_v5 }
 0x7e6   : > { %v16964_v8 = vadd.f32 %v11786_v49, %v9993_v57 }
 0x7e7   : > { %v11711_v12 = vpop.f32.mrb[64].mxu1 }
 0x7e8   : > { %v11787_v46 = vpop.f32.mrb[112].mxu0  ;;  %v11712_v18 = vpop.f32.mrb[65].mxu1 }
 0x7e9   : > { %v11788_v43 = vpop.f32.mrb[113].mxu0  ;;  %v16968_v47 = vadd.f32 %v11712_v18, %v11711_v12  ;;  %v11714_v55 = vpop.f32.mrb[66].mxu1  ;;  %v10017_v12 = vadd.f32 %v16922_v0, %v16894_v5 }
 0x7ea   : > { %v11789_v7 = vadd.f32 %v11788_v43, %v11787_v46  ;;  %v11790_v58 = vpop.f32.mrb[114].mxu0  ;;  %v11715_v10 = vpop.f32.mrb[67].mxu1 }
 0x7eb   : > { %v11791_v48 = vpop.f32.mrb[115].mxu0  ;;  %v16972_v6 = vadd.f32 %v11715_v10, %v11714_v55  ;;  %v10022_v10 = vadd.f32 %v16932_v42, %v16894_v5  ;;  %v10030_v42 = vadd.f32 %v16944_v25, %v16894_v5  ;;  %v10041_v25 = vadd.f32 %v16960_v56, %v16894_v5 }
 0x7ec   : > { %v16974_v3 = vadd.f32 %v11789_v7, %v9998_v21  ;;  %v11792_v1 = vadd.f32 %v11791_v48, %v11790_v58 }
 0x7ee   : > { %v16976_v27 = vadd.f32 %v11792_v1, %v10001_v52 }
 0x7ef   : > { %v11717_v13 = vpop.f32.mrb[68].mxu1 }
 0x7f0   : > { %v11793_v11 = vpop.f32.mrb[116].mxu0  ;;  %v11718_v59 = vpop.f32.mrb[69].mxu1 }
 0x7f1   : > { %v11794_v38 = vpop.f32.mrb[117].mxu0  ;;  %v16980_v63 = vadd.f32 %v11718_v59, %v11717_v13  ;;  %v11720_v9 = vpop.f32.mrb[70].mxu1  ;;  %v10025_v59 = vadd.f32 %v16936_v50, %v16894_v5 }
 0x7f2   : > { %v11795_v45 = vadd.f32 %v11794_v38, %v11793_v11  ;;  %v11796_v30 = vpop.f32.mrb[118].mxu0  ;;  %v11721_v54 = vpop.f32.mrb[71].mxu1 }
 0x7f3   : > { %v11797_v33 = vpop.f32.mrb[119].mxu0  ;;  %v16984_v44 = vadd.f32 %v11721_v54, %v11720_v9 }
 0x7f4   : > { %v16986_v62 = vadd.f32 %v11795_v45, %v10006_v40  ;;  %v11798_v16 = vadd.f32 %v11797_v33, %v11796_v30 }
 0x7f6   : > { %v16988_v14 = vadd.f32 %v11798_v16, %v10009_v35 }
 0x7f7   : > { %v11723_v51 = vpop.f32.mrb[72].mxu1 }
 0x7f8   : > { %v11799_v32 = vpop.f32.mrb[120].mxu0  ;;  %v11724_v53 = vpop.f32.mrb[73].mxu1 }
 0x7f9   : > { %v11800_v29 = vpop.f32.mrb[121].mxu0  ;;  %v16992_v41 = vadd.f32 %v11724_v53, %v11723_v51  ;;  %v11726_v2 = vpop.f32.mrb[74].mxu1  ;;  %v10033_v51 = vadd.f32 %v16948_v23, %v16894_v5 }
 0x7fa   : > { %v11801_v37 = vadd.f32 %v11800_v29, %v11799_v32  ;;  %v11802_v57 = vpop.f32.mrb[122].mxu0  ;;  %v11727_v61 = vpop.f32.mrb[75].mxu1 }
 0x7fb   : > { %v11803_v49 = vpop.f32.mrb[123].mxu0  ;;  %v16996_v46 = vadd.f32 %v11727_v61, %v11726_v2  ;;  %v10038_v2 = vadd.f32 %v16956_v36, %v16894_v5  ;;  %v10049_v36 = vadd.f32 %v16972_v6, %v16894_v5 }
 0x7fc   : > { %v16998_v18 = vadd.f32 %v11801_v37, %v10014_v17  ;;  %v11804_v43 = vadd.f32 %v11803_v49, %v11802_v57 }
 0x7fe   : > { %v17000_v21 = vadd.f32 %v11804_v43, %v10017_v12 }
 0x7ff   : > { %v11729_v55 = vpop.f32.mrb[76].mxu1 }
 0x800   : > { %v11805_v7 = vpop.f32.mrb[124].mxu0  ;;  %v11730_v4 = vpop.f32.mrb[77].mxu1 }
 0x801   : > { %v11806_v58 = vpop.f32.mrb[125].mxu0  ;;  %v17004_v48 = vadd.f32 %v11730_v4, %v11729_v55  ;;  %v11732_v52 = vpop.f32.mrb[78].mxu1 }
 0x802   : > { %v11807_v1 = vadd.f32 %v11806_v58, %v11805_v7  ;;  %v11808_v13 = vpop.f32.mrb[126].mxu0  ;;  %v11733_v0 = vpop.f32.mrb[79].mxu1  ;;  %v10046_v7 = vadd.f32 %v16968_v47, %v16894_v5  ;;  %v10057_v47 = vadd.f32 %v16984_v44, %v16894_v5 }
 0x803   : > { %v11809_v11 = vpop.f32.mrb[127].mxu0  ;;  %v11734_v38 = vadd.f32 %v11733_v0, %v11732_v52 }
 0x804   : > { %v17008_v40 = vadd.f32 %v11807_v1, %v10022_v10  ;;  %v11810_v9 = vadd.f32 %v11809_v11, %v11808_v13  ;;  %v10054_v11 = vadd.f32 %v16980_v63, %v16894_v5  ;;  %v10065_v63 = vadd.f32 %v16996_v46, %v16894_v5 }
 0x806   : > { %v17010_v45 = vadd.f32 %v11810_v9, %v10025_v59 }
 0x808   : > { %v11811_v30 = vpop.f32.mrb[128].mxu0 }
 0x809   : > { %v11812_v54 = vpop.f32.mrb[129].mxu0 }
 0x80a   : > { %v11813_v33 = vadd.f32 %v11812_v54, %v11811_v30  ;;  %v11814_v35 = vpop.f32.mrb[130].mxu0 }
 0x80b   : > { %v11815_v16 = vpop.f32.mrb[131].mxu0 }
 0x80c   : > { %v17016_v32 = vadd.f32 %v11813_v33, %v10030_v42  ;;  %v11816_v50 = vadd.f32 %v11815_v16, %v11814_v35  ;;  %v10062_v16 = vadd.f32 %v16992_v41, %v16894_v5 }
 0x80e   : > { %v17018_v53 = vadd.f32 %v11816_v50, %v10033_v51 }
 0x810   : > { %v11817_v29 = vpop.f32.mrb[132].mxu0 }
 0x811   : > { %v11818_v17 = vpop.f32.mrb[133].mxu0 }
 0x812   : > { %v11819_v37 = vadd.f32 %v11818_v17, %v11817_v29  ;;  %v11820_v57 = vpop.f32.mrb[134].mxu0 }
 0x813   : > { %v11821_v61 = vpop.f32.mrb[135].mxu0 }
 0x814   : > { %v17024_v49 = vadd.f32 %v11819_v37, %v10038_v2  ;;  %v11822_v12 = vadd.f32 %v11821_v61, %v11820_v57  ;;  %v10070_v61 = vadd.f32 %v17004_v48, %v16894_v5 }
 0x816   : > { %v17026_v23 = vadd.f32 %v11822_v12, %v10041_v25 }
 0x818   : > { %v11823_v43 = vpop.f32.mrb[136].mxu0 }
 0x819   : > { %v11824_v55 = vpop.f32.mrb[137].mxu0 }
 0x81a   : > { %v11825_v4 = vadd.f32 %v11824_v55, %v11823_v43  ;;  %v11826_v58 = vpop.f32.mrb[138].mxu0  ;;  %v10073_v43 = vadd.f32 %v11734_v38, %v16894_v5 }
 0x81b   : > { %v11827_v10 = vpop.f32.mrb[139].mxu0 }
 0x81c   : > { %v17032_v52 = vadd.f32 %v11825_v4, %v10046_v7  ;;  %v11828_v1 = vadd.f32 %v11827_v10, %v11826_v58  ;;  %v17062_v4 = vld [vmem:[%s17214_s12] ss:$0 sm:$0xff] }
 0x81d   : > { %v12101_v48 = vadd.f32 %v17062_v4, %v16912_v19 }
 0x81e   : > { %v17034_v56 = vadd.f32 %v11828_v1, %v10049_v36 }
 0x820   : > { %v11829_v13 = vpop.f32.mrb[140].mxu0 }
 0x821   : > { %v11830_v0 = vpop.f32.mrb[141].mxu0 }
 0x822   : > { %v11831_v59 = vadd.f32 %v11830_v0, %v11829_v13  ;;  %v11832_v9 = vpop.f32.mrb[142].mxu0 }
 0x823   : > { %v11833_v30 = vpop.f32.mrb[143].mxu0 }
 0x824   : > { %v17040_v54 = vadd.f32 %v11831_v59, %v10054_v11  ;;  %v11834_v42 = vadd.f32 %v11833_v30, %v11832_v9  ;;  %v12107_v59 = vadd.f32 %v17062_v4, %v16924_v60  ;;  %v12113_v60 = vadd.f32 %v17062_v4, %v16962_v39 }
 0x826   : > { %v17042_v6 = vadd.f32 %v11834_v42, %v10057_v47  ;;  %v12109_v47 = vadd.f32 %v17062_v4, %v16940_v31 }
 0x828   : > { %v11835_v33 = vpop.f32.mrb[144].mxu0 }
 0x829   : > { %v11836_v35 = vpop.f32.mrb[145].mxu0 }
 0x82a   : > { %v11837_v51 = vadd.f32 %v11836_v35, %v11835_v33  ;;  %v11838_v50 = vpop.f32.mrb[146].mxu0  ;;  %v12111_v35 = vadd.f32 %v17062_v4, %v16928_v34  ;;  %v12115_v34 = vadd.f32 %v17062_v4, %v16950_v22  ;;  %v12121_v22 = vadd.f32 %v17062_v4, %v16986_v62 }
 0x82b   : > { %v11839_v29 = vpop.f32.mrb[147].mxu0 }
 0x82c   : > { %v17048_v17 = vadd.f32 %v11837_v51, %v10062_v16  ;;  %v11840_v2 = vadd.f32 %v11839_v29, %v11838_v50 }
 0x82e   : > { %v17050_v44 = vadd.f32 %v11840_v2, %v10065_v63  ;;  %v12117_v63 = vadd.f32 %v17062_v4, %v16964_v8 }
 0x833   : > { %v11841_v37 = vpop.f32.mrb[148].mxu0 }
 0x834   : > { %v11842_v57 = vpop.f32.mrb[149].mxu0 }
 0x835   : > { %v11843_v25 = vadd.f32 %v11842_v57, %v11841_v37  ;;  %v11844_v12 = vpop.f32.mrb[150].mxu0  ;;  %v12119_v57 = vadd.f32 %v17062_v4, %v16952_v26  ;;  %v12123_v26 = vadd.f32 %v17062_v4, %v16974_v3  ;;  %v12129_v3 = vadd.f32 %v17062_v4, %v17008_v40 }
 0x836   : > { %v11845_v41 = vpop.f32.mrb[151].mxu0 }
 0x837   : > { %v17055_v55 = vadd.f32 %v11843_v25, %v10070_v61  ;;  %v11846_v7 = vadd.f32 %v11845_v41, %v11844_v12 }
 0x839   : > { %v17057_v46 = vadd.f32 %v11846_v7, %v10073_v43  ;;  %v12125_v43 = vadd.f32 %v17062_v4, %v16988_v14 }
 0x847   : > { %v12027_v58 = vpop.f32.mrb[80].mxu1 }
 0x848   : > { %v12097_v10 = vadd.f32 %v12027_v58, %v16910_v15  ;;  %v10519_v36 = vpop.f32.mrb[81].mxu1  ;;  %v12103_v15 = vadd.f32 %v17062_v4, %v16900_v28  ;;  %v12105_v28 = vadd.f32 %v17062_v4, %v16938_v24 }
 0x849   : > { %v12099_v5 = vadd.f32 %v10519_v36, %v16926_v20  ;;  %v12028_v38 = vpop.f32.mrb[82].mxu1 }
 0x84a   : > { %v12098_v1 = vadd.f32 %v12097_v10, %v17062_v4  ;;  %v12102_v13 = vadd.f32 %v12101_v48, %v12028_v38  ;;  %v10522_v19 = vpop.f32.mrb[83].mxu1  ;;  %v12127_v10 = vadd.f32 %v17062_v4, %v16976_v27  ;;  %v12131_v27 = vadd.f32 %v17062_v4, %v16998_v18 }
 0x84b   : > { %v12100_v0 = vadd.f32 %v12099_v5, %v17062_v4  ;;  %v12104_v11 = vadd.f32 %v12103_v15, %v10522_v19  ;;  %v12133_v15 = vadd.f32 %v17062_v4, %v17010_v45  ;;  %v12135_v19 = vadd.f32 %v17062_v4, %v17000_v21 }
 0x84c   : > { %10680 = vst.msk [vmem:[%s17072_s21 + $0x10] sm:$0xff] %vm5230_vm13, %v12098_v1  ;;  %10681 = vst.msk [vmem:[%s17072_s21 + $0x18] sm:$0xff] %vm5230_vm13, %v12102_v13  ;;  %v12137_v18 = vadd.f32 %v17062_v4, %v17024_v49  ;;  %v12139_v21 = vadd.f32 %v17062_v4, %v17016_v32  ;;  %v12145_v32 = vadd.f32 %v17062_v4, %v17040_v54 }
 0x84d   : > { %10678 = vst.msk [vmem:[%s17072_s21] sm:$0xff] %vm5230_vm13, %v12100_v0  ;;  %10679 = vst.msk [vmem:[%s17072_s21 + $0x8] sm:$0xff] %vm5230_vm13, %v12104_v11 }
 0x84f   : > { %v12031_v20 = vpop.f32.mrb[84].mxu1 }
 0x850   : > { %v12106_v9 = vadd.f32 %v12105_v28, %v12031_v20  ;;  %v10535_v30 = vpop.f32.mrb[85].mxu1 }
 0x851   : > { %v12108_v42 = vadd.f32 %v12107_v59, %v10535_v30  ;;  %v12032_v33 = vpop.f32.mrb[86].mxu1  ;;  %v12141_v59 = vadd.f32 %v17062_v4, %v17026_v23 }
 0x852   : > { %10684 = vst.msk [vmem:[%s17072_s21 + $0x30] sm:$0xff] %vm5230_vm13, %v12106_v9  ;;  %v12110_v16 = vadd.f32 %v12109_v47, %v12032_v33  ;;  %v10538_v51 = vpop.f32.mrb[87].mxu1  ;;  %v12143_v47 = vadd.f32 %v17062_v4, %v17018_v53  ;;  %v12147_v53 = vadd.f32 %v17062_v4, %v17032_v52  ;;  %v12153_v52 = vadd.f32 %v17062_v4, %v17055_v55 }
 0x853   : > { %10682 = vst.msk [vmem:[%s17072_s21 + $0x20] sm:$0xff] %vm5230_vm13, %v12108_v42  ;;  %v12112_v24 = vadd.f32 %v12111_v35, %v10538_v51  ;;  %v12149_v51 = vadd.f32 %v17062_v4, %v17042_v6 }
 0x854   : > { %10685 = vst.msk [vmem:[%s17072_s21 + $0x38] sm:$0xff] %vm5230_vm13, %v12110_v16 }
 0x855   : > { %10683 = vst.msk [vmem:[%s17072_s21 + $0x28] sm:$0xff] %vm5230_vm13, %v12112_v24 }
 0x857   : > { %v12035_v31 = vpop.f32.mrb[88].mxu1 }
 0x858   : > { %v12114_v50 = vadd.f32 %v12113_v60, %v12035_v31  ;;  %v10551_v29 = vpop.f32.mrb[89].mxu1  ;;  %v12151_v31 = vadd.f32 %v17062_v4, %v17034_v56  ;;  %v12155_v56 = vadd.f32 %v17062_v4, %v17048_v17 }
 0x859   : > { %v12116_v2 = vadd.f32 %v12115_v34, %v10551_v29  ;;  %v12036_v37 = vpop.f32.mrb[90].mxu1 }
 0x85a   : > { %10688 = vst.msk [vmem:[%s17072_s21 + $0x50] sm:$0xff] %vm5230_vm13, %v12114_v50  ;;  %v12118_v61 = vadd.f32 %v12117_v63, %v12036_v37  ;;  %v10554_v25 = vpop.f32.mrb[91].mxu1 }
 0x85b   : > { %10686 = vst.msk [vmem:[%s17072_s21 + $0x40] sm:$0xff] %vm5230_vm13, %v12116_v2  ;;  %v12120_v39 = vadd.f32 %v12119_v57, %v10554_v25  ;;  %v12157_v2 = vadd.f32 %v17062_v4, %v17057_v46 }
 0x85c   : > { %10689 = vst.msk [vmem:[%s17072_s21 + $0x58] sm:$0xff] %vm5230_vm13, %v12118_v61  ;;  %v12159_v61 = vadd.f32 %v17062_v4, %v17050_v44 }
 0x85d   : > { %10687 = vst.msk [vmem:[%s17072_s21 + $0x48] sm:$0xff] %vm5230_vm13, %v12120_v39 }
 0x85f   : > { %v12039_v8 = vpop.f32.mrb[92].mxu1 }
 0x860   : > { %v12122_v12 = vadd.f32 %v12121_v22, %v12039_v8  ;;  %v10567_v41 = vpop.f32.mrb[93].mxu1 }
 0x861   : > { %v12124_v7 = vadd.f32 %v12123_v26, %v10567_v41  ;;  %v12040_v58 = vpop.f32.mrb[94].mxu1 }
 0x862   : > { %10692 = vst.msk [vmem:[%s17072_s21 + $0x70] sm:$0xff] %vm5230_vm13, %v12122_v12  ;;  %v12126_v36 = vadd.f32 %v12125_v43, %v12040_v58  ;;  %v10570_v48 = vpop.f32.mrb[95].mxu1 }
 0x863   : > { %10690 = vst.msk [vmem:[%s17072_s21 + $0x60] sm:$0xff] %vm5230_vm13, %v12124_v7  ;;  %v12128_v62 = vadd.f32 %v12127_v10, %v10570_v48 }
 0x864   : > { %10693 = vst.msk [vmem:[%s17072_s21 + $0x78] sm:$0xff] %vm5230_vm13, %v12126_v36 }
 0x865   : > { %10691 = vst.msk [vmem:[%s17072_s21 + $0x68] sm:$0xff] %vm5230_vm13, %v12128_v62 }
 0x867   : > { %v12043_v14 = vpop.f32.mrb[96].mxu1 }
 0x868   : > { %v12130_v5 = vadd.f32 %v12129_v3, %v12043_v14  ;;  %v10583_v38 = vpop.f32.mrb[97].mxu1 }
 0x869   : > { %v12132_v1 = vadd.f32 %v12131_v27, %v10583_v38  ;;  %v12044_v13 = vpop.f32.mrb[98].mxu1 }
 0x86a   : > { %10696 = vst.msk [vmem:[%s17072_s21 + $0x90] sm:$0xff] %vm5230_vm13, %v12130_v5  ;;  %v12134_v0 = vadd.f32 %v12133_v15, %v12044_v13  ;;  %v10586_v11 = vpop.f32.mrb[99].mxu1 }
 0x86b   : > { %10694 = vst.msk [vmem:[%s17072_s21 + $0x80] sm:$0xff] %vm5230_vm13, %v12132_v1  ;;  %v12136_v40 = vadd.f32 %v12135_v19, %v10586_v11 }
 0x86c   : > { %10697 = vst.msk [vmem:[%s17072_s21 + $0x98] sm:$0xff] %vm5230_vm13, %v12134_v0 }
 0x86d   : > { %10695 = vst.msk [vmem:[%s17072_s21 + $0x88] sm:$0xff] %vm5230_vm13, %v12136_v40 }
 0x86f   : > { %v12047_v45 = vpop.f32.mrb[100].mxu1 }
 0x870   : > { %v12138_v28 = vadd.f32 %v12137_v18, %v12047_v45  ;;  %v10599_v20 = vpop.f32.mrb[101].mxu1 }
 0x871   : > { %v12140_v9 = vadd.f32 %v12139_v21, %v10599_v20  ;;  %v12048_v30 = vpop.f32.mrb[102].mxu1 }
 0x872   : > { %10700 = vst.msk [vmem:[%s17072_s21 + $0xb0] sm:$0xff] %vm5230_vm13, %v12138_v28  ;;  %v12142_v42 = vadd.f32 %v12141_v59, %v12048_v30  ;;  %v10602_v33 = vpop.f32.mrb[103].mxu1 }
 0x873   : > { %10698 = vst.msk [vmem:[%s17072_s21 + $0xa0] sm:$0xff] %vm5230_vm13, %v12140_v9  ;;  %v12144_v49 = vadd.f32 %v12143_v47, %v10602_v33 }
 0x874   : > { %10701 = vst.msk [vmem:[%s17072_s21 + $0xb8] sm:$0xff] %vm5230_vm13, %v12142_v42 }
 0x875   : > { %10699 = vst.msk [vmem:[%s17072_s21 + $0xa8] sm:$0xff] %vm5230_vm13, %v12144_v49 }
 0x877   : > { %v12051_v23 = vpop.f32.mrb[104].mxu1 }
 0x878   : > { %v12146_v35 = vadd.f32 %v12145_v32, %v12051_v23  ;;  %v10615_v16 = vpop.f32.mrb[105].mxu1 }
 0x879   : > { %v12148_v24 = vadd.f32 %v12147_v53, %v10615_v16  ;;  %v12052_v60 = vpop.f32.mrb[106].mxu1 }
 0x87a   : > { %10704 = vst.msk [vmem:[%s17072_s21 + $0xd0] sm:$0xff] %vm5230_vm13, %v12146_v35  ;;  %v12150_v34 = vadd.f32 %v12149_v51, %v12052_v60  ;;  %v10618_v50 = vpop.f32.mrb[107].mxu1 }
 0x87b   : > { %10702 = vst.msk [vmem:[%s17072_s21 + $0xc0] sm:$0xff] %vm5230_vm13, %v12148_v24  ;;  %v12152_v54 = vadd.f32 %v12151_v31, %v10618_v50 }
 0x87c   : > { %10705 = vst.msk [vmem:[%s17072_s21 + $0xd8] sm:$0xff] %vm5230_vm13, %v12150_v34 }
 0x87d   : > { %10703 = vst.msk [vmem:[%s17072_s21 + $0xc8] sm:$0xff] %vm5230_vm13, %v12152_v54 }
 0x87f   : > { %v12055_v6 = vpop.f32.mrb[108].mxu1 }
 0x880   : > { %v12154_v29 = vadd.f32 %v12153_v52, %v12055_v6  ;;  %v10631_v63 = vpop.f32.mrb[109].mxu1 }
 0x881   : > { %v12156_v37 = vadd.f32 %v12155_v56, %v10631_v63  ;;  %v12056_v57 = vpop.f32.mrb[110].mxu1 }
 0x882   : > { %10708 = vst.msk [vmem:[%s17072_s21 + $0xf0] sm:$0xff] %vm5230_vm13, %v12154_v29  ;;  %v12158_v25 = vadd.f32 %v12157_v2, %v12056_v57  ;;  %v10634_v39 = vpop.f32.mrb[111].mxu1 }
 0x883   : > { %10706 = vst.msk [vmem:[%s17072_s21 + $0xe0] sm:$0xff] %vm5230_vm13, %v12156_v37  ;;  %v12160_v55 = vadd.f32 %v12159_v61, %v10634_v39 }
 0x884   : > { %10709 = vst.msk [vmem:[%s17072_s21 + $0xf8] sm:$0xff] %vm5230_vm13, %v12158_v25 }
 0x885   : > { %10707 = vst.msk [vmem:[%s17072_s21 + $0xe8] sm:$0xff] %vm5230_vm13, %v12160_v55 }
 0x886 PF: > { %s23_s25 = sadd.s32 1, %s12668_s25  }
 0x887   : > { %p20_p4 = scmp.ge.s32.totalorder %s23_s25, 4  }
 0x889   :  { %22 = sbr.rel (!%p20_p4) target bundleno = 1 (0x1), region = 105 }

</bundles_post_ra>
